<compile_context>
chip_gen: v7x
topology: tpu7x:2x2x1
jax: 0.10.0
libtpu: 0.0.40
codegen_flags: <defaults>
</compile_context>

<pallas_src>
import functools

import jax
import jax.numpy as jnp
from jax import lax
from jax.experimental import pallas as pl
from jax.experimental.pallas import tpu as pltpu


def _round_up(x, m):
    return (x + m - 1) // m * m


def _buf_len(H, W):
    # (H+2)*(W+2) pixel rows plus >=2 slack rows (max tap offset 2*(W+2)+2
    # with matmul M = H*(W+2)), rounded up to a sublane multiple.
    return _round_up((H + 2) * (W + 2) + 2, 8)


# ----------------------------------------------------------------------------
# In-kernel building blocks (operate on flat-padded VMEM buffers)
# ----------------------------------------------------------------------------

def _col_mask(H, W):
    """(M, 1) f32 mask zeroing the phantom columns (x >= W) of a row batch."""
    Wp = W + 2
    M = H * Wp
    col = lax.broadcasted_iota(jnp.int32, (M, 1), 0) % Wp
    return (col < W).astype(jnp.float32)


def _zero_pad_bands(ref, H, W):
    """Zero only the rows a conv store never touches (top/bottom bands)."""
    Wp = W + 2
    L, C = ref.shape
    top = Wp + 1
    ref[pl.ds(0, top), :] = jnp.zeros((top, C), ref.dtype)
    bot = (H + 1) * Wp + 1
    ref[pl.ds(bot, L - bot), :] = jnp.zeros((L - bot, C), ref.dtype)


def _conv_store(lhs, w_ref, b_ref, dst, colmask, H, W, *, relu=True):
    """One MXU matmul (+bias,+ReLU), masked shifted store into flat-padded dst.

    lhs: (M, K) im2col value with row r = y*(W+2)+x.  w_ref: (K, Cout).
    """
    Wp = W + 2
    M = H * Wp
    acc = jnp.dot(lhs, w_ref[...], preferred_element_type=jnp.float32) + b_ref[...]
    if relu:
        acc = jnp.maximum(acc, 0.0)
    # Zero phantom columns so they land exactly on dst's interior padding cells.
    acc = acc * colmask
    # Output pixel (h, w) -> dst row (h+1)*Wp + (w+1): one shifted block store.
    dst[pl.ds(Wp + 1, M), :] = acc.astype(dst.dtype)


def _conv3x3(src, dst, w_ref, b_ref, im_ref, colmask, H, W):
    """3x3 'same' conv: build im2col once in VMEM, then a single matmul."""
    Wp = W + 2
    M = H * Wp
    Cin = src.shape[-1]
    K = 9 * Cin
    for dy in range(3):
        for dx in range(3):
            t = dy * 3 + dx
            im_ref[pl.ds(0, M), pl.ds(t * Cin, Cin)] = src[pl.ds(dy * Wp + dx, M), :]
    lhs = im_ref[pl.ds(0, M), pl.ds(0, K)]
    _conv_store(lhs, w_ref, b_ref, dst, colmask, H, W)


def _maxpool2x2(src, dst, H, W):
    """2x2 / stride-2 max pool: HxW (src layout) -> (H/2)x(W/2) (dst layout).

    Tiny fraction of runtime; kept as strided VMEM reads + elementwise max.
    """
    Wp = W + 2
    Ho, Wo = H // 2, W // 2
    Wpo = Wo + 2
    for i in range(Ho):                                     # fully unrolled
        m = None
        for r in range(2):
            for q in range(2):
                start = (2 * i + 1 + r) * Wp + 1 + q
                s = src[pl.ds(start, Wo, stride=2), :]      # every other pixel
                m = s if m is None else jnp.maximum(m, s)
        dst[pl.ds((i + 1) * Wpo + 1, Wo), :] = m


def _conv_transpose2x2(src, tw_ref, tb_ref, H, W):
    """ConvTranspose2d(kernel=2, stride=2) as one matmul.

    src: flat-padded (L, Cin) ref.  tw_ref: (Cin, 4*Cout) with column
    (ky*2+kx)*Cout + co.  Returns (H*(W+2), 4*Cout); phantom columns and the
    (ky, kx) un-interleave are handled in glue.
    """
    Wp = W + 2
    M = H * Wp
    return (jnp.dot(src[pl.ds(Wp + 1, M), :], tw_ref[...],
                    preferred_element_type=jnp.float32) + tb_ref[...])


# ----------------------------------------------------------------------------
# Fused UNet kernel
# ----------------------------------------------------------------------------

def _unet_kernel(x_ref,
                 ew1, eb1, ew2, eb2,
                 mw1, mb1, mw2, mb2,
                 dw1, db1, dw2, db2,
                 tw, tb,
                 o_ref,
                 s_enc1, s_enc2, s_pool1, s_mid1, s_mid2, s_pool2, s_dec1, s_dec2,
                 s_im,
                 *, H, W, B):
    H1, W1 = H, W
    H2, W2 = H // 2, W // 2
    H3, W3 = H // 4, W // 4

    # Re-establish the zero-padding invariant every grid step (with a
    # "parallel" batch axis each TensorCore owns its own scratch, so a
    # program_id()==0 init could miss a core):
    #   * conv-written conv-inputs: only the top/bottom padding bands (the
    #     interior padding columns are rewritten to 0 by the masked store),
    #   * pool-written conv-inputs: whole (small) buffer, since the pool only
    #     writes the valid pixel rows.
    _zero_pad_bands(s_enc1, H1, W1)
    _zero_pad_bands(s_mid1, H2, W2)
    _zero_pad_bands(s_dec1, H3, W3)
    s_pool1[...] = jnp.zeros(s_pool1.shape, s_pool1.dtype)
    s_pool2[...] = jnp.zeros(s_pool2.shape, s_pool2.dtype)

    # Phantom-column masks: one per stage shape, shared by both convs.
    mask1 = _col_mask(H1, W1)
    mask2 = _col_mask(H2, W2)
    mask3 = _col_mask(H3, W3)

    for b in range(B):                      # weights stay VMEM-resident across b
        # encoder (stage-1 im2col comes pre-built from glue)
        _conv_store(x_ref[b], ew1, eb1, s_enc1, mask1, H1, W1)
        _conv3x3(s_enc1, s_enc2, ew2, eb2, s_im, mask1, H1, W1)
        _maxpool2x2(s_enc2, s_pool1, H1, W1)
        # middle
        _conv3x3(s_pool1, s_mid1, mw1, mb1, s_im, mask2, H2, W2)
        _conv3x3(s_mid1, s_mid2, mw2, mb2, s_im, mask2, H2, W2)
        _maxpool2x2(s_mid2, s_pool2, H2, W2)
        # decoder
        _conv3x3(s_pool2, s_dec1, dw1, db1, s_im, mask3, H3, W3)
        _conv3x3(s_dec1, s_dec2, dw2, db2, s_im, mask3, H3, W3)
        o_ref[b] = _conv_transpose2x2(s_dec2, tw, tb, H3, W3).astype(o_ref.dtype)


# ----------------------------------------------------------------------------
# Wrapper (glue: stage-1 im2col, weight packing, output un-interleave)
# ----------------------------------------------------------------------------

def unet_forward(x_nchw, p, *, batch_block=1):
    """Pallas UNet forward. Input/output are NCHW to match PyTorch.

    batch_block = images folded into one grid step.  Keep >=2 grid steps on
    v7x (dual TensorCore); fold the whole batch on single-TC v5e/v6e.
    """
    N, Cin, H, W = x_nchw.shape
    assert H % 4 == 0 and W % 4 == 0
    assert N % batch_block == 0
    B = batch_block

    CoT = p["dect_b"].shape[0]
    c1 = p["enc_w1"].shape[3]   # 64
    c2 = p["mid_w1"].shape[3]   # 128
    c3 = p["dec_w1"].shape[3]   # 64
    Wp = W + 2
    H2, W2 = H // 2, W // 2
    H3, W3 = H // 4, W // 4
    M1, M2, M3 = H * Wp, H2 * (W2 + 2), H3 * (W3 + 2)
    L1, L2, L3 = _buf_len(H, W), _buf_len(H2, W2), _buf_len(H3, W3)

    # Stage-1 im2col built in XLA: (N, M1, 9*Cin), row r = y*(W+2)+x of the
    # padded image, column t*Cin + c (tap-major).  Dense 36-lane kernel input.
    x = jnp.transpose(x_nchw, (0, 2, 3, 1)).astype(jnp.float32)          # NHWC
    xp = jnp.pad(x, ((0, 0), (1, 1), (1, 1), (0, 0)))
    xp = xp.reshape(N, (H + 2) * Wp, Cin)
    xp = jnp.pad(xp, ((0, 0), (0, 2), (0, 0)))                           # tap slack
    xim = jnp.concatenate(
        [xp[:, dy * Wp + dx: dy * Wp + dx + M1, :]
         for dy in range(3) for dx in range(3)], axis=-1)                # (N, M1, 9Cin)

    def cw(w):   # (3,3,Ci,Co) -> (9*Ci, Co), row = tap*Ci + ci (matches im2col)
        return w.reshape(9 * w.shape[2], w.shape[3])

    def cb(b):
        return b.reshape(1, -1)

    # ConvTranspose weight packed on lanes: column (ky*2+kx)*Cout + co.
    tw = p["dect_w"].transpose(2, 0, 1, 3).reshape(p["dect_w"].shape[2], 4 * CoT)
    tb = jnp.tile(p["dect_b"], 4).reshape(1, 4 * CoT)

    def full(shape):
        nd = len(shape)
        return pl.BlockSpec(shape, lambda n, _nd=nd: (0,) * _nd)

    flops = 2 * N * (M1 * 9 * Cin * c1 + M1 * 9 * c1 * c1 +
                     M2 * 9 * c1 * c2 + M2 * 9 * c2 * c2 +
                     M3 * 9 * c2 * c3 + M3 * 9 * c3 * c3 +
                     M3 * c3 * 4 * CoT)
    w_bytes = 4 * (9 * Cin * c1 + 9 * c1 * c1 + 9 * c1 * c2 + 9 * c2 * c2 +
                   9 * c2 * c3 + 9 * c3 * c3 + c3 * 4 * CoT +
                   3 * c1 + 2 * c2 + c3 + 4 * CoT)
    bytes_accessed = N * M1 * 9 * Cin * 4 + N * M3 * 4 * CoT * 4 + w_bytes

    kern = functools.partial(_unet_kernel, H=H, W=W, B=B)

    out = pl.pallas_call(
        kern,
        out_shape=jax.ShapeDtypeStruct((N, M3, 4 * CoT), jnp.float32),
        grid=(N // B,),
        in_specs=[
            pl.BlockSpec((B, M1, 9 * Cin), lambda n: (n, 0, 0)),
            full((9 * Cin, c1)), full((1, c1)),
            full((9 * c1, c1)), full((1, c1)),
            full((9 * c1, c2)), full((1, c2)),
            full((9 * c2, c2)), full((1, c2)),
            full((9 * c2, c3)), full((1, c3)),
            full((9 * c3, c3)), full((1, c3)),
            full((c3, 4 * CoT)), full((1, 4 * CoT)),
        ],
        out_specs=pl.BlockSpec((B, M3, 4 * CoT), lambda n: (n, 0, 0)),
        scratch_shapes=[
            pltpu.VMEM((L1, c1), jnp.float32),        # s_enc1
            pltpu.VMEM((L1, c1), jnp.float32),        # s_enc2
            pltpu.VMEM((L2, c1), jnp.float32),        # s_pool1
            pltpu.VMEM((L2, c2), jnp.float32),        # s_mid1
            pltpu.VMEM((L2, c2), jnp.float32),        # s_mid2
            pltpu.VMEM((L3, c2), jnp.float32),        # s_pool2
            pltpu.VMEM((L3, c3), jnp.float32),        # s_dec1
            pltpu.VMEM((L3, c3), jnp.float32),        # s_dec2
            pltpu.VMEM((M1, 9 * c2), jnp.float32),    # shared im2col buffer
        ],
        compiler_params=pltpu.CompilerParams(
            dimension_semantics=("parallel",)),
        cost_estimate=pl.CostEstimate(flops=flops, transcendentals=0,
                                      bytes_accessed=bytes_accessed),
    )(xim,
      cw(p["enc_w1"]), cb(p["enc_b1"]), cw(p["enc_w2"]), cb(p["enc_b2"]),
      cw(p["mid_w1"]), cb(p["mid_b1"]), cw(p["mid_w2"]), cb(p["mid_b2"]),
      cw(p["dec_w1"]), cb(p["dec_b1"]), cw(p["dec_w2"]), cb(p["dec_b2"]),
      tw, tb)

    # Strip phantom columns and un-interleave (ky, kx) from the lane axis:
    # (N, H3, W3+2, 2, 2, Co) -> (N, 2*H3, 2*W3, Co) -> NCHW.
    y = out.reshape(N, H3, W3 + 2, 2, 2, CoT)[:, :, :W3]
    y = y.transpose(0, 1, 3, 2, 4, 5).reshape(N, 2 * H3, 2 * W3, CoT)
    return jnp.transpose(y, (0, 3, 1, 2))


# ----------------------------------------------------------------------------
# Pure-JAX reference (for correctness check)
# ----------------------------------------------------------------------------

def ref_forward(x, p):
    def conv(x, w, b):
        y = jax.lax.conv_general_dilated(
            x, w, (1, 1), ((1, 1), (1, 1)),
            dimension_numbers=("NCHW", "HWIO", "NCHW"))
        return jnp.maximum(y + b.reshape(1, -1, 1, 1), 0.0)

    def pool(x):
        N, C, H, W = x.shape
        return x.reshape(N, C, H // 2, 2, W // 2, 2).max(axis=(3, 5))

    def convT(x, w, b):
        N, C, H, W = x.shape
        Cout = w.shape[-1]
        y = jnp.einsum("nchw,uvco->nohuwv", x, w).reshape(N, Cout, 2 * H, 2 * W)
        return y + b.reshape(1, -1, 1, 1)

    h = conv(x, p["enc_w1"], p["enc_b1"])
    h = conv(h, p["enc_w2"], p["enc_b2"])
    h = pool(h)
    h = conv(h, p["mid_w1"], p["mid_b1"])
    h = conv(h, p["mid_w2"], p["mid_b2"])
    h = pool(h)
    h = conv(h, p["dec_w1"], p["dec_b1"])
    h = conv(h, p["dec_w2"], p["dec_b2"])
    return convT(h, p["dect_w"], p["dect_b"])


# ----------------------------------------------------------------------------
# Main
# ----------------------------------------------------------------------------

if __name__ == "__main__":
    in_ch, out_ch = 4, 3
    N, H, W = 2, 16, 16

    key = jax.random.PRNGKey(0)
    ks = jax.random.split(key, 20)

    def winit(k, shape):   # deterministic, fan-in scaled (HWIO / kk-Cin-Cout)
        fan_in = shape[0] * shape[1] * shape[2]
        return jax.random.normal(k, shape, jnp.float32) / jnp.sqrt(fan_in)

    def binit(k, n):
        return 0.01 * jax.random.normal(k, (n,), jnp.float32)

    params = {
        "enc_w1": winit(ks[0], (3, 3, in_ch, 64)),  "enc_b1": binit(ks[1], 64),
        "enc_w2": winit(ks[2], (3, 3, 64, 64)),     "enc_b2": binit(ks[3], 64),
        "mid_w1": winit(ks[4], (3, 3, 64, 128)),    "mid_b1": binit(ks[5], 128),
        "mid_w2": winit(ks[6], (3, 3, 128, 128)),   "mid_b2": binit(ks[7], 128),
        "dec_w1": winit(ks[8], (3, 3, 128, 64)),    "dec_b1": binit(ks[9], 64),
        "dec_w2": winit(ks[10], (3, 3, 64, 64)),    "dec_b2": binit(ks[11], 64),
        # ConvTranspose2d weight stored as (kh, kw, Cin, Cout)
        "dect_w": winit(ks[12], (2, 2, 64, out_ch)), "dect_b": binit(ks[13], out_ch),
    }

    x = jax.random.normal(ks[14], (N, in_ch, H, W), jnp.float32)   # NCHW

    fwd = jax.jit(unet_forward)
    out = jax.block_until_ready(fwd(x, params))
    assert out.shape == (N, out_ch, H // 2, W // 2), out.shape

    ref = jax.block_until_ready(jax.jit(ref_forward)(x, params))
    # Tolerance tightened vs 2e-2; margin kept for the MXU's default-precision
    # (bf16-pass) rounding, which both the kernel and the XLA reference use.
    if not jnp.allclose(out, ref, rtol=1e-2, atol=1e-2):
        raise AssertionError(
            f"mismatch: max abs diff = {float(jnp.max(jnp.abs(out - ref)))}")

    print("KERNEL_OK")
</pallas_src>

<mosaic_0001>
module attributes {stable_mosaic.version = 11 : i64} {
  func.func @_unet_kernel(%arg0: i32, %arg1: memref<1x288x36xf32, #tpu.memory_space<vmem>>, %arg2: memref<36x64xf32, #tpu.memory_space<vmem>>, %arg3: memref<1x64xf32, #tpu.memory_space<vmem>>, %arg4: memref<576x64xf32, #tpu.memory_space<vmem>>, %arg5: memref<1x64xf32, #tpu.memory_space<vmem>>, %arg6: memref<576x128xf32, #tpu.memory_space<vmem>>, %arg7: memref<1x128xf32, #tpu.memory_space<vmem>>, %arg8: memref<1152x128xf32, #tpu.memory_space<vmem>>, %arg9: memref<1x128xf32, #tpu.memory_space<vmem>>, %arg10: memref<1152x64xf32, #tpu.memory_space<vmem>>, %arg11: memref<1x64xf32, #tpu.memory_space<vmem>>, %arg12: memref<576x64xf32, #tpu.memory_space<vmem>>, %arg13: memref<1x64xf32, #tpu.memory_space<vmem>>, %arg14: memref<64x12xf32, #tpu.memory_space<vmem>>, %arg15: memref<1x12xf32, #tpu.memory_space<vmem>>, %arg16: memref<1x24x12xf32, #tpu.memory_space<vmem>>, %arg17: memref<328x64xf32, #tpu.memory_space<vmem>>, %arg18: memref<328x64xf32, #tpu.memory_space<vmem>>, %arg19: memref<104x64xf32, #tpu.memory_space<vmem>>, %arg20: memref<104x128xf32, #tpu.memory_space<vmem>>, %arg21: memref<104x128xf32, #tpu.memory_space<vmem>>, %arg22: memref<40x128xf32, #tpu.memory_space<vmem>>, %arg23: memref<40x64xf32, #tpu.memory_space<vmem>>, %arg24: memref<40x64xf32, #tpu.memory_space<vmem>>, %arg25: memref<288x1152xf32, #tpu.memory_space<vmem>>) attributes {dimension_semantics = [#tpu.dimension_semantics<parallel>], iteration_bounds = array<i64: 2>, scalar_prefetch = 0 : i64, scratch_operands = 9 : i64, tpu.core_type = #tpu.core_type<tc>, window_params = [{transform_indices = @transform_0, window_bounds = array<i64: 1, 288, 36>}, {pipeline_mode = #tpu.pipeline_mode<synchronous>, transform_indices = @transform_1, window_bounds = array<i64: 36, 64>}, {pipeline_mode = #tpu.pipeline_mode<synchronous>, transform_indices = @transform_2, window_bounds = array<i64: 1, 64>}, {pipeline_mode = #tpu.pipeline_mode<synchronous>, transform_indices = @transform_3, window_bounds = array<i64: 576, 64>}, {pipeline_mode = #tpu.pipeline_mode<synchronous>, transform_indices = @transform_4, window_bounds = array<i64: 1, 64>}, {pipeline_mode = #tpu.pipeline_mode<synchronous>, transform_indices = @transform_5, window_bounds = array<i64: 576, 128>}, {pipeline_mode = #tpu.pipeline_mode<synchronous>, transform_indices = @transform_6, window_bounds = array<i64: 1, 128>}, {pipeline_mode = #tpu.pipeline_mode<synchronous>, transform_indices = @transform_7, window_bounds = array<i64: 1152, 128>}, {pipeline_mode = #tpu.pipeline_mode<synchronous>, transform_indices = @transform_8, window_bounds = array<i64: 1, 128>}, {pipeline_mode = #tpu.pipeline_mode<synchronous>, transform_indices = @transform_9, window_bounds = array<i64: 1152, 64>}, {pipeline_mode = #tpu.pipeline_mode<synchronous>, transform_indices = @transform_10, window_bounds = array<i64: 1, 64>}, {pipeline_mode = #tpu.pipeline_mode<synchronous>, transform_indices = @transform_11, window_bounds = array<i64: 576, 64>}, {pipeline_mode = #tpu.pipeline_mode<synchronous>, transform_indices = @transform_12, window_bounds = array<i64: 1, 64>}, {pipeline_mode = #tpu.pipeline_mode<synchronous>, transform_indices = @transform_13, window_bounds = array<i64: 64, 12>}, {pipeline_mode = #tpu.pipeline_mode<synchronous>, transform_indices = @transform_14, window_bounds = array<i64: 1, 12>}, {transform_indices = @transform_15, window_bounds = array<i64: 1, 24, 12>}]} {
    %cst = arith.constant 0.000000e+00 : f32
    %0 = vector.broadcast %cst : f32 to vector<19x64xf32>
    %c0 = arith.constant 0 : index
    %c0_0 = arith.constant 0 : index
    %1 = vector.load %arg17[%c0, %c0_0] : memref<328x64xf32, #tpu.memory_space<vmem>>, vector<19x64xf32>
    tpu.vector_store %arg17[%c0, %c0_0], %0 {strides = array<i32>} : memref<328x64xf32, #tpu.memory_space<vmem>>, vector<19x64xf32>,
    %cst_1 = arith.constant 0.000000e+00 : f32
    %2 = vector.broadcast %cst_1 : f32 to vector<21x64xf32>
    %c307 = arith.constant 307 : index
    %c0_2 = arith.constant 0 : index
    %3 = vector.load %arg17[%c307, %c0_2] : memref<328x64xf32, #tpu.memory_space<vmem>>, vector<21x64xf32>
    tpu.vector_store %arg17[%c307, %c0_2], %2 {strides = array<i32>} : memref<328x64xf32, #tpu.memory_space<vmem>>, vector<21x64xf32>,
    %cst_3 = arith.constant 0.000000e+00 : f32
    %4 = vector.broadcast %cst_3 : f32 to vector<11x128xf32>
    %c0_4 = arith.constant 0 : index
    %c0_5 = arith.constant 0 : index
    %5 = vector.load %arg20[%c0_4, %c0_5] : memref<104x128xf32, #tpu.memory_space<vmem>>, vector<11x128xf32>
    tpu.vector_store %arg20[%c0_4, %c0_5], %4 {strides = array<i32>} : memref<104x128xf32, #tpu.memory_space<vmem>>, vector<11x128xf32>,
    %cst_6 = arith.constant 0.000000e+00 : f32
    %6 = vector.broadcast %cst_6 : f32 to vector<13x128xf32>
    %c91 = arith.constant 91 : index
    %c0_7 = arith.constant 0 : index
    %7 = vector.load %arg20[%c91, %c0_7] : memref<104x128xf32, #tpu.memory_space<vmem>>, vector<13x128xf32>
    tpu.vector_store %arg20[%c91, %c0_7], %6 {strides = array<i32>} : memref<104x128xf32, #tpu.memory_space<vmem>>, vector<13x128xf32>,
    %cst_8 = arith.constant 0.000000e+00 : f32
    %8 = vector.broadcast %cst_8 : f32 to vector<7x64xf32>
    %c0_9 = arith.constant 0 : index
    %c0_10 = arith.constant 0 : index
    %9 = vector.load %arg23[%c0_9, %c0_10] : memref<40x64xf32, #tpu.memory_space<vmem>>, vector<7x64xf32>
    tpu.vector_store %arg23[%c0_9, %c0_10], %8 {strides = array<i32>} : memref<40x64xf32, #tpu.memory_space<vmem>>, vector<7x64xf32>,
    %cst_11 = arith.constant 0.000000e+00 : f32
    %10 = vector.broadcast %cst_11 : f32 to vector<9x64xf32>
    %c31 = arith.constant 31 : index
    %c0_12 = arith.constant 0 : index
    %11 = vector.load %arg23[%c31, %c0_12] : memref<40x64xf32, #tpu.memory_space<vmem>>, vector<9x64xf32>
    tpu.vector_store %arg23[%c31, %c0_12], %10 {strides = array<i32>} : memref<40x64xf32, #tpu.memory_space<vmem>>, vector<9x64xf32>,
    %cst_13 = arith.constant 0.000000e+00 : f32
    %12 = vector.broadcast %cst_13 : f32 to vector<104x64xf32>
    %c0_14 = arith.constant 0 : index
    %c0_15 = arith.constant 0 : index
    %13 = vector.load %arg19[%c0_14, %c0_15] : memref<104x64xf32, #tpu.memory_space<vmem>>, vector<104x64xf32>
    tpu.vector_store %arg19[%c0_14, %c0_15], %12 {strides = array<i32>} : memref<104x64xf32, #tpu.memory_space<vmem>>, vector<104x64xf32>,
    %cst_16 = arith.constant 0.000000e+00 : f32
    %14 = vector.broadcast %cst_16 : f32 to vector<40x128xf32>
    %c0_17 = arith.constant 0 : index
    %c0_18 = arith.constant 0 : index
    %15 = vector.load %arg22[%c0_17, %c0_18] : memref<40x128xf32, #tpu.memory_space<vmem>>, vector<40x128xf32>
    tpu.vector_store %arg22[%c0_17, %c0_18], %14 {strides = array<i32>} : memref<40x128xf32, #tpu.memory_space<vmem>>, vector<40x128xf32>,
    %16 = tpu.iota {dimensions = array<i32: 0>} : vector<288x1xi32>
    %c18_i32 = arith.constant 18 : i32
    %c0_i32 = arith.constant 0 : i32
    %17 = arith.cmpi eq, %c18_i32, %c0_i32 : i32
    %c1_i32 = arith.constant 1 : i32
    %18 = arith.select %17, %c1_i32, %c18_i32 : i32
    %19 = vector.broadcast %18 : i32 to vector<288x1xi32>
    %20 = arith.remsi %16, %19 : vector<288x1xi32>
    %c0_i32_19 = arith.constant 0 : i32
    %21 = vector.broadcast %c0_i32_19 : i32 to vector<288x1xi32>
    %22 = arith.cmpi ne, %20, %21 : vector<288x1xi32>
    %c0_i32_20 = arith.constant 0 : i32
    %23 = vector.broadcast %c0_i32_20 : i32 to vector<288x1xi32>
    %24 = arith.cmpi slt, %20, %23 : vector<288x1xi32>
    %c0_i32_21 = arith.constant 0 : i32
    %25 = arith.cmpi slt, %18, %c0_i32_21 : i32
    %26 = vector.broadcast %25 : i1 to vector<288x1xi1>
    %27 = vector.broadcast %26 : vector<288x1xi1> to vector<288x1xi1>
    %28 = arith.xori %24, %27 : vector<288x1xi1>
    %29 = arith.andi %28, %22 : vector<288x1xi1>
    %30 = vector.broadcast %18 : i32 to vector<288x1xi32>
    %31 = arith.addi %20, %30 : vector<288x1xi32>
    %32 = arith.select %29, %31, %20 : vector<288x1xi1>, vector<288x1xi32>
    %c16_i32 = arith.constant 16 : i32
    %33 = vector.broadcast %c16_i32 : i32 to vector<288x1xi32>
    %34 = arith.cmpi slt, %32, %33 : vector<288x1xi32>
    %35 = arith.extui %34 : vector<288x1xi1> to vector<288x1xi32>
    %36 = arith.sitofp %35 : vector<288x1xi32> to vector<288x1xf32>
    %37 = tpu.iota {dimensions = array<i32: 0>} : vector<80x1xi32>
    %c10_i32 = arith.constant 10 : i32
    %c0_i32_22 = arith.constant 0 : i32
    %38 = arith.cmpi eq, %c10_i32, %c0_i32_22 : i32
    %c1_i32_23 = arith.constant 1 : i32
    %39 = arith.select %38, %c1_i32_23, %c10_i32 : i32
    %40 = vector.broadcast %39 : i32 to vector<80x1xi32>
    %41 = arith.remsi %37, %40 : vector<80x1xi32>
    %c0_i32_24 = arith.constant 0 : i32
    %42 = vector.broadcast %c0_i32_24 : i32 to vector<80x1xi32>
    %43 = arith.cmpi ne, %41, %42 : vector<80x1xi32>
    %c0_i32_25 = arith.constant 0 : i32
    %44 = vector.broadcast %c0_i32_25 : i32 to vector<80x1xi32>
    %45 = arith.cmpi slt, %41, %44 : vector<80x1xi32>
    %c0_i32_26 = arith.constant 0 : i32
    %46 = arith.cmpi slt, %39, %c0_i32_26 : i32
    %47 = vector.broadcast %46 : i1 to vector<80x1xi1>
    %48 = vector.broadcast %47 : vector<80x1xi1> to vector<80x1xi1>
    %49 = arith.xori %45, %48 : vector<80x1xi1>
    %50 = arith.andi %49, %43 : vector<80x1xi1>
    %51 = vector.broadcast %39 : i32 to vector<80x1xi32>
    %52 = arith.addi %41, %51 : vector<80x1xi32>
    %53 = arith.select %50, %52, %41 : vector<80x1xi1>, vector<80x1xi32>
    %c8_i32 = arith.constant 8 : i32
    %54 = vector.broadcast %c8_i32 : i32 to vector<80x1xi32>
    %55 = arith.cmpi slt, %53, %54 : vector<80x1xi32>
    %56 = arith.extui %55 : vector<80x1xi1> to vector<80x1xi32>
    %57 = arith.sitofp %56 : vector<80x1xi32> to vector<80x1xf32>
    %58 = tpu.iota {dimensions = array<i32: 0>} : vector<24x1xi32>
    %c6_i32 = arith.constant 6 : i32
    %c0_i32_27 = arith.constant 0 : i32
    %59 = arith.cmpi eq, %c6_i32, %c0_i32_27 : i32
    %c1_i32_28 = arith.constant 1 : i32
    %60 = arith.select %59, %c1_i32_28, %c6_i32 : i32
    %61 = vector.broadcast %60 : i32 to vector<24x1xi32>
    %62 = arith.remsi %58, %61 : vector<24x1xi32>
    %c0_i32_29 = arith.constant 0 : i32
    %63 = vector.broadcast %c0_i32_29 : i32 to vector<24x1xi32>
    %64 = arith.cmpi ne, %62, %63 : vector<24x1xi32>
    %c0_i32_30 = arith.constant 0 : i32
    %65 = vector.broadcast %c0_i32_30 : i32 to vector<24x1xi32>
    %66 = arith.cmpi slt, %62, %65 : vector<24x1xi32>
    %c0_i32_31 = arith.constant 0 : i32
    %67 = arith.cmpi slt, %60, %c0_i32_31 : i32
    %68 = vector.broadcast %67 : i1 to vector<24x1xi1>
    %69 = vector.broadcast %68 : vector<24x1xi1> to vector<24x1xi1>
    %70 = arith.xori %66, %69 : vector<24x1xi1>
    %71 = arith.andi %70, %64 : vector<24x1xi1>
    %72 = vector.broadcast %60 : i32 to vector<24x1xi32>
    %73 = arith.addi %62, %72 : vector<24x1xi32>
    %74 = arith.select %71, %73, %62 : vector<24x1xi1>, vector<24x1xi32>
    %c4_i32 = arith.constant 4 : i32
    %75 = vector.broadcast %c4_i32 : i32 to vector<24x1xi32>
    %76 = arith.cmpi slt, %74, %75 : vector<24x1xi32>
    %77 = arith.extui %76 : vector<24x1xi1> to vector<24x1xi32>
    %78 = arith.sitofp %77 : vector<24x1xi32> to vector<24x1xf32>
    %c0_32 = arith.constant 0 : index
    %c0_33 = arith.constant 0 : index
    %c0_34 = arith.constant 0 : index
    %79 = vector.load %arg1[%c0_32, %c0_33, %c0_34] : memref<1x288x36xf32, #tpu.memory_space<vmem>>, vector<1x288x36xf32>
    %80 = vector.shape_cast %79 : vector<1x288x36xf32> to vector<288x36xf32>
    %c0_35 = arith.constant 0 : index
    %c0_36 = arith.constant 0 : index
    %81 = vector.load %arg2[%c0_35, %c0_36] : memref<36x64xf32, #tpu.memory_space<vmem>>, vector<36x64xf32>
    %cst_37 = arith.constant dense<0.000000e+00> : vector<288x64xf32>
    %82 = tpu.matmul %80, %81, %cst_37 {dimension_numbers = #tpu.dot_dimension_numbers<[1], [0], [0], [1], [0, 0, 1, 1], [], []>} : vector<288x36xf32>, vector<36x64xf32>, vector<288x64xf32> -> vector<288x64xf32>
    %c0_38 = arith.constant 0 : index
    %c0_39 = arith.constant 0 : index
    %83 = vector.load %arg3[%c0_38, %c0_39] : memref<1x64xf32, #tpu.memory_space<vmem>>, vector<1x64xf32>
    %84 = vector.broadcast %83 : vector<1x64xf32> to vector<288x64xf32>
    %85 = arith.addf %82, %84 : vector<288x64xf32>
    %cst_40 = arith.constant 0.000000e+00 : f32
    %86 = vector.broadcast %cst_40 : f32 to vector<288x64xf32>
    %87 = arith.maximumf %85, %86 : vector<288x64xf32>
    %88 = vector.broadcast %36 : vector<288x1xf32> to vector<288x64xf32>
    %89 = arith.mulf %87, %88 : vector<288x64xf32>
    %c19 = arith.constant 19 : index
    %c0_41 = arith.constant 0 : index
    %90 = vector.load %arg17[%c19, %c0_41] : memref<328x64xf32, #tpu.memory_space<vmem>>, vector<288x64xf32>
    tpu.vector_store %arg17[%c19, %c0_41], %89 {strides = array<i32>} : memref<328x64xf32, #tpu.memory_space<vmem>>, vector<288x64xf32>,
    %c0_42 = arith.constant 0 : index
    %c0_43 = arith.constant 0 : index
    %91 = vector.load %arg17[%c0_42, %c0_43] : memref<328x64xf32, #tpu.memory_space<vmem>>, vector<288x64xf32>
    %c0_44 = arith.constant 0 : index
    %c0_45 = arith.constant 0 : index
    %92 = vector.load %arg25[%c0_44, %c0_45] : memref<288x1152xf32, #tpu.memory_space<vmem>>, vector<288x64xf32>
    tpu.vector_store %arg25[%c0_44, %c0_45], %91 {strides = array<i32>} : memref<288x1152xf32, #tpu.memory_space<vmem>>, vector<288x64xf32>,
    %c1 = arith.constant 1 : index
    %c0_46 = arith.constant 0 : index
    %93 = vector.load %arg17[%c1, %c0_46] : memref<328x64xf32, #tpu.memory_space<vmem>>, vector<288x64xf32>
    %c0_47 = arith.constant 0 : index
    %c64 = arith.constant 64 : index
    %94 = vector.load %arg25[%c0_47, %c64] : memref<288x1152xf32, #tpu.memory_space<vmem>>, vector<288x64xf32>
    tpu.vector_store %arg25[%c0_47, %c64], %93 {strides = array<i32>} : memref<288x1152xf32, #tpu.memory_space<vmem>>, vector<288x64xf32>,
    %c2 = arith.constant 2 : index
    %c0_48 = arith.constant 0 : index
    %95 = vector.load %arg17[%c2, %c0_48] : memref<328x64xf32, #tpu.memory_space<vmem>>, vector<288x64xf32>
    %c0_49 = arith.constant 0 : index
    %c128 = arith.constant 128 : index
    %96 = vector.load %arg25[%c0_49, %c128] : memref<288x1152xf32, #tpu.memory_space<vmem>>, vector<288x64xf32>
    tpu.vector_store %arg25[%c0_49, %c128], %95 {strides = array<i32>} : memref<288x1152xf32, #tpu.memory_space<vmem>>, vector<288x64xf32>,
    %c18 = arith.constant 18 : index
    %c0_50 = arith.constant 0 : index
    %97 = vector.load %arg17[%c18, %c0_50] : memref<328x64xf32, #tpu.memory_space<vmem>>, vector<288x64xf32>
    %c0_51 = arith.constant 0 : index
    %c192 = arith.constant 192 : index
    %98 = vector.load %arg25[%c0_51, %c192] : memref<288x1152xf32, #tpu.memory_space<vmem>>, vector<288x64xf32>
    tpu.vector_store %arg25[%c0_51, %c192], %97 {strides = array<i32>} : memref<288x1152xf32, #tpu.memory_space<vmem>>, vector<288x64xf32>,
    %c19_52 = arith.constant 19 : index
    %c0_53 = arith.constant 0 : index
    %99 = vector.load %arg17[%c19_52, %c0_53] : memref<328x64xf32, #tpu.memory_space<vmem>>, vector<288x64xf32>
    %c0_54 = arith.constant 0 : index
    %c256 = arith.constant 256 : index
    %100 = vector.load %arg25[%c0_54, %c256] : memref<288x1152xf32, #tpu.memory_space<vmem>>, vector<288x64xf32>
    tpu.vector_store %arg25[%c0_54, %c256], %99 {strides = array<i32>} : memref<288x1152xf32, #tpu.memory_space<vmem>>, vector<288x64xf32>,
    %c20 = arith.constant 20 : index
    %c0_55 = arith.constant 0 : index
    %101 = vector.load %arg17[%c20, %c0_55] : memref<328x64xf32, #tpu.memory_space<vmem>>, vector<288x64xf32>
    %c0_56 = arith.constant 0 : index
    %c320 = arith.constant 320 : index
    %102 = vector.load %arg25[%c0_56, %c320] : memref<288x1152xf32, #tpu.memory_space<vmem>>, vector<288x64xf32>
    tpu.vector_store %arg25[%c0_56, %c320], %101 {strides = array<i32>} : memref<288x1152xf32, #tpu.memory_space<vmem>>, vector<288x64xf32>,
    %c36 = arith.constant 36 : index
    %c0_57 = arith.constant 0 : index
    %103 = vector.load %arg17[%c36, %c0_57] : memref<328x64xf32, #tpu.memory_space<vmem>>, vector<288x64xf32>
    %c0_58 = arith.constant 0 : index
    %c384 = arith.constant 384 : index
    %104 = vector.load %arg25[%c0_58, %c384] : memref<288x1152xf32, #tpu.memory_space<vmem>>, vector<288x64xf32>
    tpu.vector_store %arg25[%c0_58, %c384], %103 {strides = array<i32>} : memref<288x1152xf32, #tpu.memory_space<vmem>>, vector<288x64xf32>,
    %c37 = arith.constant 37 : index
    %c0_59 = arith.constant 0 : index
    %105 = vector.load %arg17[%c37, %c0_59] : memref<328x64xf32, #tpu.memory_space<vmem>>, vector<288x64xf32>
    %c0_60 = arith.constant 0 : index
    %c448 = arith.constant 448 : index
    %106 = vector.load %arg25[%c0_60, %c448] : memref<288x1152xf32, #tpu.memory_space<vmem>>, vector<288x64xf32>
    tpu.vector_store %arg25[%c0_60, %c448], %105 {strides = array<i32>} : memref<288x1152xf32, #tpu.memory_space<vmem>>, vector<288x64xf32>,
    %c38 = arith.constant 38 : index
    %c0_61 = arith.constant 0 : index
    %107 = vector.load %arg17[%c38, %c0_61] : memref<328x64xf32, #tpu.memory_space<vmem>>, vector<288x64xf32>
    %c0_62 = arith.constant 0 : index
    %c512 = arith.constant 512 : index
    %108 = vector.load %arg25[%c0_62, %c512] : memref<288x1152xf32, #tpu.memory_space<vmem>>, vector<288x64xf32>
    tpu.vector_store %arg25[%c0_62, %c512], %107 {strides = array<i32>} : memref<288x1152xf32, #tpu.memory_space<vmem>>, vector<288x64xf32>,
    %c0_63 = arith.constant 0 : index
    %c0_64 = arith.constant 0 : index
    %109 = vector.load %arg25[%c0_63, %c0_64] : memref<288x1152xf32, #tpu.memory_space<vmem>>, vector<288x576xf32>
    %c0_65 = arith.constant 0 : index
    %c0_66 = arith.constant 0 : index
    %110 = vector.load %arg4[%c0_65, %c0_66] : memref<576x64xf32, #tpu.memory_space<vmem>>, vector<576x64xf32>
    %cst_67 = arith.constant dense<0.000000e+00> : vector<288x64xf32>
    %111 = tpu.matmul %109, %110, %cst_67 {dimension_numbers = #tpu.dot_dimension_numbers<[1], [0], [0], [1], [0, 0, 1, 1], [], []>} : vector<288x576xf32>, vector<576x64xf32>, vector<288x64xf32> -> vector<288x64xf32>
    %c0_68 = arith.constant 0 : index
    %c0_69 = arith.constant 0 : index
    %112 = vector.load %arg5[%c0_68, %c0_69] : memref<1x64xf32, #tpu.memory_space<vmem>>, vector<1x64xf32>
    %113 = vector.broadcast %112 : vector<1x64xf32> to vector<288x64xf32>
    %114 = arith.addf %111, %113 : vector<288x64xf32>
    %cst_70 = arith.constant 0.000000e+00 : f32
    %115 = vector.broadcast %cst_70 : f32 to vector<288x64xf32>
    %116 = arith.maximumf %114, %115 : vector<288x64xf32>
    %117 = vector.broadcast %36 : vector<288x1xf32> to vector<288x64xf32>
    %118 = arith.mulf %116, %117 : vector<288x64xf32>
    %c19_71 = arith.constant 19 : index
    %c0_72 = arith.constant 0 : index
    %119 = vector.load %arg18[%c19_71, %c0_72] : memref<328x64xf32, #tpu.memory_space<vmem>>, vector<288x64xf32>
    tpu.vector_store %arg18[%c19_71, %c0_72], %118 {strides = array<i32>} : memref<328x64xf32, #tpu.memory_space<vmem>>, vector<288x64xf32>,
    %c19_73 = arith.constant 19 : index
    %c0_74 = arith.constant 0 : index
    %120 = tpu.strided_load %arg18[%c19_73, %c0_74] {strides = array<i32: 2, 1>} : memref<328x64xf32, #tpu.memory_space<vmem>>, vector<8x64xf32>
    %c20_75 = arith.constant 20 : index
    %c0_76 = arith.constant 0 : index
    %121 = tpu.strided_load %arg18[%c20_75, %c0_76] {strides = array<i32: 2, 1>} : memref<328x64xf32, #tpu.memory_space<vmem>>, vector<8x64xf32>
    %122 = arith.maximumf %120, %121 : vector<8x64xf32>
    %c37_77 = arith.constant 37 : index
    %c0_78 = arith.constant 0 : index
    %123 = tpu.strided_load %arg18[%c37_77, %c0_78] {strides = array<i32: 2, 1>} : memref<328x64xf32, #tpu.memory_space<vmem>>, vector<8x64xf32>
    %124 = arith.maximumf %122, %123 : vector<8x64xf32>
    %c38_79 = arith.constant 38 : index
    %c0_80 = arith.constant 0 : index
    %125 = tpu.strided_load %arg18[%c38_79, %c0_80] {strides = array<i32: 2, 1>} : memref<328x64xf32, #tpu.memory_space<vmem>>, vector<8x64xf32>
    %126 = arith.maximumf %124, %125 : vector<8x64xf32>
    %c11 = arith.constant 11 : index
    %c0_81 = arith.constant 0 : index
    %127 = vector.load %arg19[%c11, %c0_81] : memref<104x64xf32, #tpu.memory_space<vmem>>, vector<8x64xf32>
    tpu.vector_store %arg19[%c11, %c0_81], %126 {strides = array<i32>} : memref<104x64xf32, #tpu.memory_space<vmem>>, vector<8x64xf32>,
    %c55 = arith.constant 55 : index
    %c0_82 = arith.constant 0 : index
    %128 = tpu.strided_load %arg18[%c55, %c0_82] {strides = array<i32: 2, 1>} : memref<328x64xf32, #tpu.memory_space<vmem>>, vector<8x64xf32>
    %c56 = arith.constant 56 : index
    %c0_83 = arith.constant 0 : index
    %129 = tpu.strided_load %arg18[%c56, %c0_83] {strides = array<i32: 2, 1>} : memref<328x64xf32, #tpu.memory_space<vmem>>, vector<8x64xf32>
    %130 = arith.maximumf %128, %129 : vector<8x64xf32>
    %c73 = arith.constant 73 : index
    %c0_84 = arith.constant 0 : index
    %131 = tpu.strided_load %arg18[%c73, %c0_84] {strides = array<i32: 2, 1>} : memref<328x64xf32, #tpu.memory_space<vmem>>, vector<8x64xf32>
    %132 = arith.maximumf %130, %131 : vector<8x64xf32>
    %c74 = arith.constant 74 : index
    %c0_85 = arith.constant 0 : index
    %133 = tpu.strided_load %arg18[%c74, %c0_85] {strides = array<i32: 2, 1>} : memref<328x64xf32, #tpu.memory_space<vmem>>, vector<8x64xf32>
    %134 = arith.maximumf %132, %133 : vector<8x64xf32>
    %c21 = arith.constant 21 : index
    %c0_86 = arith.constant 0 : index
    %135 = vector.load %arg19[%c21, %c0_86] : memref<104x64xf32, #tpu.memory_space<vmem>>, vector<8x64xf32>
    tpu.vector_store %arg19[%c21, %c0_86], %134 {strides = array<i32>} : memref<104x64xf32, #tpu.memory_space<vmem>>, vector<8x64xf32>,
    %c91_87 = arith.constant 91 : index
    %c0_88 = arith.constant 0 : index
    %136 = tpu.strided_load %arg18[%c91_87, %c0_88] {strides = array<i32: 2, 1>} : memref<328x64xf32, #tpu.memory_space<vmem>>, vector<8x64xf32>
    %c92 = arith.constant 92 : index
    %c0_89 = arith.constant 0 : index
    %137 = tpu.strided_load %arg18[%c92, %c0_89] {strides = array<i32: 2, 1>} : memref<328x64xf32, #tpu.memory_space<vmem>>, vector<8x64xf32>
    %138 = arith.maximumf %136, %137 : vector<8x64xf32>
    %c109 = arith.constant 109 : index
    %c0_90 = arith.constant 0 : index
    %139 = tpu.strided_load %arg18[%c109, %c0_90] {strides = array<i32: 2, 1>} : memref<328x64xf32, #tpu.memory_space<vmem>>, vector<8x64xf32>
    %140 = arith.maximumf %138, %139 : vector<8x64xf32>
    %c110 = arith.constant 110 : index
    %c0_91 = arith.constant 0 : index
    %141 = tpu.strided_load %arg18[%c110, %c0_91] {strides = array<i32: 2, 1>} : memref<328x64xf32, #tpu.memory_space<vmem>>, vector<8x64xf32>
    %142 = arith.maximumf %140, %141 : vector<8x64xf32>
    %c31_92 = arith.constant 31 : index
    %c0_93 = arith.constant 0 : index
    %143 = vector.load %arg19[%c31_92, %c0_93] : memref<104x64xf32, #tpu.memory_space<vmem>>, vector<8x64xf32>
    tpu.vector_store %arg19[%c31_92, %c0_93], %142 {strides = array<i32>} : memref<104x64xf32, #tpu.memory_space<vmem>>, vector<8x64xf32>,
    %c127 = arith.constant 127 : index
    %c0_94 = arith.constant 0 : index
    %144 = tpu.strided_load %arg18[%c127, %c0_94] {strides = array<i32: 2, 1>} : memref<328x64xf32, #tpu.memory_space<vmem>>, vector<8x64xf32>
    %c128_95 = arith.constant 128 : index
    %c0_96 = arith.constant 0 : index
    %145 = tpu.strided_load %arg18[%c128_95, %c0_96] {strides = array<i32: 2, 1>} : memref<328x64xf32, #tpu.memory_space<vmem>>, vector<8x64xf32>
    %146 = arith.maximumf %144, %145 : vector<8x64xf32>
    %c145 = arith.constant 145 : index
    %c0_97 = arith.constant 0 : index
    %147 = tpu.strided_load %arg18[%c145, %c0_97] {strides = array<i32: 2, 1>} : memref<328x64xf32, #tpu.memory_space<vmem>>, vector<8x64xf32>
    %148 = arith.maximumf %146, %147 : vector<8x64xf32>
    %c146 = arith.constant 146 : index
    %c0_98 = arith.constant 0 : index
    %149 = tpu.strided_load %arg18[%c146, %c0_98] {strides = array<i32: 2, 1>} : memref<328x64xf32, #tpu.memory_space<vmem>>, vector<8x64xf32>
    %150 = arith.maximumf %148, %149 : vector<8x64xf32>
    %c41 = arith.constant 41 : index
    %c0_99 = arith.constant 0 : index
    %151 = vector.load %arg19[%c41, %c0_99] : memref<104x64xf32, #tpu.memory_space<vmem>>, vector<8x64xf32>
    tpu.vector_store %arg19[%c41, %c0_99], %150 {strides = array<i32>} : memref<104x64xf32, #tpu.memory_space<vmem>>, vector<8x64xf32>,
    %c163 = arith.constant 163 : index
    %c0_100 = arith.constant 0 : index
    %152 = tpu.strided_load %arg18[%c163, %c0_100] {strides = array<i32: 2, 1>} : memref<328x64xf32, #tpu.memory_space<vmem>>, vector<8x64xf32>
    %c164 = arith.constant 164 : index
    %c0_101 = arith.constant 0 : index
    %153 = tpu.strided_load %arg18[%c164, %c0_101] {strides = array<i32: 2, 1>} : memref<328x64xf32, #tpu.memory_space<vmem>>, vector<8x64xf32>
    %154 = arith.maximumf %152, %153 : vector<8x64xf32>
    %c181 = arith.constant 181 : index
    %c0_102 = arith.constant 0 : index
    %155 = tpu.strided_load %arg18[%c181, %c0_102] {strides = array<i32: 2, 1>} : memref<328x64xf32, #tpu.memory_space<vmem>>, vector<8x64xf32>
    %156 = arith.maximumf %154, %155 : vector<8x64xf32>
    %c182 = arith.constant 182 : index
    %c0_103 = arith.constant 0 : index
    %157 = tpu.strided_load %arg18[%c182, %c0_103] {strides = array<i32: 2, 1>} : memref<328x64xf32, #tpu.memory_space<vmem>>, vector<8x64xf32>
    %158 = arith.maximumf %156, %157 : vector<8x64xf32>
    %c51 = arith.constant 51 : index
    %c0_104 = arith.constant 0 : index
    %159 = vector.load %arg19[%c51, %c0_104] : memref<104x64xf32, #tpu.memory_space<vmem>>, vector<8x64xf32>
    tpu.vector_store %arg19[%c51, %c0_104], %158 {strides = array<i32>} : memref<104x64xf32, #tpu.memory_space<vmem>>, vector<8x64xf32>,
    %c199 = arith.constant 199 : index
    %c0_105 = arith.constant 0 : index
    %160 = tpu.strided_load %arg18[%c199, %c0_105] {strides = array<i32: 2, 1>} : memref<328x64xf32, #tpu.memory_space<vmem>>, vector<8x64xf32>
    %c200 = arith.constant 200 : index
    %c0_106 = arith.constant 0 : index
    %161 = tpu.strided_load %arg18[%c200, %c0_106] {strides = array<i32: 2, 1>} : memref<328x64xf32, #tpu.memory_space<vmem>>, vector<8x64xf32>
    %162 = arith.maximumf %160, %161 : vector<8x64xf32>
    %c217 = arith.constant 217 : index
    %c0_107 = arith.constant 0 : index
    %163 = tpu.strided_load %arg18[%c217, %c0_107] {strides = array<i32: 2, 1>} : memref<328x64xf32, #tpu.memory_space<vmem>>, vector<8x64xf32>
    %164 = arith.maximumf %162, %163 : vector<8x64xf32>
    %c218 = arith.constant 218 : index
    %c0_108 = arith.constant 0 : index
    %165 = tpu.strided_load %arg18[%c218, %c0_108] {strides = array<i32: 2, 1>} : memref<328x64xf32, #tpu.memory_space<vmem>>, vector<8x64xf32>
    %166 = arith.maximumf %164, %165 : vector<8x64xf32>
    %c61 = arith.constant 61 : index
    %c0_109 = arith.constant 0 : index
    %167 = vector.load %arg19[%c61, %c0_109] : memref<104x64xf32, #tpu.memory_space<vmem>>, vector<8x64xf32>
    tpu.vector_store %arg19[%c61, %c0_109], %166 {strides = array<i32>} : memref<104x64xf32, #tpu.memory_space<vmem>>, vector<8x64xf32>,
    %c235 = arith.constant 235 : index
    %c0_110 = arith.constant 0 : index
    %168 = tpu.strided_load %arg18[%c235, %c0_110] {strides = array<i32: 2, 1>} : memref<328x64xf32, #tpu.memory_space<vmem>>, vector<8x64xf32>
    %c236 = arith.constant 236 : index
    %c0_111 = arith.constant 0 : index
    %169 = tpu.strided_load %arg18[%c236, %c0_111] {strides = array<i32: 2, 1>} : memref<328x64xf32, #tpu.memory_space<vmem>>, vector<8x64xf32>
    %170 = arith.maximumf %168, %169 : vector<8x64xf32>
    %c253 = arith.constant 253 : index
    %c0_112 = arith.constant 0 : index
    %171 = tpu.strided_load %arg18[%c253, %c0_112] {strides = array<i32: 2, 1>} : memref<328x64xf32, #tpu.memory_space<vmem>>, vector<8x64xf32>
    %172 = arith.maximumf %170, %171 : vector<8x64xf32>
    %c254 = arith.constant 254 : index
    %c0_113 = arith.constant 0 : index
    %173 = tpu.strided_load %arg18[%c254, %c0_113] {strides = array<i32: 2, 1>} : memref<328x64xf32, #tpu.memory_space<vmem>>, vector<8x64xf32>
    %174 = arith.maximumf %172, %173 : vector<8x64xf32>
    %c71 = arith.constant 71 : index
    %c0_114 = arith.constant 0 : index
    %175 = vector.load %arg19[%c71, %c0_114] : memref<104x64xf32, #tpu.memory_space<vmem>>, vector<8x64xf32>
    tpu.vector_store %arg19[%c71, %c0_114], %174 {strides = array<i32>} : memref<104x64xf32, #tpu.memory_space<vmem>>, vector<8x64xf32>,
    %c271 = arith.constant 271 : index
    %c0_115 = arith.constant 0 : index
    %176 = tpu.strided_load %arg18[%c271, %c0_115] {strides = array<i32: 2, 1>} : memref<328x64xf32, #tpu.memory_space<vmem>>, vector<8x64xf32>
    %c272 = arith.constant 272 : index
    %c0_116 = arith.constant 0 : index
    %177 = tpu.strided_load %arg18[%c272, %c0_116] {strides = array<i32: 2, 1>} : memref<328x64xf32, #tpu.memory_space<vmem>>, vector<8x64xf32>
    %178 = arith.maximumf %176, %177 : vector<8x64xf32>
    %c289 = arith.constant 289 : index
    %c0_117 = arith.constant 0 : index
    %179 = tpu.strided_load %arg18[%c289, %c0_117] {strides = array<i32: 2, 1>} : memref<328x64xf32, #tpu.memory_space<vmem>>, vector<8x64xf32>
    %180 = arith.maximumf %178, %179 : vector<8x64xf32>
    %c290 = arith.constant 290 : index
    %c0_118 = arith.constant 0 : index
    %181 = tpu.strided_load %arg18[%c290, %c0_118] {strides = array<i32: 2, 1>} : memref<328x64xf32, #tpu.memory_space<vmem>>, vector<8x64xf32>
    %182 = arith.maximumf %180, %181 : vector<8x64xf32>
    %c81 = arith.constant 81 : index
    %c0_119 = arith.constant 0 : index
    %183 = vector.load %arg19[%c81, %c0_119] : memref<104x64xf32, #tpu.memory_space<vmem>>, vector<8x64xf32>
    tpu.vector_store %arg19[%c81, %c0_119], %182 {strides = array<i32>} : memref<104x64xf32, #tpu.memory_space<vmem>>, vector<8x64xf32>,
    %c0_120 = arith.constant 0 : index
    %c0_121 = arith.constant 0 : index
    %184 = vector.load %arg19[%c0_120, %c0_121] : memref<104x64xf32, #tpu.memory_space<vmem>>, vector<80x64xf32>
    %c0_122 = arith.constant 0 : index
    %c0_123 = arith.constant 0 : index
    %185 = vector.load %arg25[%c0_122, %c0_123] : memref<288x1152xf32, #tpu.memory_space<vmem>>, vector<80x64xf32>
    tpu.vector_store %arg25[%c0_122, %c0_123], %184 {strides = array<i32>} : memref<288x1152xf32, #tpu.memory_space<vmem>>, vector<80x64xf32>,
    %c1_124 = arith.constant 1 : index
    %c0_125 = arith.constant 0 : index
    %186 = vector.load %arg19[%c1_124, %c0_125] : memref<104x64xf32, #tpu.memory_space<vmem>>, vector<80x64xf32>
    %c0_126 = arith.constant 0 : index
    %c64_127 = arith.constant 64 : index
    %187 = vector.load %arg25[%c0_126, %c64_127] : memref<288x1152xf32, #tpu.memory_space<vmem>>, vector<80x64xf32>
    tpu.vector_store %arg25[%c0_126, %c64_127], %186 {strides = array<i32>} : memref<288x1152xf32, #tpu.memory_space<vmem>>, vector<80x64xf32>,
    %c2_128 = arith.constant 2 : index
    %c0_129 = arith.constant 0 : index
    %188 = vector.load %arg19[%c2_128, %c0_129] : memref<104x64xf32, #tpu.memory_space<vmem>>, vector<80x64xf32>
    %c0_130 = arith.constant 0 : index
    %c128_131 = arith.constant 128 : index
    %189 = vector.load %arg25[%c0_130, %c128_131] : memref<288x1152xf32, #tpu.memory_space<vmem>>, vector<80x64xf32>
    tpu.vector_store %arg25[%c0_130, %c128_131], %188 {strides = array<i32>} : memref<288x1152xf32, #tpu.memory_space<vmem>>, vector<80x64xf32>,
    %c10 = arith.constant 10 : index
    %c0_132 = arith.constant 0 : index
    %190 = vector.load %arg19[%c10, %c0_132] : memref<104x64xf32, #tpu.memory_space<vmem>>, vector<80x64xf32>
    %c0_133 = arith.constant 0 : index
    %c192_134 = arith.constant 192 : index
    %191 = vector.load %arg25[%c0_133, %c192_134] : memref<288x1152xf32, #tpu.memory_space<vmem>>, vector<80x64xf32>
    tpu.vector_store %arg25[%c0_133, %c192_134], %190 {strides = array<i32>} : memref<288x1152xf32, #tpu.memory_space<vmem>>, vector<80x64xf32>,
    %c11_135 = arith.constant 11 : index
    %c0_136 = arith.constant 0 : index
    %192 = vector.load %arg19[%c11_135, %c0_136] : memref<104x64xf32, #tpu.memory_space<vmem>>, vector<80x64xf32>
    %c0_137 = arith.constant 0 : index
    %c256_138 = arith.constant 256 : index
    %193 = vector.load %arg25[%c0_137, %c256_138] : memref<288x1152xf32, #tpu.memory_space<vmem>>, vector<80x64xf32>
    tpu.vector_store %arg25[%c0_137, %c256_138], %192 {strides = array<i32>} : memref<288x1152xf32, #tpu.memory_space<vmem>>, vector<80x64xf32>,
    %c12 = arith.constant 12 : index
    %c0_139 = arith.constant 0 : index
    %194 = vector.load %arg19[%c12, %c0_139] : memref<104x64xf32, #tpu.memory_space<vmem>>, vector<80x64xf32>
    %c0_140 = arith.constant 0 : index
    %c320_141 = arith.constant 320 : index
    %195 = vector.load %arg25[%c0_140, %c320_141] : memref<288x1152xf32, #tpu.memory_space<vmem>>, vector<80x64xf32>
    tpu.vector_store %arg25[%c0_140, %c320_141], %194 {strides = array<i32>} : memref<288x1152xf32, #tpu.memory_space<vmem>>, vector<80x64xf32>,
    %c20_142 = arith.constant 20 : index
    %c0_143 = arith.constant 0 : index
    %196 = vector.load %arg19[%c20_142, %c0_143] : memref<104x64xf32, #tpu.memory_space<vmem>>, vector<80x64xf32>
    %c0_144 = arith.constant 0 : index
    %c384_145 = arith.constant 384 : index
    %197 = vector.load %arg25[%c0_144, %c384_145] : memref<288x1152xf32, #tpu.memory_space<vmem>>, vector<80x64xf32>
    tpu.vector_store %arg25[%c0_144, %c384_145], %196 {strides = array<i32>} : memref<288x1152xf32, #tpu.memory_space<vmem>>, vector<80x64xf32>,
    %c21_146 = arith.constant 21 : index
    %c0_147 = arith.constant 0 : index
    %198 = vector.load %arg19[%c21_146, %c0_147] : memref<104x64xf32, #tpu.memory_space<vmem>>, vector<80x64xf32>
    %c0_148 = arith.constant 0 : index
    %c448_149 = arith.constant 448 : index
    %199 = vector.load %arg25[%c0_148, %c448_149] : memref<288x1152xf32, #tpu.memory_space<vmem>>, vector<80x64xf32>
    tpu.vector_store %arg25[%c0_148, %c448_149], %198 {strides = array<i32>} : memref<288x1152xf32, #tpu.memory_space<vmem>>, vector<80x64xf32>,
    %c22 = arith.constant 22 : index
    %c0_150 = arith.constant 0 : index
    %200 = vector.load %arg19[%c22, %c0_150] : memref<104x64xf32, #tpu.memory_space<vmem>>, vector<80x64xf32>
    %c0_151 = arith.constant 0 : index
    %c512_152 = arith.constant 512 : index
    %201 = vector.load %arg25[%c0_151, %c512_152] : memref<288x1152xf32, #tpu.memory_space<vmem>>, vector<80x64xf32>
    tpu.vector_store %arg25[%c0_151, %c512_152], %200 {strides = array<i32>} : memref<288x1152xf32, #tpu.memory_space<vmem>>, vector<80x64xf32>,
    %c0_153 = arith.constant 0 : index
    %c0_154 = arith.constant 0 : index
    %202 = vector.load %arg25[%c0_153, %c0_154] : memref<288x1152xf32, #tpu.memory_space<vmem>>, vector<80x576xf32>
    %c0_155 = arith.constant 0 : index
    %c0_156 = arith.constant 0 : index
    %203 = vector.load %arg6[%c0_155, %c0_156] : memref<576x128xf32, #tpu.memory_space<vmem>>, vector<576x128xf32>
    %cst_157 = arith.constant dense<0.000000e+00> : vector<80x128xf32>
    %204 = tpu.matmul %202, %203, %cst_157 {dimension_numbers = #tpu.dot_dimension_numbers<[1], [0], [0], [1], [0, 0, 1, 1], [], []>} : vector<80x576xf32>, vector<576x128xf32>, vector<80x128xf32> -> vector<80x128xf32>
    %c0_158 = arith.constant 0 : index
    %c0_159 = arith.constant 0 : index
    %205 = vector.load %arg7[%c0_158, %c0_159] : memref<1x128xf32, #tpu.memory_space<vmem>>, vector<1x128xf32>
    %206 = vector.broadcast %205 : vector<1x128xf32> to vector<80x128xf32>
    %207 = arith.addf %204, %206 : vector<80x128xf32>
    %cst_160 = arith.constant 0.000000e+00 : f32
    %208 = vector.broadcast %cst_160 : f32 to vector<80x128xf32>
    %209 = arith.maximumf %207, %208 : vector<80x128xf32>
    %210 = vector.broadcast %57 : vector<80x1xf32> to vector<80x128xf32>
    %211 = arith.mulf %209, %210 : vector<80x128xf32>
    %c11_161 = arith.constant 11 : index
    %c0_162 = arith.constant 0 : index
    %212 = vector.load %arg20[%c11_161, %c0_162] : memref<104x128xf32, #tpu.memory_space<vmem>>, vector<80x128xf32>
    tpu.vector_store %arg20[%c11_161, %c0_162], %211 {strides = array<i32>} : memref<104x128xf32, #tpu.memory_space<vmem>>, vector<80x128xf32>,
    %c0_163 = arith.constant 0 : index
    %c0_164 = arith.constant 0 : index
    %213 = vector.load %arg20[%c0_163, %c0_164] : memref<104x128xf32, #tpu.memory_space<vmem>>, vector<80x128xf32>
    %c0_165 = arith.constant 0 : index
    %c0_166 = arith.constant 0 : index
    %214 = vector.load %arg25[%c0_165, %c0_166] : memref<288x1152xf32, #tpu.memory_space<vmem>>, vector<80x128xf32>
    tpu.vector_store %arg25[%c0_165, %c0_166], %213 {strides = array<i32>} : memref<288x1152xf32, #tpu.memory_space<vmem>>, vector<80x128xf32>,
    %c1_167 = arith.constant 1 : index
    %c0_168 = arith.constant 0 : index
    %215 = vector.load %arg20[%c1_167, %c0_168] : memref<104x128xf32, #tpu.memory_space<vmem>>, vector<80x128xf32>
    %c0_169 = arith.constant 0 : index
    %c128_170 = arith.constant 128 : index
    %216 = vector.load %arg25[%c0_169, %c128_170] : memref<288x1152xf32, #tpu.memory_space<vmem>>, vector<80x128xf32>
    tpu.vector_store %arg25[%c0_169, %c128_170], %215 {strides = array<i32>} : memref<288x1152xf32, #tpu.memory_space<vmem>>, vector<80x128xf32>,
    %c2_171 = arith.constant 2 : index
    %c0_172 = arith.constant 0 : index
    %217 = vector.load %arg20[%c2_171, %c0_172] : memref<104x128xf32, #tpu.memory_space<vmem>>, vector<80x128xf32>
    %c0_173 = arith.constant 0 : index
    %c256_174 = arith.constant 256 : index
    %218 = vector.load %arg25[%c0_173, %c256_174] : memref<288x1152xf32, #tpu.memory_space<vmem>>, vector<80x128xf32>
    tpu.vector_store %arg25[%c0_173, %c256_174], %217 {strides = array<i32>} : memref<288x1152xf32, #tpu.memory_space<vmem>>, vector<80x128xf32>,
    %c10_175 = arith.constant 10 : index
    %c0_176 = arith.constant 0 : index
    %219 = vector.load %arg20[%c10_175, %c0_176] : memref<104x128xf32, #tpu.memory_space<vmem>>, vector<80x128xf32>
    %c0_177 = arith.constant 0 : index
    %c384_178 = arith.constant 384 : index
    %220 = vector.load %arg25[%c0_177, %c384_178] : memref<288x1152xf32, #tpu.memory_space<vmem>>, vector<80x128xf32>
    tpu.vector_store %arg25[%c0_177, %c384_178], %219 {strides = array<i32>} : memref<288x1152xf32, #tpu.memory_space<vmem>>, vector<80x128xf32>,
    %c11_179 = arith.constant 11 : index
    %c0_180 = arith.constant 0 : index
    %221 = vector.load %arg20[%c11_179, %c0_180] : memref<104x128xf32, #tpu.memory_space<vmem>>, vector<80x128xf32>
    %c0_181 = arith.constant 0 : index
    %c512_182 = arith.constant 512 : index
    %222 = vector.load %arg25[%c0_181, %c512_182] : memref<288x1152xf32, #tpu.memory_space<vmem>>, vector<80x128xf32>
    tpu.vector_store %arg25[%c0_181, %c512_182], %221 {strides = array<i32>} : memref<288x1152xf32, #tpu.memory_space<vmem>>, vector<80x128xf32>,
    %c12_183 = arith.constant 12 : index
    %c0_184 = arith.constant 0 : index
    %223 = vector.load %arg20[%c12_183, %c0_184] : memref<104x128xf32, #tpu.memory_space<vmem>>, vector<80x128xf32>
    %c0_185 = arith.constant 0 : index
    %c640 = arith.constant 640 : index
    %224 = vector.load %arg25[%c0_185, %c640] : memref<288x1152xf32, #tpu.memory_space<vmem>>, vector<80x128xf32>
    tpu.vector_store %arg25[%c0_185, %c640], %223 {strides = array<i32>} : memref<288x1152xf32, #tpu.memory_space<vmem>>, vector<80x128xf32>,
    %c20_186 = arith.constant 20 : index
    %c0_187 = arith.constant 0 : index
    %225 = vector.load %arg20[%c20_186, %c0_187] : memref<104x128xf32, #tpu.memory_space<vmem>>, vector<80x128xf32>
    %c0_188 = arith.constant 0 : index
    %c768 = arith.constant 768 : index
    %226 = vector.load %arg25[%c0_188, %c768] : memref<288x1152xf32, #tpu.memory_space<vmem>>, vector<80x128xf32>
    tpu.vector_store %arg25[%c0_188, %c768], %225 {strides = array<i32>} : memref<288x1152xf32, #tpu.memory_space<vmem>>, vector<80x128xf32>,
    %c21_189 = arith.constant 21 : index
    %c0_190 = arith.constant 0 : index
    %227 = vector.load %arg20[%c21_189, %c0_190] : memref<104x128xf32, #tpu.memory_space<vmem>>, vector<80x128xf32>
    %c0_191 = arith.constant 0 : index
    %c896 = arith.constant 896 : index
    %228 = vector.load %arg25[%c0_191, %c896] : memref<288x1152xf32, #tpu.memory_space<vmem>>, vector<80x128xf32>
    tpu.vector_store %arg25[%c0_191, %c896], %227 {strides = array<i32>} : memref<288x1152xf32, #tpu.memory_space<vmem>>, vector<80x128xf32>,
    %c22_192 = arith.constant 22 : index
    %c0_193 = arith.constant 0 : index
    %229 = vector.load %arg20[%c22_192, %c0_193] : memref<104x128xf32, #tpu.memory_space<vmem>>, vector<80x128xf32>
    %c0_194 = arith.constant 0 : index
    %c1024 = arith.constant 1024 : index
    %230 = vector.load %arg25[%c0_194, %c1024] : memref<288x1152xf32, #tpu.memory_space<vmem>>, vector<80x128xf32>
    tpu.vector_store %arg25[%c0_194, %c1024], %229 {strides = array<i32>} : memref<288x1152xf32, #tpu.memory_space<vmem>>, vector<80x128xf32>,
    %c0_195 = arith.constant 0 : index
    %c0_196 = arith.constant 0 : index
    %231 = vector.load %arg25[%c0_195, %c0_196] : memref<288x1152xf32, #tpu.memory_space<vmem>>, vector<80x1152xf32>
    %c0_197 = arith.constant 0 : index
    %c0_198 = arith.constant 0 : index
    %232 = vector.load %arg8[%c0_197, %c0_198] : memref<1152x128xf32, #tpu.memory_space<vmem>>, vector<1152x128xf32>
    %cst_199 = arith.constant dense<0.000000e+00> : vector<80x128xf32>
    %233 = tpu.matmul %231, %232, %cst_199 {dimension_numbers = #tpu.dot_dimension_numbers<[1], [0], [0], [1], [0, 0, 1, 1], [], []>} : vector<80x1152xf32>, vector<1152x128xf32>, vector<80x128xf32> -> vector<80x128xf32>
    %c0_200 = arith.constant 0 : index
    %c0_201 = arith.constant 0 : index
    %234 = vector.load %arg9[%c0_200, %c0_201] : memref<1x128xf32, #tpu.memory_space<vmem>>, vector<1x128xf32>
    %235 = vector.broadcast %234 : vector<1x128xf32> to vector<80x128xf32>
    %236 = arith.addf %233, %235 : vector<80x128xf32>
    %cst_202 = arith.constant 0.000000e+00 : f32
    %237 = vector.broadcast %cst_202 : f32 to vector<80x128xf32>
    %238 = arith.maximumf %236, %237 : vector<80x128xf32>
    %239 = vector.broadcast %57 : vector<80x1xf32> to vector<80x128xf32>
    %240 = arith.mulf %238, %239 : vector<80x128xf32>
    %c11_203 = arith.constant 11 : index
    %c0_204 = arith.constant 0 : index
    %241 = vector.load %arg21[%c11_203, %c0_204] : memref<104x128xf32, #tpu.memory_space<vmem>>, vector<80x128xf32>
    tpu.vector_store %arg21[%c11_203, %c0_204], %240 {strides = array<i32>} : memref<104x128xf32, #tpu.memory_space<vmem>>, vector<80x128xf32>,
    %c11_205 = arith.constant 11 : index
    %c0_206 = arith.constant 0 : index
    %242 = tpu.strided_load %arg21[%c11_205, %c0_206] {strides = array<i32: 2, 1>} : memref<104x128xf32, #tpu.memory_space<vmem>>, vector<4x128xf32>
    %c12_207 = arith.constant 12 : index
    %c0_208 = arith.constant 0 : index
    %243 = tpu.strided_load %arg21[%c12_207, %c0_208] {strides = array<i32: 2, 1>} : memref<104x128xf32, #tpu.memory_space<vmem>>, vector<4x128xf32>
    %244 = arith.maximumf %242, %243 : vector<4x128xf32>
    %c21_209 = arith.constant 21 : index
    %c0_210 = arith.constant 0 : index
    %245 = tpu.strided_load %arg21[%c21_209, %c0_210] {strides = array<i32: 2, 1>} : memref<104x128xf32, #tpu.memory_space<vmem>>, vector<4x128xf32>
    %246 = arith.maximumf %244, %245 : vector<4x128xf32>
    %c22_211 = arith.constant 22 : index
    %c0_212 = arith.constant 0 : index
    %247 = tpu.strided_load %arg21[%c22_211, %c0_212] {strides = array<i32: 2, 1>} : memref<104x128xf32, #tpu.memory_space<vmem>>, vector<4x128xf32>
    %248 = arith.maximumf %246, %247 : vector<4x128xf32>
    %c7 = arith.constant 7 : index
    %c0_213 = arith.constant 0 : index
    %249 = vector.load %arg22[%c7, %c0_213] : memref<40x128xf32, #tpu.memory_space<vmem>>, vector<4x128xf32>
    tpu.vector_store %arg22[%c7, %c0_213], %248 {strides = array<i32>} : memref<40x128xf32, #tpu.memory_space<vmem>>, vector<4x128xf32>,
    %c31_214 = arith.constant 31 : index
    %c0_215 = arith.constant 0 : index
    %250 = tpu.strided_load %arg21[%c31_214, %c0_215] {strides = array<i32: 2, 1>} : memref<104x128xf32, #tpu.memory_space<vmem>>, vector<4x128xf32>
    %c32 = arith.constant 32 : index
    %c0_216 = arith.constant 0 : index
    %251 = tpu.strided_load %arg21[%c32, %c0_216] {strides = array<i32: 2, 1>} : memref<104x128xf32, #tpu.memory_space<vmem>>, vector<4x128xf32>
    %252 = arith.maximumf %250, %251 : vector<4x128xf32>
    %c41_217 = arith.constant 41 : index
    %c0_218 = arith.constant 0 : index
    %253 = tpu.strided_load %arg21[%c41_217, %c0_218] {strides = array<i32: 2, 1>} : memref<104x128xf32, #tpu.memory_space<vmem>>, vector<4x128xf32>
    %254 = arith.maximumf %252, %253 : vector<4x128xf32>
    %c42 = arith.constant 42 : index
    %c0_219 = arith.constant 0 : index
    %255 = tpu.strided_load %arg21[%c42, %c0_219] {strides = array<i32: 2, 1>} : memref<104x128xf32, #tpu.memory_space<vmem>>, vector<4x128xf32>
    %256 = arith.maximumf %254, %255 : vector<4x128xf32>
    %c13 = arith.constant 13 : index
    %c0_220 = arith.constant 0 : index
    %257 = vector.load %arg22[%c13, %c0_220] : memref<40x128xf32, #tpu.memory_space<vmem>>, vector<4x128xf32>
    tpu.vector_store %arg22[%c13, %c0_220], %256 {strides = array<i32>} : memref<40x128xf32, #tpu.memory_space<vmem>>, vector<4x128xf32>,
    %c51_221 = arith.constant 51 : index
    %c0_222 = arith.constant 0 : index
    %258 = tpu.strided_load %arg21[%c51_221, %c0_222] {strides = array<i32: 2, 1>} : memref<104x128xf32, #tpu.memory_space<vmem>>, vector<4x128xf32>
    %c52 = arith.constant 52 : index
    %c0_223 = arith.constant 0 : index
    %259 = tpu.strided_load %arg21[%c52, %c0_223] {strides = array<i32: 2, 1>} : memref<104x128xf32, #tpu.memory_space<vmem>>, vector<4x128xf32>
    %260 = arith.maximumf %258, %259 : vector<4x128xf32>
    %c61_224 = arith.constant 61 : index
    %c0_225 = arith.constant 0 : index
    %261 = tpu.strided_load %arg21[%c61_224, %c0_225] {strides = array<i32: 2, 1>} : memref<104x128xf32, #tpu.memory_space<vmem>>, vector<4x128xf32>
    %262 = arith.maximumf %260, %261 : vector<4x128xf32>
    %c62 = arith.constant 62 : index
    %c0_226 = arith.constant 0 : index
    %263 = tpu.strided_load %arg21[%c62, %c0_226] {strides = array<i32: 2, 1>} : memref<104x128xf32, #tpu.memory_space<vmem>>, vector<4x128xf32>
    %264 = arith.maximumf %262, %263 : vector<4x128xf32>
    %c19_227 = arith.constant 19 : index
    %c0_228 = arith.constant 0 : index
    %265 = vector.load %arg22[%c19_227, %c0_228] : memref<40x128xf32, #tpu.memory_space<vmem>>, vector<4x128xf32>
    tpu.vector_store %arg22[%c19_227, %c0_228], %264 {strides = array<i32>} : memref<40x128xf32, #tpu.memory_space<vmem>>, vector<4x128xf32>,
    %c71_229 = arith.constant 71 : index
    %c0_230 = arith.constant 0 : index
    %266 = tpu.strided_load %arg21[%c71_229, %c0_230] {strides = array<i32: 2, 1>} : memref<104x128xf32, #tpu.memory_space<vmem>>, vector<4x128xf32>
    %c72 = arith.constant 72 : index
    %c0_231 = arith.constant 0 : index
    %267 = tpu.strided_load %arg21[%c72, %c0_231] {strides = array<i32: 2, 1>} : memref<104x128xf32, #tpu.memory_space<vmem>>, vector<4x128xf32>
    %268 = arith.maximumf %266, %267 : vector<4x128xf32>
    %c81_232 = arith.constant 81 : index
    %c0_233 = arith.constant 0 : index
    %269 = tpu.strided_load %arg21[%c81_232, %c0_233] {strides = array<i32: 2, 1>} : memref<104x128xf32, #tpu.memory_space<vmem>>, vector<4x128xf32>
    %270 = arith.maximumf %268, %269 : vector<4x128xf32>
    %c82 = arith.constant 82 : index
    %c0_234 = arith.constant 0 : index
    %271 = tpu.strided_load %arg21[%c82, %c0_234] {strides = array<i32: 2, 1>} : memref<104x128xf32, #tpu.memory_space<vmem>>, vector<4x128xf32>
    %272 = arith.maximumf %270, %271 : vector<4x128xf32>
    %c25 = arith.constant 25 : index
    %c0_235 = arith.constant 0 : index
    %273 = vector.load %arg22[%c25, %c0_235] : memref<40x128xf32, #tpu.memory_space<vmem>>, vector<4x128xf32>
    tpu.vector_store %arg22[%c25, %c0_235], %272 {strides = array<i32>} : memref<40x128xf32, #tpu.memory_space<vmem>>, vector<4x128xf32>,
    %c0_236 = arith.constant 0 : index
    %c0_237 = arith.constant 0 : index
    %274 = vector.load %arg22[%c0_236, %c0_237] : memref<40x128xf32, #tpu.memory_space<vmem>>, vector<24x128xf32>
    %c0_238 = arith.constant 0 : index
    %c0_239 = arith.constant 0 : index
    %275 = vector.load %arg25[%c0_238, %c0_239] : memref<288x1152xf32, #tpu.memory_space<vmem>>, vector<24x128xf32>
    tpu.vector_store %arg25[%c0_238, %c0_239], %274 {strides = array<i32>} : memref<288x1152xf32, #tpu.memory_space<vmem>>, vector<24x128xf32>,
    %c1_240 = arith.constant 1 : index
    %c0_241 = arith.constant 0 : index
    %276 = vector.load %arg22[%c1_240, %c0_241] : memref<40x128xf32, #tpu.memory_space<vmem>>, vector<24x128xf32>
    %c0_242 = arith.constant 0 : index
    %c128_243 = arith.constant 128 : index
    %277 = vector.load %arg25[%c0_242, %c128_243] : memref<288x1152xf32, #tpu.memory_space<vmem>>, vector<24x128xf32>
    tpu.vector_store %arg25[%c0_242, %c128_243], %276 {strides = array<i32>} : memref<288x1152xf32, #tpu.memory_space<vmem>>, vector<24x128xf32>,
    %c2_244 = arith.constant 2 : index
    %c0_245 = arith.constant 0 : index
    %278 = vector.load %arg22[%c2_244, %c0_245] : memref<40x128xf32, #tpu.memory_space<vmem>>, vector<24x128xf32>
    %c0_246 = arith.constant 0 : index
    %c256_247 = arith.constant 256 : index
    %279 = vector.load %arg25[%c0_246, %c256_247] : memref<288x1152xf32, #tpu.memory_space<vmem>>, vector<24x128xf32>
    tpu.vector_store %arg25[%c0_246, %c256_247], %278 {strides = array<i32>} : memref<288x1152xf32, #tpu.memory_space<vmem>>, vector<24x128xf32>,
    %c6 = arith.constant 6 : index
    %c0_248 = arith.constant 0 : index
    %280 = vector.load %arg22[%c6, %c0_248] : memref<40x128xf32, #tpu.memory_space<vmem>>, vector<24x128xf32>
    %c0_249 = arith.constant 0 : index
    %c384_250 = arith.constant 384 : index
    %281 = vector.load %arg25[%c0_249, %c384_250] : memref<288x1152xf32, #tpu.memory_space<vmem>>, vector<24x128xf32>
    tpu.vector_store %arg25[%c0_249, %c384_250], %280 {strides = array<i32>} : memref<288x1152xf32, #tpu.memory_space<vmem>>, vector<24x128xf32>,
    %c7_251 = arith.constant 7 : index
    %c0_252 = arith.constant 0 : index
    %282 = vector.load %arg22[%c7_251, %c0_252] : memref<40x128xf32, #tpu.memory_space<vmem>>, vector<24x128xf32>
    %c0_253 = arith.constant 0 : index
    %c512_254 = arith.constant 512 : index
    %283 = vector.load %arg25[%c0_253, %c512_254] : memref<288x1152xf32, #tpu.memory_space<vmem>>, vector<24x128xf32>
    tpu.vector_store %arg25[%c0_253, %c512_254], %282 {strides = array<i32>} : memref<288x1152xf32, #tpu.memory_space<vmem>>, vector<24x128xf32>,
    %c8 = arith.constant 8 : index
    %c0_255 = arith.constant 0 : index
    %284 = vector.load %arg22[%c8, %c0_255] : memref<40x128xf32, #tpu.memory_space<vmem>>, vector<24x128xf32>
    %c0_256 = arith.constant 0 : index
    %c640_257 = arith.constant 640 : index
    %285 = vector.load %arg25[%c0_256, %c640_257] : memref<288x1152xf32, #tpu.memory_space<vmem>>, vector<24x128xf32>
    tpu.vector_store %arg25[%c0_256, %c640_257], %284 {strides = array<i32>} : memref<288x1152xf32, #tpu.memory_space<vmem>>, vector<24x128xf32>,
    %c12_258 = arith.constant 12 : index
    %c0_259 = arith.constant 0 : index
    %286 = vector.load %arg22[%c12_258, %c0_259] : memref<40x128xf32, #tpu.memory_space<vmem>>, vector<24x128xf32>
    %c0_260 = arith.constant 0 : index
    %c768_261 = arith.constant 768 : index
    %287 = vector.load %arg25[%c0_260, %c768_261] : memref<288x1152xf32, #tpu.memory_space<vmem>>, vector<24x128xf32>
    tpu.vector_store %arg25[%c0_260, %c768_261], %286 {strides = array<i32>} : memref<288x1152xf32, #tpu.memory_space<vmem>>, vector<24x128xf32>,
    %c13_262 = arith.constant 13 : index
    %c0_263 = arith.constant 0 : index
    %288 = vector.load %arg22[%c13_262, %c0_263] : memref<40x128xf32, #tpu.memory_space<vmem>>, vector<24x128xf32>
    %c0_264 = arith.constant 0 : index
    %c896_265 = arith.constant 896 : index
    %289 = vector.load %arg25[%c0_264, %c896_265] : memref<288x1152xf32, #tpu.memory_space<vmem>>, vector<24x128xf32>
    tpu.vector_store %arg25[%c0_264, %c896_265], %288 {strides = array<i32>} : memref<288x1152xf32, #tpu.memory_space<vmem>>, vector<24x128xf32>,
    %c14 = arith.constant 14 : index
    %c0_266 = arith.constant 0 : index
    %290 = vector.load %arg22[%c14, %c0_266] : memref<40x128xf32, #tpu.memory_space<vmem>>, vector<24x128xf32>
    %c0_267 = arith.constant 0 : index
    %c1024_268 = arith.constant 1024 : index
    %291 = vector.load %arg25[%c0_267, %c1024_268] : memref<288x1152xf32, #tpu.memory_space<vmem>>, vector<24x128xf32>
    tpu.vector_store %arg25[%c0_267, %c1024_268], %290 {strides = array<i32>} : memref<288x1152xf32, #tpu.memory_space<vmem>>, vector<24x128xf32>,
    %c0_269 = arith.constant 0 : index
    %c0_270 = arith.constant 0 : index
    %292 = vector.load %arg25[%c0_269, %c0_270] : memref<288x1152xf32, #tpu.memory_space<vmem>>, vector<24x1152xf32>
    %c0_271 = arith.constant 0 : index
    %c0_272 = arith.constant 0 : index
    %293 = vector.load %arg10[%c0_271, %c0_272] : memref<1152x64xf32, #tpu.memory_space<vmem>>, vector<1152x64xf32>
    %cst_273 = arith.constant dense<0.000000e+00> : vector<24x64xf32>
    %294 = tpu.matmul %292, %293, %cst_273 {dimension_numbers = #tpu.dot_dimension_numbers<[1], [0], [0], [1], [0, 0, 1, 1], [], []>} : vector<24x1152xf32>, vector<1152x64xf32>, vector<24x64xf32> -> vector<24x64xf32>
    %c0_274 = arith.constant 0 : index
    %c0_275 = arith.constant 0 : index
    %295 = vector.load %arg11[%c0_274, %c0_275] : memref<1x64xf32, #tpu.memory_space<vmem>>, vector<1x64xf32>
    %296 = vector.broadcast %295 : vector<1x64xf32> to vector<24x64xf32>
    %297 = arith.addf %294, %296 : vector<24x64xf32>
    %cst_276 = arith.constant 0.000000e+00 : f32
    %298 = vector.broadcast %cst_276 : f32 to vector<24x64xf32>
    %299 = arith.maximumf %297, %298 : vector<24x64xf32>
    %300 = vector.broadcast %78 : vector<24x1xf32> to vector<24x64xf32>
    %301 = arith.mulf %299, %300 : vector<24x64xf32>
    %c7_277 = arith.constant 7 : index
    %c0_278 = arith.constant 0 : index
    %302 = vector.load %arg23[%c7_277, %c0_278] : memref<40x64xf32, #tpu.memory_space<vmem>>, vector<24x64xf32>
    tpu.vector_store %arg23[%c7_277, %c0_278], %301 {strides = array<i32>} : memref<40x64xf32, #tpu.memory_space<vmem>>, vector<24x64xf32>,
    %c0_279 = arith.constant 0 : index
    %c0_280 = arith.constant 0 : index
    %303 = vector.load %arg23[%c0_279, %c0_280] : memref<40x64xf32, #tpu.memory_space<vmem>>, vector<24x64xf32>
    %c0_281 = arith.constant 0 : index
    %c0_282 = arith.constant 0 : index
    %304 = vector.load %arg25[%c0_281, %c0_282] : memref<288x1152xf32, #tpu.memory_space<vmem>>, vector<24x64xf32>
    tpu.vector_store %arg25[%c0_281, %c0_282], %303 {strides = array<i32>} : memref<288x1152xf32, #tpu.memory_space<vmem>>, vector<24x64xf32>,
    %c1_283 = arith.constant 1 : index
    %c0_284 = arith.constant 0 : index
    %305 = vector.load %arg23[%c1_283, %c0_284] : memref<40x64xf32, #tpu.memory_space<vmem>>, vector<24x64xf32>
    %c0_285 = arith.constant 0 : index
    %c64_286 = arith.constant 64 : index
    %306 = vector.load %arg25[%c0_285, %c64_286] : memref<288x1152xf32, #tpu.memory_space<vmem>>, vector<24x64xf32>
    tpu.vector_store %arg25[%c0_285, %c64_286], %305 {strides = array<i32>} : memref<288x1152xf32, #tpu.memory_space<vmem>>, vector<24x64xf32>,
    %c2_287 = arith.constant 2 : index
    %c0_288 = arith.constant 0 : index
    %307 = vector.load %arg23[%c2_287, %c0_288] : memref<40x64xf32, #tpu.memory_space<vmem>>, vector<24x64xf32>
    %c0_289 = arith.constant 0 : index
    %c128_290 = arith.constant 128 : index
    %308 = vector.load %arg25[%c0_289, %c128_290] : memref<288x1152xf32, #tpu.memory_space<vmem>>, vector<24x64xf32>
    tpu.vector_store %arg25[%c0_289, %c128_290], %307 {strides = array<i32>} : memref<288x1152xf32, #tpu.memory_space<vmem>>, vector<24x64xf32>,
    %c6_291 = arith.constant 6 : index
    %c0_292 = arith.constant 0 : index
    %309 = vector.load %arg23[%c6_291, %c0_292] : memref<40x64xf32, #tpu.memory_space<vmem>>, vector<24x64xf32>
    %c0_293 = arith.constant 0 : index
    %c192_294 = arith.constant 192 : index
    %310 = vector.load %arg25[%c0_293, %c192_294] : memref<288x1152xf32, #tpu.memory_space<vmem>>, vector<24x64xf32>
    tpu.vector_store %arg25[%c0_293, %c192_294], %309 {strides = array<i32>} : memref<288x1152xf32, #tpu.memory_space<vmem>>, vector<24x64xf32>,
    %c7_295 = arith.constant 7 : index
    %c0_296 = arith.constant 0 : index
    %311 = vector.load %arg23[%c7_295, %c0_296] : memref<40x64xf32, #tpu.memory_space<vmem>>, vector<24x64xf32>
    %c0_297 = arith.constant 0 : index
    %c256_298 = arith.constant 256 : index
    %312 = vector.load %arg25[%c0_297, %c256_298] : memref<288x1152xf32, #tpu.memory_space<vmem>>, vector<24x64xf32>
    tpu.vector_store %arg25[%c0_297, %c256_298], %311 {strides = array<i32>} : memref<288x1152xf32, #tpu.memory_space<vmem>>, vector<24x64xf32>,
    %c8_299 = arith.constant 8 : index
    %c0_300 = arith.constant 0 : index
    %313 = vector.load %arg23[%c8_299, %c0_300] : memref<40x64xf32, #tpu.memory_space<vmem>>, vector<24x64xf32>
    %c0_301 = arith.constant 0 : index
    %c320_302 = arith.constant 320 : index
    %314 = vector.load %arg25[%c0_301, %c320_302] : memref<288x1152xf32, #tpu.memory_space<vmem>>, vector<24x64xf32>
    tpu.vector_store %arg25[%c0_301, %c320_302], %313 {strides = array<i32>} : memref<288x1152xf32, #tpu.memory_space<vmem>>, vector<24x64xf32>,
    %c12_303 = arith.constant 12 : index
    %c0_304 = arith.constant 0 : index
    %315 = vector.load %arg23[%c12_303, %c0_304] : memref<40x64xf32, #tpu.memory_space<vmem>>, vector<24x64xf32>
    %c0_305 = arith.constant 0 : index
    %c384_306 = arith.constant 384 : index
    %316 = vector.load %arg25[%c0_305, %c384_306] : memref<288x1152xf32, #tpu.memory_space<vmem>>, vector<24x64xf32>
    tpu.vector_store %arg25[%c0_305, %c384_306], %315 {strides = array<i32>} : memref<288x1152xf32, #tpu.memory_space<vmem>>, vector<24x64xf32>,
    %c13_307 = arith.constant 13 : index
    %c0_308 = arith.constant 0 : index
    %317 = vector.load %arg23[%c13_307, %c0_308] : memref<40x64xf32, #tpu.memory_space<vmem>>, vector<24x64xf32>
    %c0_309 = arith.constant 0 : index
    %c448_310 = arith.constant 448 : index
    %318 = vector.load %arg25[%c0_309, %c448_310] : memref<288x1152xf32, #tpu.memory_space<vmem>>, vector<24x64xf32>
    tpu.vector_store %arg25[%c0_309, %c448_310], %317 {strides = array<i32>} : memref<288x1152xf32, #tpu.memory_space<vmem>>, vector<24x64xf32>,
    %c14_311 = arith.constant 14 : index
    %c0_312 = arith.constant 0 : index
    %319 = vector.load %arg23[%c14_311, %c0_312] : memref<40x64xf32, #tpu.memory_space<vmem>>, vector<24x64xf32>
    %c0_313 = arith.constant 0 : index
    %c512_314 = arith.constant 512 : index
    %320 = vector.load %arg25[%c0_313, %c512_314] : memref<288x1152xf32, #tpu.memory_space<vmem>>, vector<24x64xf32>
    tpu.vector_store %arg25[%c0_313, %c512_314], %319 {strides = array<i32>} : memref<288x1152xf32, #tpu.memory_space<vmem>>, vector<24x64xf32>,
    %c0_315 = arith.constant 0 : index
    %c0_316 = arith.constant 0 : index
    %321 = vector.load %arg25[%c0_315, %c0_316] : memref<288x1152xf32, #tpu.memory_space<vmem>>, vector<24x576xf32>
    %c0_317 = arith.constant 0 : index
    %c0_318 = arith.constant 0 : index
    %322 = vector.load %arg12[%c0_317, %c0_318] : memref<576x64xf32, #tpu.memory_space<vmem>>, vector<576x64xf32>
    %cst_319 = arith.constant dense<0.000000e+00> : vector<24x64xf32>
    %323 = tpu.matmul %321, %322, %cst_319 {dimension_numbers = #tpu.dot_dimension_numbers<[1], [0], [0], [1], [0, 0, 1, 1], [], []>} : vector<24x576xf32>, vector<576x64xf32>, vector<24x64xf32> -> vector<24x64xf32>
    %c0_320 = arith.constant 0 : index
    %c0_321 = arith.constant 0 : index
    %324 = vector.load %arg13[%c0_320, %c0_321] : memref<1x64xf32, #tpu.memory_space<vmem>>, vector<1x64xf32>
    %325 = vector.broadcast %324 : vector<1x64xf32> to vector<24x64xf32>
    %326 = arith.addf %323, %325 : vector<24x64xf32>
    %cst_322 = arith.constant 0.000000e+00 : f32
    %327 = vector.broadcast %cst_322 : f32 to vector<24x64xf32>
    %328 = arith.maximumf %326, %327 : vector<24x64xf32>
    %329 = vector.broadcast %78 : vector<24x1xf32> to vector<24x64xf32>
    %330 = arith.mulf %328, %329 : vector<24x64xf32>
    %c7_323 = arith.constant 7 : index
    %c0_324 = arith.constant 0 : index
    %331 = vector.load %arg24[%c7_323, %c0_324] : memref<40x64xf32, #tpu.memory_space<vmem>>, vector<24x64xf32>
    tpu.vector_store %arg24[%c7_323, %c0_324], %330 {strides = array<i32>} : memref<40x64xf32, #tpu.memory_space<vmem>>, vector<24x64xf32>,
    %c7_325 = arith.constant 7 : index
    %c0_326 = arith.constant 0 : index
    %332 = vector.load %arg24[%c7_325, %c0_326] : memref<40x64xf32, #tpu.memory_space<vmem>>, vector<24x64xf32>
    %c0_327 = arith.constant 0 : index
    %c0_328 = arith.constant 0 : index
    %333 = vector.load %arg14[%c0_327, %c0_328] : memref<64x12xf32, #tpu.memory_space<vmem>>, vector<64x12xf32>
    %cst_329 = arith.constant dense<0.000000e+00> : vector<24x12xf32>
    %334 = tpu.matmul %332, %333, %cst_329 {dimension_numbers = #tpu.dot_dimension_numbers<[1], [0], [0], [1], [0, 0, 1, 1], [], []>} : vector<24x64xf32>, vector<64x12xf32>, vector<24x12xf32> -> vector<24x12xf32>
    %c0_330 = arith.constant 0 : index
    %c0_331 = arith.constant 0 : index
    %335 = vector.load %arg15[%c0_330, %c0_331] : memref<1x12xf32, #tpu.memory_space<vmem>>, vector<1x12xf32>
    %336 = vector.broadcast %335 : vector<1x12xf32> to vector<24x12xf32>
    %337 = arith.addf %334, %336 : vector<24x12xf32>
    %c0_332 = arith.constant 0 : index
    %c0_333 = arith.constant 0 : index
    %c0_334 = arith.constant 0 : index
    %338 = vector.load %arg16[%c0_332, %c0_333, %c0_334] : memref<1x24x12xf32, #tpu.memory_space<vmem>>, vector<1x24x12xf32>
    %339 = vector.shape_cast %338 : vector<1x24x12xf32> to vector<24x12xf32>
    %340 = vector.shape_cast %337 : vector<24x12xf32> to vector<1x24x12xf32>
    tpu.vector_store %arg16[%c0_332, %c0_333, %c0_334], %340 {strides = array<i32>} : memref<1x24x12xf32, #tpu.memory_space<vmem>>, vector<1x24x12xf32>,
    return
  }
  func.func @transform_0(%arg0: i32) -> (i32, i32, i32) {
    %c0_i32 = arith.constant 0 : i32
    %c0_i32_0 = arith.constant 0 : i32
    %c0_i32_1 = arith.constant 0 : i32
    return %arg0, %c0_i32, %c0_i32_0 : i32, i32, i32
  }
  func.func @transform_1(%arg0: i32) -> (i32, i32) {
    %c0_i32 = arith.constant 0 : i32
    %c0_i32_0 = arith.constant 0 : i32
    %c0_i32_1 = arith.constant 0 : i32
    return %c0_i32, %c0_i32_0 : i32, i32
  }
  func.func @transform_2(%arg0: i32) -> (i32, i32) {
    %c0_i32 = arith.constant 0 : i32
    %c0_i32_0 = arith.constant 0 : i32
    %c0_i32_1 = arith.constant 0 : i32
    return %c0_i32, %c0_i32_0 : i32, i32
  }
  func.func @transform_3(%arg0: i32) -> (i32, i32) {
    %c0_i32 = arith.constant 0 : i32
    %c0_i32_0 = arith.constant 0 : i32
    %c0_i32_1 = arith.constant 0 : i32
    return %c0_i32, %c0_i32_0 : i32, i32
  }
  func.func @transform_4(%arg0: i32) -> (i32, i32) {
    %c0_i32 = arith.constant 0 : i32
    %c0_i32_0 = arith.constant 0 : i32
    %c0_i32_1 = arith.constant 0 : i32
    return %c0_i32, %c0_i32_0 : i32, i32
  }
  func.func @transform_5(%arg0: i32) -> (i32, i32) {
    %c0_i32 = arith.constant 0 : i32
    %c0_i32_0 = arith.constant 0 : i32
    %c0_i32_1 = arith.constant 0 : i32
    return %c0_i32, %c0_i32_0 : i32, i32
  }
  func.func @transform_6(%arg0: i32) -> (i32, i32) {
    %c0_i32 = arith.constant 0 : i32
    %c0_i32_0 = arith.constant 0 : i32
    %c0_i32_1 = arith.constant 0 : i32
    return %c0_i32, %c0_i32_0 : i32, i32
  }
  func.func @transform_7(%arg0: i32) -> (i32, i32) {
    %c0_i32 = arith.constant 0 : i32
    %c0_i32_0 = arith.constant 0 : i32
    %c0_i32_1 = arith.constant 0 : i32
    return %c0_i32, %c0_i32_0 : i32, i32
  }
  func.func @transform_8(%arg0: i32) -> (i32, i32) {
    %c0_i32 = arith.constant 0 : i32
    %c0_i32_0 = arith.constant 0 : i32
    %c0_i32_1 = arith.constant 0 : i32
    return %c0_i32, %c0_i32_0 : i32, i32
  }
  func.func @transform_9(%arg0: i32) -> (i32, i32) {
    %c0_i32 = arith.constant 0 : i32
    %c0_i32_0 = arith.constant 0 : i32
    %c0_i32_1 = arith.constant 0 : i32
    return %c0_i32, %c0_i32_0 : i32, i32
  }
  func.func @transform_10(%arg0: i32) -> (i32, i32) {
    %c0_i32 = arith.constant 0 : i32
    %c0_i32_0 = arith.constant 0 : i32
    %c0_i32_1 = arith.constant 0 : i32
    return %c0_i32, %c0_i32_0 : i32, i32
  }
  func.func @transform_11(%arg0: i32) -> (i32, i32) {
    %c0_i32 = arith.constant 0 : i32
    %c0_i32_0 = arith.constant 0 : i32
    %c0_i32_1 = arith.constant 0 : i32
    return %c0_i32, %c0_i32_0 : i32, i32
  }
  func.func @transform_12(%arg0: i32) -> (i32, i32) {
    %c0_i32 = arith.constant 0 : i32
    %c0_i32_0 = arith.constant 0 : i32
    %c0_i32_1 = arith.constant 0 : i32
    return %c0_i32, %c0_i32_0 : i32, i32
  }
  func.func @transform_13(%arg0: i32) -> (i32, i32) {
    %c0_i32 = arith.constant 0 : i32
    %c0_i32_0 = arith.constant 0 : i32
    %c0_i32_1 = arith.constant 0 : i32
    return %c0_i32, %c0_i32_0 : i32, i32
  }
  func.func @transform_14(%arg0: i32) -> (i32, i32) {
    %c0_i32 = arith.constant 0 : i32
    %c0_i32_0 = arith.constant 0 : i32
    %c0_i32_1 = arith.constant 0 : i32
    return %c0_i32, %c0_i32_0 : i32, i32
  }
  func.func @transform_15(%arg0: i32) -> (i32, i32, i32) {
    %c0_i32 = arith.constant 0 : i32
    %c0_i32_0 = arith.constant 0 : i32
    %c0_i32_1 = arith.constant 0 : i32
    return %arg0, %c0_i32, %c0_i32_0 : i32, i32, i32
  }
}

</mosaic_0001>

<bundles_post_ra>
// kernel: tile.8
= control target key start
LH: loop header
LB: loop body
LE: loop exit
PB: predicated region body
PF: predicated region fallthrough
CT: control target
= control target key end

     0   :  { %s22_s0 = inlined_call_operand.vmem [shape: f32[3], index: 0, kind: input, shape index: {}]   ;;  %s23_s1 = inlined_call_operand.vmem [shape: f32[4,3], index: 1, kind: output, shape index: {}]  }
   0x1   :  { %v4_v0 = vld [vmem:[%s22_s0] ss:$0 sm:$0xff] }
   0x2   :  { %5 = vst [vmem:[%s23_s1] sm:$0xf] %v4_v0 }

// kernel: tile.9
= control target key start
LH: loop header
LB: loop body
LE: loop exit
PB: predicated region body
PF: predicated region fallthrough
CT: control target
= control target key end

     0   :  { %vm7_vm0 = vcmask 23552   ;;  %s37_s8 = smov 3   ;;  %s38_s9 = smov 6   ;;  %vm13_vm1 = vcmask 97352   ;;  %vm19_vm2 = vcmask 72752   ;;  %vm25_vm3 = vcmask 48152   ;;  %s55_s0 = inlined_call_operand.vmem [shape: f32[4,3], index: 0, kind: input, shape index: {}]   ;;  %s56_s1 = inlined_call_operand.vmem [shape: f32[1,12], index: 1, kind: output, shape index: {}]  }
   0x1   :  { %v4_v0 = vld [vmem:[%s55_s0] sm:$0xf]  ;;  %s36_s0 = smov 9  }
   0x2   :  { %5 = vst [vmem:[#allocation1] sm:$0xf] %v4_v0 }
   0x9   :  { %v10_v1 = vld [vmem:[#allocation1 + $0x3] sm:$0x1]   ;;  %v22_v2 = vld [vmem:[#allocation1 + $0x1] sm:$0x1]   ;;  %v6_v3 = vld [vmem:[#allocation1] sm:$0x1]  }
   0xa   :  { %11 = vrot.lane.b32.xlu0 %v10_v1, %s36_s0  ;;  %23 = vrot.lane.b32.xlu1 %v22_v2, %s37_s8  ;;  %v16_v4 = vld [vmem:[#allocation1 + $0x2] sm:$0x1]   ;;  %8 = vst.msk [vmem:[#allocation0] sm:$0x1] %vm7_vm0, %v6_v3  }
   0xe   :  { %17 = vrot.lane.b32.xlu0 %v16_v4, %s38_s9 }
  0x7c   :  { %v12_v5 = vpop.permute.xlu0 %11   ;;  %v24_v6 = vpop.permute.xlu1 %23  }
  0x7d   :  { %14 = vst.msk [vmem:[#allocation0] sm:$0x1] %vm13_vm1, %v12_v5  }
  0x80   :  { %v18_v7 = vpop.permute.xlu0 %17  }
  0x81   :  { %20 = vst.msk [vmem:[#allocation0] sm:$0x1] %vm19_vm2, %v18_v7  }
  0x82   :  { %26 = vst.msk [vmem:[#allocation0] sm:$0x1] %vm25_vm3, %v24_v6  }
  0x89   :  { %v30_v8 = vld [vmem:[#allocation0] sm:$0x1] }
  0x8a   :  { %32 = vst [vmem:[%s56_s1] sm:$0x1] %v30_v8 }

// kernel: unet_forward.1
= control target key start
LH: loop header
LB: loop body
LE: loop exit
PB: predicated region body
PF: predicated region fallthrough
CT: control target
= control target key end

     0   :  { %s9916_s18 = smov 0   ;;  %s14826_s0 = inlined_call_operand.vmem [shape: f32[2,288,36], index: 0, kind: input, shape index: {}]   ;;  %s14827_s1 = inlined_call_operand.vmem [shape: f32[36,64], index: 1, kind: input, shape index: {}]   ;;  %s14828_s2 = inlined_call_operand.vmem [shape: f32[1,64], index: 2, kind: input, shape index: {}]   ;;  %s14829_s3 = inlined_call_operand.vmem [shape: f32[576,64], index: 3, kind: input, shape index: {}]   ;;  %s14830_s4 = inlined_call_operand.vmem [shape: f32[1,64], index: 4, kind: input, shape index: {}]   ;;  %s14831_s5 = inlined_call_operand.vmem [shape: f32[576,128], index: 5, kind: input, shape index: {}]   ;;  %s14832_s6 = inlined_call_operand.vmem [shape: f32[1,128], index: 6, kind: input, shape index: {}]   ;;  %s14833_s7 = inlined_call_operand.vmem [shape: f32[1152,128], index: 7, kind: input, shape index: {}]   ;;  %s14834_s8 = inlined_call_operand.vmem [shape: f32[1,128], index: 8, kind: input, shape index: {}]   ;;  %s14835_s9 = inlined_call_operand.vmem [shape: f32[1152,64], index: 9, kind: input, shape index: {}]   ;;  %s14836_s10 = inlined_call_operand.vmem [shape: f32[1,64], index: 10, kind: input, shape index: {}]   ;;  %s14837_s11 = inlined_call_operand.vmem [shape: f32[576,64], index: 11, kind: input, shape index: {}]   ;;  %s14838_s12 = inlined_call_operand.vmem [shape: f32[1,64], index: 12, kind: input, shape index: {}]   ;;  %s14839_s13 = inlined_call_operand.vmem [shape: f32[64,12], index: 13, kind: input, shape index: {}]   ;;  %s14840_s14 = inlined_call_operand.vmem [shape: f32[1,12], index: 14, kind: input, shape index: {}]   ;;  %s14841_s15 = inlined_call_operand.vmem [shape: f32[2,24,12], index: 15, kind: output, shape index: {}]  }
   0x1 LB: > { %s7753_s19 = sadd.s32 4294967295, %s9830_s18   ;;  %p7757_p0 = scmp.ge.s32.totalorder %s9830_s18, 1  ;;  %s9830_s18 = sphi %s9916_s18, %s25_s18  }
   0x2   : > { %p437_p1 = scmp.lt.s32.totalorder %s9830_s18, 3 }
   0x4   : > { %p438_p2 = pnand %p7757_p0, %p437_p1 }
   0x6   : > { %441 = sbr.rel (%p438_p2) target bundleno = 2564 (0xa04), region = 80 }
   0xd   : > { %v1535_v0 = vld [vmem:[%s14827_s1] sm:$0xff]  ;;  %v1536_v1 = vld [vmem:[%s14827_s1 + $0x8] sm:$0xff]  ;;  %v1537_v2 = vld [vmem:[%s14827_s1 + $0x10] sm:$0xff]  ;;  %p485_p3 = scmp.lt.s32.totalorder %s7753_s19, 1  ;;  %vm495_vm0 = vcmask 523264   ;;  %v9832_v6 = vmov 0.0   ;;  %v531_v56 = vlaneseq }
   0xe   : > { %v8998_v3 = vpack.c.bf16 %v1536_v1, %v1535_v0  ;;  %v1538_v4 = vld [vmem:[%s14827_s1 + $0x18] sm:$0xff]  ;;  %496 = vst.msk [vmem:[#allocation2] sm:$0xff] %vm495_vm0, %v9832_v6  ;;  %497 = vst.msk [vmem:[#allocation2 + $0x8] sm:$0xff] %vm495_vm0, %v9832_v6  ;;  %vm1547_vm1 = vcmask 293888   ;;  %v1539_v7 = vld [vmem:[%s14827_s1 + $0x20] sm:$0xf] }
   0xf   : > { %v9002_v5 = vpack.c.bf16 %v1538_v4, %v1537_v2  ;;  %s15133_s19 = smov (!%p485_p3, %s7753_s19), 1  ;;  %500 = vst.msk [vmem:[#allocation2 + $0x133] sm:$0xff] %vm495_vm0, %v9832_v6  ;;  %501 = vst.msk [vmem:[#allocation2 + $0x13b] sm:$0xff] %vm495_vm0, %v9832_v6  ;;  %vm1656_vm2 = vcmask 1043456   ;;  %vm498_vm3 = vcmask 518144   ;;  %v3482_v44 = vld [vmem:[%s14829_s3 + $0x200] sm:$0xff] }
  0x10   : > { %504 = vst [vmem:[#allocation5] sm:$0xff] %v9832_v6  ;;  %505 = vst [vmem:[#allocation5 + $0x8] sm:$0x7] %v9832_v6  ;;  %8999 = vmatprep.subr.bf16.mxu0 %v8998_v3  ;;  %s9706_s28 = smul.u32 288, %s15133_s19  ;;  %v3483_v45 = vld [vmem:[%s14829_s3 + $0x208] sm:$0xff]  ;;  %v3484_v47 = vld [vmem:[%s14829_s3 + $0x210] sm:$0xff] }
  0x11   : > { %506 = vst [vmem:[#allocation5 + $0x5b] sm:$0xff] %v9832_v6  ;;  %507 = vst [vmem:[#allocation5 + $0x63] sm:$0x1f] %v9832_v6  ;;  %9001 = vmatpush3.bf16.msra.mxu0 %v8998_v3  ;;  %v9102_v46 = vpack.c.bf16 %v3483_v45, %v3482_v44  ;;  %v3485_v48 = vld [vmem:[%s14829_s3 + $0x218] sm:$0xff]  ;;  %v3486_v50 = vld [vmem:[%s14829_s3 + $0x220] sm:$0xff]  ;;  %v10089_v57 = vshrl.u32 %v531_v56, 7 }
  0x12   : > { %510 = vst.msk [vmem:[#allocation8 + $0x1f] sm:$0xff] %vm495_vm0, %v9832_v6  ;;  %513 = vst.msk [vmem:[#allocation4] sm:$0xff] %vm495_vm0, %v9832_v6  ;;  %9003 = vmatprep.subr.bf16.mxu0 %v9002_v5  ;;  %s9990_s20 = scalar_lea.vmem %s14826_s0, %s9706_s28  ;;  %v9106_v49 = vpack.c.bf16 %v3485_v48, %v3484_v47  ;;  %v3487_v51 = vld [vmem:[%s14829_s3 + $0x228] sm:$0xff]  ;;  %v3488_v53 = vld [vmem:[%s14829_s3 + $0x230] sm:$0xff]  ;;  %s9834_s25 = smov 64  }
  0x13   : > { %514 = vst.msk [vmem:[#allocation4 + $0x8] sm:$0xff] %vm495_vm0, %v9832_v6  ;;  %515 = vst.msk [vmem:[#allocation4 + $0x10] sm:$0xff] %vm495_vm0, %v9832_v6  ;;  %v1499_v8 = vld [vmem:[%s9990_s20] sm:$0xff]  ;;  %v1500_v9 = vld [vmem:[%s9990_s20 + $0x8] sm:$0xff]  ;;  %v9110_v52 = vpack.c.bf16 %v3487_v51, %v3486_v50  ;;  %v10092_v58 = vadd.s32 8, %v10089_v57  ;;  %v10103_v63 = vadd.s32 16, %v10089_v57 }
  0x14   : > { %516 = vst.msk [vmem:[#allocation4 + $0x18] sm:$0xff] %vm495_vm0, %v9832_v6  ;;  %517 = vst.msk [vmem:[#allocation4 + $0x20] sm:$0xff] %vm495_vm0, %v9832_v6  ;;  %8705 = vmatprep.mubr.msk.f32.mxu0 %vm1547_vm1, %v1499_v8  ;;  %v1501_v10 = vld [vmem:[%s9990_s20 + $0x10] sm:$0xff]  ;;  %v1502_v11 = vld [vmem:[%s9990_s20 + $0x18] sm:$0xff]  ;;  %v10099_v61 = vmul.u32.u64.low 3817748708, %v10089_v57  ;;  %v10100_v62 = vmul.u32.u64.high 3817748708, %v10089_v57, %v10099_v61 }
  0x15   : > { %518 = vst.msk [vmem:[#allocation4 + $0x28] sm:$0xff] %vm495_vm0, %v9832_v6  ;;  %519 = vst.msk [vmem:[#allocation4 + $0x30] sm:$0xff] %vm495_vm0, %v9832_v6  ;;  %9005 = vmatpush3.bf16.msra.mxu0 %v9002_v5  ;;  %v1503_v12 = vld [vmem:[%s9990_s20 + $0x20] sm:$0xff]  ;;  %v1504_v13 = vld [vmem:[%s9990_s20 + $0x28] sm:$0xff]  ;;  %v10095_v59 = vmul.u32.u64.low 3817748708, %v10092_v58  ;;  %v10096_v60 = vmul.u32.u64.high 3817748708, %v10092_v58, %v10095_v59 }
  0x16   : > { %520 = vst.msk [vmem:[#allocation4 + $0x38] sm:$0xff] %vm495_vm0, %v9832_v6  ;;  %521 = vst.msk [vmem:[#allocation4 + $0x40] sm:$0xff] %vm495_vm0, %v9832_v6  ;;  %8703 = vmatprep.subr.msk.mxu0 %vm1656_vm2, %v1539_v7  ;;  %v1505_v14 = vld [vmem:[%s9990_s20 + $0x30] sm:$0xff]  ;;  %v1506_v15 = vld [vmem:[%s9990_s20 + $0x38] sm:$0xff]  ;;  %v10106_v0 = vadd.s32 24, %v10089_v57  ;;  %v10109_v1 = vadd.s32 32, %v10089_v57 }
  0x17   : > { %522 = vst.msk [vmem:[#allocation4 + $0x48] sm:$0xff] %vm495_vm0, %v9832_v6  ;;  %523 = vst.msk [vmem:[#allocation4 + $0x50] sm:$0xff] %vm495_vm0, %v9832_v6  ;;  %v1507_v16 = vld [vmem:[%s9990_s20 + $0x40] sm:$0xff]  ;;  %v1508_v17 = vld [vmem:[%s9990_s20 + $0x48] sm:$0xff]  ;;  %v585_v2 = vshrl.u32 %v10096_v60, 4  ;;  %v574_v8 = vshrl.u32 %v10100_v62, 4 }
  0x18   : > { %524 = vst.msk [vmem:[#allocation4 + $0x58] sm:$0xff] %vm495_vm0, %v9832_v6  ;;  %525 = vst.msk [vmem:[#allocation4 + $0x60] sm:$0xff] %vm495_vm0, %v9832_v6  ;;  %v1509_v18 = vld [vmem:[%s9990_s20 + $0x50] sm:$0xff]  ;;  %v1510_v19 = vld [vmem:[%s9990_s20 + $0x58] sm:$0xff]  ;;  %v10113_v3 = vmul.u32.u64.low 3817748708, %v10103_v63  ;;  %v10114_v4 = vmul.u32.u64.high 3817748708, %v10103_v63, %v10113_v3 }
  0x19   : > { %526 = vst [vmem:[#allocation7] sm:$0xff] %v9832_v6  ;;  %527 = vst [vmem:[#allocation7 + $0x8] sm:$0xff] %v9832_v6  ;;  %8704 = vmatpush3.msk.msra.mxu0 %vm1656_vm2, %v1539_v7  ;;  %v1511_v20 = vld [vmem:[%s9990_s20 + $0x60] sm:$0xff]  ;;  %v1512_v21 = vld [vmem:[%s9990_s20 + $0x68] sm:$0xff]  ;;  %v10117_v5 = vmul.u32.u64.low 3817748708, %v10106_v0  ;;  %v10118_v7 = vmul.u32.u64.high 3817748708, %v10106_v0, %v10117_v5 }
  0x1a   : > { %528 = vst [vmem:[#allocation7 + $0x10] sm:$0xff] %v9832_v6  ;;  %529 = vst [vmem:[#allocation7 + $0x18] sm:$0xff] %v9832_v6  ;;  %8706 = vmatmul.mubr.msk.f32.vlgmr.msra.gmra.mrb[0].mxu0 %vm1547_vm1, %v1500_v9  ;;  %v1513_v22 = vld [vmem:[%s9990_s20 + $0x70] sm:$0xff]  ;;  %v1514_v23 = vld [vmem:[%s9990_s20 + $0x78] sm:$0xff]  ;;  %9103 = vmatprep.subr.bf16.mxu0 %v9102_v46  ;;  %v10122_v9 = vadd.s32 40, %v10089_v57  ;;  %v10382_v5 = vadd.s32 112, %v10089_v57 }
  0x1b   : > { %530 = vst [vmem:[#allocation7 + $0x20] sm:$0xff] %v9832_v6  ;;  %8708 = vmatprep.mubr.msk.f32.mxu0 %vm1547_vm1, %v1501_v10  ;;  %v1515_v24 = vld [vmem:[%s9990_s20 + $0x80] sm:$0xff]  ;;  %v1516_v25 = vld [vmem:[%s9990_s20 + $0x88] sm:$0xff]  ;;  %v1517_v26 = vld [vmem:[%s9990_s20 + $0x90] sm:$0xff]  ;;  %9105 = vmatpush3.bf16.msra.mxu0 %v9102_v46  ;;  %s9707_s16 = smul.u32 24, %s15133_s19 }
  0x1c   : > { %v1518_v27 = vld [vmem:[%s9990_s20 + $0x98] sm:$0xff]  ;;  %v1519_v28 = vld [vmem:[%s9990_s20 + $0xa0] sm:$0xff]  ;;  %v1520_v29 = vld [vmem:[%s9990_s20 + $0xa8] sm:$0xff]  ;;  %499 = vst.msk [vmem:[#allocation2 + $0x10] sm:$0x7] %vm498_vm3, %v9832_v6  ;;  %9107 = vmatprep.subr.bf16.mxu0 %v9106_v49 }
  0x1d   : > { %v1521_v30 = vld [vmem:[%s9990_s20 + $0xb0] sm:$0xff]  ;;  %v1522_v31 = vld [vmem:[%s9990_s20 + $0xb8] sm:$0xff]  ;;  %v1523_v32 = vld [vmem:[%s9990_s20 + $0xc0] sm:$0xff]  ;;  %14886 = vst [vmem:[#allocation11_spill] sm:$0xff] %v10089_v57  ;;  %s494_s23 = scalar_lea.vmem %s14841_s15, %s9707_s16 }
  0x1e   : > { %8709 = vmatmul.mubr.msk.f32.gmra.mrb[2].mxu0 %vm1547_vm1, %v1502_v11  ;;  %v1524_v33 = vld [vmem:[%s9990_s20 + $0xc8] sm:$0xff]  ;;  %v1525_v34 = vld [vmem:[%s9990_s20 + $0xd0] sm:$0xff]  ;;  %v1526_v35 = vld [vmem:[%s9990_s20 + $0xd8] sm:$0xff]  ;;  %14887 = vst [vmem:[#allocation12_spill] sm:$0xff] %v10092_v58  ;;  %v10125_v10 = vmul.u32.u64.low 3817748708, %v10109_v1  ;;  %v10126_v11 = vmul.u32.u64.high 3817748708, %v10109_v1, %v10125_v10 }
  0x1f   : > { %8711 = vmatprep.mubr.msk.f32.mxu0 %vm1547_vm1, %v1503_v12  ;;  %v1527_v36 = vld [vmem:[%s9990_s20 + $0xe0] sm:$0xff]  ;;  %v1528_v37 = vld [vmem:[%s9990_s20 + $0xe8] sm:$0xff]  ;;  %v1529_v38 = vld [vmem:[%s9990_s20 + $0xf0] sm:$0xff]  ;;  %9109 = vmatpush3.bf16.msra.mxu0 %v9106_v49  ;;  %14888 = vst [vmem:[#allocation13_spill] sm:$0xff] %v10103_v63  ;;  %v586_v12 = vmul.u32 18, %v585_v2 }
  0x20   : > { %v1530_v39 = vld [vmem:[%s9990_s20 + $0xf8] sm:$0xff]  ;;  %v1531_v40 = vld [vmem:[%s9990_s20 + $0x100] sm:$0xff]  ;;  %v1532_v41 = vld [vmem:[%s9990_s20 + $0x108] sm:$0xff]  ;;  %9111 = vmatprep.subr.bf16.mxu0 %v9110_v52  ;;  %14889 = vst [vmem:[#allocation14_spill] sm:$0xff] %v10106_v0 }
  0x21   : > { %v1533_v42 = vld [vmem:[%s9990_s20 + $0x110] sm:$0xff]  ;;  %v1534_v43 = vld [vmem:[%s9990_s20 + $0x118] sm:$0xff]  ;;  %14890 = vst [vmem:[#allocation15_spill] sm:$0xff] %v10109_v1  ;;  %14891 = vst [vmem:[#allocation16_spill] sm:$0xff] %v10122_v9 }
  0x22   : > { %8712 = vmatmul.mubr.msk.f32.gmra.mrb[4].mxu0 %vm1547_vm1, %v1504_v13  ;;  %v3489_v54 = vld [vmem:[%s14829_s3 + $0x238] sm:$0xff]  ;;  %v10129_v13 = vadd.s32 48, %v10089_v57 }
  0x23   : > { %8714 = vmatprep.mubr.msk.f32.mxu0 %vm1547_vm1, %v1505_v14  ;;  %9113 = vmatpush3.bf16.msra.mxu0 %v9110_v52  ;;  %v9114_v55 = vpack.c.bf16 %v3489_v54, %v3488_v53  ;;  %v575_v14 = vmul.u32 18, %v574_v8 }
  0x24   : > { %14892 = vst [vmem:[#allocation17_spill] sm:$0xff] %v10129_v13 }
  0x25   : > { %9115 = vmatprep.subr.bf16.mxu0 %v9114_v55 }
  0x26   : > { %8715 = vmatmul.mubr.msk.f32.gmra.mrb[6].mxu0 %vm1547_vm1, %v1506_v15 }
  0x27   : > { %8717 = vmatprep.mubr.msk.f32.mxu0 %vm1547_vm1, %v1507_v16  ;;  %9117 = vmatpush3.bf16.msra.mxu0 %v9114_v55  ;;  %v10132_v15 = vmul.u32.u64.low 3817748708, %v10122_v9  ;;  %v10133_v16 = vmul.u32.u64.high 3817748708, %v10122_v9, %v10132_v15 }
  0x2a   : > { %8718 = vmatmul.mubr.msk.f32.gmra.mrb[8].mxu0 %vm1547_vm1, %v1508_v17  ;;  %v10136_v17 = vadd.s32 56, %v10089_v57 }
  0x2b   : > { %8720 = vmatprep.mubr.msk.f32.mxu0 %vm1547_vm1, %v1509_v18  ;;  %v587_v18 = vsub.s32 %v10092_v58, %v586_v12  ;;  %v3418_v12 = vld [vmem:[%s14829_s3] sm:$0xff] }
  0x2c   : > { %14893 = vst [vmem:[#allocation18_spill] sm:$0xff] %v10136_v17 }
  0x2d   : > { %vm965_vm4 = vcmp.ne.s32.totalorder %v587_v18, 0  ;;  %vm1001_vm5 = vcmp.lt.s32.totalorder %v587_v18, 0 }
  0x2e   : > { %8721 = vmatmul.mubr.msk.f32.gmra.mrb[10].mxu0 %vm1547_vm1, %v1510_v19  ;;  %v596_v19 = vshrl.u32 %v10114_v4, 4  ;;  %vm10152_vm8 = vmand %vm1001_vm5, %vm965_vm4 }
  0x2f   : > { %8723 = vmatprep.mubr.msk.f32.mxu0 %vm1547_vm1, %v1511_v20 }
  0x32   : > { %8724 = vmatmul.mubr.msk.f32.gmra.mrb[12].mxu0 %vm1547_vm1, %v1512_v21  ;;  %v10141_v20 = vmul.u32.u64.low 3817748708, %v10129_v13  ;;  %v10142_v21 = vmul.u32.u64.high 3817748708, %v10129_v13, %v10141_v20 }
  0x33   : > { %8726 = vmatprep.mubr.msk.f32.mxu0 %vm1547_vm1, %v1513_v22  ;;  %v607_v22 = vshrl.u32 %v10118_v7, 4  ;;  %v10239_v7 = vadd.s32 88, %v10089_v57 }
  0x36   : > { %8727 = vmatmul.mubr.msk.f32.gmra.mrb[14].mxu0 %vm1547_vm1, %v1514_v23  ;;  %v576_v23 = vsub.s32 %v10089_v57, %v575_v14  ;;  %v3419_v14 = vld [vmem:[%s14829_s3 + $0x8] sm:$0xff] }
  0x37   : > { %8729 = vmatprep.mubr.msk.f32.mxu0 %vm1547_vm1, %v1515_v24  ;;  %v618_v24 = vshrl.u32 %v10126_v11, 4  ;;  %v10246_v11 = vadd.s32 96, %v10089_v57 }
  0x38   : > { %vm964_vm6 = vcmp.ne.s32.totalorder %v576_v23, 0  ;;  %vm1000_vm7 = vcmp.lt.s32.totalorder %v576_v23, 0 }
  0x39   : > { %vm10163_vm9 = vmand %vm1000_vm7, %vm964_vm6 }
  0x3a   : > { %8730 = vmatmul.mubr.msk.f32.gmra.mrb[16].mxu0 %vm1547_vm1, %v1516_v25 }
  0x3b   : > { %8732 = vmatprep.mubr.msk.f32.mxu0 %vm1547_vm1, %v1517_v26  ;;  %v10148_v25 = vmul.u32.u64.low 3817748708, %v10136_v17  ;;  %v10149_v26 = vmul.u32.u64.high 3817748708, %v10136_v17, %v10148_v25 }
  0x3d   : > { %v651_v44 = vshrl.u32 %v10149_v26, 4  ;;  %v10278_v25 = vmul.u32.u64.low 3817748708, %v10239_v7  ;;  %v10279_v26 = vmul.u32.u64.high 3817748708, %v10239_v7, %v10278_v25 }
  0x3e   : > { %8733 = vmatmul.mubr.msk.f32.gmra.mrb[18].mxu0 %vm1547_vm1, %v1518_v27  ;;  %v597_v27 = vmul.u32 18, %v596_v19 }
  0x3f   : > { %8735 = vmatprep.mubr.msk.f32.mxu0 %vm1547_vm1, %v1519_v28  ;;  %v608_v28 = vmul.u32 18, %v607_v22  ;;  %v652_v56 = vmul.u32 18, %v651_v44  ;;  %v9007_v22 = vpack.c.bf16 %v3419_v14, %v3418_v12  ;;  %v10388_v12 = vadd.s32 120, %v10089_v57 }
  0x41   : > { %v10242_v8 = vsub.s32 %v10136_v17, %v652_v56 }
  0x42   : > { %8736 = vmatmul.mubr.msk.f32.gmra.mrb[20].mxu0 %vm1547_vm1, %v1520_v29  ;;  %v1073_v29 = vadd.s32 18, %v587_v18 }
  0x43   : > { %8738 = vmatprep.mubr.msk.f32.mxu0 %vm1547_vm1, %v1521_v30  ;;  %v629_v30 = vshrl.u32 %v10133_v16, 4  ;;  %v10260_v16 = vadd.s32 104, %v10089_v57 }
  0x46   : > { %8739 = vmatmul.mubr.msk.f32.gmra.mrb[22].mxu0 %vm1547_vm1, %v1522_v31 }
  0x47   : > { %8741 = vmatprep.mubr.msk.f32.mxu0 %vm1547_vm1, %v1523_v32  ;;  %v619_v32 = vmul.u32 18, %v618_v24 }
  0x4a   : > { %8742 = vmatmul.mubr.msk.f32.gmra.mrb[24].mxu0 %vm1547_vm1, %v1524_v33  ;;  %v10157_v33 = vadd.s32 64, %v10089_v57 }
  0x4b   : > { %8744 = vmatprep.mubr.msk.f32.mxu0 %vm1547_vm1, %v1525_v34  ;;  %v1072_v34 = vadd.s32 18, %v576_v23 }
  0x4c   : > { %14896 = vst [vmem:[#allocation19_spill] sm:$0xff] %v10157_v33  ;;  %v10183_v45 = vmul.u32.u64.low 3817748708, %v10157_v33  ;;  %v10184_v46 = vmul.u32.u64.high 3817748708, %v10157_v33, %v10183_v45 }
  0x4d   : > { %v1108_v47 = vsel %vm10163_vm9, %v1072_v34, %v576_v23  ;;  %v3421_v34 = vld [vmem:[%s14829_s3 + $0x18] sm:$0xff]  ;;  %v1079_v45 = vadd.s32 18, %v10242_v8 }
  0x4e   : > { %8745 = vmatmul.mubr.msk.f32.gmra.mrb[26].mxu0 %vm1547_vm1, %v1526_v35  ;;  %v10160_v35 = vsub.s32 %v10103_v63, %v597_v27  ;;  %vm10218_vm3 = vcmp.lt.s32.totalorder %v1108_v47, 16  ;;  %v662_v10 = vshrl.u32 %v10184_v46, 4 }
  0x4f   : > { %8747 = vmatprep.mubr.msk.f32.mxu0 %vm1547_vm1, %v1527_v36  ;;  %v640_v36 = vshrl.u32 %v10142_v21, 4 }
  0x50   : > { %vm966_vm10 = vcmp.ne.s32.totalorder %v10160_v35, 0  ;;  %vm1002_vm11 = vcmp.lt.s32.totalorder %v10160_v35, 0  ;;  %v1074_v49 = vadd.s32 18, %v10160_v35 }
  0x51   : > { %v641_v48 = vmul.u32 18, %v640_v36  ;;  %vm10204_vm14 = vmand %vm1002_vm11, %vm966_vm10  ;;  %vm971_vm11 = vcmp.ne.s32.totalorder %v10242_v8, 0 }
  0x52   : > { %8748 = vmatmul.mubr.msk.f32.gmra.mrb[28].mxu0 %vm1547_vm1, %v1528_v37  ;;  %v1110_v4 = vsel %vm10204_vm14, %v1074_v49, %v10160_v35  ;;  %v10299_v35 = vmul.u32.u64.low 3817748708, %v10260_v16  ;;  %v10300_v36 = vmul.u32.u64.high 3817748708, %v10260_v16, %v10299_v35 }
  0x53   : > { %8750 = vmatprep.mubr.msk.f32.mxu0 %vm1547_vm1, %v1529_v38  ;;  %v10168_v38 = vsub.s32 %v10106_v0, %v608_v28  ;;  %v10212_v60 = vsub.s32 %v10129_v13, %v641_v48 }
  0x55   : > { %vm967_vm12 = vcmp.ne.s32.totalorder %v10168_v38, 0  ;;  %vm1003_vm13 = vcmp.lt.s32.totalorder %v10168_v38, 0  ;;  %v1075_v59 = vadd.s32 18, %v10168_v38  ;;  %vm1006_vm9 = vcmp.lt.s32.totalorder %v10212_v60, 0 }
  0x56   : > { %8751 = vmatmul.mubr.msk.f32.gmra.mrb[30].mxu0 %vm1547_vm1, %v1530_v39  ;;  %v10171_v39 = vadd.s32 72, %v10089_v57  ;;  %vm10224_vm4 = vmand %vm1003_vm13, %vm967_vm12  ;;  %v1078_v24 = vadd.s32 18, %v10212_v60  ;;  %vm1007_vm13 = vcmp.lt.s32.totalorder %v10242_v8, 0 }
  0x57   : > { %8753 = vmatprep.mubr.msk.f32.mxu0 %vm1547_vm1, %v1531_v40  ;;  %v1109_v40 = vsel %vm10152_vm8, %v1073_v29, %v587_v18  ;;  %v1111_v15 = vsel %vm10224_vm4, %v1075_v59, %v10168_v38  ;;  %vm970_vm8 = vcmp.ne.s32.totalorder %v10212_v60, 0  ;;  %v14844_v18 = vmov 0.0|0.0   ;;  %vm10329_vm4 = vmand %vm1007_vm13, %vm971_vm11 }
  0x58   : > { %14899 = vst [vmem:[#allocation20_spill] sm:$0xff] %v10171_v39  ;;  %v10193_v50 = vmul.u32.u64.low 3817748708, %v10171_v39  ;;  %v10194_v51 = vmul.u32.u64.high 3817748708, %v10171_v39, %v10193_v50  ;;  %vm10214_vm2 = vcmp.lt.s32.totalorder %v1109_v40, 16  ;;  %9006 = vmatprep.subr.bf16.mxu1 %v14844_v18  ;;  %vm10283_vm12 = vmand %vm1006_vm9, %vm970_vm8  ;;  %v663_v29 = vmul.u32 18, %v662_v10 }
  0x59   : > { %9008 = vmatpush1.bf16.msra.mxu1 %v9007_v22  ;;  %vm10303_vm14 = vcmp.lt.s32.totalorder %v1111_v15, 16  ;;  %v1114_v46 = vsel %vm10283_vm12, %v1078_v24, %v10212_v60  ;;  %v10325_v48 = vsel %vm10214_vm2, 1.0, %v9832_v6  ;;  %v1115_v2 = vsel %vm10329_vm4, %v1079_v45, %v10242_v8  ;;  %v3424_v8 = vld [vmem:[%s14829_s3 + $0x30] sm:$0xff] }
  0x5a   : > { %8754 = vmatmul.mubr.msk.f32.gmra.mrb[32].mxu0 %vm1547_vm1, %v1532_v41  ;;  %v630_v41 = vmul.u32 18, %v629_v30  ;;  %v673_v21 = vshrl.u32 %v10194_v51, 4  ;;  %v10288_v30 = vmul.u32.u64.low 3817748708, %v10246_v11  ;;  %v10289_v31 = vmul.u32.u64.high 3817748708, %v10246_v11, %v10288_v30  ;;  %9009 = vmatprep.subr.bf16.mxu1 %v14844_v18  ;;  %v3422_v51 = vld [vmem:[%s14829_s3 + $0x20] sm:$0xff] }
  0x5b   : > { %8756 = vmatprep.mubr.msk.f32.mxu0 %vm1547_vm1, %v1533_v42  ;;  %v10176_v42 = vadd.s32 80, %v10089_v57  ;;  %v10334_v50 = vsub.s32 %v10157_v33, %v663_v29  ;;  %v717_v15 = vshrl.u32 %v10300_v36, 4  ;;  %v10409_v22 = vadd.s32 136, %v10089_v57  ;;  %v2086_v33 = vld [vmem:[#allocation2 + $0x9] sm:$0xff] }
  0x5c   : > { %v10198_v52 = vsub.s32 %v10122_v9, %v630_v41  ;;  %v706_v10 = vshrl.u32 %v10289_v31, 4  ;;  %v10413_v24 = vmul.u32.u64.low 3817748708, %v10382_v5  ;;  %v10414_v25 = vmul.u32.u64.high 3817748708, %v10382_v5, %v10413_v24  ;;  %v3426_v31 = vld [vmem:[%s14829_s3 + $0x40] sm:$0xff] }
  0x5d   : > { %v10201_v53 = vmul.u32.u64.low 3817748708, %v10176_v42  ;;  %v10202_v54 = vmul.u32.u64.high 3817748708, %v10176_v42, %v10201_v53  ;;  %v1080_v14 = vadd.s32 18, %v10334_v50  ;;  %v10429_v30 = vadd.s32 144, %v10089_v57 }
  0x5e   : > { %8757 = vmatmul.mubr.msk.f32.gmra.mrb[34].mxu0 %vm1547_vm1, %v1534_v43  ;;  %v10179_v43 = vsub.s32 %v10109_v1, %v619_v32  ;;  %vm969_vm5 = vcmp.ne.s32.totalorder %v10198_v52, 0  ;;  %vm1005_vm6 = vcmp.lt.s32.totalorder %v10198_v52, 0  ;;  %v1077_v19 = vadd.s32 18, %v10198_v52  ;;  %v3420_v32 = vld [vmem:[%s14829_s3 + $0x10] sm:$0xff] }
  0x5f   : > { %vm10272_vm10 = vmand %vm1005_vm6, %vm969_vm5  ;;  %v684_v27 = vshrl.u32 %v10202_v54, 4  ;;  %v9010_v37 = vpack.c.bf16 %v3421_v34, %v3420_v32  ;;  %v10345_v53 = vsel %vm10218_vm3, 1.0, %v9832_v6  ;;  %v10350_v54 = vsel %vm10303_vm14, 1.0, %v9832_v6  ;;  %v3427_v32 = vld [vmem:[%s14829_s3 + $0x48] sm:$0xff] }
  0x60   : > { %vm968_vm15 = vcmp.ne.s32.totalorder %v10179_v43, 0  ;;  %vm1004_vm1 = vcmp.lt.s32.totalorder %v10179_v43, 0  ;;  %v1076_v3 = vadd.s32 18, %v10179_v43  ;;  %v1113_v44 = vsel %vm10272_vm10, %v1077_v19, %v10198_v52  ;;  %v3423_v52 = vld [vmem:[%s14829_s3 + $0x28] sm:$0xff] }
  0x61   : > { %vm10234_vm7 = vmand %vm1004_vm1, %vm968_vm15  ;;  %vm10307_vm15 = vcmp.lt.s32.totalorder %v1110_v4, 16  ;;  %v685_v47 = vmul.u32 18, %v684_v27  ;;  %9011 = vmatpush1.bf16.msra.mxu1 %v9010_v37  ;;  %vm10363_vm2 = vcmp.lt.s32.totalorder %v1113_v44, 16  ;;  %vm10367_vm3 = vcmp.lt.s32.totalorder %v1114_v46, 16 }
  0x62   : > { %v1112_v20 = vsel %vm10234_vm7, %v1076_v3, %v10179_v43  ;;  %v674_v43 = vmul.u32 18, %v673_v21  ;;  %v10355_v55 = vsel %vm10307_vm15, 1.0, %v9832_v6  ;;  %9012 = vmatprep.subr.bf16.mxu1 %v14844_v18  ;;  %v9013_v62 = vpack.c.bf16 %v3423_v52, %v3422_v51 }
  0x63   : > { %vm10311_vm1 = vcmp.lt.s32.totalorder %v1112_v20, 16  ;;  %v695_v3 = vshrl.u32 %v10279_v26, 4  ;;  %v10379_v4 = vsub.s32 %v10176_v42, %v685_v47  ;;  %vm972_vm5 = vcmp.ne.s32.totalorder %v10334_v50, 0  ;;  %v3425_v42 = vld [vmem:[%s14829_s3 + $0x38] sm:$0xff]  ;;  %v3432_v47 = vld [vmem:[%s14829_s3 + $0x70] sm:$0xff] }
  0x64   : > { %v10360_v56 = vsel %vm10311_vm1, 1.0, %v9832_v6  ;;  %v10372_v61 = vsub.s32 %v10171_v39, %v674_v43  ;;  %vm1008_vm6 = vcmp.lt.s32.totalorder %v10334_v50, 0  ;;  %v10399_v19 = vadd.s32 128, %v10089_v57 }
  0x65   : > { %9014 = vmatpush1.bf16.msra.mxu1 %v9013_v62  ;;  %v9016_v20 = vpack.c.bf16 %v3425_v42, %v3424_v8  ;;  %vm10402_vm7 = vcmp.lt.s32.totalorder %v1115_v2, 16  ;;  %v696_v23 = vmul.u32 18, %v695_v3  ;;  %vm974_vm10 = vcmp.ne.s32.totalorder %v10379_v4, 0  ;;  %vm10420_vm11 = vmand %vm1008_vm6, %vm972_vm5 }
  0x66   : > { %9015 = vmatprep.subr.bf16.mxu1 %v14844_v18  ;;  %vm973_vm8 = vcmp.ne.s32.totalorder %v10372_v61, 0  ;;  %vm1009_vm9 = vcmp.lt.s32.totalorder %v10372_v61, 0  ;;  %v707_v27 = vmul.u32 18, %v706_v10  ;;  %vm1010_vm12 = vcmp.lt.s32.totalorder %v10379_v4, 0 }
  0x67   : > { %v10425_v28 = vmul.u32.u64.low 3817748708, %v10388_v12  ;;  %v10426_v29 = vmul.u32.u64.high 3817748708, %v10388_v12, %v10425_v28  ;;  %v718_v34 = vmul.u32 18, %v717_v15  ;;  %v10448_v40 = vadd.s32 152, %v10089_v57  ;;  %vm10466_vm13 = vmand %vm1009_vm9, %vm973_vm8 }
  0x68   : > { %v10439_v35 = vmul.u32.u64.low 3817748708, %v10399_v19  ;;  %v10440_v36 = vmul.u32.u64.high 3817748708, %v10399_v19, %v10439_v35  ;;  %v10444_v37 = vmul.u32.u64.low 3817748708, %v10409_v22  ;;  %v10445_v38 = vmul.u32.u64.high 3817748708, %v10409_v22, %v10444_v37  ;;  %vm10498_vm14 = vmand %vm1010_vm12, %vm974_vm10 }
  0x69   : > { %9017 = vmatpush1.bf16.msra.mxu1 %v9016_v20  ;;  %v9019_v41 = vpack.c.bf16 %v3427_v32, %v3426_v31  ;;  %v10453_v43 = vsel %vm10363_vm2, 1.0, %v9832_v6  ;;  %v1081_v44 = vadd.s32 18, %v10372_v61  ;;  %v1116_v45 = vsel %vm10420_vm11, %v1080_v14, %v10334_v50  ;;  %v3429_v50 = vld [vmem:[%s14829_s3 + $0x58] sm:$0xff] }
  0x6a   : > { %9018 = vmatprep.subr.bf16.mxu1 %v14844_v18  ;;  %v10460_v46 = vsub.s32 %v10239_v7, %v696_v23  ;;  %v1082_v49 = vadd.s32 18, %v10379_v4  ;;  %v10472_v51 = vsub.s32 %v10246_v11, %v707_v27  ;;  %v3428_v7 = vld [vmem:[%s14829_s3 + $0x50] sm:$0xff]  ;;  %v10487_v62 = vsel %vm10402_vm7, 1.0, %v9832_v6  ;;  %v3431_v23 = vld [vmem:[%s14829_s3 + $0x68] sm:$0xff]  ;;  %v3445_v31 = vld [vmem:[%s14829_s3 + $0xd8] sm:$0xff] }
  0x6b   : > { %v10475_v52 = vmul.u32.u64.low 3817748708, %v10429_v30  ;;  %v10476_v59 = vmul.u32.u64.high 3817748708, %v10429_v30, %v10475_v52  ;;  %v10492_v11 = vsel %vm10367_vm3, 1.0, %v9832_v6  ;;  %v10503_v3 = vsub.s32 %v10260_v16, %v718_v34  ;;  %v3437_v34 = vld [vmem:[%s14829_s3 + $0x98] sm:$0xff] }
  0x6c   : > { %v9022_v10 = vpack.c.bf16 %v3429_v50, %v3428_v7  ;;  %vm10506_vm15 = vcmp.lt.s32.totalorder %v1116_v45, 16  ;;  %v10511_v60 = vmul.u32.u64.low 3817748708, %v10448_v40  ;;  %v10512_v42 = vmul.u32.u64.high 3817748708, %v10448_v40, %v10511_v60 }
  0x6d   : > { %9020 = vmatpush1.bf16.msra.mxu1 %v9019_v41  ;;  %v10515_v14 = vadd.s32 160, %v10089_v57  ;;  %v1117_v15 = vsel %vm10466_vm13, %v1081_v44, %v10372_v61  ;;  %vm975_vm1 = vcmp.ne.s32.totalorder %v10460_v46, 0  ;;  %vm1011_vm4 = vcmp.lt.s32.totalorder %v10460_v46, 0  ;;  %v3430_v61 = vld [vmem:[%s14829_s3 + $0x60] sm:$0xff] }
  0x6e   : > { %9021 = vmatprep.subr.bf16.mxu1 %v14844_v18  ;;  %v728_v16 = vshrl.u32 %v10414_v25, 4  ;;  %v1118_v20 = vsel %vm10498_vm14, %v1082_v49, %v10379_v4  ;;  %vm976_vm2 = vcmp.ne.s32.totalorder %v10472_v51, 0  ;;  %vm1012_vm3 = vcmp.lt.s32.totalorder %v10472_v51, 0  ;;  %vm10544_vm7 = vmand %vm1011_vm4, %vm975_vm1  ;;  %v3433_v49 = vld [vmem:[%s14829_s3 + $0x78] sm:$0xff] }
  0x6f   : > { %v739_v21 = vshrl.u32 %v10426_v29, 4  ;;  %v1083_v24 = vadd.s32 18, %v10460_v46  ;;  %vm977_vm5 = vcmp.ne.s32.totalorder %v10503_v3, 0  ;;  %vm1013_vm6 = vcmp.lt.s32.totalorder %v10503_v3, 0  ;;  %vm10562_vm9 = vmand %vm1012_vm3, %vm976_vm2 }
  0x70   : > { %v750_v4 = vshrl.u32 %v10440_v36, 4  ;;  %v761_v26 = vshrl.u32 %v10445_v38, 4  ;;  %v10550_v27 = vmul.u32.u64.low 3817748708, %v10515_v14  ;;  %v10551_v28 = vmul.u32.u64.high 3817748708, %v10515_v14, %v10550_v27  ;;  %vm10573_vm11 = vmand %vm1013_vm6, %vm977_vm5 }
  0x71   : > { %9023 = vmatpush1.bf16.msra.mxu1 %v9022_v10  ;;  %v9025_v29 = vpack.c.bf16 %v3431_v23, %v3430_v61  ;;  %vm10553_vm8 = vcmp.lt.s32.totalorder %v1117_v15, 16  ;;  %v1085_v32 = vadd.s32 18, %v10503_v3  ;;  %v1084_v35 = vadd.s32 18, %v10472_v51 }
  0x72   : > { %9024 = vmatprep.subr.bf16.mxu1 %v14844_v18  ;;  %v729_v36 = vmul.u32 18, %v728_v16  ;;  %vm10567_vm10 = vcmp.lt.s32.totalorder %v1118_v20, 16  ;;  %v740_v41 = vmul.u32 18, %v739_v21  ;;  %v772_v44 = vshrl.u32 %v10476_v59, 4 }
  0x73   : > { %v10579_v45 = vadd.s32 168, %v10089_v57  ;;  %v10590_v52 = vsel %vm10506_vm15, 1.0, %v9832_v6  ;;  %v751_v7 = vmul.u32 18, %v750_v4  ;;  %v10593_v59 = vadd.s32 176, %v10089_v57 }
  0x74   : > { %v9028_v50 = vpack.c.bf16 %v3433_v49, %v3432_v47  ;;  %v10599_v2 = vsel %vm10553_vm8, 1.0, %v9832_v6  ;;  %v1119_v10 = vsel %vm10544_vm7, %v1083_v24, %v10460_v46  ;;  %v762_v60 = vmul.u32 18, %v761_v26 }
  0x75   : > { %9026 = vmatpush1.bf16.msra.mxu1 %v9025_v29  ;;  %v783_v8 = vshrl.u32 %v10512_v42, 4  ;;  %v10608_v15 = vsel %vm10567_vm10, 1.0, %v9832_v6  ;;  %v1121_v16 = vsel %vm10573_vm11, %v1085_v32, %v10503_v3  ;;  %v1120_v20 = vsel %vm10562_vm9, %v1084_v35, %v10472_v51  ;;  %v3434_v3 = vld [vmem:[%s14829_s3 + $0x80] sm:$0xff]  ;;  %v3435_v51 = vld [vmem:[%s14829_s3 + $0x88] sm:$0xff]  ;;  %v3436_v32 = vld [vmem:[%s14829_s3 + $0x90] sm:$0xff] }
  0x76   : > { %9027 = vmatprep.subr.bf16.mxu1 %v14844_v18  ;;  %v10617_v21 = vsub.s32 %v10382_v5, %v729_v36  ;;  %v10620_v46 = vsub.s32 %v10388_v12, %v740_v41  ;;  %v773_v42 = vmul.u32 18, %v772_v44  ;;  %vm10632_vm12 = vcmp.lt.s32.totalorder %v1119_v10, 16 }
  0x77   : > { %v10623_v61 = vmul.u32.u64.low 3817748708, %v10579_v45  ;;  %v10624_v23 = vmul.u32.u64.high 3817748708, %v10579_v45, %v10623_v61  ;;  %v10637_v12 = vsub.s32 %v10399_v19, %v751_v7  ;;  %v10645_v25 = vsub.s32 %v10409_v22, %v762_v60 }
  0x78   : > { %v10640_v24 = vmul.u32.u64.low 3817748708, %v10593_v59  ;;  %v10641_v4 = vmul.u32.u64.high 3817748708, %v10593_v59, %v10640_v24  ;;  %v784_v26 = vmul.u32 18, %v783_v8  ;;  %v794_v27 = vshrl.u32 %v10551_v28, 4  ;;  %v3438_v8 = vld [vmem:[%s14829_s3 + $0xa0] sm:$0xff] }
  0x79   : > { %9029 = vmatpush1.bf16.msra.mxu1 %v9028_v50  ;;  %v9031_v29 = vpack.c.bf16 %v3435_v51, %v3434_v3  ;;  %vm10648_vm13 = vcmp.lt.s32.totalorder %v1121_v16, 16  ;;  %vm10652_vm14 = vcmp.lt.s32.totalorder %v1120_v20, 16  ;;  %vm978_vm15 = vcmp.ne.s32.totalorder %v10617_v21, 0  ;;  %v3439_v16 = vld [vmem:[%s14829_s3 + $0xa8] sm:$0xff] }
  0x7a   : > { %9030 = vmatprep.subr.bf16.mxu1 %v14844_v18  ;;  %vm1014_vm1 = vcmp.lt.s32.totalorder %v10617_v21, 0  ;;  %vm979_vm4 = vcmp.ne.s32.totalorder %v10620_v46, 0  ;;  %vm1015_vm2 = vcmp.lt.s32.totalorder %v10620_v46, 0  ;;  %v10661_v22 = vsub.s32 %v10429_v30, %v773_v42 }
  0x7b   : > { %v10664_v28 = vadd.s32 184, %v10089_v57  ;;  %vm980_vm3 = vcmp.ne.s32.totalorder %v10637_v12, 0  ;;  %vm1016_vm5 = vcmp.lt.s32.totalorder %v10637_v12, 0  ;;  %v10675_v35 = vadd.s32 192, %v10089_v57  ;;  %vm10682_vm6 = vmand %vm1014_vm1, %vm978_vm15 }
  0x7c   : > { %v9034_v30 = vpack.c.bf16 %v3437_v34, %v3436_v32  ;;  %vm981_vm7 = vcmp.ne.s32.totalorder %v10645_v25, 0  ;;  %vm1017_vm8 = vcmp.lt.s32.totalorder %v10645_v25, 0  ;;  %v10689_v37 = vsub.s32 %v10448_v40, %v784_v26  ;;  %vm10695_vm9 = vmand %vm1015_vm2, %vm979_vm4 }
  0x7d   : > { %9032 = vmatpush1.bf16.msra.mxu1 %v9031_v29  ;;  %v795_v38 = vmul.u32 18, %v794_v27  ;;  %v1087_v44 = vadd.s32 18, %v10620_v46  ;;  %v1086_v47 = vadd.s32 18, %v10617_v21  ;;  %v1089_v49 = vadd.s32 18, %v10645_v25  ;;  %vm10707_vm10 = vmand %vm1016_vm5, %vm980_vm3 }
  0x7e   : > { %9033 = vmatprep.subr.bf16.mxu1 %v14844_v18  ;;  %v1088_v7 = vadd.s32 18, %v10637_v12  ;;  %vm982_vm11 = vcmp.ne.s32.totalorder %v10661_v22, 0  ;;  %v805_v50 = vshrl.u32 %v10624_v23, 4  ;;  %vm10727_vm15 = vmand %vm1017_vm8, %vm981_vm7  ;;  %vm1018_vm1 = vcmp.lt.s32.totalorder %v10661_v22, 0 }
  0x7f   : > { %v10714_v10 = vmul.u32.u64.low 3817748708, %v10664_v28  ;;  %v10715_v60 = vmul.u32.u64.high 3817748708, %v10664_v28, %v10714_v10  ;;  %v816_v42 = vshrl.u32 %v10641_v4, 4  ;;  %vm983_vm4 = vcmp.ne.s32.totalorder %v10689_v37, 0 }
  0x80   : > { %v10734_v61 = vmul.u32.u64.low 3817748708, %v10675_v35  ;;  %v10735_v23 = vmul.u32.u64.high 3817748708, %v10675_v35, %v10734_v61  ;;  %vm1019_vm2 = vcmp.lt.s32.totalorder %v10689_v37, 0  ;;  %v10741_v3 = vsub.s32 %v10515_v14, %v795_v38 }
  0x81   : > { %9035 = vmatpush1.bf16.msra.mxu1 %v9034_v30  ;;  %v9037_v51 = vpack.c.bf16 %v3439_v16, %v3438_v8  ;;  %v10746_v24 = vsel %vm10632_vm12, 1.0, %v9832_v6  ;;  %v1123_v4 = vsel %vm10695_vm9, %v1087_v44, %v10620_v46  ;;  %v1122_v26 = vsel %vm10682_vm6, %v1086_v47, %v10617_v21  ;;  %vm10766_vm12 = vmand %vm1018_vm1, %vm982_vm11  ;;  %v10847_v16 = vld [vmem:[%s14828_s2] ss:$0 sm:$0xff] }
  0x82   : > { %9036 = vmatprep.subr.bf16.mxu1 %v14844_v18  ;;  %v1090_v27 = vadd.s32 18, %v10661_v22  ;;  %v1125_v14 = vsel %vm10727_vm15, %v1089_v49, %v10645_v25  ;;  %v1124_v5 = vsel %vm10707_vm10, %v1088_v7, %v10637_v12  ;;  %v1091_v29 = vadd.s32 18, %v10689_v37  ;;  %v3440_v25 = vld [vmem:[%s14829_s3 + $0xb0] sm:$0xff]  ;;  %v3441_v12 = vld [vmem:[%s14829_s3 + $0xb8] sm:$0xff]  ;;  %vm10790_vm3 = vmand %vm1019_vm2, %vm983_vm4 }
  0x83   : > { %v806_v21 = vmul.u32 18, %v805_v50  ;;  %v10779_v32 = vsel %vm10648_vm13, 1.0, %v9832_v6  ;;  %v10784_v34 = vsel %vm10652_vm14, 1.0, %v9832_v6  ;;  %v817_v36 = vmul.u32 18, %v816_v42  ;;  %v3443_v50 = vld [vmem:[%s14829_s3 + $0xc8] sm:$0xff] }
  0x84   : > { %v9040_v38 = vpack.c.bf16 %v3441_v12, %v3440_v25  ;;  %vm1159_vm5 = vcmp.lt.s32.totalorder %v1123_v4, 16  ;;  %vm1158_vm13 = vcmp.lt.s32.totalorder %v1122_v26, 16  ;;  %vm984_vm6 = vcmp.ne.s32.totalorder %v10741_v3, 0 }
  0x85   : > { %9038 = vmatpush1.bf16.msra.mxu1 %v9037_v51  ;;  %vm1020_vm7 = vcmp.lt.s32.totalorder %v10741_v3, 0  ;;  %vm10797_vm14 = vcmp.lt.s32.totalorder %v1125_v14, 16  ;;  %vm10801_vm8 = vcmp.lt.s32.totalorder %v1124_v5, 16  ;;  %v1126_v41 = vsel %vm10766_vm12, %v1090_v27, %v10661_v22  ;;  %v3442_v22 = vld [vmem:[%s14829_s3 + $0xc0] sm:$0xff] }
  0x86   : > { %9039 = vmatprep.subr.bf16.mxu1 %v14844_v18  ;;  %v10809_v44 = vadd.s32 200, %v10089_v57  ;;  %v1127_v47 = vsel %vm10790_vm3, %v1091_v29, %v10689_v37  ;;  %v10815_v49 = vsub.s32 %v10579_v45, %v806_v21  ;;  %v10818_v7 = vadd.s32 18, %v10741_v3  ;;  %vm10835_vm9 = vmand %vm1020_vm7, %vm984_vm6  ;;  %v2303_v29 = vld [vmem:[#allocation2 + $0xa] sm:$0xff] }
  0x87   : > { %v827_v40 = vshrl.u32 %v10715_v60, 4  ;;  %v10828_v10 = vsel %vm1159_vm5, 1.0, %v9832_v6  ;;  %v10831_v45 = vsel %vm1158_vm13, 1.0, %v9832_v6  ;;  %v10840_v60 = vsub.s32 %v10593_v59, %v817_v36  ;;  %2339 = vst.msk [vmem:[#allocation10 + $0x50] sm:$0xff] %vm495_vm0, %v2303_v29  ;;  %v2302_v36 = vld [vmem:[#allocation2 + $0x2] sm:$0xff] }
  0x88   : > { %14968 = vst [vmem:[#allocation21_spill] sm:$0xff] %v10828_v10  ;;  %v838_v8 = vshrl.u32 %v10735_v23, 4  ;;  %v10852_v20 = vsel %vm10797_vm14, 1.0, %v9832_v6  ;;  %v10857_v42 = vsel %vm10801_vm8, 1.0, %v9832_v6  ;;  %v10860_v59 = vadd.s32 216, %v10089_v57  ;;  %2338 = vst.msk [vmem:[#allocation10 + $0x8] sm:$0xff] %vm495_vm0, %v2302_v36 }
  0x89   : > { %9041 = vmatpush1.bf16.msra.mxu1 %v9040_v38  ;;  %14971 = vst [vmem:[#allocation22_spill] sm:$0xff] %v10852_v20  ;;  %14972 = vst [vmem:[#allocation23_spill] sm:$0xff] %v10857_v42  ;;  %v9043_v61 = vpack.c.bf16 %v3443_v50, %v3442_v22  ;;  %vm10862_vm10 = vcmp.lt.s32.totalorder %v1127_v47, 16  ;;  %vm10866_vm11 = vcmp.lt.s32.totalorder %v1126_v41, 16  ;;  %vm985_vm15 = vcmp.ne.s32.totalorder %v10815_v49, 0  ;;  %v3444_v38 = vld [vmem:[%s14829_s3 + $0xd0] sm:$0xff] }
  0x8a   : > { %9042 = vmatprep.subr.bf16.mxu1 %v14844_v18  ;;  %v10871_v4 = vmul.u32.u64.low 3817748708, %v10809_v44  ;;  %v10872_v26 = vmul.u32.u64.high 3817748708, %v10809_v44, %v10871_v4  ;;  %v1128_v6 = vsel %vm10835_vm9, %v10818_v7, %v10741_v3  ;;  %v828_v14 = vmul.u32 18, %v827_v40 }
  0x8b   : > { %v10880_v5 = vadd.s32 208, %v10089_v57  ;;  %vm1021_vm1 = vcmp.lt.s32.totalorder %v10815_v49, 0  ;;  %vm986_vm4 = vcmp.ne.s32.totalorder %v10840_v60, 0  ;;  %v839_v25 = vmul.u32 18, %v838_v8  ;;  %v2014_v4 = vld [vmem:[#allocation2 + $0x8] sm:$0xff] }
  0x8c   : > { %vm1022_vm2 = vcmp.lt.s32.totalorder %v10840_v60, 0  ;;  %v10890_v12 = vmul.u32.u64.low 3817748708, %v10860_v59  ;;  %v10891_v30 = vmul.u32.u64.high 3817748708, %v10860_v59, %v10890_v12  ;;  %v10900_v41 = vadd.s32 18, %v10815_v49  ;;  %vm10910_vm12 = vmand %vm1021_vm1, %vm985_vm15  ;;  %2050 = vst.msk [vmem:[#allocation10 + $0x48] sm:$0xff] %vm495_vm0, %v2014_v4 }
  0x8d   : > { %9044 = vmatpush1.bf16.msra.mxu1 %v9043_v61  ;;  %v10903_v47 = vadd.s32 18, %v10840_v60  ;;  %v9046_v7 = vpack.c.bf16 %v3445_v31, %v3444_v38  ;;  %v10915_v37 = vsub.s32 %v10664_v28, %v828_v14  ;;  %vm10934_vm3 = vmand %vm1022_vm2, %vm986_vm4  ;;  %v10939_v14 = vsub.s32 %v10675_v35, %v839_v25  ;;  %v2013_v35 = vld [vmem:[#allocation2] sm:$0xff]  ;;  %v3447_v31 = vld [vmem:[%s14829_s3 + $0xe8] sm:$0xff] }
  0x8e   : > { %9045 = vmatprep.subr.bf16.mxu1 %v14844_v18  ;;  %v10918_v8 = vmul.u32.u64.low 3817748708, %v10880_v5  ;;  %v10919_v61 = vmul.u32.u64.high 3817748708, %v10880_v5, %v10918_v8  ;;  %vm10949_vm5 = vcmp.lt.s32.totalorder %v1128_v6, 16  ;;  %v3446_v25 = vld [vmem:[%s14829_s3 + $0xe0] sm:$0xff]  ;;  %v1129_v6 = vsel %vm10910_vm12, %v10900_v41, %v10815_v49  ;;  %2049 = vst.msk [vmem:[#allocation10] sm:$0xff] %vm495_vm0, %v2013_v35 }
  0x8f   : > { %vm987_vm13 = vcmp.ne.s32.totalorder %v10915_v37, 0  ;;  %vm1023_vm6 = vcmp.lt.s32.totalorder %v10915_v37, 0  ;;  %v1130_v8 = vsel %vm10934_vm3, %v10903_v47, %v10840_v60  ;;  %vm988_vm7 = vcmp.ne.s32.totalorder %v10939_v14, 0  ;;  %v3448_v60 = vld [vmem:[%s14829_s3 + $0xf0] sm:$0xff]  ;;  %v3449_v47 = vld [vmem:[%s14829_s3 + $0xf8] sm:$0xff] }
  0x90   : > { %v10978_v50 = vadd.s32 224, %v10089_v57  ;;  %vm1024_vm14 = vcmp.lt.s32.totalorder %v10939_v14, 0  ;;  %v1095_v28 = vadd.s32 18, %v10915_v37  ;;  %vm10994_vm8 = vcmp.lt.s32.totalorder %v1129_v6, 16  ;;  %vm11002_vm9 = vmand %vm1023_vm6, %vm987_vm13 }
  0x91   : > { %9047 = vmatpush1.bf16.msra.mxu1 %v9046_v7  ;;  %v9049_v7 = vpack.c.bf16 %v3447_v31, %v3446_v25 }
  0x92   : > { %9048 = vmatprep.subr.bf16.mxu1 %v14844_v18 }
  0x95   : > { %9050 = vmatpush1.bf16.msra.mxu1 %v9049_v7 }
  0x96   : > { %9051 = vmatprep.subr.bf16.mxu1 %v14844_v18 }
  0xed   : > { %v8707_v27 = vpop.f32.mrb[0].mxu0 }
  0xee   : > { %v1732_v46 = vadd.f32 %v8707_v27, %v10847_v16  ;;  %v1726_v21 = vpop.f32.mrb[1].mxu0 }
  0xef   : > { %v1727_v3 = vadd.f32 %v10847_v16, %v1726_v21  ;;  %v10923_v21 = vld [vmem:[#allocation5] sm:$0xff] }
  0xf0   : > { %v1906_v19 = vmax.f32 %v1732_v46, 0.0  ;;  %v10947_v36 = vsel %vm10862_vm10, 1.0, %v10923_v21  ;;  %vm11014_vm10 = vmand %vm1024_vm14, %vm988_vm7 }
  0xf1   : > { %v1905_v40 = vmax.f32 %v1727_v3, 0.0  ;;  %v8710_v22 = vpop.f32.mrb[2].mxu0  ;;  %v10928_v3 = vsel %vm10866_vm11, 1.0, %v10923_v21  ;;  %14982 = vst [vmem:[#allocation25_spill] sm:$0xff] %v10947_v36  ;;  %vm11024_vm11 = vcmp.lt.s32.totalorder %v1130_v8, 16  ;;  %v1131_v8 = vsel %vm11002_vm9, %v1095_v28, %v10915_v37 }
  0xf2   : > { %v1942_v27 = vmul.f32 %v10325_v48, %v1906_v19  ;;  %v1742_v29 = vadd.f32 %v8710_v22, %v10847_v16  ;;  %v1736_v46 = vpop.f32.mrb[3].mxu0  ;;  %14979 = vst [vmem:[#allocation24_spill] sm:$0xff] %v10928_v3  ;;  %v849_v19 = vshrl.u32 %v10872_v26, 4  ;;  %v11054_v37 = vadd.s32 232, %v10089_v57 }
  0xf3   : > { %v1941_v12 = vmul.f32 %v10345_v53, %v1905_v40  ;;  %v1737_v51 = vadd.f32 %v10847_v16, %v1736_v46  ;;  %v11061_v25 = vsel %vm11024_vm11, 1.0, %v10923_v21  ;;  %vm11067_vm15 = vcmp.lt.s32.totalorder %v1131_v8, 16 }
  0xf4   : > { %1978 = vst.msk [vmem:[#allocation2 + $0x1b] sm:$0xff] %vm495_vm0, %v1942_v27  ;;  %v1908_v23 = vmax.f32 %v1742_v29, 0.0  ;;  %v871_v29 = vshrl.u32 %v10891_v30, 4  ;;  %14995 = vst [vmem:[#allocation28_spill] sm:$0xff] %v11061_v25 }
  0xf5   : > { %1977 = vst.msk [vmem:[#allocation2 + $0x13] sm:$0xff] %vm495_vm0, %v1941_v12  ;;  %v1907_v40 = vmax.f32 %v1737_v51, 0.0  ;;  %v8713_v22 = vpop.f32.mrb[4].mxu0  ;;  %v850_v12 = vmul.u32 18, %v849_v19  ;;  %v9052_v51 = vpack.c.bf16 %v3449_v47, %v3448_v60  ;;  %v860_v19 = vshrl.u32 %v10919_v61, 4 }
  0xf6   : > { %v1944_v49 = vmul.f32 %v10350_v54, %v1908_v23  ;;  %v1752_v26 = vadd.f32 %v8713_v22, %v10847_v16  ;;  %v1746_v41 = vpop.f32.mrb[5].mxu0  ;;  %v1096_v23 = vadd.s32 18, %v10939_v14 }
  0xf7   : > { %v1943_v4 = vmul.f32 %v10355_v55, %v1907_v40  ;;  %v1747_v27 = vadd.f32 %v10847_v16, %v1746_v41  ;;  %9053 = vmatpush1.bf16.msra.mxu1 %v9052_v51  ;;  %v11033_v51 = vsel %vm10949_vm5, 1.0, %v10923_v21 }
  0xf8   : > { %1980 = vst.msk [vmem:[#allocation2 + $0x2b] sm:$0xff] %vm495_vm0, %v1944_v49  ;;  %v1910_v46 = vmax.f32 %v1752_v26, 0.0  ;;  %v11019_v49 = vmul.u32.u64.low 3817748708, %v10978_v50  ;;  %v11020_v26 = vmul.u32.u64.high 3817748708, %v10978_v50, %v11019_v49  ;;  %9054 = vmatprep.subr.bf16.mxu1 %v14844_v18  ;;  %14993 = vst [vmem:[#allocation26_spill] sm:$0xff] %v11033_v51 }
  0xf9   : > { %1979 = vst.msk [vmem:[#allocation2 + $0x23] sm:$0xff] %vm495_vm0, %v1943_v4  ;;  %v1909_v30 = vmax.f32 %v1747_v27, 0.0  ;;  %v8716_v35 = vpop.f32.mrb[6].mxu0  ;;  %v872_v27 = vmul.u32 18, %v871_v29  ;;  %v11039_v29 = vsub.s32 %v10809_v44, %v850_v12  ;;  %v1132_v44 = vsel %vm11014_vm10, %v1096_v23, %v10939_v14 }
  0xfa   : > { %v1946_v7 = vmul.f32 %v10453_v43, %v1910_v46  ;;  %v1762_v40 = vadd.f32 %v8716_v35, %v10847_v16  ;;  %v1756_v6 = vpop.f32.mrb[7].mxu0  ;;  %vm11079_vm2 = vcmp.lt.s32.totalorder %v1132_v44, 16 }
  0xfb   : > { %v1945_v61 = vmul.f32 %v10360_v56, %v1909_v30  ;;  %v1757_v41 = vadd.f32 %v10847_v16, %v1756_v6  ;;  %v2591_v60 = vld [vmem:[#allocation2 + $0x1b] sm:$0xff]  ;;  %vm989_vm1 = vcmp.ne.s32.totalorder %v11039_v29, 0  ;;  %vm1025_vm4 = vcmp.lt.s32.totalorder %v11039_v29, 0 }
  0xfc   : > { %1982 = vst.msk [vmem:[#allocation2 + $0x3b] sm:$0xff] %vm495_vm0, %v1946_v7  ;;  %v2375_v47 = vld [vmem:[#allocation2 + $0x1a] sm:$0xff]  ;;  %v2374_v46 = vld [vmem:[#allocation2 + $0x12] sm:$0xff]  ;;  %v1912_v35 = vmax.f32 %v1762_v40, 0.0  ;;  %2627 = vst.msk [vmem:[#allocation10 + $0x58] sm:$0xff] %vm495_vm0, %v2591_v60  ;;  %v11048_v7 = vsel %vm10994_vm8, 1.0, %v10923_v21 }
  0xfd   : > { %1981 = vst.msk [vmem:[#allocation2 + $0x33] sm:$0xff] %vm495_vm0, %v1945_v61  ;;  %2448 = vrot.lane.b32.xlu1 %v2375_v47, %s9834_s25  ;;  %2446 = vrot.lane.b32.xlu0 %v2374_v46, %s9834_s25  ;;  %v1911_v30 = vmax.f32 %v1757_v41, 0.0  ;;  %v8719_v38 = vpop.f32.mrb[8].mxu0  ;;  %14994 = vst [vmem:[#allocation27_spill] sm:$0xff] %v11048_v7  ;;  %v2304_v28 = vld [vmem:[#allocation2 + $0x12] sm:$0xff]  ;;  %v2085_v40 = vld [vmem:[#allocation2 + $0x1] sm:$0xff]  ;;  %v11072_v47 = vsub.s32 %v10860_v59, %v872_v27 }
  0xfe   : > { %v2015_v12 = vld [vmem:[#allocation2 + $0x10] sm:$0xff]  ;;  %v1948_v31 = vmul.f32 %v10487_v62, %v1912_v35  ;;  %v1772_v6 = vadd.f32 %v8719_v38, %v10847_v16  ;;  %v1766_v49 = vpop.f32.mrb[9].mxu0  ;;  %v861_v61 = vmul.u32 18, %v860_v19  ;;  %2340 = vst.msk [vmem:[#allocation10 + $0x98] sm:$0xff] %vm495_vm0, %v2304_v28  ;;  %v2305_v14 = vld [vmem:[#allocation2 + $0x1a] sm:$0xff]  ;;  %v11093_v38 = vadd.s32 248, %v10089_v57  ;;  %vm11130_vm5 = vmand %vm1025_vm4, %vm989_vm1 }
  0xff   : > { %2051 = vst.msk [vmem:[#allocation10 + $0x90] sm:$0xff] %vm495_vm0, %v2015_v12  ;;  %v2016_v23 = vld [vmem:[#allocation2 + $0x18] sm:$0xff]  ;;  %v1947_v22 = vmul.f32 %v10492_v11, %v1911_v30  ;;  %v1767_v41 = vadd.f32 %v10847_v16, %v1766_v49  ;;  %2341 = vst.msk [vmem:[#allocation10 + $0xe0] sm:$0xff] %vm495_vm0, %v2305_v14  ;;  %v11089_v8 = vmul.u32.u64.low 3817748708, %v11054_v37  ;;  %v11090_v30 = vmul.u32.u64.high 3817748708, %v11054_v37, %v11089_v8 }
 0x100   : > { %2052 = vst.msk [vmem:[#allocation10 + $0xd8] sm:$0xff] %vm495_vm0, %v2016_v23  ;;  %v2590_v19 = vld [vmem:[#allocation2 + $0x13] sm:$0xff]  ;;  %1984 = vst.msk [vmem:[#allocation2 + $0x4b] sm:$0xff] %vm495_vm0, %v1948_v31  ;;  %v1914_v4 = vmax.f32 %v1772_v6, 0.0  ;;  %v3166_v46 = vld [vmem:[#allocation2 + $0x26] sm:$0xff]  ;;  %vm991_vm12 = vcmp.ne.s32.totalorder %v11072_v47, 0 }
 0x101   : > { %2626 = vst.msk [vmem:[#allocation10 + $0x10] sm:$0xff] %vm495_vm0, %v2590_v19  ;;  %1983 = vst.msk [vmem:[#allocation2 + $0x43] sm:$0xff] %vm495_vm0, %v1947_v22  ;;  %2159 = vrot.lane.b32.xlu1 %v2086_v33, %s9834_s25  ;;  %2157 = vrot.lane.b32.xlu0 %v2085_v40, %s9834_s25  ;;  %v1913_v59 = vmax.f32 %v1767_v41, 0.0  ;;  %v8722_v27 = vpop.f32.mrb[10].mxu0  ;;  %v2306_v44 = vld [vmem:[#allocation2 + $0x22] sm:$0xff]  ;;  %v11098_v33 = vsub.s32 %v10880_v5, %v861_v61  ;;  %v882_v40 = vshrl.u32 %v11020_v26, 4 }
 0x102   : > { %3202 = vst.msk [vmem:[#allocation10 + $0x20] sm:$0xff] %vm495_vm0, %v3166_v46  ;;  %v1950_v28 = vmul.f32 %v10599_v2, %v1914_v4  ;;  %v1782_v12 = vadd.f32 %v8722_v27, %v10847_v16  ;;  %v1776_v31 = vpop.f32.mrb[11].mxu0  ;;  %2342 = vst.msk [vmem:[#allocation10 + $0x128] sm:$0xff] %vm495_vm0, %v2306_v44  ;;  %v2017_v6 = vld [vmem:[#allocation2 + $0x20] sm:$0xff]  ;;  %v2307_v49 = vld [vmem:[#allocation2 + $0x2a] sm:$0xff]  ;;  %vm1027_vm3 = vcmp.lt.s32.totalorder %v11072_v47, 0 }
 0x103   : > { %v2018_v14 = vld [vmem:[#allocation2 + $0x28] sm:$0xff]  ;;  %v1949_v23 = vmul.f32 %v10590_v52, %v1913_v59  ;;  %v1777_v22 = vadd.f32 %v10847_v16, %v1776_v31  ;;  %2053 = vst.msk [vmem:[#allocation10 + $0x120] sm:$0xff] %vm495_vm0, %v2017_v6  ;;  %2343 = vst.msk [vmem:[#allocation10 + $0x170] sm:$0xff] %vm495_vm0, %v2307_v49  ;;  %v2087_v41 = vld [vmem:[#allocation2 + $0x11] sm:$0xff]  ;;  %v11115_v4 = vsel %vm11067_vm15, 1.0, %v10923_v21  ;;  %v11118_v46 = vadd.s32 18, %v11039_v29 }
 0x104   : > { %2054 = vst.msk [vmem:[#allocation10 + $0x168] sm:$0xff] %vm495_vm0, %v2018_v14  ;;  %v11109_v5 = vld [vmem:[#allocation2 + $0x24] sm:$0xff]  ;;  %v3167_v26 = vld [vmem:[#allocation2 + $0x2e] sm:$0xff]  ;;  %1986 = vst.msk [vmem:[#allocation2 + $0x5b] sm:$0xff] %vm495_vm0, %v1950_v28  ;;  %v1916_v19 = vmax.f32 %v1782_v12, 0.0  ;;  %v11139_v12 = vadd.s32 240, %v10089_v57 }
 0x105   : > { %v2376_v61 = vld [vmem:[#allocation2 + $0x22] sm:$0xff]  ;;  %15000 = vst [vmem:[#allocation29_spill] sm:$0xff] %v11115_v4  ;;  %2914 = vst.msk [vmem:[#allocation10 + $0x18] sm:$0xff] %vm495_vm0, %v11109_v5  ;;  %2161 = vrot.lane.b32.xlu1 %v2087_v41, %s9834_s25  ;;  %v1915_v59 = vmax.f32 %v1777_v22, 0.0  ;;  %v3168_v27 = vld [vmem:[#allocation2 + $0x36] sm:$0xff]  ;;  %v8725_v8 = vpop.f32.mrb[12].mxu0 }
 0x106   : > { %3203 = vst.msk [vmem:[#allocation10 + $0x68] sm:$0xff] %vm495_vm0, %v3167_v26  ;;  %2450 = vrot.lane.b32.xlu0 %v2376_v61, %s9834_s25  ;;  %1985 = vst.msk [vmem:[#allocation2 + $0x53] sm:$0xff] %vm495_vm0, %v1949_v23  ;;  %v11135_v44 = vmul.u32.u64.low 3817748708, %v11093_v38  ;;  %v11136_v28 = vmul.u32.u64.high 3817748708, %v11093_v38, %v11135_v44  ;;  %v2088_v31 = vld [vmem:[#allocation2 + $0x19] sm:$0xff]  ;;  %v1952_v6 = vmul.f32 %v10746_v24, %v1916_v19  ;;  %v1792_v49 = vadd.f32 %v8725_v8, %v10847_v16  ;;  %v1786_v14 = vpop.f32.mrb[13].mxu0 }
 0x107   : > { %3204 = vst.msk [vmem:[#allocation10 + $0xb0] sm:$0xff] %vm495_vm0, %v3168_v27  ;;  %v11147_v23 = vsel %vm11079_vm2, 1.0, %v10923_v21  ;;  %vm11153_vm13 = vmand %vm1027_vm3, %vm991_vm12  ;;  %v11158_v26 = vadd.s32 18, %v11072_v47  ;;  %v2308_v61 = vld [vmem:[#allocation2 + $0x32] sm:$0xff]  ;;  %v1951_v41 = vmul.f32 %v10608_v15, %v1915_v59  ;;  %v1787_v19 = vadd.f32 %v10847_v16, %v1786_v14  ;;  %v2309_v8 = vld [vmem:[#allocation2 + $0x3a] sm:$0xff] }
 0x108   : > { %15003 = vst [vmem:[#allocation30_spill] sm:$0xff] %v11147_v23  ;;  %vm990_vm6 = vcmp.ne.s32.totalorder %v11098_v33, 0  ;;  %v883_v35 = vmul.u32 18, %v882_v40  ;;  %2344 = vst.msk [vmem:[#allocation10 + $0x1b8] sm:$0xff] %vm495_vm0, %v2308_v61  ;;  %v2019_v27 = vld [vmem:[#allocation2 + $0x30] sm:$0xff]  ;;  %v2020_v44 = vld [vmem:[#allocation2 + $0x38] sm:$0xff]  ;;  %v1133_v59 = vsel %vm11130_vm5, %v11118_v46, %v11039_v29 }
 0x109   : > { %v2377_v18 = vld [vmem:[#allocation2 + $0x2a] sm:$0xff]  ;;  %v3242_v39 = vld [vmem:[#allocation10 + $0x20] sm:$0xff]  ;;  %1988 = vst.msk [vmem:[#allocation2 + $0x6b] sm:$0xff] %vm495_vm0, %v1952_v6  ;;  %v1918_v13 = vmax.f32 %v1792_v49, 0.0  ;;  %vm1026_vm7 = vcmp.lt.s32.totalorder %v11098_v33, 0  ;;  %v11171_v40 = vadd.s32 256, %v10089_v57  ;;  %2163 = vrot.lane.b32.xlu1 %v2088_v31, %s9834_s25 }
 0x10a   : > { %v3169_v17 = vld [vmem:[#allocation2 + $0x3e] sm:$0xff]  ;;  %2055 = vst.msk [vmem:[#allocation10 + $0x1b0] sm:$0xff] %vm495_vm0, %v2019_v27  ;;  %2345 = vst.msk [vmem:[#allocation10 + $0x200] sm:$0xff] %vm495_vm0, %v2309_v8  ;;  %2452 = vrot.lane.b32.xlu0 %v2377_v18, %s9834_s25  ;;  %v1917_v29 = vmax.f32 %v1787_v19, 0.0  ;;  %v3170_v46 = vld [vmem:[#allocation2 + $0x46] sm:$0xff]  ;;  %v8728_v60 = vpop.f32.mrb[14].mxu0  ;;  %8775 = vmatprep.mubr.msk.f32.mxu0 %vm495_vm0, %v3242_v39 }
 0x10b   : > { %2056 = vst.msk [vmem:[#allocation10 + $0x1f8] sm:$0xff] %vm495_vm0, %v2020_v44  ;;  %1987 = vst.msk [vmem:[#allocation2 + $0x63] sm:$0xff] %vm495_vm0, %v1951_v41  ;;  %v893_v6 = vshrl.u32 %v11090_v30, 4  ;;  %v11182_v49 = vmul.u32.u64.low 3817748708, %v11139_v12  ;;  %v11183_v14 = vmul.u32.u64.high 3817748708, %v11139_v12, %v11182_v49  ;;  %v1954_v61 = vmul.f32 %v10779_v32, %v1918_v13  ;;  %v1796_v31 = vpop.f32.mrb[15].mxu0 }
 0x10c   : > { %3205 = vst.msk [vmem:[#allocation10 + $0xf8] sm:$0xff] %vm495_vm0, %v3169_v17  ;;  %3206 = vst.msk [vmem:[#allocation10 + $0x140] sm:$0xff] %vm495_vm0, %v3170_v46  ;;  %v1802_v18 = vadd.f32 %v8728_v60, %v10847_v16  ;;  %v1135_v17 = vsel %vm11153_vm13, %v11158_v26, %v11072_v47  ;;  %v11194_v30 = vadd.s32 264, %v10089_v57  ;;  %v2310_v41 = vld [vmem:[#allocation2 + $0x42] sm:$0xff]  ;;  %v1953_v39 = vmul.f32 %v10784_v34, %v1917_v29  ;;  %v2311_v47 = vld [vmem:[#allocation2 + $0x4a] sm:$0xff] }
 0x10d   : > { %v2021_v19 = vld [vmem:[#allocation2 + $0x40] sm:$0xff]  ;;  %v1797_v13 = vadd.f32 %v10847_v16, %v1796_v31  ;;  %v11199_v8 = vadd.s32 18, %v11098_v33  ;;  %v11202_v44 = vsub.s32 %v10978_v50, %v883_v35  ;;  %2346 = vst.msk [vmem:[#allocation10 + $0x248] sm:$0xff] %vm495_vm0, %v2310_v41  ;;  %v2022_v22 = vld [vmem:[#allocation2 + $0x48] sm:$0xff]  ;;  %v2378_v26 = vld [vmem:[#allocation2 + $0x32] sm:$0xff]  ;;  %vm11217_vm14 = vcmp.lt.s32.totalorder %v1133_v59, 16 }
 0x10e   : > { %v2089_v27 = vld [vmem:[#allocation2 + $0x21] sm:$0xff]  ;;  %2057 = vst.msk [vmem:[#allocation10 + $0x240] sm:$0xff] %vm495_vm0, %v2021_v19  ;;  %1990 = vst.msk [vmem:[#allocation2 + $0x7b] sm:$0xff] %vm495_vm0, %v1954_v61  ;;  %v1920_v60 = vmax.f32 %v1802_v18, 0.0  ;;  %v3171_v29 = vld [vmem:[#allocation2 + $0x4e] sm:$0xff]  ;;  %2454 = vrot.lane.b32.xlu0 %v2378_v26, %s9834_s25  ;;  %v8731_v18 = vpop.f32.mrb[16].mxu0 }
 0x10f   : > { %v3247_v46 = vld [vmem:[#allocation10 + $0x68] sm:$0xff]  ;;  %v11208_v49 = vmul.u32.u64.low 3817748708, %v11171_v40  ;;  %v11209_v31 = vmul.u32.u64.high 3817748708, %v11171_v40, %v11208_v49  ;;  %2347 = vst.msk [vmem:[#allocation10 + $0x290] sm:$0xff] %vm495_vm0, %v2311_v47  ;;  %2058 = vst.msk [vmem:[#allocation10 + $0x288] sm:$0xff] %vm495_vm0, %v2022_v22  ;;  %2165 = vrot.lane.b32.xlu1 %v2089_v27, %s9834_s25  ;;  %v3252_v50 = vld [vmem:[#allocation10 + $0xb0] sm:$0xff] }
 0x110   : > { %1989 = vst.msk [vmem:[#allocation2 + $0x73] sm:$0xff] %vm495_vm0, %v1953_v39  ;;  %3207 = vst.msk [vmem:[#allocation10 + $0x188] sm:$0xff] %vm495_vm0, %v3171_v29  ;;  %v1919_v35 = vmax.f32 %v1797_v13, 0.0  ;;  %v3172_v61 = vld [vmem:[#allocation2 + $0x56] sm:$0xff]  ;;  %vm11221_vm8 = vcmp.lt.s32.totalorder %v1135_v17, 16  ;;  %v894_v47 = vmul.u32 18, %v893_v6  ;;  %8776 = vmatmul.mubr.msk.f32.vlgmr.msra.gmra.mrb[36].mxu0 %vm495_vm0, %v3247_v46  ;;  %v1956_v27 = vmul.f32 %v10828_v10, %v1920_v60 }
 0x111   : > { %v915_v22 = vshrl.u32 %v11136_v28, 4  ;;  %3208 = vst.msk [vmem:[#allocation10 + $0x1d0] sm:$0xff] %vm495_vm0, %v3172_v61  ;;  %v1812_v39 = vadd.f32 %v8731_v18, %v10847_v16  ;;  %v1806_v13 = vpop.f32.mrb[17].mxu0  ;;  %v11231_v59 = vmul.u32.u64.low 3817748708, %v11194_v30  ;;  %v11232_v26 = vmul.u32.u64.high 3817748708, %v11194_v30, %v11231_v59  ;;  %v2090_v17 = vld [vmem:[#allocation2 + $0x29] sm:$0xff]  ;;  %8778 = vmatprep.mubr.msk.f32.mxu0 %vm495_vm0, %v3252_v50  ;;  %vm11263_vm11 = vmand %vm1026_vm7, %vm990_vm6 }
 0x112   : > { %v1955_v6 = vmul.f32 %v10831_v45, %v1919_v35  ;;  %v1807_v28 = vadd.f32 %v10847_v16, %v1806_v13  ;;  %vm992_vm9 = vcmp.ne.s32.totalorder %v11202_v44, 0  ;;  %v11239_v46 = vadd.s32 280, %v10089_v57  ;;  %v2312_v60 = vld [vmem:[#allocation2 + $0x52] sm:$0xff]  ;;  %v2379_v29 = vld [vmem:[#allocation2 + $0x3a] sm:$0xff]  ;;  %1992 = vst.msk [vmem:[#allocation2 + $0x8b] sm:$0xff] %vm495_vm0, %v1956_v27  ;;  %v3174_v27 = vld [vmem:[#allocation2 + $0x66] sm:$0xff] }
 0x113   : > { %v3257_v49 = vld [vmem:[#allocation10 + $0xf8] sm:$0xff]  ;;  %v1922_v61 = vmax.f32 %v1812_v39, 0.0  ;;  %vm1028_vm10 = vcmp.lt.s32.totalorder %v11202_v44, 0  ;;  %v11244_v50 = vadd.s32 272, %v10089_v57  ;;  %2348 = vst.msk [vmem:[#allocation10 + $0x2d8] sm:$0xff] %vm495_vm0, %v2312_v60  ;;  %2456 = vrot.lane.b32.xlu0 %v2379_v29, %s9834_s25  ;;  %2167 = vrot.lane.b32.xlu1 %v2090_v17, %s9834_s25  ;;  %v3262_v35 = vld [vmem:[#allocation10 + $0x140] sm:$0xff] }
 0x114   : > { %v3173_v18 = vld [vmem:[#allocation2 + $0x5e] sm:$0xff]  ;;  %1991 = vst.msk [vmem:[#allocation2 + $0x83] sm:$0xff] %vm495_vm0, %v1955_v6  ;;  %v1921_v13 = vmax.f32 %v1807_v28, 0.0  ;;  %v8734_v39 = vpop.f32.mrb[18].mxu0  ;;  %v11252_v59 = vadd.s32 18, %v11202_v44  ;;  %v904_v1 = vshrl.u32 %v11183_v14, 4  ;;  %8779 = vmatmul.mubr.msk.f32.gmra.mrb[38].mxu0 %vm495_vm0, %v3257_v49  ;;  %v11268_v28 = vsub.s32 %v11054_v37, %v894_v47  ;;  %vm11300_vm15 = vmand %vm1028_vm10, %vm992_vm9 }
 0x115   : > { %3209 = vst.msk [vmem:[#allocation10 + $0x218] sm:$0xff] %vm495_vm0, %v3173_v18  ;;  %v1958_v60 = vmul.f32 %v10852_v20, %v1922_v61  ;;  %3210 = vst.msk [vmem:[#allocation10 + $0x260] sm:$0xff] %vm495_vm0, %v3174_v27  ;;  %v1822_v17 = vadd.f32 %v8734_v39, %v10847_v16  ;;  %v1816_v29 = vpop.f32.mrb[19].mxu0  ;;  %v916_v14 = vmul.u32 18, %v915_v22  ;;  %v2023_v49 = vld [vmem:[#allocation2 + $0x50] sm:$0xff]  ;;  %8781 = vmatprep.mubr.msk.f32.mxu0 %vm495_vm0, %v3262_v35  ;;  %v2313_v0 = vld [vmem:[#allocation2 + $0x5a] sm:$0xff] }
 0x116   : > { %v2091_v18 = vld [vmem:[#allocation2 + $0x31] sm:$0xff]  ;;  %v1957_v61 = vmul.f32 %v10857_v42, %v1921_v13  ;;  %v1817_v27 = vadd.f32 %v10847_v16, %v1816_v29  ;;  %v11274_v39 = vmul.u32.u64.low 3817748708, %v11239_v46  ;;  %v11275_v9 = vmul.u32.u64.high 3817748708, %v11239_v46, %v11274_v39  ;;  %2059 = vst.msk [vmem:[#allocation10 + $0x2d0] sm:$0xff] %vm495_vm0, %v2023_v49  ;;  %v2380_v37 = vld [vmem:[#allocation2 + $0x42] sm:$0xff]  ;;  %2349 = vst.msk [vmem:[#allocation10 + $0x320] sm:$0xff] %vm495_vm0, %v2313_v0 }
 0x117   : > { %v11278_v63 = vld [vmem:[#allocation2 + $0x2c] sm:$0xff]  ;;  %1994 = vst.msk [vmem:[#allocation2 + $0x9b] sm:$0xff] %vm495_vm0, %v1958_v60  ;;  %v1924_v22 = vmax.f32 %v1822_v17, 0.0  ;;  %v11282_v35 = vmul.u32.u64.low 3817748708, %v11244_v50  ;;  %v11283_v13 = vmul.u32.u64.high 3817748708, %v11244_v50, %v11282_v35  ;;  %2458 = vrot.lane.b32.xlu0 %v2380_v37, %s9834_s25  ;;  %2169 = vrot.lane.b32.xlu1 %v2091_v18, %s9834_s25  ;;  %v3176_v17 = vld [vmem:[#allocation2 + $0x76] sm:$0xff]  ;;  %v1134_v0 = vsel %vm11263_vm11, %v11199_v8, %v11098_v33 }
 0x118   : > { %v3267_v47 = vld [vmem:[#allocation10 + $0x188] sm:$0xff]  ;;  %2915 = vst.msk [vmem:[#allocation10 + $0x60] sm:$0xff] %vm495_vm0, %v11278_v63  ;;  %v3272_v29 = vld [vmem:[#allocation10 + $0x1d0] sm:$0xff]  ;;  %1993 = vst.msk [vmem:[#allocation2 + $0x93] sm:$0xff] %vm495_vm0, %v1957_v61  ;;  %v1923_v60 = vmax.f32 %v1817_v27, 0.0  ;;  %v8737_v49 = vpop.f32.mrb[20].mxu0  ;;  %v11310_v8 = vsub.s32 %v11093_v38, %v916_v14 }
 0x119   : > { %v3175_v57 = vld [vmem:[#allocation2 + $0x6e] sm:$0xff]  ;;  %v905_v18 = vmul.u32 18, %v904_v1  ;;  %v926_v61 = vshrl.u32 %v11209_v31, 4  ;;  %8782 = vmatmul.mubr.msk.f32.gmra.mrb[40].mxu0 %vm495_vm0, %v3267_v47  ;;  %3212 = vst.msk [vmem:[#allocation10 + $0x2f0] sm:$0xff] %vm495_vm0, %v3176_v17  ;;  %v1832_v6 = vadd.f32 %v8737_v49, %v10847_v16  ;;  %v1826_v33 = vpop.f32.mrb[21].mxu0  ;;  %v937_v27 = vshrl.u32 %v11232_v26, 4 }
 0x11a   : > { %3211 = vst.msk [vmem:[#allocation10 + $0x2a8] sm:$0xff] %vm495_vm0, %v3175_v57  ;;  %v1960_v57 = vmul.f32 %v10947_v36, %v1924_v22  ;;  %v2092_v37 = vld [vmem:[#allocation2 + $0x39] sm:$0xff]  ;;  %8784 = vmatprep.mubr.msk.f32.mxu0 %vm495_vm0, %v3272_v29  ;;  %v1959_v1 = vmul.f32 %v10928_v3, %v1923_v60  ;;  %v1827_v31 = vadd.f32 %v10847_v16, %v1826_v33  ;;  %vm993_vm1 = vcmp.ne.s32.totalorder %v11268_v28, 0  ;;  %v2381_v22 = vld [vmem:[#allocation2 + $0x4a] sm:$0xff]  ;;  %v8740_v49 = vpop.f32.mrb[22].mxu0 }
 0x11b   : > { %vm1029_vm4 = vcmp.lt.s32.totalorder %v11268_v28, 0  ;;  %v2024_v47 = vld [vmem:[#allocation2 + $0x58] sm:$0xff]  ;;  %v1926_v38 = vmax.f32 %v1832_v6, 0.0  ;;  %v11322_v26 = vsel %vm11217_vm14, 1.0, %v10923_v21  ;;  %v11327_v29 = vsel %vm11221_vm8, 1.0, %v10923_v21  ;;  %2460 = vrot.lane.b32.xlu0 %v2381_v22, %s9834_s25  ;;  %2171 = vrot.lane.b32.xlu1 %v2092_v37, %s9834_s25  ;;  %v3178_v19 = vld [vmem:[#allocation2 + $0x86] sm:$0xff] }
 0x11c   : > { %v3277_v35 = vld [vmem:[#allocation10 + $0x218] sm:$0xff]  ;;  %1996 = vst.msk [vmem:[#allocation2 + $0xab] sm:$0xff] %vm495_vm0, %v1960_v57  ;;  %15014 = vst [vmem:[#allocation31_spill] sm:$0xff] %v11322_v26  ;;  %v1136_v60 = vsel %vm11300_vm15, %v11252_v59, %v11202_v44  ;;  %v3282_v17 = vld [vmem:[#allocation10 + $0x260] sm:$0xff]  ;;  %v1925_v41 = vmax.f32 %v1827_v31, 0.0  ;;  %vm11338_vm2 = vcmp.lt.s32.totalorder %v1134_v0, 16  ;;  %v11346_v59 = vsub.s32 %v11139_v12, %v905_v18 }
 0x11d   : > { %v3177_v14 = vld [vmem:[#allocation2 + $0x7e] sm:$0xff]  ;;  %15015 = vst [vmem:[#allocation32_spill] sm:$0xff] %v11327_v29  ;;  %2060 = vst.msk [vmem:[#allocation10 + $0x318] sm:$0xff] %vm495_vm0, %v2024_v47  ;;  %v11343_v44 = vadd.s32 18, %v11268_v28  ;;  %v927_v39 = vmul.u32 18, %v926_v61  ;;  %8785 = vmatmul.mubr.msk.f32.gmra.mrb[42].mxu0 %vm495_vm0, %v3277_v35  ;;  %v4873_v6 = vld [vmem:[#allocation4 + $0x5e] sm:$0xff]  ;;  %v1962_v33 = vmul.f32 %v11048_v7, %v1926_v38  ;;  %v1842_v37 = vadd.f32 %v8740_v49, %v10847_v16 }
 0x11e   : > { %1995 = vst.msk [vmem:[#allocation2 + $0xa3] sm:$0xff] %vm495_vm0, %v1959_v1  ;;  %3213 = vst.msk [vmem:[#allocation10 + $0x338] sm:$0xff] %vm495_vm0, %v3177_v14  ;;  %v1836_v0 = vpop.f32.mrb[23].mxu0  ;;  %vm995_vm3 = vcmp.ne.s32.totalorder %v11310_v8, 0  ;;  %v938_v12 = vmul.u32 18, %v937_v27  ;;  %v11361_v18 = vld [vmem:[#allocation2 + $0x34] sm:$0xff]  ;;  %8787 = vmatprep.mubr.msk.f32.mxu0 %vm495_vm0, %v3282_v17  ;;  %v1961_v31 = vmul.f32 %v11033_v51, %v1925_v41 }
 0x11f   : > { %3214 = vst.msk [vmem:[#allocation10 + $0x380] sm:$0xff] %vm495_vm0, %v3178_v19  ;;  %vm11356_vm12 = vmand %vm1029_vm4, %vm993_vm1  ;;  %v2093_v61 = vld [vmem:[#allocation2 + $0x41] sm:$0xff]  ;;  %v1837_v47 = vadd.f32 %v10847_v16, %v1836_v0  ;;  %vm1031_vm5 = vcmp.lt.s32.totalorder %v11310_v8, 0  ;;  %v959_v22 = vshrl.u32 %v11275_v9, 4  ;;  %v2382_v14 = vld [vmem:[#allocation2 + $0x52] sm:$0xff]  ;;  %v1928_v19 = vmax.f32 %v1842_v37, 0.0 }
 0x120   : > { %v2314_v35 = vld [vmem:[#allocation2 + $0x62] sm:$0xff]  ;;  %2916 = vst.msk [vmem:[#allocation10 + $0xa8] sm:$0xff] %vm495_vm0, %v11361_v18  ;;  %1998 = vst.msk [vmem:[#allocation2 + $0xbb] sm:$0xff] %vm495_vm0, %v1962_v33  ;;  %v3179_v49 = vld [vmem:[#allocation2 + $0x8e] sm:$0xff]  ;;  %vm11371_vm13 = vcmp.lt.s32.totalorder %v1136_v60, 16  ;;  %v948_v41 = vshrl.u32 %v11283_v13, 4  ;;  %2462 = vrot.lane.b32.xlu0 %v2382_v14, %s9834_s25  ;;  %2173 = vrot.lane.b32.xlu1 %v2093_v61, %s9834_s25  ;;  %v1137_v13 = vsel %vm11356_vm12, %v11343_v44, %v11268_v28 }
 0x121   : > { %v2025_v38 = vld [vmem:[#allocation2 + $0x60] sm:$0xff]  ;;  %v3287_v27 = vld [vmem:[#allocation10 + $0x2a8] sm:$0xff]  ;;  %2350 = vst.msk [vmem:[#allocation10 + $0x368] sm:$0xff] %vm495_vm0, %v2314_v35  ;;  %v3292_v9 = vld [vmem:[#allocation10 + $0x2f0] sm:$0xff]  ;;  %v1927_v60 = vmax.f32 %v1837_v47, 0.0  ;;  %v8743_v37 = vpop.f32.mrb[24].mxu0  ;;  %v11391_v61 = vsub.s32 %v11171_v40, %v927_v39  ;;  %v11407_v40 = vsub.s32 %v11194_v30, %v938_v12 }
 0x122   : > { %2061 = vst.msk [vmem:[#allocation10 + $0x360] sm:$0xff] %vm495_vm0, %v2025_v38  ;;  %4883 = vst.msk [vmem:[#allocation10 + $0x2a8] sm:$0xff] %vm495_vm0, %v4873_v6  ;;  %v3180_v33 = vld [vmem:[#allocation2 + $0x96] sm:$0xff]  ;;  %v11388_v0 = vadd.s32 18, %v11310_v8  ;;  %8788 = vmatmul.mubr.msk.f32.gmra.mrb[44].mxu0 %vm495_vm0, %v3287_v27  ;;  %v1964_v6 = vmul.f32 %v11115_v4, %v1928_v19  ;;  %v1846_v47 = vpop.f32.mrb[25].mxu0  ;;  %vm994_vm7 = vcmp.ne.s32.totalorder %v11346_v59, 0 }
 0x123   : > { %1997 = vst.msk [vmem:[#allocation2 + $0xb3] sm:$0xff] %vm495_vm0, %v1961_v31  ;;  %3215 = vst.msk [vmem:[#allocation10 + $0x3c8] sm:$0xff] %vm495_vm0, %v3179_v49  ;;  %v1852_v31 = vadd.f32 %v8743_v37, %v10847_v16  ;;  %v11409_v44 = vld [vmem:[#allocation2 + $0x3c] sm:$0xff]  ;;  %v2094_v39 = vld [vmem:[#allocation2 + $0x49] sm:$0xff]  ;;  %8790 = vmatprep.mubr.msk.f32.mxu0 %vm495_vm0, %v3292_v9  ;;  %v1963_v1 = vmul.f32 %v11061_v25, %v1927_v60  ;;  %v1847_v35 = vadd.f32 %v10847_v16, %v1846_v47  ;;  %v15057_v10 = vmov 0.0|0.0  }
 0x124   : > { %3216 = vst.msk [vmem:[#allocation10 + $0x410] sm:$0xff] %vm495_vm0, %v3180_v33  ;;  %vm11401_vm6 = vmand %vm1031_vm5, %vm995_vm3  ;;  %vm1030_vm14 = vcmp.lt.s32.totalorder %v11346_v59, 0  ;;  %v960_v38 = vmul.u32 18, %v959_v22  ;;  %v2315_v14 = vld [vmem:[#allocation2 + $0x6a] sm:$0xff]  ;;  %v2383_v19 = vld [vmem:[#allocation2 + $0x5a] sm:$0xff]  ;;  %vm11418_vm8 = vcmp.lt.s32.totalorder %v1137_v13, 16  ;;  %2175 = vrot.lane.b32.xlu1 %v2094_v39, %s9834_s25 }
 0x125   : > { %v2026_v27 = vld [vmem:[#allocation2 + $0x68] sm:$0xff]  ;;  %2917 = vst.msk [vmem:[#allocation10 + $0xf0] sm:$0xff] %vm495_vm0, %v11409_v44  ;;  %v3297_v30 = vld [vmem:[#allocation10 + $0x338] sm:$0xff]  ;;  %2000 = vst.msk [vmem:[#allocation2 + $0xcb] sm:$0xff] %vm495_vm0, %v1964_v6  ;;  %v1930_v12 = vmax.f32 %v1852_v31, 0.0  ;;  %v949_v60 = vmul.u32 18, %v948_v41  ;;  %2464 = vrot.lane.b32.xlu0 %v2383_v19, %s9834_s25  ;;  %v1139_v41 = vsel %vm11401_vm6, %v11388_v0, %v11310_v8 }
 0x126   : > { %v3181_v49 = vld [vmem:[#allocation2 + $0x9e] sm:$0xff]  ;;  %2351 = vst.msk [vmem:[#allocation10 + $0x3b0] sm:$0xff] %vm495_vm0, %v2315_v14  ;;  %2062 = vst.msk [vmem:[#allocation10 + $0x3a8] sm:$0xff] %vm495_vm0, %v2026_v27  ;;  %v1929_v33 = vmax.f32 %v1847_v35, 0.0  ;;  %v3182_v37 = vld [vmem:[#allocation2 + $0xa6] sm:$0xff]  ;;  %v8746_v13 = vpop.f32.mrb[26].mxu0  ;;  %8791 = vmatmul.mubr.msk.f32.gmra.mrb[46].mxu0 %vm495_vm0, %v3297_v30  ;;  %v11455_v35 = vsub.s32 %v11239_v46, %v960_v38 }
 0x127   : > { %v3302_v22 = vld [vmem:[#allocation10 + $0x380] sm:$0xff]  ;;  %1999 = vst.msk [vmem:[#allocation2 + $0xc3] sm:$0xff] %vm495_vm0, %v1963_v1  ;;  %3217 = vst.msk [vmem:[#allocation10 + $0x458] sm:$0xff] %vm495_vm0, %v3181_v49  ;;  %v11433_v6 = vadd.s32 18, %v11346_v59  ;;  %vm996_vm9 = vcmp.ne.s32.totalorder %v11391_v61, 0  ;;  %v1966_v31 = vmul.f32 %v11322_v26, %v1930_v12  ;;  %v1862_v47 = vadd.f32 %v8746_v13, %v10847_v16  ;;  %v1856_v39 = vpop.f32.mrb[27].mxu0 }
 0x128   : > { %3218 = vst.msk [vmem:[#allocation10 + $0x4a0] sm:$0xff] %vm495_vm0, %v3182_v37  ;;  %vm11444_vm10 = vmand %vm1030_vm14, %vm994_vm7  ;;  %vm997_vm11 = vcmp.ne.s32.totalorder %v11407_v40, 0  ;;  %vm1032_vm15 = vcmp.lt.s32.totalorder %v11391_v61, 0  ;;  %v2095_v0 = vld [vmem:[#allocation2 + $0x51] sm:$0xff]  ;;  %8793 = vmatprep.mubr.msk.f32.mxu0 %vm495_vm0, %v3302_v22  ;;  %v1965_v28 = vmul.f32 %v11147_v23, %v1929_v33  ;;  %v1857_v1 = vadd.f32 %v10847_v16, %v1856_v39  ;;  %v11457_v14 = vld [vmem:[#allocation2 + $0x44] sm:$0xff] }
 0x129   : > { %vm1033_vm1 = vcmp.lt.s32.totalorder %v11407_v40, 0  ;;  %v2316_v27 = vld [vmem:[#allocation2 + $0x72] sm:$0xff]  ;;  %v2384_v19 = vld [vmem:[#allocation2 + $0x62] sm:$0xff]  ;;  %2002 = vst.msk [vmem:[#allocation2 + $0xdb] sm:$0xff] %vm495_vm0, %v1966_v31  ;;  %v1932_v12 = vmax.f32 %v1862_v47, 0.0  ;;  %v11463_v22 = vsel %vm11338_vm2, 1.0, %v10923_v21  ;;  %v11471_v46 = vsub.s32 %v11244_v50, %v949_v60  ;;  %2177 = vrot.lane.b32.xlu1 %v2095_v0, %s9834_s25  ;;  %vm11496_vm4 = vmand %vm1032_vm15, %vm996_vm9 }
 0x12a   : > { %v3307_v30 = vld [vmem:[#allocation10 + $0x3c8] sm:$0xff]  ;;  %15028 = vst [vmem:[#allocation33_spill] sm:$0xff] %v11463_v22  ;;  %v11468_v33 = vsel %vm11371_vm13, 1.0, %v10923_v21  ;;  %2352 = vst.msk [vmem:[#allocation10 + $0x3f8] sm:$0xff] %vm495_vm0, %v2316_v27  ;;  %2466 = vrot.lane.b32.xlu0 %v2384_v19, %s9834_s25  ;;  %v1931_v17 = vmax.f32 %v1857_v1, 0.0  ;;  %v3184_v38 = vld [vmem:[#allocation2 + $0xb6] sm:$0xff]  ;;  %v1138_v37 = vsel %vm11444_vm10, %v11433_v6, %v11346_v59 }
 0x12b   : > { %v3183_v49 = vld [vmem:[#allocation2 + $0xae] sm:$0xff]  ;;  %15029 = vst [vmem:[#allocation34_spill] sm:$0xff] %v11468_v33  ;;  %2918 = vst.msk [vmem:[#allocation10 + $0x138] sm:$0xff] %vm495_vm0, %v11457_v14  ;;  %v11483_v50 = vsel %vm11418_vm8, 1.0, %v10923_v21  ;;  %v8749_v60 = vpop.f32.mrb[28].mxu0  ;;  %v11490_v13 = vadd.s32 18, %v11407_v40  ;;  %8794 = vmatmul.mubr.msk.f32.gmra.mrb[48].mxu0 %vm495_vm0, %v3307_v30  ;;  %v1968_v9 = vmul.f32 %v11327_v29, %v1932_v12 }
 0x12c   : > { %v3312_v57 = vld [vmem:[#allocation10 + $0x410] sm:$0xff]  ;;  %2001 = vst.msk [vmem:[#allocation2 + $0xd3] sm:$0xff] %vm495_vm0, %v1965_v28  ;;  %3219 = vst.msk [vmem:[#allocation10 + $0x4e8] sm:$0xff] %vm495_vm0, %v3183_v49  ;;  %v1872_v47 = vadd.f32 %v8749_v60, %v10847_v16  ;;  %v1866_v59 = vpop.f32.mrb[29].mxu0  ;;  %vm11504_vm2 = vcmp.lt.s32.totalorder %v1139_v41, 16  ;;  %v11517_v8 = vadd.s32 18, %v11391_v61  ;;  %v1967_v41 = vmul.f32 %v11463_v22, %v1931_v17 }
 0x12d   : > { %15030 = vst [vmem:[#allocation35_spill] sm:$0xff] %v11483_v50  ;;  %3220 = vst.msk [vmem:[#allocation10 + $0x530] sm:$0xff] %vm495_vm0, %v3184_v38  ;;  %v2027_v0 = vld [vmem:[#allocation2 + $0x70] sm:$0xff]  ;;  %v2096_v28 = vld [vmem:[#allocation2 + $0x59] sm:$0xff]  ;;  %8796 = vmatprep.mubr.msk.f32.mxu0 %vm495_vm0, %v3312_v57  ;;  %v1867_v1 = vadd.f32 %v10847_v16, %v1866_v59  ;;  %vm999_vm3 = vcmp.ne.s32.totalorder %v11455_v35, 0  ;;  %vm1035_vm5 = vcmp.lt.s32.totalorder %v11455_v35, 0 }
 0x12e   : > { %vm11512_vm12 = vmand %vm1033_vm1, %vm997_vm11  ;;  %2063 = vst.msk [vmem:[#allocation10 + $0x3f0] sm:$0xff] %vm495_vm0, %v2027_v0  ;;  %v11525_v27 = vld [vmem:[#allocation2 + $0x4c] sm:$0xff]  ;;  %v2317_v19 = vld [vmem:[#allocation2 + $0x7a] sm:$0xff]  ;;  %v1934_v49 = vmax.f32 %v1872_v47, 0.0  ;;  %vm998_vm13 = vcmp.ne.s32.totalorder %v11471_v46, 0  ;;  %vm1034_vm6 = vcmp.lt.s32.totalorder %v11471_v46, 0  ;;  %2179 = vrot.lane.b32.xlu1 %v2096_v28, %s9834_s25 }
 0x12f   : > { %v2385_v30 = vld [vmem:[#allocation2 + $0x6a] sm:$0xff]  ;;  %v3317_v12 = vld [vmem:[#allocation10 + $0x458] sm:$0xff]  ;;  %2004 = vst.msk [vmem:[#allocation2 + $0xeb] sm:$0xff] %vm495_vm0, %v1968_v9  ;;  %2353 = vst.msk [vmem:[#allocation10 + $0x440] sm:$0xff] %vm495_vm0, %v2317_v19  ;;  %v1933_v57 = vmax.f32 %v1867_v1, 0.0  ;;  %v8752_v60 = vpop.f32.mrb[30].mxu0  ;;  %v1141_v47 = vsel %vm11512_vm12, %v11490_v13, %v11407_v40  ;;  %v1140_v40 = vsel %vm11496_vm4, %v11517_v8, %v11391_v61 }
 0x130   : > { %v3185_v38 = vld [vmem:[#allocation2 + $0xbe] sm:$0xff]  ;;  %2919 = vst.msk [vmem:[#allocation10 + $0x180] sm:$0xff] %vm495_vm0, %v11525_v27  ;;  %2468 = vrot.lane.b32.xlu0 %v2385_v30, %s9834_s25  ;;  %2003 = vst.msk [vmem:[#allocation2 + $0xe3] sm:$0xff] %vm495_vm0, %v1967_v41  ;;  %v3186_v17 = vld [vmem:[#allocation2 + $0xc6] sm:$0xff]  ;;  %vm11537_vm7 = vcmp.lt.s32.totalorder %v1138_v37, 16  ;;  %v1107_v59 = vadd.s32 18, %v11455_v35  ;;  %8797 = vmatmul.mubr.msk.f32.gmra.mrb[50].mxu0 %vm495_vm0, %v3317_v12  ;;  %v1970_v0 = vmul.f32 %v11483_v50, %v1934_v49 }
 0x131   : > { %v3322_v16 = vld [vmem:[#allocation10 + $0x4a0] sm:$0xff]  ;;  %3221 = vst.msk [vmem:[#allocation10 + $0x578] sm:$0xff] %vm495_vm0, %v3185_v38  ;;  %3222 = vst.msk [vmem:[#allocation10 + $0x5c0] sm:$0xff] %vm495_vm0, %v3186_v17  ;;  %v1876_v41 = vpop.f32.mrb[31].mxu0  ;;  %v1106_v39 = vadd.s32 18, %v11471_v46  ;;  %v1969_v19 = vmul.f32 %v11468_v33, %v1933_v57  ;;  %v11573_v31 = vsel %vm11504_vm2, 1.0, %v10923_v21 }
 0x132   : > { %v11552_v37 = vld [vmem:[%s14828_s2] ss:$0 sm:$0xff]  ;;  %vm11563_vm14 = vmand %vm1035_vm5, %vm999_vm3  ;;  %v2097_v1 = vld [vmem:[#allocation2 + $0x61] sm:$0xff]  ;;  %8799 = vmatprep.mubr.msk.f32.mxu0 %vm495_vm0, %v3322_v16  ;;  %15041 = vst [vmem:[#allocation36_spill] sm:$0xff] %v11573_v31  ;;  %vm11592_vm9 = vcmp.lt.s32.totalorder %v1141_v47, 16  ;;  %v8755_v9 = vpop.f32.mrb[32].mxu0 }
 0x133   : > { %v1882_v28 = vadd.f32 %v11552_v37, %v8752_v60  ;;  %v1877_v61 = vadd.f32 %v11552_v37, %v1876_v41  ;;  %vm11580_vm8 = vmand %vm1034_vm6, %vm998_vm13  ;;  %v2028_v30 = vld [vmem:[#allocation2 + $0x78] sm:$0xff]  ;;  %v3327_v49 = vld [vmem:[#allocation10 + $0x4e8] sm:$0xff]  ;;  %2006 = vst.msk [vmem:[#allocation2 + $0xfb] sm:$0xff] %vm495_vm0, %v1970_v0  ;;  %2181 = vrot.lane.b32.xlu1 %v2097_v1, %s9834_s25  ;;  %vm11601_vm10 = vcmp.lt.s32.totalorder %v1140_v40, 16  ;;  %v1143_v47 = vsel %vm11563_vm14, %v1107_v59, %v11455_v35 }
 0x134   : > { %v2386_v12 = vld [vmem:[#allocation2 + $0x72] sm:$0xff]  ;;  %2064 = vst.msk [vmem:[#allocation10 + $0x438] sm:$0xff] %vm495_vm0, %v2028_v30  ;;  %2005 = vst.msk [vmem:[#allocation2 + $0xf3] sm:$0xff] %vm495_vm0, %v1969_v19  ;;  %8800 = vmatmul.mubr.msk.f32.gmra.mrb[52].mxu0 %vm495_vm0, %v3327_v49  ;;  %v1892_v1 = vadd.f32 %v11552_v37, %v8755_v9  ;;  %v1886_v19 = vpop.f32.mrb[33].mxu0  ;;  %v1142_v40 = vsel %vm11580_vm8, %v1106_v39, %v11471_v46  ;;  %v2098_v30 = vld [vmem:[#allocation2 + $0x69] sm:$0xff]  ;;  %vm11633_vm11 = vcmp.lt.s32.totalorder %v1143_v47, 16 }
 0x135   : > { %v1936_v38 = vmax.f32 %v1882_v28, 0.0  ;;  %v3187_v16 = vld [vmem:[#allocation2 + $0xce] sm:$0xff]  ;;  %v11585_v6 = vld [vmem:[#allocation5] sm:$0xff]  ;;  %2470 = vrot.lane.b32.xlu0 %v2386_v12, %s9834_s25  ;;  %v1935_v60 = vmax.f32 %v1877_v61, 0.0  ;;  %v1887_v13 = vadd.f32 %v11552_v37, %v1886_v19  ;;  %v2318_v12 = vld [vmem:[#allocation2 + $0x82] sm:$0xff]  ;;  %v8758_v9 = vpop.f32.mrb[34].mxu0 }
 0x136   : > { %v11590_v21 = vsel %vm11537_vm7, 1.0, %v11585_v6  ;;  %v3332_v17 = vld [vmem:[#allocation10 + $0x530] sm:$0xff]  ;;  %3223 = vst.msk [vmem:[#allocation10 + $0x608] sm:$0xff] %vm495_vm0, %v3187_v16  ;;  %v11622_v59 = vsel %vm11592_vm9, 1.0, %v11585_v6  ;;  %v2029_v49 = vld [vmem:[#allocation2 + $0x80] sm:$0xff]  ;;  %v1938_v8 = vmax.f32 %v1892_v1, 0.0 }
 0x137   : > { %15044 = vst [vmem:[#allocation37_spill] sm:$0xff] %v11590_v21  ;;  %v3188_v0 = vld [vmem:[#allocation2 + $0xd6] sm:$0xff]  ;;  %v1972_v41 = vmul.f32 %v11573_v31, %v1936_v38  ;;  %8802 = vmatprep.mubr.msk.f32.mxu0 %vm495_vm0, %v3332_v17  ;;  %v1971_v35 = vmul.f32 %v11590_v21, %v1935_v60  ;;  %15049 = vst [vmem:[#allocation38_spill] sm:$0xff] %v11622_v59  ;;  %v3189_v38 = vld [vmem:[#allocation2 + $0xde] sm:$0xff]  ;;  %v11631_v16 = vsel %vm11601_vm10, 1.0, %v11585_v6  ;;  %2183 = vrot.lane.b32.xlu1 %v2098_v30, %s9834_s25  ;;  %v1896_v1 = vpop.f32.mrb[35].mxu0 }
 0x138   : > { %3224 = vst.msk [vmem:[#allocation10 + $0x650] sm:$0xff] %vm495_vm0, %v3188_v0  ;;  %v11615_v61 = vld [vmem:[#allocation2 + $0x54] sm:$0xff]  ;;  %15050 = vst [vmem:[#allocation39_spill] sm:$0xff] %v11631_v16  ;;  %v3342_v17 = vld [vmem:[#allocation10 + $0x5c0] sm:$0xff]  ;;  %v1937_v60 = vmax.f32 %v1887_v13, 0.0  ;;  %vm11643_vm15 = vcmp.lt.s32.totalorder %v1142_v40, 16  ;;  %v1974_v47 = vmul.f32 %v11622_v59, %v1938_v8  ;;  %v1897_v13 = vadd.f32 %v11552_v37, %v1896_v1 }
 0x139   : > { %2920 = vst.msk [vmem:[#allocation10 + $0x1c8] sm:$0xff] %vm495_vm0, %v11615_v61  ;;  %v2387_v46 = vld [vmem:[#allocation2 + $0x7a] sm:$0xff]  ;;  %2008 = vst.msk [vmem:[#allocation2 + $0x10b] sm:$0xff] %vm495_vm0, %v1972_v41  ;;  %v3190_v0 = vld [vmem:[#allocation2 + $0xe6] sm:$0xff]  ;;  %v1902_v41 = vadd.f32 %v11552_v37, %v8758_v9  ;;  %v11658_v40 = vsel %vm11633_vm11, 1.0, %v11585_v6  ;;  %vm2265_vm1 = vcmask 1048064  }
 0x13a   : > { %v3337_v39 = vld [vmem:[#allocation10 + $0x578] sm:$0xff]  ;;  %2354 = vst.msk [vmem:[#allocation10 + $0x488] sm:$0xff] %vm495_vm0, %v2318_v12  ;;  %2065 = vst.msk [vmem:[#allocation10 + $0x480] sm:$0xff] %vm495_vm0, %v2029_v49  ;;  %2472 = vrot.lane.b32.xlu0 %v2387_v46, %s9834_s25  ;;  %v2319_v12 = vld [vmem:[#allocation2 + $0x8a] sm:$0xff]  ;;  %v1939_v57 = vmax.f32 %v1897_v13, 0.0  ;;  %vm502_vm4 = vcmask 520192  }
 0x13b   : > { %2007 = vst.msk [vmem:[#allocation2 + $0x103] sm:$0xff] %vm495_vm0, %v1971_v35  ;;  %3225 = vst.msk [vmem:[#allocation10 + $0x698] sm:$0xff] %vm495_vm0, %v3189_v38  ;;  %8803 = vmatmul.mubr.msk.f32.gmra.mrb[54].mxu0 %vm495_vm0, %v3337_v39  ;;  %v11651_v19 = vld [vmem:[#allocation2 + $0x5c] sm:$0xff]  ;;  %v2099_v30 = vld [vmem:[#allocation2 + $0x71] sm:$0xff]  ;;  %v1973_v35 = vmul.f32 %v11631_v16, %v1937_v60  ;;  %v1940_v39 = vmax.f32 %v1902_v41, 0.0  ;;  %v11667_v38 = vsel %vm11643_vm15, 1.0, %v11585_v6 }
 0x13c   : > { %3226 = vst.msk [vmem:[#allocation10 + $0x6e0] sm:$0xff] %vm495_vm0, %v3190_v0  ;;  %8805 = vmatprep.mubr.msk.f32.mxu0 %vm495_vm0, %v3342_v17  ;;  %15055 = vst [vmem:[#allocation40_spill] sm:$0xff] %v11658_v40  ;;  %v2388_v49 = vld [vmem:[#allocation2 + $0x82] sm:$0xff]  ;;  %v3191_v8 = vld [vmem:[#allocation2 + $0xee] sm:$0xff]  ;;  %2185 = vrot.lane.b32.xlu1 %v2099_v30, %s9834_s25  ;;  %v1975_v9 = vmul.f32 %v11667_v38, %v1939_v57 }
 0x13d   : > { %2921 = vst.msk [vmem:[#allocation10 + $0x210] sm:$0xff] %vm495_vm0, %v11651_v19  ;;  %v3347_v46 = vld [vmem:[#allocation10 + $0x608] sm:$0xff]  ;;  %2010 = vst.msk [vmem:[#allocation2 + $0x11b] sm:$0xff] %vm495_vm0, %v1974_v47  ;;  %v3192_v17 = vld [vmem:[#allocation2 + $0xf6] sm:$0xff]  ;;  %v1976_v60 = vmul.f32 %v11658_v40, %v1940_v39 }
 0x13e   : > { %15056 = vst [vmem:[#allocation41_spill] sm:$0xff] %v11667_v38  ;;  %2355 = vst.msk [vmem:[#allocation10 + $0x4d0] sm:$0xff] %vm495_vm0, %v2319_v12  ;;  %2474 = vrot.lane.b32.xlu0 %v2388_v49, %s9834_s25  ;;  %v2030_v6 = vld [vmem:[#allocation2 + $0x88] sm:$0xff]  ;;  %v2100_v0 = vld [vmem:[#allocation2 + $0x79] sm:$0xff] }
 0x13f   : > { %v3352_v37 = vld [vmem:[#allocation10 + $0x650] sm:$0xff]  ;;  %2009 = vst.msk [vmem:[#allocation2 + $0x113] sm:$0xff] %vm495_vm0, %v1973_v35  ;;  %3227 = vst.msk [vmem:[#allocation10 + $0x728] sm:$0xff] %vm495_vm0, %v3191_v8  ;;  %8806 = vmatmul.mubr.msk.f32.gmra.mrb[56].mxu0 %vm495_vm0, %v3347_v46  ;;  %v11680_v28 = vld [vmem:[#allocation2 + $0x64] sm:$0xff] }
 0x140   : > { %3228 = vst.msk [vmem:[#allocation10 + $0x770] sm:$0xff] %vm495_vm0, %v3192_v17  ;;  %8808 = vmatprep.mubr.msk.f32.mxu0 %vm495_vm0, %v3352_v37  ;;  %2066 = vst.msk [vmem:[#allocation10 + $0x4c8] sm:$0xff] %vm495_vm0, %v2030_v6  ;;  %v2320_v47 = vld [vmem:[#allocation2 + $0x92] sm:$0xff]  ;;  %v2389_v41 = vld [vmem:[#allocation2 + $0x8a] sm:$0xff]  ;;  %2187 = vrot.lane.b32.xlu1 %v2100_v0, %s9834_s25 }
 0x141   : > { %2012 = vst.msk [vmem:[#allocation2 + $0x12b] sm:$0xff] %vm495_vm0, %v1976_v60  ;;  %2356 = vst.msk [vmem:[#allocation10 + $0x518] sm:$0xff] %vm495_vm0, %v2320_v47  ;;  %v2031_v12 = vld [vmem:[#allocation2 + $0x90] sm:$0xff]  ;;  %v2101_v49 = vld [vmem:[#allocation2 + $0x81] sm:$0xff] }
 0x142   : > { %v3357_v1 = vld [vmem:[#allocation10 + $0x698] sm:$0xff]  ;;  %2922 = vst.msk [vmem:[#allocation10 + $0x258] sm:$0xff] %vm495_vm0, %v11680_v28  ;;  %2476 = vrot.lane.b32.xlu0 %v2389_v41, %s9834_s25  ;;  %2011 = vst.msk [vmem:[#allocation2 + $0x123] sm:$0xff] %vm495_vm0, %v1975_v9  ;;  %v3194_v13 = vld [vmem:[#allocation2 + $0x106] sm:$0xff] }
 0x143   : > { %v3193_v30 = vld [vmem:[#allocation2 + $0xfe] sm:$0xff]  ;;  %8809 = vmatmul.mubr.msk.f32.gmra.mrb[58].mxu0 %vm495_vm0, %v3357_v1  ;;  %3230 = vst.msk [vmem:[#allocation10 + $0x800] sm:$0xff] %vm495_vm0, %v3194_v13  ;;  %2067 = vst.msk [vmem:[#allocation10 + $0x510] sm:$0xff] %vm495_vm0, %v2031_v12  ;;  %v11694_v46 = vld [vmem:[#allocation2 + $0x6c] sm:$0xff] }
 0x144   : > { %v3362_v35 = vld [vmem:[#allocation10 + $0x6e0] sm:$0xff]  ;;  %3229 = vst.msk [vmem:[#allocation10 + $0x7b8] sm:$0xff] %vm495_vm0, %v3193_v30  ;;  %v2390_v39 = vld [vmem:[#allocation2 + $0x92] sm:$0xff]  ;;  %2923 = vst.msk [vmem:[#allocation10 + $0x2a0] sm:$0xff] %vm495_vm0, %v11694_v46  ;;  %2189 = vrot.lane.b32.xlu1 %v2101_v49, %s9834_s25 }
 0x145   : > { %8811 = vmatprep.mubr.msk.f32.mxu0 %vm495_vm0, %v3362_v35  ;;  %v2102_v60 = vld [vmem:[#allocation2 + $0x89] sm:$0xff]  ;;  %v2321_v0 = vld [vmem:[#allocation2 + $0x9a] sm:$0xff]  ;;  %v2103_v13 = vld [vmem:[#allocation2 + $0x91] sm:$0xff] }
 0x146   : > { %v3367_v8 = vld [vmem:[#allocation10 + $0x728] sm:$0xff]  ;;  %2478 = vrot.lane.b32.xlu0 %v2390_v39, %s9834_s25  ;;  %v3196_v17 = vld [vmem:[#allocation2 + $0x116] sm:$0xff]  ;;  %2357 = vst.msk [vmem:[#allocation10 + $0x560] sm:$0xff] %vm495_vm0, %v2321_v0 }
 0x147   : > { %v3195_v37 = vld [vmem:[#allocation2 + $0x10e] sm:$0xff]  ;;  %8812 = vmatmul.mubr.msk.f32.gmra.mrb[60].mxu0 %vm495_vm0, %v3367_v8  ;;  %3232 = vst.msk [vmem:[#allocation10 + $0x890] sm:$0xff] %vm495_vm0, %v3196_v17  ;;  %v2032_v9 = vld [vmem:[#allocation2 + $0x98] sm:$0xff]  ;;  %v2322_v49 = vld [vmem:[#allocation2 + $0xa2] sm:$0xff] }
 0x148   : > { %v3372_v57 = vld [vmem:[#allocation10 + $0x770] sm:$0xff]  ;;  %3231 = vst.msk [vmem:[#allocation10 + $0x848] sm:$0xff] %vm495_vm0, %v3195_v37  ;;  %v2391_v47 = vld [vmem:[#allocation2 + $0x9a] sm:$0xff]  ;;  %2068 = vst.msk [vmem:[#allocation10 + $0x558] sm:$0xff] %vm495_vm0, %v2032_v9  ;;  %2191 = vrot.lane.b32.xlu1 %v2102_v60, %s9834_s25 }
 0x149   : > { %8814 = vmatprep.mubr.msk.f32.mxu0 %vm495_vm0, %v3372_v57  ;;  %v3199_v6 = vld [vmem:[#allocation2 + $0x12e] sm:$0xff]  ;;  %v3197_v1 = vld [vmem:[#allocation2 + $0x11e] sm:$0xff]  ;;  %v3198_v35 = vld [vmem:[#allocation2 + $0x126] sm:$0xff]  ;;  %2358 = vst.msk [vmem:[#allocation10 + $0x5a8] sm:$0xff] %vm495_vm0, %v2322_v49 }
 0x14a   : > { %3235 = vst.msk [vmem:[#allocation10 + $0x968] sm:$0xff] %vm495_vm0, %v3199_v6  ;;  %2480 = vrot.lane.b32.xlu0 %v2391_v47, %s9834_s25  ;;  %v3382_v30 = vld [vmem:[#allocation10 + $0x800] sm:$0xff]  ;;  %3233 = vst.msk [vmem:[#allocation10 + $0x8d8] sm:$0xff] %vm495_vm0, %v3197_v1  ;;  %v11712_v12 = vld [vmem:[#allocation2 + $0x74] sm:$0xff] }
 0x14b   : > { %v3377_v41 = vld [vmem:[#allocation10 + $0x7b8] sm:$0xff]  ;;  %3234 = vst.msk [vmem:[#allocation10 + $0x920] sm:$0xff] %vm495_vm0, %v3198_v35  ;;  %v2392_v39 = vld [vmem:[#allocation2 + $0xa2] sm:$0xff]  ;;  %2924 = vst.msk [vmem:[#allocation10 + $0x2e8] sm:$0xff] %vm495_vm0, %v11712_v12 }
 0x14c   : > { %8815 = vmatmul.mubr.msk.f32.gmra.mrb[62].mxu0 %vm495_vm0, %v3377_v41  ;;  %v2033_v8 = vld [vmem:[#allocation2 + $0xa0] sm:$0xff]  ;;  %v2323_v17 = vld [vmem:[#allocation2 + $0xaa] sm:$0xff]  ;;  %2193 = vrot.lane.b32.xlu1 %v2103_v13, %s9834_s25  ;;  %v2324_v9 = vld [vmem:[#allocation2 + $0xb2] sm:$0xff] }
 0x14d   : > { %8817 = vmatprep.mubr.msk.f32.mxu0 %vm495_vm0, %v3382_v30  ;;  %v11716_v37 = vld [vmem:[#allocation2 + $0x7c] sm:$0xff]  ;;  %2069 = vst.msk [vmem:[#allocation10 + $0x5a0] sm:$0xff] %vm495_vm0, %v2033_v8  ;;  %v2034_v60 = vld [vmem:[#allocation2 + $0xa8] sm:$0xff]  ;;  %2359 = vst.msk [vmem:[#allocation10 + $0x5f0] sm:$0xff] %vm495_vm0, %v2323_v17 }
 0x14e   : > { %2925 = vst.msk [vmem:[#allocation10 + $0x330] sm:$0xff] %vm495_vm0, %v11716_v37  ;;  %2482 = vrot.lane.b32.xlu0 %v2392_v39, %s9834_s25  ;;  %v3392_v6 = vld [vmem:[#allocation10 + $0x890] sm:$0xff]  ;;  %2070 = vst.msk [vmem:[#allocation10 + $0x5e8] sm:$0xff] %vm495_vm0, %v2034_v60  ;;  %v11728_v0 = vld [vmem:[#allocation2 + $0x84] sm:$0xff] }
 0x14f   : > { %v3387_v57 = vld [vmem:[#allocation10 + $0x848] sm:$0xff]  ;;  %v2104_v41 = vld [vmem:[#allocation2 + $0x99] sm:$0xff]  ;;  %2360 = vst.msk [vmem:[#allocation10 + $0x638] sm:$0xff] %vm495_vm0, %v2324_v9  ;;  %v2035_v1 = vld [vmem:[#allocation2 + $0xb0] sm:$0xff] }
 0x150   : > { %8818 = vmatmul.mubr.msk.f32.gmra.mrb[64].mxu0 %vm495_vm0, %v3387_v57  ;;  %v2393_v47 = vld [vmem:[#allocation2 + $0xaa] sm:$0xff]  ;;  %2926 = vst.msk [vmem:[#allocation10 + $0x378] sm:$0xff] %vm495_vm0, %v11728_v0  ;;  %2071 = vst.msk [vmem:[#allocation10 + $0x630] sm:$0xff] %vm495_vm0, %v2035_v1  ;;  %v2325_v13 = vld [vmem:[#allocation2 + $0xba] sm:$0xff]  ;;  %2195 = vrot.lane.b32.xlu1 %v2104_v41, %s9834_s25 }
 0x151   : > { %8820 = vmatprep.mubr.msk.f32.mxu0 %vm495_vm0, %v3392_v6  ;;  %v3397_v30 = vld [vmem:[#allocation10 + $0x8d8] sm:$0xff]  ;;  %v11735_v35 = vld [vmem:[#allocation2 + $0x8c] sm:$0xff]  ;;  %2361 = vst.msk [vmem:[#allocation10 + $0x680] sm:$0xff] %vm495_vm0, %v2325_v13  ;;  %v2326_v57 = vld [vmem:[#allocation2 + $0xc2] sm:$0xff] }
 0x152   : > { %2484 = vrot.lane.b32.xlu0 %v2393_v47, %s9834_s25  ;;  %v3402_v49 = vld [vmem:[#allocation10 + $0x920] sm:$0xff]  ;;  %v2036_v39 = vld [vmem:[#allocation2 + $0xb8] sm:$0xff]  ;;  %2927 = vst.msk [vmem:[#allocation10 + $0x3c0] sm:$0xff] %vm495_vm0, %v11735_v35  ;;  %v3407_v60 = vld [vmem:[#allocation10 + $0x968] sm:$0xff] }
 0x153   : > { %2072 = vst.msk [vmem:[#allocation10 + $0x678] sm:$0xff] %vm495_vm0, %v2036_v39  ;;  %v11744_v8 = vld [vmem:[#allocation2 + $0x94] sm:$0xff]  ;;  %v2037_v17 = vld [vmem:[#allocation2 + $0xc0] sm:$0xff]  ;;  %2362 = vst.msk [vmem:[#allocation10 + $0x6c8] sm:$0xff] %vm495_vm0, %v2326_v57 }
 0x154   : > { %8821 = vmatmul.mubr.msk.f32.gmra.mrb[66].mxu0 %vm495_vm0, %v3397_v30  ;;  %2073 = vst.msk [vmem:[#allocation10 + $0x6c0] sm:$0xff] %vm495_vm0, %v2037_v17  ;;  %v11749_v6 = vld [vmem:[#allocation2 + $0x9c] sm:$0xff]  ;;  %v2327_v9 = vld [vmem:[#allocation2 + $0xca] sm:$0xff]  ;;  %2928 = vst.msk [vmem:[#allocation10 + $0x408] sm:$0xff] %vm495_vm0, %v11744_v8 }
 0x155   : > { %8823 = vmatprep.mubr.msk.f32.mxu0 %vm495_vm0, %v3402_v49  ;;  %v2394_v47 = vld [vmem:[#allocation2 + $0xb2] sm:$0xff]  ;;  %v2105_v41 = vld [vmem:[#allocation2 + $0xa1] sm:$0xff]  ;;  %2363 = vst.msk [vmem:[#allocation10 + $0x710] sm:$0xff] %vm495_vm0, %v2327_v9  ;;  %2929 = vst.msk [vmem:[#allocation10 + $0x450] sm:$0xff] %vm495_vm0, %v11749_v6 }
 0x156   : > { %v2038_v1 = vld [vmem:[#allocation2 + $0xc8] sm:$0xff]  ;;  %2486 = vrot.lane.b32.xlu0 %v2394_v47, %s9834_s25  ;;  %2197 = vrot.lane.b32.xlu1 %v2105_v41, %s9834_s25  ;;  %v2328_v13 = vld [vmem:[#allocation2 + $0xd2] sm:$0xff]  ;;  %v2395_v17 = vld [vmem:[#allocation2 + $0xba] sm:$0xff] }
 0x157   : > { %2074 = vst.msk [vmem:[#allocation10 + $0x708] sm:$0xff] %vm495_vm0, %v2038_v1  ;;  %v11759_v30 = vld [vmem:[#allocation2 + $0xa4] sm:$0xff]  ;;  %2364 = vst.msk [vmem:[#allocation10 + $0x758] sm:$0xff] %vm495_vm0, %v2328_v13  ;;  %v2039_v39 = vld [vmem:[#allocation2 + $0xd0] sm:$0xff] }
 0x158   : > { %v2106_v49 = vld [vmem:[#allocation2 + $0xa9] sm:$0xff]  ;;  %8824 = vmatmul.mubr.msk.f32.gmra.mrb[68].mxu0 %vm495_vm0, %v3407_v60  ;;  %2930 = vst.msk [vmem:[#allocation10 + $0x498] sm:$0xff] %vm495_vm0, %v11759_v30  ;;  %2075 = vst.msk [vmem:[#allocation10 + $0x750] sm:$0xff] %vm495_vm0, %v2039_v39  ;;  %v2329_v9 = vld [vmem:[#allocation2 + $0xda] sm:$0xff] }
 0x159   : > { %v11763_v57 = vld [vmem:[#allocation2 + $0xac] sm:$0xff]  ;;  %v2040_v47 = vld [vmem:[#allocation2 + $0xd8] sm:$0xff]  ;;  %2365 = vst.msk [vmem:[#allocation10 + $0x7a0] sm:$0xff] %vm495_vm0, %v2329_v9  ;;  %v2330_v41 = vld [vmem:[#allocation2 + $0xe2] sm:$0xff] }
 0x15a   : > { %2931 = vst.msk [vmem:[#allocation10 + $0x4e0] sm:$0xff] %vm495_vm0, %v11763_v57  ;;  %2076 = vst.msk [vmem:[#allocation10 + $0x798] sm:$0xff] %vm495_vm0, %v2040_v47  ;;  %v11772_v60 = vld [vmem:[#allocation2 + $0xb4] sm:$0xff]  ;;  %v2041_v1 = vld [vmem:[#allocation2 + $0xe0] sm:$0xff]  ;;  %2488 = vrot.lane.b32.xlu0 %v2395_v17, %s9834_s25  ;;  %2199 = vrot.lane.b32.xlu1 %v2106_v49, %s9834_s25 }
 0x15b   : > { %2366 = vst.msk [vmem:[#allocation10 + $0x7e8] sm:$0xff] %vm495_vm0, %v2330_v41  ;;  %2077 = vst.msk [vmem:[#allocation10 + $0x7e0] sm:$0xff] %vm495_vm0, %v2041_v1  ;;  %v11778_v13 = vld [vmem:[#allocation2 + $0xbc] sm:$0xff]  ;;  %v2331_v39 = vld [vmem:[#allocation2 + $0xea] sm:$0xff] }
 0x15c   : > { %2932 = vst.msk [vmem:[#allocation10 + $0x528] sm:$0xff] %vm495_vm0, %v11772_v60  ;;  %v2107_v9 = vld [vmem:[#allocation2 + $0xb1] sm:$0xff]  ;;  %2367 = vst.msk [vmem:[#allocation10 + $0x830] sm:$0xff] %vm495_vm0, %v2331_v39  ;;  %v2042_v47 = vld [vmem:[#allocation2 + $0xe8] sm:$0xff] }
 0x15d   : > { %v11783_v58 = vld [vmem:[#allocation2 + $0xc4] sm:$0xff]  ;;  %2933 = vst.msk [vmem:[#allocation10 + $0x570] sm:$0xff] %vm495_vm0, %v11778_v13  ;;  %2078 = vst.msk [vmem:[#allocation10 + $0x828] sm:$0xff] %vm495_vm0, %v2042_v47  ;;  %v2332_v17 = vld [vmem:[#allocation2 + $0xf2] sm:$0xff] }
 0x15e   : > { %v2396_v49 = vld [vmem:[#allocation2 + $0xc2] sm:$0xff]  ;;  %v2043_v41 = vld [vmem:[#allocation2 + $0xf0] sm:$0xff]  ;;  %2934 = vst.msk [vmem:[#allocation10 + $0x5b8] sm:$0xff] %vm495_vm0, %v11783_v58  ;;  %2368 = vst.msk [vmem:[#allocation10 + $0x878] sm:$0xff] %vm495_vm0, %v2332_v17  ;;  %2201 = vrot.lane.b32.xlu1 %v2107_v9, %s9834_s25 }
 0x15f   : > { %2079 = vst.msk [vmem:[#allocation10 + $0x870] sm:$0xff] %vm495_vm0, %v2043_v41  ;;  %v11792_v1 = vld [vmem:[#allocation2 + $0xcc] sm:$0xff]  ;;  %v2333_v39 = vld [vmem:[#allocation2 + $0xfa] sm:$0xff]  ;;  %2490 = vrot.lane.b32.xlu0 %v2396_v49, %s9834_s25  ;;  %v2334_v38 = vld [vmem:[#allocation2 + $0x102] sm:$0xff] }
 0x160   : > { %v2044_v40 = vld [vmem:[#allocation2 + $0xf8] sm:$0xff]  ;;  %2369 = vst.msk [vmem:[#allocation10 + $0x8c0] sm:$0xff] %vm495_vm0, %v2333_v39  ;;  %2935 = vst.msk [vmem:[#allocation10 + $0x600] sm:$0xff] %vm495_vm0, %v11792_v1  ;;  %v2045_v17 = vld [vmem:[#allocation2 + $0x100] sm:$0xff] }
 0x161   : > { %2080 = vst.msk [vmem:[#allocation10 + $0x8b8] sm:$0xff] %vm495_vm0, %v2044_v40  ;;  %v11798_v47 = vld [vmem:[#allocation2 + $0xd4] sm:$0xff]  ;;  %2370 = vst.msk [vmem:[#allocation10 + $0x908] sm:$0xff] %vm495_vm0, %v2334_v38  ;;  %v11806_v9 = vld [vmem:[#allocation2 + $0xdc] sm:$0xff] }
 0x162   : > { %2936 = vst.msk [vmem:[#allocation10 + $0x648] sm:$0xff] %vm495_vm0, %v11798_v47  ;;  %v2108_v41 = vld [vmem:[#allocation2 + $0xb9] sm:$0xff]  ;;  %2081 = vst.msk [vmem:[#allocation10 + $0x900] sm:$0xff] %vm495_vm0, %v2045_v17  ;;  %v2335_v49 = vld [vmem:[#allocation2 + $0x10a] sm:$0xff] }
 0x163   : > { %v2397_v39 = vld [vmem:[#allocation2 + $0xca] sm:$0xff]  ;;  %2371 = vst.msk [vmem:[#allocation10 + $0x950] sm:$0xff] %vm495_vm0, %v2335_v49  ;;  %2937 = vst.msk [vmem:[#allocation10 + $0x690] sm:$0xff] %vm495_vm0, %v11806_v9  ;;  %2203 = vrot.lane.b32.xlu1 %v2108_v41, %s9834_s25  ;;  %v2336_v38 = vld [vmem:[#allocation2 + $0x112] sm:$0xff] }
 0x164   : > { %v2046_v40 = vld [vmem:[#allocation2 + $0x108] sm:$0xff]  ;;  %2492 = vrot.lane.b32.xlu0 %v2397_v39, %s9834_s25  ;;  %v2047_v17 = vld [vmem:[#allocation2 + $0x110] sm:$0xff]  ;;  %2372 = vst.msk [vmem:[#allocation10 + $0x998] sm:$0xff] %vm495_vm0, %v2336_v38  ;;  %v2337_v16 = vld [vmem:[#allocation2 + $0x11a] sm:$0xff] }
 0x165   : > { %v11809_v59 = vld [vmem:[#allocation2 + $0xe4] sm:$0xff]  ;;  %2082 = vst.msk [vmem:[#allocation10 + $0x948] sm:$0xff] %vm495_vm0, %v2046_v40  ;;  %2083 = vst.msk [vmem:[#allocation10 + $0x990] sm:$0xff] %vm495_vm0, %v2047_v17  ;;  %v11820_v49 = vld [vmem:[#allocation2 + $0xec] sm:$0xff] }
 0x166   : > { %2938 = vst.msk [vmem:[#allocation10 + $0x6d8] sm:$0xff] %vm495_vm0, %v11809_v59  ;;  %v2048_v31 = vld [vmem:[#allocation2 + $0x118] sm:$0xff]  ;;  %v2109_v21 = vld [vmem:[#allocation2 + $0xc1] sm:$0xff]  ;;  %2373 = vst.msk [vmem:[#allocation10 + $0x9e0] sm:$0xff] %vm495_vm0, %v2337_v16 }
 0x167   : > { %2084 = vst.msk [vmem:[#allocation10 + $0x9d8] sm:$0xff] %vm495_vm0, %v2048_v31  ;;  %v11824_v41 = vld [vmem:[#allocation2 + $0xf4] sm:$0xff]  ;;  %2939 = vst.msk [vmem:[#allocation10 + $0x720] sm:$0xff] %vm495_vm0, %v11820_v49  ;;  %v11828_v40 = vld [vmem:[#allocation2 + $0xfc] sm:$0xff]  ;;  %2205 = vrot.lane.b32.xlu1 %v2109_v21, %s9834_s25 }
 0x168   : > { %v2398_v39 = vld [vmem:[#allocation2 + $0xd2] sm:$0xff]  ;;  %v11830_v38 = vld [vmem:[#allocation2 + $0x104] sm:$0xff]  ;;  %2940 = vst.msk [vmem:[#allocation10 + $0x768] sm:$0xff] %vm495_vm0, %v11824_v41  ;;  %2941 = vst.msk [vmem:[#allocation10 + $0x7b0] sm:$0xff] %vm495_vm0, %v11828_v40 }
 0x169   : > { %2494 = vrot.lane.b32.xlu0 %v2398_v39, %s9834_s25  ;;  %v2592_v16 = vld [vmem:[#allocation2 + $0x23] sm:$0xff]  ;;  %v11836_v17 = vld [vmem:[#allocation2 + $0x10c] sm:$0xff]  ;;  %2942 = vst.msk [vmem:[#allocation10 + $0x7f8] sm:$0xff] %vm495_vm0, %v11830_v38  ;;  %v11846_v39 = vld [vmem:[#allocation2 + $0x114] sm:$0xff] }
 0x16a   : > { %2628 = vst.msk [vmem:[#allocation10 + $0xa0] sm:$0xff] %vm495_vm0, %v2592_v16  ;;  %v2593_v31 = vld [vmem:[#allocation2 + $0x2b] sm:$0xff]  ;;  %2943 = vst.msk [vmem:[#allocation10 + $0x840] sm:$0xff] %vm495_vm0, %v11836_v17  ;;  %v2594_v21 = vld [vmem:[#allocation2 + $0x33] sm:$0xff] }
 0x16b   : > { %v2110_v50 = vld [vmem:[#allocation2 + $0xc9] sm:$0xff]  ;;  %2629 = vst.msk [vmem:[#allocation10 + $0xe8] sm:$0xff] %vm495_vm0, %v2593_v31  ;;  %v2399_v33 = vld [vmem:[#allocation2 + $0xda] sm:$0xff]  ;;  %2630 = vst.msk [vmem:[#allocation10 + $0x130] sm:$0xff] %vm495_vm0, %v2594_v21 }
 0x16c   : > { %v11849_v29 = vld [vmem:[#allocation2 + $0x11c] sm:$0xff]  ;;  %2944 = vst.msk [vmem:[#allocation10 + $0x888] sm:$0xff] %vm495_vm0, %v11846_v39  ;;  %2207 = vrot.lane.b32.xlu1 %v2110_v50, %s9834_s25  ;;  %v11856_v16 = vld [vmem:[#allocation2 + $0x124] sm:$0xff]  ;;  %v11858_v26 = vld [vmem:[#allocation2 + $0x12c] sm:$0xff] }
 0x16d   : > { %v2595_v22 = vld [vmem:[#allocation2 + $0x3b] sm:$0xff]  ;;  %2496 = vrot.lane.b32.xlu0 %v2399_v33, %s9834_s25  ;;  %v2596_v31 = vld [vmem:[#allocation2 + $0x43] sm:$0xff]  ;;  %2945 = vst.msk [vmem:[#allocation10 + $0x8d0] sm:$0xff] %vm495_vm0, %v11849_v29  ;;  %v2111_v23 = vld [vmem:[#allocation2 + $0xd1] sm:$0xff] }
 0x16e   : > { %2631 = vst.msk [vmem:[#allocation10 + $0x178] sm:$0xff] %vm495_vm0, %v2595_v22  ;;  %v2400_v21 = vld [vmem:[#allocation2 + $0xe2] sm:$0xff]  ;;  %2632 = vst.msk [vmem:[#allocation10 + $0x1c0] sm:$0xff] %vm495_vm0, %v2596_v31  ;;  %v2597_v4 = vld [vmem:[#allocation2 + $0x4b] sm:$0xff] }
 0x16f   : > { %v2598_v25 = vld [vmem:[#allocation2 + $0x53] sm:$0xff]  ;;  %v2599_v7 = vld [vmem:[#allocation2 + $0x5b] sm:$0xff]  ;;  %2946 = vst.msk [vmem:[#allocation10 + $0x918] sm:$0xff] %vm495_vm0, %v11856_v16  ;;  %2947 = vst.msk [vmem:[#allocation10 + $0x960] sm:$0xff] %vm495_vm0, %v11858_v26 }
 0x170   : > { %2633 = vst.msk [vmem:[#allocation10 + $0x208] sm:$0xff] %vm495_vm0, %v2597_v4  ;;  %2634 = vst.msk [vmem:[#allocation10 + $0x250] sm:$0xff] %vm495_vm0, %v2598_v25  ;;  %v2600_v22 = vld [vmem:[#allocation2 + $0x63] sm:$0xff]  ;;  %v2601_v33 = vld [vmem:[#allocation2 + $0x6b] sm:$0xff]  ;;  %2209 = vrot.lane.b32.xlu1 %v2111_v23, %s9834_s25 }
 0x171   : > { %2635 = vst.msk [vmem:[#allocation10 + $0x298] sm:$0xff] %vm495_vm0, %v2599_v7  ;;  %v2602_v50 = vld [vmem:[#allocation2 + $0x73] sm:$0xff]  ;;  %2636 = vst.msk [vmem:[#allocation10 + $0x2e0] sm:$0xff] %vm495_vm0, %v2600_v22  ;;  %v2603_v31 = vld [vmem:[#allocation2 + $0x7b] sm:$0xff]  ;;  %2498 = vrot.lane.b32.xlu0 %v2400_v21, %s9834_s25 }
 0x172   : > { %2637 = vst.msk [vmem:[#allocation10 + $0x328] sm:$0xff] %vm495_vm0, %v2601_v33  ;;  %2638 = vst.msk [vmem:[#allocation10 + $0x370] sm:$0xff] %vm495_vm0, %v2602_v50  ;;  %v2604_v51 = vld [vmem:[#allocation2 + $0x83] sm:$0xff]  ;;  %v2605_v36 = vld [vmem:[#allocation2 + $0x8b] sm:$0xff] }
 0x173   : > { %2639 = vst.msk [vmem:[#allocation10 + $0x3b8] sm:$0xff] %vm495_vm0, %v2603_v31  ;;  %2640 = vst.msk [vmem:[#allocation10 + $0x400] sm:$0xff] %vm495_vm0, %v2604_v51  ;;  %v2606_v7 = vld [vmem:[#allocation2 + $0x93] sm:$0xff]  ;;  %v2607_v25 = vld [vmem:[#allocation2 + $0x9b] sm:$0xff] }
 0x174   : > { %2641 = vst.msk [vmem:[#allocation10 + $0x448] sm:$0xff] %vm495_vm0, %v2605_v36  ;;  %v2608_v4 = vld [vmem:[#allocation2 + $0xa3] sm:$0xff]  ;;  %2642 = vst.msk [vmem:[#allocation10 + $0x490] sm:$0xff] %vm495_vm0, %v2606_v7  ;;  %v2609_v22 = vld [vmem:[#allocation2 + $0xab] sm:$0xff] }
 0x175   : > { %2643 = vst.msk [vmem:[#allocation10 + $0x4d8] sm:$0xff] %vm495_vm0, %v2607_v25  ;;  %2644 = vst.msk [vmem:[#allocation10 + $0x520] sm:$0xff] %vm495_vm0, %v2608_v4  ;;  %v2610_v33 = vld [vmem:[#allocation2 + $0xb3] sm:$0xff]  ;;  %v2611_v21 = vld [vmem:[#allocation2 + $0xbb] sm:$0xff] }
 0x176   : > { %2645 = vst.msk [vmem:[#allocation10 + $0x568] sm:$0xff] %vm495_vm0, %v2609_v22  ;;  %2646 = vst.msk [vmem:[#allocation10 + $0x5b0] sm:$0xff] %vm495_vm0, %v2610_v33  ;;  %v2612_v51 = vld [vmem:[#allocation2 + $0xc3] sm:$0xff]  ;;  %v2613_v36 = vld [vmem:[#allocation2 + $0xcb] sm:$0xff] }
 0x177   : > { %2647 = vst.msk [vmem:[#allocation10 + $0x5f8] sm:$0xff] %vm495_vm0, %v2611_v21  ;;  %v2614_v23 = vld [vmem:[#allocation2 + $0xd3] sm:$0xff]  ;;  %v2401_v50 = vld [vmem:[#allocation2 + $0xea] sm:$0xff]  ;;  %2648 = vst.msk [vmem:[#allocation10 + $0x640] sm:$0xff] %vm495_vm0, %v2612_v51 }
 0x178   : > { %v2112_v31 = vld [vmem:[#allocation2 + $0xd9] sm:$0xff]  ;;  %2649 = vst.msk [vmem:[#allocation10 + $0x688] sm:$0xff] %vm495_vm0, %v2613_v36  ;;  %2650 = vst.msk [vmem:[#allocation10 + $0x6d0] sm:$0xff] %vm495_vm0, %v2614_v23  ;;  %2500 = vrot.lane.b32.xlu0 %v2401_v50, %s9834_s25  ;;  %v2616_v25 = vld [vmem:[#allocation2 + $0xe3] sm:$0xff] }
 0x179   : > { %v2615_v7 = vld [vmem:[#allocation2 + $0xdb] sm:$0xff]  ;;  %2211 = vrot.lane.b32.xlu1 %v2112_v31, %s9834_s25  ;;  %v2617_v4 = vld [vmem:[#allocation2 + $0xeb] sm:$0xff]  ;;  %v2618_v22 = vld [vmem:[#allocation2 + $0xf3] sm:$0xff]  ;;  %2652 = vst.msk [vmem:[#allocation10 + $0x760] sm:$0xff] %vm495_vm0, %v2616_v25 }
 0x17a   : > { %2651 = vst.msk [vmem:[#allocation10 + $0x718] sm:$0xff] %vm495_vm0, %v2615_v7  ;;  %2653 = vst.msk [vmem:[#allocation10 + $0x7a8] sm:$0xff] %vm495_vm0, %v2617_v4  ;;  %v2619_v33 = vld [vmem:[#allocation2 + $0xfb] sm:$0xff]  ;;  %v2620_v21 = vld [vmem:[#allocation2 + $0x103] sm:$0xff]  ;;  %v2449_v4 = vpop.permute.xlu1 %2448 }
 0x17b   : > { %2654 = vst.msk [vmem:[#allocation10 + $0x7f0] sm:$0xff] %vm495_vm0, %v2618_v22  ;;  %v2621_v51 = vld [vmem:[#allocation2 + $0x10b] sm:$0xff]  ;;  %2655 = vst.msk [vmem:[#allocation10 + $0x838] sm:$0xff] %vm495_vm0, %v2619_v33  ;;  %v2622_v36 = vld [vmem:[#allocation2 + $0x113] sm:$0xff]  ;;  %v2447_v22 = vpop.permute.xlu0 %2446 }
 0x17c   : > { %2656 = vst.msk [vmem:[#allocation10 + $0x880] sm:$0xff] %vm495_vm0, %v2620_v21  ;;  %2657 = vst.msk [vmem:[#allocation10 + $0x8c8] sm:$0xff] %vm495_vm0, %v2621_v51  ;;  %v2623_v23 = vld [vmem:[#allocation2 + $0x11b] sm:$0xff]  ;;  %v2624_v50 = vld [vmem:[#allocation2 + $0x123] sm:$0xff] }
 0x17d   : > { %v2402_v31 = vld [vmem:[#allocation2 + $0xf2] sm:$0xff]  ;;  %v2113_v7 = vld [vmem:[#allocation2 + $0xe1] sm:$0xff]  ;;  %2658 = vst.msk [vmem:[#allocation10 + $0x910] sm:$0xff] %vm495_vm0, %v2622_v36  ;;  %2659 = vst.msk [vmem:[#allocation10 + $0x958] sm:$0xff] %vm495_vm0, %v2623_v23 }
 0x17e   : > { %2660 = vst.msk [vmem:[#allocation10 + $0x9a0] sm:$0xff] %vm495_vm0, %v2624_v50  ;;  %v2625_v25 = vld [vmem:[#allocation2 + $0x12b] sm:$0xff]  ;;  %2502 = vrot.lane.b32.xlu0 %v2402_v31, %s9834_s25  ;;  %2213 = vrot.lane.b32.xlu1 %v2113_v7, %s9834_s25  ;;  %v2403_v33 = vld [vmem:[#allocation2 + $0xfa] sm:$0xff]  ;;  %v2160_v51 = vpop.permute.xlu1 %2159  ;;  %v2404_v23 = vld [vmem:[#allocation2 + $0x102] sm:$0xff] }
 0x17f   : > { %2661 = vst.msk [vmem:[#allocation10 + $0x9e8] sm:$0xff] %vm495_vm0, %v2625_v25  ;;  %v2114_v21 = vld [vmem:[#allocation2 + $0xe9] sm:$0xff]  ;;  %v2158_v36 = vpop.permute.xlu0 %2157  ;;  %v2115_v50 = vld [vmem:[#allocation2 + $0xf1] sm:$0xff]  ;;  %v3450_v31 = vld [vmem:[%s14829_s3 + $0x100] sm:$0xff] }
 0x180   : > { %2555 = vst.msk [vmem:[#allocation10 + $0x50] sm:$0xff] %vm2265_vm1, %v2449_v4  ;;  %2554 = vst.msk [vmem:[#allocation10 + $0x8] sm:$0xff] %vm2265_vm1, %v2447_v22  ;;  %v3451_v7 = vld [vmem:[%s14829_s3 + $0x108] sm:$0xff]  ;;  %v3452_v3 = vld [vmem:[%s14829_s3 + $0x110] sm:$0xff] }
 0x181   : > { %2267 = vst.msk [vmem:[#allocation10 + $0x48] sm:$0xff] %vm2265_vm1, %v2160_v51  ;;  %2266 = vst.msk [vmem:[#allocation10] sm:$0xff] %vm2265_vm1, %v2158_v36  ;;  %v9055_v51 = vpack.c.bf16 %v3451_v7, %v3450_v31  ;;  %v2117_v7 = vld [vmem:[#allocation2 + $0x101] sm:$0xff] }
 0x182   : > { %2504 = vrot.lane.b32.xlu0 %v2403_v33, %s9834_s25  ;;  %2215 = vrot.lane.b32.xlu1 %v2114_v21, %s9834_s25  ;;  %v2162_v4 = vpop.permute.xlu1 %2161  ;;  %v2405_v33 = vld [vmem:[#allocation2 + $0x10a] sm:$0xff]  ;;  %v2116_v21 = vld [vmem:[#allocation2 + $0xf9] sm:$0xff] }
 0x183   : > { %v2451_v25 = vpop.permute.xlu0 %2450  ;;  %2268 = vst.msk [vmem:[#allocation10 + $0x90] sm:$0xff] %vm2265_vm1, %v2162_v4  ;;  %v2406_v4 = vld [vmem:[#allocation2 + $0x112] sm:$0xff] }
 0x184   : > { %2556 = vst.msk [vmem:[#allocation10 + $0x98] sm:$0xff] %vm2265_vm1, %v2451_v25  ;;  %v3453_v25 = vld [vmem:[%s14829_s3 + $0x118] sm:$0xff] }
 0x186   : > { %2506 = vrot.lane.b32.xlu0 %v2404_v23, %s9834_s25  ;;  %2217 = vrot.lane.b32.xlu1 %v2115_v50, %s9834_s25  ;;  %v2164_v23 = vpop.permute.xlu1 %2163 }
 0x187   : > { %v3239_v22 = vld [vmem:[#allocation10 + $0x8] sm:$0xff]  ;;  %v2453_v36 = vpop.permute.xlu0 %2452  ;;  %2269 = vst.msk [vmem:[#allocation10 + $0xd8] sm:$0xff] %vm2265_vm1, %v2164_v23  ;;  %v3244_v31 = vld [vmem:[#allocation10 + $0x50] sm:$0xff]  ;;  %v2407_v23 = vld [vmem:[#allocation2 + $0x11a] sm:$0xff] }
 0x188   : > { %3669 = vmatprep.mubr.f32.mxu1 %v3239_v22  ;;  %v3238_v50 = vld [vmem:[#allocation10] sm:$0xff]  ;;  %2557 = vst.msk [vmem:[#allocation10 + $0xe0] sm:$0xff] %vm2265_vm1, %v2453_v36  ;;  %v3243_v22 = vld [vmem:[#allocation10 + $0x48] sm:$0xff] }
 0x189   : > { %3670 = vmatmul.mubr.f32.vlgmr.msra.gmra.mrb[0].mxu1 %v3238_v50  ;;  %v3454_v36 = vld [vmem:[%s14829_s3 + $0x120] sm:$0xff] }
 0x18a   : > { %2508 = vrot.lane.b32.xlu0 %v2405_v33, %s9834_s25  ;;  %2219 = vrot.lane.b32.xlu1 %v2116_v21, %s9834_s25  ;;  %v9058_v33 = vpack.c.bf16 %v3453_v25, %v3452_v3  ;;  %v2166_v20 = vpop.permute.xlu1 %2165  ;;  %v2118_v3 = vld [vmem:[#allocation2 + $0x109] sm:$0xff] }
 0x18b   : > { %9056 = vmatpush1.bf16.msra.mxu1 %v9055_v51  ;;  %3674 = vmatprep.mubr.f32.mxu1 %v3244_v31  ;;  %v2455_v21 = vpop.permute.xlu0 %2454  ;;  %v3249_v42 = vld [vmem:[#allocation10 + $0x98] sm:$0xff]  ;;  %v3455_v51 = vld [vmem:[%s14829_s3 + $0x128] sm:$0xff]  ;;  %2270 = vst.msk [vmem:[#allocation10 + $0x120] sm:$0xff] %vm2265_vm1, %v2166_v20  ;;  %v3456_v25 = vld [vmem:[%s14829_s3 + $0x130] sm:$0xff] }
 0x18c   : > { %9057 = vmatprep.subr.bf16.mxu1 %v15057_v10  ;;  %2558 = vst.msk [vmem:[#allocation10 + $0x128] sm:$0xff] %vm2265_vm1, %v2455_v21  ;;  %v9061_v50 = vpack.c.bf16 %v3455_v51, %v3454_v36  ;;  %v3457_v20 = vld [vmem:[%s14829_s3 + $0x138] sm:$0xff]  ;;  %v3458_v36 = vld [vmem:[%s14829_s3 + $0x140] sm:$0xff] }
 0x18d   : > { %3675 = vmatmul.mubr.f32.gmra.mrb[2].mxu1 %v3243_v22  ;;  %v2119_v22 = vld [vmem:[#allocation2 + $0x111] sm:$0xff] }
 0x18e   : > { %2510 = vrot.lane.b32.xlu0 %v2406_v4, %s9834_s25  ;;  %2221 = vrot.lane.b32.xlu1 %v2117_v7, %s9834_s25  ;;  %v2168_v31 = vpop.permute.xlu1 %2167  ;;  %v3248_v7 = vld [vmem:[#allocation10 + $0x90] sm:$0xff] }
 0x18f   : > { %3679 = vmatprep.mubr.f32.mxu1 %v3249_v42  ;;  %9059 = vmatpush1.bf16.msra.mxu1 %v9058_v33  ;;  %v2457_v4 = vpop.permute.xlu0 %2456  ;;  %v3254_v21 = vld [vmem:[#allocation10 + $0xe0] sm:$0xff]  ;;  %2271 = vst.msk [vmem:[#allocation10 + $0x168] sm:$0xff] %vm2265_vm1, %v2168_v31  ;;  %v9064_v33 = vpack.c.bf16 %v3457_v20, %v3456_v25  ;;  %v3459_v31 = vld [vmem:[%s14829_s3 + $0x148] sm:$0xff] }
 0x190   : > { %9060 = vmatprep.subr.bf16.mxu1 %v15057_v10  ;;  %2559 = vst.msk [vmem:[#allocation10 + $0x170] sm:$0xff] %vm2265_vm1, %v2457_v4  ;;  %v2408_v42 = vld [vmem:[#allocation2 + $0x122] sm:$0xff]  ;;  %v2120_v25 = vld [vmem:[#allocation2 + $0x119] sm:$0xff] }
 0x191   : > { %3680 = vmatmul.mubr.f32.gmra.mrb[4].mxu1 %v3248_v7  ;;  %v9067_v7 = vpack.c.bf16 %v3459_v31, %v3458_v36  ;;  %v2662_v36 = vld [vmem:[#allocation2 + $0x14] sm:$0xff] }
 0x192   : > { %2512 = vrot.lane.b32.xlu0 %v2407_v23, %s9834_s25  ;;  %2223 = vrot.lane.b32.xlu1 %v2118_v3, %s9834_s25  ;;  %v2170_v23 = vpop.permute.xlu1 %2169  ;;  %v3253_v3 = vld [vmem:[#allocation10 + $0xd8] sm:$0xff] }
 0x193   : > { %3684 = vmatprep.mubr.f32.mxu1 %v3254_v21  ;;  %9062 = vmatpush1.bf16.msra.mxu1 %v9061_v50  ;;  %v2459_v51 = vpop.permute.xlu0 %2458  ;;  %v3259_v4 = vld [vmem:[#allocation10 + $0x128] sm:$0xff]  ;;  %2272 = vst.msk [vmem:[#allocation10 + $0x1b0] sm:$0xff] %vm2265_vm1, %v2170_v23  ;;  %v3460_v21 = vld [vmem:[%s14829_s3 + $0x150] sm:$0xff]  ;;  %v3461_v23 = vld [vmem:[%s14829_s3 + $0x158] sm:$0xff] }
 0x194   : > { %9063 = vmatprep.subr.bf16.mxu1 %v15057_v10  ;;  %2560 = vst.msk [vmem:[#allocation10 + $0x1b8] sm:$0xff] %vm2265_vm1, %v2459_v51  ;;  %v2409_v50 = vld [vmem:[#allocation2 + $0x12a] sm:$0xff] }
 0x195   : > { %3685 = vmatmul.mubr.f32.gmra.mrb[6].mxu1 %v3253_v3  ;;  %v9070_v3 = vpack.c.bf16 %v3461_v23, %v3460_v21  ;;  %v2663_v21 = vld [vmem:[#allocation2 + $0x1c] sm:$0xff] }
 0x196   : > { %2514 = vrot.lane.b32.xlu0 %v2408_v42, %s9834_s25  ;;  %2225 = vrot.lane.b32.xlu1 %v2119_v22, %s9834_s25  ;;  %v2172_v42 = vpop.permute.xlu1 %2171  ;;  %v3258_v22 = vld [vmem:[#allocation10 + $0x120] sm:$0xff] }
 0x197   : > { %3689 = vmatprep.mubr.f32.mxu1 %v3259_v4  ;;  %9065 = vmatpush1.bf16.msra.mxu1 %v9064_v33  ;;  %v2461_v20 = vpop.permute.xlu0 %2460  ;;  %v3264_v51 = vld [vmem:[#allocation10 + $0x170] sm:$0xff]  ;;  %2273 = vst.msk [vmem:[#allocation10 + $0x1f8] sm:$0xff] %vm2265_vm1, %v2172_v42  ;;  %v2950_v33 = vld [vmem:[#allocation2 + $0x25] sm:$0xff] }
 0x198   : > { %9066 = vmatprep.subr.bf16.mxu1 %v15057_v10  ;;  %2561 = vst.msk [vmem:[#allocation10 + $0x200] sm:$0xff] %vm2265_vm1, %v2461_v20  ;;  %v3462_v4 = vld [vmem:[%s14829_s3 + $0x160] sm:$0xff]  ;;  %v3463_v42 = vld [vmem:[%s14829_s3 + $0x168] sm:$0xff] }
 0x199   : > { %3690 = vmatmul.mubr.f32.gmra.mrb[8].mxu1 %v3258_v22  ;;  %v9073_v22 = vpack.c.bf16 %v3463_v42, %v3462_v4 }
 0x19a   : > { %2516 = vrot.lane.b32.xlu0 %v2409_v50, %s9834_s25  ;;  %2227 = vrot.lane.b32.xlu1 %v2120_v25, %s9834_s25  ;;  %v2174_v50 = vpop.permute.xlu1 %2173  ;;  %v3263_v25 = vld [vmem:[#allocation10 + $0x168] sm:$0xff] }
 0x19b   : > { %3694 = vmatprep.mubr.f32.mxu1 %v3264_v51  ;;  %9068 = vmatpush1.bf16.msra.mxu1 %v9067_v7  ;;  %v2463_v31 = vpop.permute.xlu0 %2462  ;;  %v3269_v20 = vld [vmem:[#allocation10 + $0x1b8] sm:$0xff]  ;;  %2274 = vst.msk [vmem:[#allocation10 + $0x240] sm:$0xff] %vm2265_vm1, %v2174_v50  ;;  %v2951_v7 = vld [vmem:[#allocation2 + $0x2d] sm:$0xff] }
 0x19c   : > { %9069 = vmatprep.subr.bf16.mxu1 %v15057_v10  ;;  %2562 = vst.msk [vmem:[#allocation10 + $0x248] sm:$0xff] %vm2265_vm1, %v2463_v31  ;;  %v3464_v51 = vld [vmem:[%s14829_s3 + $0x170] sm:$0xff]  ;;  %v3465_v50 = vld [vmem:[%s14829_s3 + $0x178] sm:$0xff] }
 0x19d   : > { %3695 = vmatmul.mubr.f32.gmra.mrb[10].mxu1 %v3263_v25  ;;  %v9076_v4 = vpack.c.bf16 %v3465_v50, %v3464_v51  ;;  %v3466_v25 = vld [vmem:[%s14829_s3 + $0x180] sm:$0xff]  ;;  %v3468_v51 = vld [vmem:[%s14829_s3 + $0x190] sm:$0xff] }
 0x19e   : > { %3022 = vrot.lane.b32.xlu0 %v2950_v33, %s9834_s25  ;;  %2734 = vrot.lane.b32.xlu1 %v2662_v36, %s9834_s25  ;;  %v2176_v33 = vpop.permute.xlu1 %2175  ;;  %v3268_v36 = vld [vmem:[#allocation10 + $0x1b0] sm:$0xff] }
 0x19f   : > { %3699 = vmatprep.mubr.f32.mxu1 %v3269_v20  ;;  %9071 = vmatpush1.bf16.msra.mxu1 %v9070_v3  ;;  %v2465_v23 = vpop.permute.xlu0 %2464  ;;  %v3274_v31 = vld [vmem:[#allocation10 + $0x200] sm:$0xff]  ;;  %2275 = vst.msk [vmem:[#allocation10 + $0x288] sm:$0xff] %vm2265_vm1, %v2176_v33  ;;  %v2952_v3 = vld [vmem:[#allocation2 + $0x35] sm:$0xff] }
 0x1a0   : > { %9072 = vmatprep.subr.bf16.mxu1 %v15057_v10  ;;  %2563 = vst.msk [vmem:[#allocation10 + $0x290] sm:$0xff] %vm2265_vm1, %v2465_v23  ;;  %v3467_v23 = vld [vmem:[%s14829_s3 + $0x188] sm:$0xff] }
 0x1a1   : > { %3700 = vmatmul.mubr.f32.gmra.mrb[12].mxu1 %v3268_v36 }
 0x1a2   : > { %3024 = vrot.lane.b32.xlu0 %v2951_v7, %s9834_s25  ;;  %2736 = vrot.lane.b32.xlu1 %v2663_v21, %s9834_s25  ;;  %v2178_v42 = vpop.permute.xlu1 %2177  ;;  %v3273_v7 = vld [vmem:[#allocation10 + $0x1f8] sm:$0xff] }
 0x1a3   : > { %3704 = vmatprep.mubr.f32.mxu1 %v3274_v31  ;;  %9074 = vmatpush1.bf16.msra.mxu1 %v9073_v22  ;;  %v2467_v20 = vpop.permute.xlu0 %2466  ;;  %v3279_v21 = vld [vmem:[#allocation10 + $0x248] sm:$0xff]  ;;  %2276 = vst.msk [vmem:[#allocation10 + $0x2d0] sm:$0xff] %vm2265_vm1, %v2178_v42  ;;  %v9079_v22 = vpack.c.bf16 %v3467_v23, %v3466_v25  ;;  %v3278_v31 = vld [vmem:[#allocation10 + $0x240] sm:$0xff] }
 0x1a4   : > { %9075 = vmatprep.subr.bf16.mxu1 %v15057_v10  ;;  %2564 = vst.msk [vmem:[#allocation10 + $0x2d8] sm:$0xff] %vm2265_vm1, %v2467_v20  ;;  %v3470_v25 = vld [vmem:[%s14829_s3 + $0x1a0] sm:$0xff]  ;;  %v9821_v20 = vld [vmem:[#allocation5] sm:$0xff] }
 0x1a5   : > { %3705 = vmatmul.mubr.f32.gmra.mrb[14].mxu1 %v3273_v7  ;;  %503 = vst.msk [vmem:[#allocation2 + $0x143] sm:$0x1f] %vm502_vm4, %v9821_v20 }
 0x1a6   : > { %3026 = vrot.lane.b32.xlu0 %v2952_v3, %s9834_s25  ;;  %2738 = vrot.lane.b32.xlu1 %v11109_v5, %s9834_s25  ;;  %v2953_v5 = vld [vmem:[#allocation2 + $0x3d] sm:$0xff]  ;;  %v2180_v36 = vpop.permute.xlu1 %2179 }
 0x1a7   : > { %3709 = vmatprep.mubr.f32.mxu1 %v3279_v21  ;;  %9077 = vmatpush1.bf16.msra.mxu1 %v9076_v4  ;;  %v2469_v33 = vpop.permute.xlu0 %2468  ;;  %v3284_v50 = vld [vmem:[#allocation10 + $0x290] sm:$0xff]  ;;  %v3469_v3 = vld [vmem:[%s14829_s3 + $0x198] sm:$0xff]  ;;  %2277 = vst.msk [vmem:[#allocation10 + $0x318] sm:$0xff] %vm2265_vm1, %v2180_v36  ;;  %v3283_v21 = vld [vmem:[#allocation10 + $0x288] sm:$0xff] }
 0x1a8   : > { %9078 = vmatprep.subr.bf16.mxu1 %v15057_v10  ;;  %2565 = vst.msk [vmem:[#allocation10 + $0x320] sm:$0xff] %vm2265_vm1, %v2469_v33  ;;  %v9082_v4 = vpack.c.bf16 %v3469_v3, %v3468_v51  ;;  %v3472_v51 = vld [vmem:[%s14829_s3 + $0x1b0] sm:$0xff]  ;;  %v3473_v3 = vld [vmem:[%s14829_s3 + $0x1b8] sm:$0xff] }
 0x1a9   : > { %3710 = vmatmul.mubr.f32.gmra.mrb[16].mxu1 %v3278_v31 }
 0x1aa   : > { %3028 = vrot.lane.b32.xlu0 %v2953_v5, %s9834_s25  ;;  %2740 = vrot.lane.b32.xlu1 %v11278_v63, %s9834_s25  ;;  %v2954_v63 = vld [vmem:[#allocation2 + $0x45] sm:$0xff]  ;;  %v2182_v7 = vpop.permute.xlu1 %2181  ;;  %v3288_v31 = vld [vmem:[#allocation10 + $0x2d0] sm:$0xff] }
 0x1ab   : > { %3714 = vmatprep.mubr.f32.mxu1 %v3284_v50  ;;  %9080 = vmatpush1.bf16.msra.mxu1 %v9079_v22  ;;  %v2471_v42 = vpop.permute.xlu0 %2470  ;;  %v3289_v23 = vld [vmem:[#allocation10 + $0x2d8] sm:$0xff]  ;;  %v3471_v5 = vld [vmem:[%s14829_s3 + $0x1a8] sm:$0xff]  ;;  %2278 = vst.msk [vmem:[#allocation10 + $0x360] sm:$0xff] %vm2265_vm1, %v2182_v7 }
 0x1ac   : > { %9081 = vmatprep.subr.bf16.mxu1 %v15057_v10  ;;  %2566 = vst.msk [vmem:[#allocation10 + $0x368] sm:$0xff] %vm2265_vm1, %v2471_v42  ;;  %v9085_v22 = vpack.c.bf16 %v3471_v5, %v3470_v25  ;;  %v3476_v5 = vld [vmem:[%s14829_s3 + $0x1d0] sm:$0xff] }
 0x1ad   : > { %3715 = vmatmul.mubr.f32.gmra.mrb[18].mxu1 %v3283_v21  ;;  %v3475_v21 = vld [vmem:[%s14829_s3 + $0x1c8] sm:$0xff] }
 0x1ae   : > { %3030 = vrot.lane.b32.xlu0 %v2954_v63, %s9834_s25  ;;  %2742 = vrot.lane.b32.xlu1 %v11361_v18, %s9834_s25  ;;  %v2955_v18 = vld [vmem:[#allocation2 + $0x4d] sm:$0xff]  ;;  %v2184_v36 = vpop.permute.xlu1 %2183  ;;  %v9088_v63 = vpack.c.bf16 %v3473_v3, %v3472_v51  ;;  %v3293_v42 = vld [vmem:[#allocation10 + $0x318] sm:$0xff] }
 0x1af   : > { %3719 = vmatprep.mubr.f32.mxu1 %v3289_v23  ;;  %9083 = vmatpush1.bf16.msra.mxu1 %v9082_v4  ;;  %v2473_v33 = vpop.permute.xlu0 %2472  ;;  %v3294_v50 = vld [vmem:[#allocation10 + $0x320] sm:$0xff]  ;;  %2279 = vst.msk [vmem:[#allocation10 + $0x3a8] sm:$0xff] %vm2265_vm1, %v2184_v36  ;;  %v3477_v36 = vld [vmem:[%s14829_s3 + $0x1d8] sm:$0xff] }
 0x1b0   : > { %9084 = vmatprep.subr.bf16.mxu1 %v15057_v10  ;;  %2567 = vst.msk [vmem:[#allocation10 + $0x3b0] sm:$0xff] %vm2265_vm1, %v2473_v33  ;;  %v3474_v4 = vld [vmem:[%s14829_s3 + $0x1c0] sm:$0xff] }
 0x1b1   : > { %3720 = vmatmul.mubr.f32.gmra.mrb[20].mxu1 %v3288_v31  ;;  %v9091_v23 = vpack.c.bf16 %v3475_v21, %v3474_v4  ;;  %v9094_v31 = vpack.c.bf16 %v3477_v36, %v3476_v5  ;;  %v3481_v5 = vld [vmem:[%s14829_s3 + $0x1f8] sm:$0xff] }
 0x1b2   : > { %3032 = vrot.lane.b32.xlu0 %v2955_v18, %s9834_s25  ;;  %2744 = vrot.lane.b32.xlu1 %v11409_v44, %s9834_s25  ;;  %v2956_v44 = vld [vmem:[#allocation2 + $0x55] sm:$0xff]  ;;  %v2186_v20 = vpop.permute.xlu1 %2185  ;;  %v3298_v51 = vld [vmem:[#allocation10 + $0x360] sm:$0xff] }
 0x1b3   : > { %3724 = vmatprep.mubr.f32.mxu1 %v3294_v50  ;;  %9086 = vmatpush1.bf16.msra.mxu1 %v9085_v22  ;;  %v2475_v25 = vpop.permute.xlu0 %2474  ;;  %v3299_v7 = vld [vmem:[#allocation10 + $0x368] sm:$0xff]  ;;  %2280 = vst.msk [vmem:[#allocation10 + $0x3f0] sm:$0xff] %vm2265_vm1, %v2186_v20  ;;  %v3478_v50 = vld [vmem:[%s14829_s3 + $0x1e0] sm:$0xff] }
 0x1b4   : > { %9087 = vmatprep.subr.bf16.mxu1 %v15057_v10  ;;  %2568 = vst.msk [vmem:[#allocation10 + $0x3f8] sm:$0xff] %vm2265_vm1, %v2475_v25  ;;  %v3479_v25 = vld [vmem:[%s14829_s3 + $0x1e8] sm:$0xff] }
 0x1b5   : > { %3725 = vmatmul.mubr.f32.gmra.mrb[22].mxu1 %v3293_v42  ;;  %v9097_v20 = vpack.c.bf16 %v3479_v25, %v3478_v50  ;;  %v3480_v42 = vld [vmem:[%s14829_s3 + $0x1f0] sm:$0xff] }
 0x1b6   : > { %3034 = vrot.lane.b32.xlu0 %v2956_v44, %s9834_s25  ;;  %2746 = vrot.lane.b32.xlu1 %v11457_v14, %s9834_s25  ;;  %v2957_v14 = vld [vmem:[#allocation2 + $0x5d] sm:$0xff]  ;;  %v2188_v22 = vpop.permute.xlu1 %2187 }
 0x1b7   : > { %3729 = vmatprep.mubr.f32.mxu1 %v3299_v7  ;;  %9089 = vmatpush1.bf16.msra.mxu1 %v9088_v63  ;;  %v2477_v18 = vpop.permute.xlu0 %2476  ;;  %v3304_v33 = vld [vmem:[#allocation10 + $0x3b0] sm:$0xff]  ;;  %2281 = vst.msk [vmem:[#allocation10 + $0x438] sm:$0xff] %vm2265_vm1, %v2188_v22  ;;  %v3303_v63 = vld [vmem:[#allocation10 + $0x3a8] sm:$0xff] }
 0x1b8   : > { %9090 = vmatprep.subr.bf16.mxu1 %v15057_v10  ;;  %2569 = vst.msk [vmem:[#allocation10 + $0x440] sm:$0xff] %vm2265_vm1, %v2477_v18  ;;  %v9100_v18 = vpack.c.bf16 %v3481_v5, %v3480_v42 }
 0x1b9   : > { %3730 = vmatmul.mubr.f32.gmra.mrb[24].mxu1 %v3298_v51 }
 0x1ba   : > { %3036 = vrot.lane.b32.xlu0 %v2957_v14, %s9834_s25  ;;  %2748 = vrot.lane.b32.xlu1 %v11525_v27, %s9834_s25  ;;  %v2958_v27 = vld [vmem:[#allocation2 + $0x65] sm:$0xff]  ;;  %v2190_v44 = vpop.permute.xlu1 %2189  ;;  %v3308_v14 = vld [vmem:[#allocation10 + $0x3f0] sm:$0xff] }
 0x1bb   : > { %3734 = vmatprep.mubr.f32.mxu1 %v3304_v33  ;;  %9092 = vmatpush1.bf16.msra.mxu1 %v9091_v23  ;;  %v2479_v3 = vpop.permute.xlu0 %2478  ;;  %v3309_v4 = vld [vmem:[#allocation10 + $0x3f8] sm:$0xff]  ;;  %2282 = vst.msk [vmem:[#allocation10 + $0x480] sm:$0xff] %vm2265_vm1, %v2190_v44  ;;  %v2962_v44 = vld [vmem:[#allocation2 + $0x85] sm:$0xff] }
 0x1bc   : > { %9093 = vmatprep.subr.bf16.mxu1 %v15057_v10  ;;  %2570 = vst.msk [vmem:[#allocation10 + $0x488] sm:$0xff] %vm2265_vm1, %v2479_v3 }
 0x1bd   : > { %3735 = vmatmul.mubr.f32.gmra.mrb[26].mxu1 %v3303_v63 }
 0x1be   : > { %3038 = vrot.lane.b32.xlu0 %v2958_v27, %s9834_s25  ;;  %2750 = vrot.lane.b32.xlu1 %v11615_v61, %s9834_s25  ;;  %v2959_v61 = vld [vmem:[#allocation2 + $0x6d] sm:$0xff]  ;;  %v2192_v21 = vpop.permute.xlu1 %2191  ;;  %v3313_v33 = vld [vmem:[#allocation10 + $0x438] sm:$0xff] }
 0x1bf   : > { %3739 = vmatprep.mubr.f32.mxu1 %v3309_v4  ;;  %9095 = vmatpush1.bf16.msra.mxu1 %v9094_v31  ;;  %v2481_v7 = vpop.permute.xlu0 %2480  ;;  %v3314_v23 = vld [vmem:[#allocation10 + $0x440] sm:$0xff]  ;;  %2283 = vst.msk [vmem:[#allocation10 + $0x4c8] sm:$0xff] %vm2265_vm1, %v2192_v21  ;;  %v2964_v21 = vld [vmem:[#allocation2 + $0x95] sm:$0xff] }
 0x1c0   : > { %9096 = vmatprep.subr.bf16.mxu1 %v15057_v10  ;;  %2571 = vst.msk [vmem:[#allocation10 + $0x4d0] sm:$0xff] %vm2265_vm1, %v2481_v7  ;;  %v2961_v27 = vld [vmem:[#allocation2 + $0x7d] sm:$0xff] }
 0x1c1   : > { %3740 = vmatmul.mubr.f32.gmra.mrb[28].mxu1 %v3308_v14 }
 0x1c2   : > { %3040 = vrot.lane.b32.xlu0 %v2959_v61, %s9834_s25  ;;  %2752 = vrot.lane.b32.xlu1 %v11651_v19, %s9834_s25  ;;  %v2960_v19 = vld [vmem:[#allocation2 + $0x75] sm:$0xff]  ;;  %v2194_v51 = vpop.permute.xlu1 %2193  ;;  %v3318_v50 = vld [vmem:[#allocation10 + $0x480] sm:$0xff]  ;;  %v2963_v61 = vld [vmem:[#allocation2 + $0x8d] sm:$0xff] }
 0x1c3   : > { %3744 = vmatprep.mubr.f32.mxu1 %v3314_v23  ;;  %9098 = vmatpush1.bf16.msra.mxu1 %v9097_v20  ;;  %v2483_v22 = vpop.permute.xlu0 %2482  ;;  %v3319_v36 = vld [vmem:[#allocation10 + $0x488] sm:$0xff]  ;;  %2284 = vst.msk [vmem:[#allocation10 + $0x510] sm:$0xff] %vm2265_vm1, %v2194_v51 }
 0x1c4   : > { %9099 = vmatprep.subr.bf16.mxu1 %v15057_v10  ;;  %2572 = vst.msk [vmem:[#allocation10 + $0x518] sm:$0xff] %vm2265_vm1, %v2483_v22 }
 0x1c5   : > { %3745 = vmatmul.mubr.f32.gmra.mrb[30].mxu1 %v3313_v33  ;;  %v2966_v33 = vld [vmem:[#allocation2 + $0xa5] sm:$0xff] }
 0x1c6   : > { %3042 = vrot.lane.b32.xlu0 %v2960_v19, %s9834_s25  ;;  %2754 = vrot.lane.b32.xlu1 %v11680_v28, %s9834_s25  ;;  %v2196_v31 = vpop.permute.xlu1 %2195  ;;  %v2965_v19 = vld [vmem:[#allocation2 + $0x9d] sm:$0xff] }
 0x1c7   : > { %3749 = vmatprep.mubr.f32.mxu1 %v3319_v36  ;;  %9101 = vmatpush1.bf16.msra.mxu1 %v9100_v18  ;;  %v2485_v28 = vpop.permute.xlu0 %2484  ;;  %v3324_v3 = vld [vmem:[#allocation10 + $0x4d0] sm:$0xff]  ;;  %2285 = vst.msk [vmem:[#allocation10 + $0x558] sm:$0xff] %vm2265_vm1, %v2196_v31 }
 0x1c8   : > { %2573 = vst.msk [vmem:[#allocation10 + $0x560] sm:$0xff] %vm2265_vm1, %v2485_v28  ;;  %v2967_v31 = vld [vmem:[#allocation2 + $0xad] sm:$0xff] }
 0x1c9   : > { %3750 = vmatmul.mubr.f32.gmra.mrb[32].mxu1 %v3318_v50 }
 0x1ca   : > { %3044 = vrot.lane.b32.xlu0 %v2961_v27, %s9834_s25  ;;  %2756 = vrot.lane.b32.xlu1 %v11694_v46, %s9834_s25  ;;  %v2198_v4 = vpop.permute.xlu1 %2197  ;;  %v3323_v46 = vld [vmem:[#allocation10 + $0x4c8] sm:$0xff]  ;;  %v3328_v7 = vld [vmem:[#allocation10 + $0x510] sm:$0xff] }
 0x1cb   : > { %3754 = vmatprep.mubr.f32.mxu1 %v3324_v3  ;;  %v2487_v63 = vpop.permute.xlu0 %2486  ;;  %v3329_v25 = vld [vmem:[#allocation10 + $0x518] sm:$0xff]  ;;  %2286 = vst.msk [vmem:[#allocation10 + $0x5a0] sm:$0xff] %vm2265_vm1, %v2198_v4 }
 0x1cc   : > { %2574 = vst.msk [vmem:[#allocation10 + $0x5a8] sm:$0xff] %vm2265_vm1, %v2487_v63  ;;  %v2968_v63 = vld [vmem:[#allocation2 + $0xb5] sm:$0xff] }
 0x1cd   : > { %3755 = vmatmul.mubr.f32.gmra.mrb[34].mxu1 %v3323_v46 }
 0x1ce   : > { %3046 = vrot.lane.b32.xlu0 %v2962_v44, %s9834_s25  ;;  %2758 = vrot.lane.b32.xlu1 %v11712_v12, %s9834_s25  ;;  %v2200_v42 = vpop.permute.xlu1 %2199  ;;  %v3333_v5 = vld [vmem:[#allocation10 + $0x558] sm:$0xff] }
 0x1cf   : > { %3759 = vmatprep.mubr.f32.mxu1 %v3329_v25  ;;  %v2489_v20 = vpop.permute.xlu0 %2488  ;;  %v3334_v12 = vld [vmem:[#allocation10 + $0x560] sm:$0xff]  ;;  %2287 = vst.msk [vmem:[#allocation10 + $0x5e8] sm:$0xff] %vm2265_vm1, %v2200_v42 }
 0x1d0   : > { %2575 = vst.msk [vmem:[#allocation10 + $0x5f0] sm:$0xff] %vm2265_vm1, %v2489_v20 }
 0x1d1   : > { %3760 = vmatmul.mubr.f32.gmra.mrb[36].mxu1 %v3328_v7 }
 0x1d2   : > { %3048 = vrot.lane.b32.xlu0 %v2963_v61, %s9834_s25  ;;  %2760 = vrot.lane.b32.xlu1 %v11716_v37, %s9834_s25  ;;  %v2202_v23 = vpop.permute.xlu1 %2201  ;;  %v3338_v51 = vld [vmem:[#allocation10 + $0x5a0] sm:$0xff] }
 0x1d3   : > { %3764 = vmatprep.mubr.f32.mxu1 %v3334_v12  ;;  %v2491_v14 = vpop.permute.xlu0 %2490  ;;  %v3339_v37 = vld [vmem:[#allocation10 + $0x5a8] sm:$0xff]  ;;  %2288 = vst.msk [vmem:[#allocation10 + $0x630] sm:$0xff] %vm2265_vm1, %v2202_v23  ;;  %v2969_v61 = vld [vmem:[#allocation2 + $0xbd] sm:$0xff] }
 0x1d4   : > { %2576 = vst.msk [vmem:[#allocation10 + $0x638] sm:$0xff] %vm2265_vm1, %v2491_v14  ;;  %v2970_v12 = vld [vmem:[#allocation2 + $0xc5] sm:$0xff] }
 0x1d5   : > { %3765 = vmatmul.mubr.f32.gmra.mrb[38].mxu1 %v3333_v5  ;;  %v2971_v5 = vld [vmem:[#allocation2 + $0xcd] sm:$0xff] }
 0x1d6   : > { %3050 = vrot.lane.b32.xlu0 %v2964_v21, %s9834_s25  ;;  %2762 = vrot.lane.b32.xlu1 %v11728_v0, %s9834_s25  ;;  %v2204_v22 = vpop.permute.xlu1 %2203  ;;  %v3343_v28 = vld [vmem:[#allocation10 + $0x5e8] sm:$0xff] }
 0x1d7   : > { %3769 = vmatprep.mubr.f32.mxu1 %v3339_v37  ;;  %v2493_v18 = vpop.permute.xlu0 %2492  ;;  %v3344_v0 = vld [vmem:[#allocation10 + $0x5f0] sm:$0xff]  ;;  %2289 = vst.msk [vmem:[#allocation10 + $0x678] sm:$0xff] %vm2265_vm1, %v2204_v22 }
 0x1d8   : > { %2577 = vst.msk [vmem:[#allocation10 + $0x680] sm:$0xff] %vm2265_vm1, %v2493_v18 }
 0x1d9   : > { %3770 = vmatmul.mubr.f32.gmra.mrb[40].mxu1 %v3338_v51 }
 0x1da   : > { %3052 = vrot.lane.b32.xlu0 %v2965_v19, %s9834_s25  ;;  %2764 = vrot.lane.b32.xlu1 %v11735_v35, %s9834_s25  ;;  %v2206_v27 = vpop.permute.xlu1 %2205  ;;  %v3348_v44 = vld [vmem:[#allocation10 + $0x630] sm:$0xff] }
 0x1db   : > { %3774 = vmatprep.mubr.f32.mxu1 %v3344_v0  ;;  %v2495_v36 = vpop.permute.xlu0 %2494  ;;  %v3349_v35 = vld [vmem:[#allocation10 + $0x638] sm:$0xff]  ;;  %2290 = vst.msk [vmem:[#allocation10 + $0x6c0] sm:$0xff] %vm2265_vm1, %v2206_v27 }
 0x1dc   : > { %2578 = vst.msk [vmem:[#allocation10 + $0x6c8] sm:$0xff] %vm2265_vm1, %v2495_v36  ;;  %v2972_v0 = vld [vmem:[#allocation2 + $0xd5] sm:$0xff] }
 0x1dd   : > { %3775 = vmatmul.mubr.f32.gmra.mrb[42].mxu1 %v3343_v28 }
 0x1de   : > { %3054 = vrot.lane.b32.xlu0 %v2966_v33, %s9834_s25  ;;  %2766 = vrot.lane.b32.xlu1 %v11744_v8, %s9834_s25  ;;  %v2208_v3 = vpop.permute.xlu1 %2207  ;;  %v3353_v25 = vld [vmem:[#allocation10 + $0x678] sm:$0xff] }
 0x1df   : > { %3779 = vmatprep.mubr.f32.mxu1 %v3349_v35  ;;  %v2497_v50 = vpop.permute.xlu0 %2496  ;;  %v3354_v8 = vld [vmem:[#allocation10 + $0x680] sm:$0xff]  ;;  %2291 = vst.msk [vmem:[#allocation10 + $0x708] sm:$0xff] %vm2265_vm1, %v2208_v3 }
 0x1e0   : > { %2579 = vst.msk [vmem:[#allocation10 + $0x710] sm:$0xff] %vm2265_vm1, %v2497_v50 }
 0x1e1   : > { %3780 = vmatmul.mubr.f32.gmra.mrb[44].mxu1 %v3348_v44 }
 0x1e2   : > { %3056 = vrot.lane.b32.xlu0 %v2967_v31, %s9834_s25  ;;  %2768 = vrot.lane.b32.xlu1 %v11749_v6, %s9834_s25  ;;  %v2210_v46 = vpop.permute.xlu1 %2209  ;;  %v3358_v7 = vld [vmem:[#allocation10 + $0x6c0] sm:$0xff] }
 0x1e3   : > { %3784 = vmatprep.mubr.f32.mxu1 %v3354_v8  ;;  %v2499_v4 = vpop.permute.xlu0 %2498  ;;  %v3359_v6 = vld [vmem:[#allocation10 + $0x6c8] sm:$0xff]  ;;  %2292 = vst.msk [vmem:[#allocation10 + $0x750] sm:$0xff] %vm2265_vm1, %v2210_v46  ;;  %v12146_v37 = vpop.f32.mrb[36].mxu0  ;;  %v2973_v31 = vld [vmem:[#allocation2 + $0xdd] sm:$0xff] }
 0x1e4   : > { %2580 = vst.msk [vmem:[#allocation10 + $0x758] sm:$0xff] %vm2265_vm1, %v2499_v4  ;;  %v12151_v19 = vpop.f32.mrb[37].mxu0  ;;  %v2974_v4 = vld [vmem:[#allocation2 + $0xe5] sm:$0xff] }
 0x1e5   : > { %3785 = vmatmul.mubr.f32.gmra.mrb[46].mxu1 %v3353_v25 }
 0x1e6   : > { %3058 = vrot.lane.b32.xlu0 %v2968_v63, %s9834_s25  ;;  %2770 = vrot.lane.b32.xlu1 %v11759_v30, %s9834_s25  ;;  %v3363_v23 = vld [vmem:[#allocation10 + $0x708] sm:$0xff] }
 0x1e7   : > { %3789 = vmatprep.mubr.f32.mxu1 %v3359_v6  ;;  %v3364_v30 = vld [vmem:[#allocation10 + $0x710] sm:$0xff]  ;;  %v12156_v33 = vpop.f32.mrb[38].mxu0 }
 0x1e9   : > { %3790 = vmatmul.mubr.f32.gmra.mrb[48].mxu1 %v3358_v7 }
 0x1ea   : > { %3060 = vrot.lane.b32.xlu0 %v2969_v61, %s9834_s25  ;;  %2772 = vrot.lane.b32.xlu1 %v11763_v57, %s9834_s25  ;;  %v2501_v20 = vpop.permute.xlu0 %2500  ;;  %v3368_v22 = vld [vmem:[#allocation10 + $0x750] sm:$0xff] }
 0x1eb   : > { %v2212_v42 = vpop.permute.xlu1 %2211  ;;  %2581 = vst.msk [vmem:[#allocation10 + $0x7a0] sm:$0xff] %vm2265_vm1, %v2501_v20  ;;  %3794 = vmatprep.mubr.f32.mxu1 %v3364_v30  ;;  %v3369_v57 = vld [vmem:[#allocation10 + $0x758] sm:$0xff] }
 0x1ec   : > { %2293 = vst.msk [vmem:[#allocation10 + $0x798] sm:$0xff] %vm2265_vm1, %v2212_v42  ;;  %v2975_v42 = vld [vmem:[#allocation2 + $0xed] sm:$0xff] }
 0x1ed   : > { %3795 = vmatmul.mubr.f32.gmra.mrb[50].mxu1 %v3363_v23  ;;  %v2976_v23 = vld [vmem:[#allocation2 + $0xf5] sm:$0xff] }
 0x1ee   : > { %3062 = vrot.lane.b32.xlu0 %v2970_v12, %s9834_s25  ;;  %2774 = vrot.lane.b32.xlu1 %v11772_v60, %s9834_s25 }
 0x1ef   : > { %3799 = vmatprep.mubr.f32.mxu1 %v3369_v57 }
 0x1f0   : > { %v2503_v21 = vpop.permute.xlu0 %2502  ;;  %v2214_v14 = vpop.permute.xlu1 %2213 }
 0x1f1   : > { %2582 = vst.msk [vmem:[#allocation10 + $0x7e8] sm:$0xff] %vm2265_vm1, %v2503_v21  ;;  %2294 = vst.msk [vmem:[#allocation10 + $0x7e0] sm:$0xff] %vm2265_vm1, %v2214_v14  ;;  %3800 = vmatmul.mubr.f32.gmra.mrb[52].mxu1 %v3368_v22 }
 0x1f2   : > { %3064 = vrot.lane.b32.xlu0 %v2971_v5, %s9834_s25  ;;  %2776 = vrot.lane.b32.xlu1 %v11778_v13, %s9834_s25  ;;  %v3374_v51 = vld [vmem:[#allocation10 + $0x7a0] sm:$0xff]  ;;  %v12160_v13 = vpop.f32.mrb[39].mxu0 }
 0x1f3   : > { %3804 = vmatprep.mubr.f32.mxu1 %v3374_v51  ;;  %v3373_v28 = vld [vmem:[#allocation10 + $0x798] sm:$0xff]  ;;  %v12165_v50 = vpop.f32.mrb[40].mxu0 }
 0x1f4   : > { %v2505_v60 = vpop.permute.xlu0 %2504  ;;  %v2216_v18 = vpop.permute.xlu1 %2215  ;;  %v2977_v51 = vld [vmem:[#allocation2 + $0xfd] sm:$0xff] }
 0x1f5   : > { %2583 = vst.msk [vmem:[#allocation10 + $0x830] sm:$0xff] %vm2265_vm1, %v2505_v60  ;;  %2295 = vst.msk [vmem:[#allocation10 + $0x828] sm:$0xff] %vm2265_vm1, %v2216_v18  ;;  %3805 = vmatmul.mubr.f32.gmra.mrb[54].mxu1 %v3373_v28 }
 0x1f6   : > { %3066 = vrot.lane.b32.xlu0 %v2972_v0, %s9834_s25  ;;  %2778 = vrot.lane.b32.xlu1 %v11783_v58, %s9834_s25  ;;  %v12169_v58 = vpop.f32.mrb[41].mxu0 }
 0x1f7   : > { %v12174_v46 = vpop.f32.mrb[42].mxu0 }
 0x1f8   : > { %v2507_v36 = vpop.permute.xlu0 %2506  ;;  %v2218_v27 = vpop.permute.xlu1 %2217  ;;  %v3379_v35 = vld [vmem:[#allocation10 + $0x7e8] sm:$0xff]  ;;  %v3378_v8 = vld [vmem:[#allocation10 + $0x7e0] sm:$0xff] }
 0x1f9   : > { %2584 = vst.msk [vmem:[#allocation10 + $0x878] sm:$0xff] %vm2265_vm1, %v2507_v36  ;;  %2296 = vst.msk [vmem:[#allocation10 + $0x870] sm:$0xff] %vm2265_vm1, %v2218_v27  ;;  %3809 = vmatprep.mubr.f32.mxu1 %v3379_v35 }
 0x1fa   : > { %3068 = vrot.lane.b32.xlu0 %v2973_v31, %s9834_s25  ;;  %2780 = vrot.lane.b32.xlu1 %v11792_v1, %s9834_s25  ;;  %v12178_v1 = vpop.f32.mrb[43].mxu0  ;;  %v2978_v31 = vld [vmem:[#allocation2 + $0x105] sm:$0xff] }
 0x1fb   : > { %3810 = vmatmul.mubr.f32.gmra.mrb[56].mxu1 %v3378_v8  ;;  %v12183_v7 = vpop.f32.mrb[44].mxu0 }
 0x1fc   : > { %v2509_v3 = vpop.permute.xlu0 %2508  ;;  %v2220_v44 = vpop.permute.xlu1 %2219  ;;  %v3384_v63 = vld [vmem:[#allocation10 + $0x830] sm:$0xff]  ;;  %v3383_v6 = vld [vmem:[#allocation10 + $0x828] sm:$0xff] }
 0x1fd   : > { %2585 = vst.msk [vmem:[#allocation10 + $0x8c0] sm:$0xff] %vm2265_vm1, %v2509_v3  ;;  %2297 = vst.msk [vmem:[#allocation10 + $0x8b8] sm:$0xff] %vm2265_vm1, %v2220_v44  ;;  %3814 = vmatprep.mubr.f32.mxu1 %v3384_v63 }
 0x1fe   : > { %3070 = vrot.lane.b32.xlu0 %v2974_v4, %s9834_s25  ;;  %2782 = vrot.lane.b32.xlu1 %v11798_v47, %s9834_s25  ;;  %v12187_v47 = vpop.f32.mrb[45].mxu0 }
 0x1ff   : > { %3815 = vmatmul.mubr.f32.gmra.mrb[58].mxu1 %v3383_v6  ;;  %v12192_v57 = vpop.f32.mrb[46].mxu0 }
 0x200   : > { %v2511_v25 = vpop.permute.xlu0 %2510  ;;  %v3389_v61 = vld [vmem:[#allocation10 + $0x878] sm:$0xff]  ;;  %v2222_v20 = vpop.permute.xlu1 %2221  ;;  %v3388_v12 = vld [vmem:[#allocation10 + $0x870] sm:$0xff] }
 0x201   : > { %2586 = vst.msk [vmem:[#allocation10 + $0x908] sm:$0xff] %vm2265_vm1, %v2511_v25  ;;  %2298 = vst.msk [vmem:[#allocation10 + $0x900] sm:$0xff] %vm2265_vm1, %v2222_v20  ;;  %3819 = vmatprep.mubr.f32.mxu1 %v3389_v61  ;;  %v2979_v25 = vld [vmem:[#allocation2 + $0x10d] sm:$0xff] }
 0x202   : > { %3072 = vrot.lane.b32.xlu0 %v2975_v42, %s9834_s25  ;;  %2784 = vrot.lane.b32.xlu1 %v11806_v9, %s9834_s25  ;;  %v12196_v9 = vpop.f32.mrb[47].mxu0 }
 0x203   : > { %3820 = vmatmul.mubr.f32.gmra.mrb[60].mxu1 %v3388_v12  ;;  %v12201_v0 = vpop.f32.mrb[48].mxu0  ;;  %v2980_v12 = vld [vmem:[#allocation2 + $0x115] sm:$0xff] }
 0x204   : > { %v2513_v30 = vpop.permute.xlu0 %2512  ;;  %v3394_v21 = vld [vmem:[#allocation10 + $0x8c0] sm:$0xff]  ;;  %v2224_v14 = vpop.permute.xlu1 %2223  ;;  %v3393_v60 = vld [vmem:[#allocation10 + $0x8b8] sm:$0xff] }
 0x205   : > { %2587 = vst.msk [vmem:[#allocation10 + $0x950] sm:$0xff] %vm2265_vm1, %v2513_v30  ;;  %2299 = vst.msk [vmem:[#allocation10 + $0x948] sm:$0xff] %vm2265_vm1, %v2224_v14  ;;  %3824 = vmatprep.mubr.f32.mxu1 %v3394_v21 }
 0x206   : > { %3074 = vrot.lane.b32.xlu0 %v2976_v23, %s9834_s25  ;;  %2786 = vrot.lane.b32.xlu1 %v11809_v59, %s9834_s25  ;;  %v12205_v59 = vpop.f32.mrb[49].mxu0 }
 0x207   : > { %3825 = vmatmul.mubr.f32.gmra.mrb[62].mxu1 %v3393_v60  ;;  %v12210_v3 = vpop.f32.mrb[50].mxu0 }
 0x208   : > { %v2515_v5 = vpop.permute.xlu0 %2514  ;;  %v3399_v18 = vld [vmem:[#allocation10 + $0x908] sm:$0xff]  ;;  %v2226_v22 = vpop.permute.xlu1 %2225  ;;  %v3398_v27 = vld [vmem:[#allocation10 + $0x900] sm:$0xff] }
 0x209   : > { %2588 = vst.msk [vmem:[#allocation10 + $0x998] sm:$0xff] %vm2265_vm1, %v2515_v5  ;;  %2300 = vst.msk [vmem:[#allocation10 + $0x990] sm:$0xff] %vm2265_vm1, %v2226_v22  ;;  %3829 = vmatprep.mubr.f32.mxu1 %v3399_v18  ;;  %v2981_v18 = vld [vmem:[#allocation2 + $0x11d] sm:$0xff] }
 0x20a   : > { %3076 = vrot.lane.b32.xlu0 %v2977_v51, %s9834_s25  ;;  %2788 = vrot.lane.b32.xlu1 %v11820_v49, %s9834_s25  ;;  %v12214_v49 = vpop.f32.mrb[51].mxu0  ;;  %v2912_v51 = vld [vmem:[#allocation2 + $0x134] sm:$0xff] }
 0x20b   : > { %3830 = vmatmul.mubr.f32.gmra.mrb[64].mxu1 %v3398_v27  ;;  %v12219_v6 = vpop.f32.mrb[52].mxu0  ;;  %2948 = vst.msk [vmem:[#allocation10 + $0x9a8] sm:$0xff] %vm495_vm0, %v2912_v51 }
 0x20c   : > { %v2517_v36 = vpop.permute.xlu0 %2516  ;;  %v3404_v28 = vld [vmem:[#allocation10 + $0x950] sm:$0xff]  ;;  %v2228_v35 = vpop.permute.xlu1 %2227  ;;  %v3403_v8 = vld [vmem:[#allocation10 + $0x948] sm:$0xff] }
 0x20d   : > { %2589 = vst.msk [vmem:[#allocation10 + $0x9e0] sm:$0xff] %vm2265_vm1, %v2517_v36  ;;  %2301 = vst.msk [vmem:[#allocation10 + $0x9d8] sm:$0xff] %vm2265_vm1, %v2228_v35  ;;  %3834 = vmatprep.mubr.f32.mxu1 %v3404_v28 }
 0x20e   : > { %3078 = vrot.lane.b32.xlu0 %v2978_v31, %s9834_s25  ;;  %2790 = vrot.lane.b32.xlu1 %v11824_v41, %s9834_s25  ;;  %v12223_v41 = vpop.f32.mrb[53].mxu0  ;;  %v2982_v31 = vld [vmem:[#allocation2 + $0x125] sm:$0xff] }
 0x20f   : > { %3835 = vmatmul.mubr.f32.gmra.mrb[66].mxu1 %v3403_v8  ;;  %v12228_v21 = vpop.f32.mrb[54].mxu0 }
 0x210   : > { %v3023_v44 = vpop.permute.xlu0 %3022  ;;  %v3409_v63 = vld [vmem:[#allocation10 + $0x998] sm:$0xff]  ;;  %v2735_v4 = vpop.permute.xlu1 %2734  ;;  %v3408_v20 = vld [vmem:[#allocation10 + $0x990] sm:$0xff] }
 0x211   : > { %3130 = vst.msk [vmem:[#allocation10 + $0x18] sm:$0xff] %vm2265_vm1, %v3023_v44  ;;  %2842 = vst.msk [vmem:[#allocation10 + $0x10] sm:$0xff] %vm2265_vm1, %v2735_v4  ;;  %3839 = vmatprep.mubr.f32.mxu1 %v3409_v63 }
 0x212   : > { %3080 = vrot.lane.b32.xlu0 %v2979_v25, %s9834_s25  ;;  %2792 = vrot.lane.b32.xlu1 %v11828_v40, %s9834_s25  ;;  %v12232_v40 = vpop.f32.mrb[55].mxu0 }
 0x213   : > { %3840 = vmatmul.mubr.f32.gmra.mrb[68].mxu1 %v3408_v20  ;;  %v12237_v22 = vpop.f32.mrb[56].mxu0  ;;  %v2983_v20 = vld [vmem:[#allocation2 + $0x12d] sm:$0xff] }
 0x214   : > { %v3025_v61 = vpop.permute.xlu0 %3024  ;;  %v3414_v42 = vld [vmem:[#allocation10 + $0x9e0] sm:$0xff]  ;;  %v2737_v30 = vpop.permute.xlu1 %2736  ;;  %v3413_v23 = vld [vmem:[#allocation10 + $0x9d8] sm:$0xff] }
 0x215   : > { %3131 = vst.msk [vmem:[#allocation10 + $0x60] sm:$0xff] %vm2265_vm1, %v3025_v61  ;;  %2843 = vst.msk [vmem:[#allocation10 + $0x58] sm:$0xff] %vm2265_vm1, %v2737_v30  ;;  %3844 = vmatprep.mubr.f32.mxu1 %v3414_v42 }
 0x216   : > { %3082 = vrot.lane.b32.xlu0 %v2980_v12, %s9834_s25  ;;  %2794 = vrot.lane.b32.xlu1 %v11830_v38, %s9834_s25  ;;  %v12241_v38 = vpop.f32.mrb[57].mxu0 }
 0x217   : > { %3845 = vmatmul.mubr.f32.gmra.mrb[70].mxu1 %v3413_v23  ;;  %v12247_v44 = vpop.f32.mrb[58].mxu0 }
 0x218   : > { %v3027_v14 = vpop.permute.xlu0 %3026  ;;  %v3241_v5 = vld [vmem:[#allocation10 + $0x18] sm:$0xff]  ;;  %v2739_v60 = vpop.permute.xlu1 %2738  ;;  %v3240_v27 = vld [vmem:[#allocation10 + $0x10] sm:$0xff] }
 0x219   : > { %3132 = vst.msk [vmem:[#allocation10 + $0xa8] sm:$0xff] %vm2265_vm1, %v3027_v14  ;;  %2844 = vst.msk [vmem:[#allocation10 + $0xa0] sm:$0xff] %vm2265_vm1, %v2739_v60  ;;  %3914 = vmatprep.mubr.f32.mxu1 %v3241_v5  ;;  %v12251_v8 = vpop.f32.mrb[59].mxu0  ;;  %v3200_v60 = vld [vmem:[#allocation2 + $0x136] sm:$0xff] }
 0x21a   : > { %3084 = vrot.lane.b32.xlu0 %v2981_v18, %s9834_s25  ;;  %2796 = vrot.lane.b32.xlu1 %v11836_v17, %s9834_s25  ;;  %v2913_v17 = vld [vmem:[#allocation2 + $0x13c] sm:$0xff]  ;;  %v12257_v42 = vpop.f32.mrb[60].mxu0  ;;  %3236 = vst.msk [vmem:[#allocation10 + $0x9b0] sm:$0xff] %vm495_vm0, %v3200_v60 }
 0x21b   : > { %3915 = vmatmul.mubr.f32.vlgmr.msra.gmra.mrb[0].mxu1 %v3240_v27  ;;  %2949 = vst.msk [vmem:[#allocation10 + $0x9f0] sm:$0xff] %vm495_vm0, %v2913_v17  ;;  %v12261_v30 = vpop.f32.mrb[61].mxu0  ;;  %v3201_v18 = vld [vmem:[#allocation2 + $0x13e] sm:$0xff] }
 0x21c   : > { %v3029_v36 = vpop.permute.xlu0 %3028  ;;  %v3246_v28 = vld [vmem:[#allocation10 + $0x60] sm:$0xff]  ;;  %v2741_v35 = vpop.permute.xlu1 %2740  ;;  %v3245_v4 = vld [vmem:[#allocation10 + $0x58] sm:$0xff]  ;;  %3237 = vst.msk [vmem:[#allocation10 + $0x9f8] sm:$0xff] %vm495_vm0, %v3201_v18 }
 0x21d   : > { %3133 = vst.msk [vmem:[#allocation10 + $0xf0] sm:$0xff] %vm2265_vm1, %v3029_v36  ;;  %2845 = vst.msk [vmem:[#allocation10 + $0xe8] sm:$0xff] %vm2265_vm1, %v2741_v35  ;;  %3919 = vmatprep.mubr.f32.mxu1 %v3246_v28 }
 0x21e   : > { %3086 = vrot.lane.b32.xlu0 %v2982_v31, %s9834_s25  ;;  %2798 = vrot.lane.b32.xlu1 %v11846_v39, %s9834_s25  ;;  %v2984_v39 = vld [vmem:[#allocation2 + $0x135] sm:$0xff] }
 0x21f   : > { %3920 = vmatmul.mubr.f32.gmra.mrb[2].mxu1 %v3245_v4  ;;  %v12266_v51 = vpop.f32.mrb[62].mxu0 }
 0x220   : > { %v3031_v63 = vpop.permute.xlu0 %3030  ;;  %v3251_v25 = vld [vmem:[#allocation10 + $0xa8] sm:$0xff]  ;;  %v2743_v61 = vpop.permute.xlu1 %2742  ;;  %v3250_v14 = vld [vmem:[#allocation10 + $0xa0] sm:$0xff] }
 0x221   : > { %3134 = vst.msk [vmem:[#allocation10 + $0x138] sm:$0xff] %vm2265_vm1, %v3031_v63  ;;  %2846 = vst.msk [vmem:[#allocation10 + $0x130] sm:$0xff] %vm2265_vm1, %v2743_v61  ;;  %3924 = vmatprep.mubr.f32.mxu1 %v3251_v25  ;;  %v12272_v36 = vpop.f32.mrb[63].mxu0 }
 0x222   : > { %3088 = vrot.lane.b32.xlu0 %v2983_v20, %s9834_s25  ;;  %2800 = vrot.lane.b32.xlu1 %v11849_v29, %s9834_s25  ;;  %v2985_v29 = vld [vmem:[#allocation2 + $0x13d] sm:$0xff]  ;;  %v3412_v20 = vld [vmem:[#allocation10 + $0x9b0] sm:$0xff] }
 0x223   : > { %3925 = vmatmul.mubr.f32.gmra.mrb[4].mxu1 %v3250_v14  ;;  %v12277_v17 = vpop.f32.mrb[64].mxu0  ;;  %8826 = vmatprep.mubr.msk.f32.mxu0 %vm495_vm0, %v3412_v20 }
 0x224   : > { %v3033_v12 = vpop.permute.xlu0 %3032  ;;  %v3256_v23 = vld [vmem:[#allocation10 + $0xf0] sm:$0xff]  ;;  %v2745_v5 = vpop.permute.xlu1 %2744  ;;  %v3255_v28 = vld [vmem:[#allocation10 + $0xe8] sm:$0xff] }
 0x225   : > { %3135 = vst.msk [vmem:[#allocation10 + $0x180] sm:$0xff] %vm2265_vm1, %v3033_v12  ;;  %2847 = vst.msk [vmem:[#allocation10 + $0x178] sm:$0xff] %vm2265_vm1, %v2745_v5  ;;  %3929 = vmatprep.mubr.f32.mxu1 %v3256_v23 }
 0x226   : > { %3090 = vrot.lane.b32.xlu0 %v2984_v39, %s9834_s25  ;;  %2802 = vrot.lane.b32.xlu1 %v11856_v16, %s9834_s25  ;;  %v12281_v16 = vpop.f32.mrb[65].mxu0  ;;  %v3417_v39 = vld [vmem:[#allocation10 + $0x9f8] sm:$0xff] }
 0x227   : > { %3930 = vmatmul.mubr.f32.gmra.mrb[6].mxu1 %v3255_v28  ;;  %v12285_v12 = vpop.f32.mrb[66].mxu0  ;;  %8827 = vmatmul.mubr.msk.f32.gmra.mrb[70].mxu0 %vm495_vm0, %v3417_v39 }
 0x228   : > { %v3035_v27 = vpop.permute.xlu0 %3034  ;;  %v3261_v35 = vld [vmem:[#allocation10 + $0x138] sm:$0xff]  ;;  %v2747_v31 = vpop.permute.xlu1 %2746  ;;  %v3260_v4 = vld [vmem:[#allocation10 + $0x130] sm:$0xff] }
 0x229   : > { %3136 = vst.msk [vmem:[#allocation10 + $0x1c8] sm:$0xff] %vm2265_vm1, %v3035_v27  ;;  %2848 = vst.msk [vmem:[#allocation10 + $0x1c0] sm:$0xff] %vm2265_vm1, %v2747_v31  ;;  %3934 = vmatprep.mubr.f32.mxu1 %v3261_v35  ;;  %v12288_v14 = vpop.f32.mrb[67].mxu0 }
 0x22a   : > { %3092 = vrot.lane.b32.xlu0 %v2985_v29, %s9834_s25  ;;  %2804 = vrot.lane.b32.xlu1 %v11858_v26, %s9834_s25 }
 0x22b   : > { %3935 = vmatmul.mubr.f32.gmra.mrb[8].mxu1 %v3260_v4  ;;  %v12293_v18 = vpop.f32.mrb[68].mxu0 }
 0x22c   : > { %v3037_v63 = vpop.permute.xlu0 %3036  ;;  %v3266_v25 = vld [vmem:[#allocation10 + $0x180] sm:$0xff]  ;;  %v2749_v61 = vpop.permute.xlu1 %2748  ;;  %v3265_v23 = vld [vmem:[#allocation10 + $0x178] sm:$0xff] }
 0x22d   : > { %3137 = vst.msk [vmem:[#allocation10 + $0x210] sm:$0xff] %vm2265_vm1, %v3037_v63  ;;  %2849 = vst.msk [vmem:[#allocation10 + $0x208] sm:$0xff] %vm2265_vm1, %v2749_v61  ;;  %3939 = vmatprep.mubr.f32.mxu1 %v3266_v25  ;;  %v12295_v29 = vpop.f32.mrb[69].mxu0 }
 0x22f   : > { %3940 = vmatmul.mubr.f32.gmra.mrb[10].mxu1 %v3265_v23 }
 0x230   : > { %v3039_v26 = vpop.permute.xlu0 %3038  ;;  %v3271_v5 = vld [vmem:[#allocation10 + $0x1c8] sm:$0xff]  ;;  %v2751_v60 = vpop.permute.xlu1 %2750  ;;  %v3270_v28 = vld [vmem:[#allocation10 + $0x1c0] sm:$0xff] }
 0x231   : > { %3138 = vst.msk [vmem:[#allocation10 + $0x258] sm:$0xff] %vm2265_vm1, %v3039_v26  ;;  %2850 = vst.msk [vmem:[#allocation10 + $0x250] sm:$0xff] %vm2265_vm1, %v2751_v60  ;;  %3944 = vmatprep.mubr.f32.mxu1 %v3271_v5 }
 0x233   : > { %3945 = vmatmul.mubr.f32.gmra.mrb[12].mxu1 %v3270_v28 }
 0x234   : > { %v3041_v27 = vpop.permute.xlu0 %3040  ;;  %v3276_v35 = vld [vmem:[#allocation10 + $0x210] sm:$0xff]  ;;  %v2753_v31 = vpop.permute.xlu1 %2752  ;;  %v3275_v4 = vld [vmem:[#allocation10 + $0x208] sm:$0xff] }
 0x235   : > { %3139 = vst.msk [vmem:[#allocation10 + $0x2a0] sm:$0xff] %vm2265_vm1, %v3041_v27  ;;  %2851 = vst.msk [vmem:[#allocation10 + $0x298] sm:$0xff] %vm2265_vm1, %v2753_v31  ;;  %3949 = vmatprep.mubr.f32.mxu1 %v3276_v35 }
 0x237   : > { %3950 = vmatmul.mubr.f32.gmra.mrb[14].mxu1 %v3275_v4 }
 0x238   : > { %v3043_v63 = vpop.permute.xlu0 %3042  ;;  %v3281_v25 = vld [vmem:[#allocation10 + $0x258] sm:$0xff]  ;;  %v2755_v61 = vpop.permute.xlu1 %2754  ;;  %v3280_v39 = vld [vmem:[#allocation10 + $0x250] sm:$0xff] }
 0x239   : > { %3140 = vst.msk [vmem:[#allocation10 + $0x2e8] sm:$0xff] %vm2265_vm1, %v3043_v63  ;;  %2852 = vst.msk [vmem:[#allocation10 + $0x2e0] sm:$0xff] %vm2265_vm1, %v2755_v61  ;;  %3954 = vmatprep.mubr.f32.mxu1 %v3281_v25 }
 0x23b   : > { %3955 = vmatmul.mubr.f32.gmra.mrb[16].mxu1 %v3280_v39 }
 0x23c   : > { %v3045_v20 = vpop.permute.xlu0 %3044  ;;  %v3286_v26 = vld [vmem:[#allocation10 + $0x2a0] sm:$0xff]  ;;  %v2757_v23 = vpop.permute.xlu1 %2756  ;;  %v3285_v60 = vld [vmem:[#allocation10 + $0x298] sm:$0xff] }
 0x23d   : > { %3141 = vst.msk [vmem:[#allocation10 + $0x330] sm:$0xff] %vm2265_vm1, %v3045_v20  ;;  %2853 = vst.msk [vmem:[#allocation10 + $0x328] sm:$0xff] %vm2265_vm1, %v2757_v23  ;;  %3959 = vmatprep.mubr.f32.mxu1 %v3286_v26 }
 0x23f   : > { %3960 = vmatmul.mubr.f32.gmra.mrb[18].mxu1 %v3285_v60 }
 0x240   : > { %v3047_v5 = vpop.permute.xlu0 %3046  ;;  %v3291_v27 = vld [vmem:[#allocation10 + $0x2e8] sm:$0xff]  ;;  %v2759_v28 = vpop.permute.xlu1 %2758  ;;  %v3290_v31 = vld [vmem:[#allocation10 + $0x2e0] sm:$0xff] }
 0x241   : > { %3142 = vst.msk [vmem:[#allocation10 + $0x378] sm:$0xff] %vm2265_vm1, %v3047_v5  ;;  %2854 = vst.msk [vmem:[#allocation10 + $0x370] sm:$0xff] %vm2265_vm1, %v2759_v28  ;;  %3964 = vmatprep.mubr.f32.mxu1 %v3291_v27 }
 0x243   : > { %3965 = vmatmul.mubr.f32.gmra.mrb[20].mxu1 %v3290_v31 }
 0x244   : > { %v3049_v35 = vpop.permute.xlu0 %3048  ;;  %v3296_v63 = vld [vmem:[#allocation10 + $0x330] sm:$0xff]  ;;  %v2761_v4 = vpop.permute.xlu1 %2760  ;;  %v3295_v61 = vld [vmem:[#allocation10 + $0x328] sm:$0xff] }
 0x245   : > { %3143 = vst.msk [vmem:[#allocation10 + $0x3c0] sm:$0xff] %vm2265_vm1, %v3049_v35  ;;  %2855 = vst.msk [vmem:[#allocation10 + $0x3b8] sm:$0xff] %vm2265_vm1, %v2761_v4  ;;  %3969 = vmatprep.mubr.f32.mxu1 %v3296_v63 }
 0x247   : > { %3970 = vmatmul.mubr.f32.gmra.mrb[22].mxu1 %v3295_v61 }
 0x248   : > { %v3051_v25 = vpop.permute.xlu0 %3050  ;;  %v3301_v20 = vld [vmem:[#allocation10 + $0x378] sm:$0xff]  ;;  %v2763_v39 = vpop.permute.xlu1 %2762  ;;  %v3300_v23 = vld [vmem:[#allocation10 + $0x370] sm:$0xff] }
 0x249   : > { %3144 = vst.msk [vmem:[#allocation10 + $0x408] sm:$0xff] %vm2265_vm1, %v3051_v25  ;;  %2856 = vst.msk [vmem:[#allocation10 + $0x400] sm:$0xff] %vm2265_vm1, %v2763_v39  ;;  %3974 = vmatprep.mubr.f32.mxu1 %v3301_v20 }
 0x24b   : > { %3975 = vmatmul.mubr.f32.gmra.mrb[24].mxu1 %v3300_v23 }
 0x24c   : > { %v3053_v26 = vpop.permute.xlu0 %3052  ;;  %v3306_v5 = vld [vmem:[#allocation10 + $0x3c0] sm:$0xff]  ;;  %v2765_v60 = vpop.permute.xlu1 %2764  ;;  %v3305_v28 = vld [vmem:[#allocation10 + $0x3b8] sm:$0xff] }
 0x24d   : > { %3145 = vst.msk [vmem:[#allocation10 + $0x450] sm:$0xff] %vm2265_vm1, %v3053_v26  ;;  %2857 = vst.msk [vmem:[#allocation10 + $0x448] sm:$0xff] %vm2265_vm1, %v2765_v60  ;;  %3979 = vmatprep.mubr.f32.mxu1 %v3306_v5 }
 0x24f   : > { %3980 = vmatmul.mubr.f32.gmra.mrb[26].mxu1 %v3305_v28 }
 0x250   : > { %v3055_v27 = vpop.permute.xlu0 %3054  ;;  %v3311_v35 = vld [vmem:[#allocation10 + $0x408] sm:$0xff]  ;;  %v2767_v31 = vpop.permute.xlu1 %2766  ;;  %v3310_v4 = vld [vmem:[#allocation10 + $0x400] sm:$0xff] }
 0x251   : > { %3146 = vst.msk [vmem:[#allocation10 + $0x498] sm:$0xff] %vm2265_vm1, %v3055_v27  ;;  %2858 = vst.msk [vmem:[#allocation10 + $0x490] sm:$0xff] %vm2265_vm1, %v2767_v31  ;;  %3984 = vmatprep.mubr.f32.mxu1 %v3311_v35 }
 0x253   : > { %3985 = vmatmul.mubr.f32.gmra.mrb[28].mxu1 %v3310_v4 }
 0x254   : > { %v3057_v63 = vpop.permute.xlu0 %3056  ;;  %v3316_v25 = vld [vmem:[#allocation10 + $0x450] sm:$0xff]  ;;  %v2769_v61 = vpop.permute.xlu1 %2768  ;;  %v3315_v39 = vld [vmem:[#allocation10 + $0x448] sm:$0xff] }
 0x255   : > { %3147 = vst.msk [vmem:[#allocation10 + $0x4e0] sm:$0xff] %vm2265_vm1, %v3057_v63  ;;  %2859 = vst.msk [vmem:[#allocation10 + $0x4d8] sm:$0xff] %vm2265_vm1, %v2769_v61  ;;  %3989 = vmatprep.mubr.f32.mxu1 %v3316_v25 }
 0x257   : > { %3990 = vmatmul.mubr.f32.gmra.mrb[30].mxu1 %v3315_v39 }
 0x258   : > { %v3059_v20 = vpop.permute.xlu0 %3058  ;;  %v3321_v26 = vld [vmem:[#allocation10 + $0x498] sm:$0xff]  ;;  %v2771_v23 = vpop.permute.xlu1 %2770  ;;  %v3320_v60 = vld [vmem:[#allocation10 + $0x490] sm:$0xff] }
 0x259   : > { %3148 = vst.msk [vmem:[#allocation10 + $0x528] sm:$0xff] %vm2265_vm1, %v3059_v20  ;;  %2860 = vst.msk [vmem:[#allocation10 + $0x520] sm:$0xff] %vm2265_vm1, %v2771_v23  ;;  %3994 = vmatprep.mubr.f32.mxu1 %v3321_v26 }
 0x25b   : > { %3995 = vmatmul.mubr.f32.gmra.mrb[32].mxu1 %v3320_v60 }
 0x25c   : > { %v3061_v5 = vpop.permute.xlu0 %3060  ;;  %v3326_v27 = vld [vmem:[#allocation10 + $0x4e0] sm:$0xff]  ;;  %v2773_v28 = vpop.permute.xlu1 %2772  ;;  %v3325_v31 = vld [vmem:[#allocation10 + $0x4d8] sm:$0xff] }
 0x25d   : > { %3149 = vst.msk [vmem:[#allocation10 + $0x570] sm:$0xff] %vm2265_vm1, %v3061_v5  ;;  %2861 = vst.msk [vmem:[#allocation10 + $0x568] sm:$0xff] %vm2265_vm1, %v2773_v28  ;;  %3999 = vmatprep.mubr.f32.mxu1 %v3326_v27 }
 0x25f   : > { %4000 = vmatmul.mubr.f32.gmra.mrb[34].mxu1 %v3325_v31 }
 0x260   : > { %v3063_v35 = vpop.permute.xlu0 %3062  ;;  %v3331_v63 = vld [vmem:[#allocation10 + $0x528] sm:$0xff]  ;;  %v2775_v4 = vpop.permute.xlu1 %2774  ;;  %v3330_v61 = vld [vmem:[#allocation10 + $0x520] sm:$0xff] }
 0x261   : > { %3150 = vst.msk [vmem:[#allocation10 + $0x5b8] sm:$0xff] %vm2265_vm1, %v3063_v35  ;;  %2862 = vst.msk [vmem:[#allocation10 + $0x5b0] sm:$0xff] %vm2265_vm1, %v2775_v4  ;;  %4004 = vmatprep.mubr.f32.mxu1 %v3331_v63 }
 0x263   : > { %4005 = vmatmul.mubr.f32.gmra.mrb[36].mxu1 %v3330_v61 }
 0x264   : > { %v3065_v25 = vpop.permute.xlu0 %3064  ;;  %v3336_v20 = vld [vmem:[#allocation10 + $0x570] sm:$0xff]  ;;  %v2777_v39 = vpop.permute.xlu1 %2776  ;;  %v3335_v23 = vld [vmem:[#allocation10 + $0x568] sm:$0xff] }
 0x265   : > { %3151 = vst.msk [vmem:[#allocation10 + $0x600] sm:$0xff] %vm2265_vm1, %v3065_v25  ;;  %2863 = vst.msk [vmem:[#allocation10 + $0x5f8] sm:$0xff] %vm2265_vm1, %v2777_v39  ;;  %4009 = vmatprep.mubr.f32.mxu1 %v3336_v20 }
 0x267   : > { %4010 = vmatmul.mubr.f32.gmra.mrb[38].mxu1 %v3335_v23 }
 0x268   : > { %v3067_v26 = vpop.permute.xlu0 %3066  ;;  %v3341_v5 = vld [vmem:[#allocation10 + $0x5b8] sm:$0xff]  ;;  %v2779_v60 = vpop.permute.xlu1 %2778  ;;  %v3340_v28 = vld [vmem:[#allocation10 + $0x5b0] sm:$0xff] }
 0x269   : > { %3152 = vst.msk [vmem:[#allocation10 + $0x648] sm:$0xff] %vm2265_vm1, %v3067_v26  ;;  %2864 = vst.msk [vmem:[#allocation10 + $0x640] sm:$0xff] %vm2265_vm1, %v2779_v60  ;;  %4014 = vmatprep.mubr.f32.mxu1 %v3341_v5 }
 0x26b   : > { %4015 = vmatmul.mubr.f32.gmra.mrb[40].mxu1 %v3340_v28 }
 0x26c   : > { %v3069_v27 = vpop.permute.xlu0 %3068  ;;  %v3346_v35 = vld [vmem:[#allocation10 + $0x600] sm:$0xff]  ;;  %v2781_v31 = vpop.permute.xlu1 %2780  ;;  %v3345_v4 = vld [vmem:[#allocation10 + $0x5f8] sm:$0xff] }
 0x26d   : > { %3153 = vst.msk [vmem:[#allocation10 + $0x690] sm:$0xff] %vm2265_vm1, %v3069_v27  ;;  %2865 = vst.msk [vmem:[#allocation10 + $0x688] sm:$0xff] %vm2265_vm1, %v2781_v31  ;;  %4019 = vmatprep.mubr.f32.mxu1 %v3346_v35 }
 0x26f   : > { %4020 = vmatmul.mubr.f32.gmra.mrb[42].mxu1 %v3345_v4 }
 0x270   : > { %v3071_v63 = vpop.permute.xlu0 %3070  ;;  %v3351_v25 = vld [vmem:[#allocation10 + $0x648] sm:$0xff]  ;;  %v2783_v61 = vpop.permute.xlu1 %2782  ;;  %v3350_v39 = vld [vmem:[#allocation10 + $0x640] sm:$0xff] }
 0x271   : > { %3154 = vst.msk [vmem:[#allocation10 + $0x6d8] sm:$0xff] %vm2265_vm1, %v3071_v63  ;;  %2866 = vst.msk [vmem:[#allocation10 + $0x6d0] sm:$0xff] %vm2265_vm1, %v2783_v61  ;;  %4024 = vmatprep.mubr.f32.mxu1 %v3351_v25 }
 0x273   : > { %4025 = vmatmul.mubr.f32.gmra.mrb[44].mxu1 %v3350_v39 }
 0x274   : > { %v3073_v20 = vpop.permute.xlu0 %3072  ;;  %v3356_v26 = vld [vmem:[#allocation10 + $0x690] sm:$0xff]  ;;  %v2785_v23 = vpop.permute.xlu1 %2784  ;;  %v3355_v60 = vld [vmem:[#allocation10 + $0x688] sm:$0xff] }
 0x275   : > { %3155 = vst.msk [vmem:[#allocation10 + $0x720] sm:$0xff] %vm2265_vm1, %v3073_v20  ;;  %2867 = vst.msk [vmem:[#allocation10 + $0x718] sm:$0xff] %vm2265_vm1, %v2785_v23  ;;  %4029 = vmatprep.mubr.f32.mxu1 %v3356_v26 }
 0x277   : > { %4030 = vmatmul.mubr.f32.gmra.mrb[46].mxu1 %v3355_v60 }
 0x278   : > { %v3075_v5 = vpop.permute.xlu0 %3074  ;;  %v3361_v27 = vld [vmem:[#allocation10 + $0x6d8] sm:$0xff]  ;;  %v2787_v28 = vpop.permute.xlu1 %2786  ;;  %v3360_v31 = vld [vmem:[#allocation10 + $0x6d0] sm:$0xff] }
 0x279   : > { %3156 = vst.msk [vmem:[#allocation10 + $0x768] sm:$0xff] %vm2265_vm1, %v3075_v5  ;;  %2868 = vst.msk [vmem:[#allocation10 + $0x760] sm:$0xff] %vm2265_vm1, %v2787_v28  ;;  %4034 = vmatprep.mubr.f32.mxu1 %v3361_v27 }
 0x27b   : > { %4035 = vmatmul.mubr.f32.gmra.mrb[48].mxu1 %v3360_v31 }
 0x27c   : > { %v3077_v35 = vpop.permute.xlu0 %3076  ;;  %v3366_v63 = vld [vmem:[#allocation10 + $0x720] sm:$0xff]  ;;  %v2789_v4 = vpop.permute.xlu1 %2788  ;;  %v3365_v61 = vld [vmem:[#allocation10 + $0x718] sm:$0xff] }
 0x27d   : > { %3157 = vst.msk [vmem:[#allocation10 + $0x7b0] sm:$0xff] %vm2265_vm1, %v3077_v35  ;;  %2869 = vst.msk [vmem:[#allocation10 + $0x7a8] sm:$0xff] %vm2265_vm1, %v2789_v4  ;;  %4039 = vmatprep.mubr.f32.mxu1 %v3366_v63 }
 0x27f   : > { %4040 = vmatmul.mubr.f32.gmra.mrb[50].mxu1 %v3365_v61 }
 0x280   : > { %v3079_v25 = vpop.permute.xlu0 %3078  ;;  %v3371_v20 = vld [vmem:[#allocation10 + $0x768] sm:$0xff]  ;;  %v2791_v39 = vpop.permute.xlu1 %2790  ;;  %v3370_v23 = vld [vmem:[#allocation10 + $0x760] sm:$0xff] }
 0x281   : > { %3158 = vst.msk [vmem:[#allocation10 + $0x7f8] sm:$0xff] %vm2265_vm1, %v3079_v25  ;;  %2870 = vst.msk [vmem:[#allocation10 + $0x7f0] sm:$0xff] %vm2265_vm1, %v2791_v39  ;;  %4044 = vmatprep.mubr.f32.mxu1 %v3371_v20 }
 0x283   : > { %4045 = vmatmul.mubr.f32.gmra.mrb[52].mxu1 %v3370_v23 }
 0x284   : > { %v3081_v26 = vpop.permute.xlu0 %3080  ;;  %v3376_v5 = vld [vmem:[#allocation10 + $0x7b0] sm:$0xff]  ;;  %v2793_v60 = vpop.permute.xlu1 %2792  ;;  %v3375_v28 = vld [vmem:[#allocation10 + $0x7a8] sm:$0xff] }
 0x285   : > { %3159 = vst.msk [vmem:[#allocation10 + $0x840] sm:$0xff] %vm2265_vm1, %v3081_v26  ;;  %2871 = vst.msk [vmem:[#allocation10 + $0x838] sm:$0xff] %vm2265_vm1, %v2793_v60  ;;  %4049 = vmatprep.mubr.f32.mxu1 %v3376_v5 }
 0x287   : > { %4050 = vmatmul.mubr.f32.gmra.mrb[54].mxu1 %v3375_v28 }
 0x288   : > { %v3083_v27 = vpop.permute.xlu0 %3082  ;;  %v3381_v35 = vld [vmem:[#allocation10 + $0x7f8] sm:$0xff]  ;;  %v2795_v31 = vpop.permute.xlu1 %2794  ;;  %v3380_v4 = vld [vmem:[#allocation10 + $0x7f0] sm:$0xff] }
 0x289   : > { %3160 = vst.msk [vmem:[#allocation10 + $0x888] sm:$0xff] %vm2265_vm1, %v3083_v27  ;;  %2872 = vst.msk [vmem:[#allocation10 + $0x880] sm:$0xff] %vm2265_vm1, %v2795_v31  ;;  %4054 = vmatprep.mubr.f32.mxu1 %v3381_v35 }
 0x28b   : > { %4055 = vmatmul.mubr.f32.gmra.mrb[56].mxu1 %v3380_v4 }
 0x28c   : > { %v3085_v63 = vpop.permute.xlu0 %3084  ;;  %v3386_v25 = vld [vmem:[#allocation10 + $0x840] sm:$0xff]  ;;  %v2797_v61 = vpop.permute.xlu1 %2796  ;;  %v3385_v39 = vld [vmem:[#allocation10 + $0x838] sm:$0xff] }
 0x28d   : > { %3161 = vst.msk [vmem:[#allocation10 + $0x8d0] sm:$0xff] %vm2265_vm1, %v3085_v63  ;;  %2873 = vst.msk [vmem:[#allocation10 + $0x8c8] sm:$0xff] %vm2265_vm1, %v2797_v61  ;;  %4059 = vmatprep.mubr.f32.mxu1 %v3386_v25 }
 0x28f   : > { %4060 = vmatmul.mubr.f32.gmra.mrb[58].mxu1 %v3385_v39 }
 0x290   : > { %v3087_v20 = vpop.permute.xlu0 %3086  ;;  %v3391_v26 = vld [vmem:[#allocation10 + $0x888] sm:$0xff]  ;;  %v2799_v23 = vpop.permute.xlu1 %2798  ;;  %v3390_v60 = vld [vmem:[#allocation10 + $0x880] sm:$0xff] }
 0x291   : > { %3162 = vst.msk [vmem:[#allocation10 + $0x918] sm:$0xff] %vm2265_vm1, %v3087_v20  ;;  %2874 = vst.msk [vmem:[#allocation10 + $0x910] sm:$0xff] %vm2265_vm1, %v2799_v23  ;;  %4064 = vmatprep.mubr.f32.mxu1 %v3391_v26 }
 0x293   : > { %4065 = vmatmul.mubr.f32.gmra.mrb[60].mxu1 %v3390_v60 }
 0x294   : > { %v3089_v5 = vpop.permute.xlu0 %3088  ;;  %v3396_v27 = vld [vmem:[#allocation10 + $0x8d0] sm:$0xff]  ;;  %v2801_v28 = vpop.permute.xlu1 %2800  ;;  %v3395_v35 = vld [vmem:[#allocation10 + $0x8c8] sm:$0xff] }
 0x295   : > { %3163 = vst.msk [vmem:[#allocation10 + $0x960] sm:$0xff] %vm2265_vm1, %v3089_v5  ;;  %2875 = vst.msk [vmem:[#allocation10 + $0x958] sm:$0xff] %vm2265_vm1, %v2801_v28  ;;  %4069 = vmatprep.mubr.f32.mxu1 %v3396_v27  ;;  %v4564_v28 = vld [vmem:[#allocation4 + $0x1] sm:$0xff] }
 0x296   : > { %4584 = vrot.lane.b32.xlu1 %v4564_v28, %s9834_s25 }
 0x297   : > { %4070 = vmatmul.mubr.f32.gmra.mrb[62].mxu1 %v3395_v35  ;;  %v12355_v35 = vld [vmem:[%s14830_s4] ss:$0 sm:$0xff] }
 0x298   : > { %v3401_v31 = vld [vmem:[#allocation10 + $0x918] sm:$0xff]  ;;  %v3091_v63 = vpop.permute.xlu0 %3090  ;;  %v2803_v4 = vpop.permute.xlu1 %2802  ;;  %v3400_v25 = vld [vmem:[#allocation10 + $0x910] sm:$0xff] }
 0x299   : > { %3164 = vst.msk [vmem:[#allocation10 + $0x9a8] sm:$0xff] %vm2265_vm1, %v3091_v63  ;;  %2876 = vst.msk [vmem:[#allocation10 + $0x9a0] sm:$0xff] %vm2265_vm1, %v2803_v4  ;;  %4074 = vmatprep.mubr.f32.mxu1 %v3401_v31 }
 0x29b   : > { %4075 = vmatmul.mubr.f32.gmra.mrb[64].mxu1 %v3400_v25 }
 0x29c   : > { %v3406_v61 = vld [vmem:[#allocation10 + $0x960] sm:$0xff]  ;;  %v3093_v20 = vpop.permute.xlu0 %3092  ;;  %v2805_v39 = vpop.permute.xlu1 %2804  ;;  %v3405_v26 = vld [vmem:[#allocation10 + $0x958] sm:$0xff] }
 0x29d   : > { %3165 = vst.msk [vmem:[#allocation10 + $0x9f0] sm:$0xff] %vm2265_vm1, %v3093_v20  ;;  %2877 = vst.msk [vmem:[#allocation10 + $0x9e8] sm:$0xff] %vm2265_vm1, %v2805_v39  ;;  %4079 = vmatprep.mubr.f32.mxu1 %v3406_v61 }
 0x29f   : > { %4080 = vmatmul.mubr.f32.gmra.mrb[66].mxu1 %v3405_v26 }
 0x2a0   : > { %v3411_v23 = vld [vmem:[#allocation10 + $0x9a8] sm:$0xff]  ;;  %v3410_v5 = vld [vmem:[#allocation10 + $0x9a0] sm:$0xff] }
 0x2a1   : > { %4084 = vmatprep.mubr.f32.mxu1 %v3411_v23 }
 0x2a3   : > { %4085 = vmatmul.mubr.f32.gmra.mrb[68].mxu1 %v3410_v5 }
 0x2a4   : > { %v3416_v60 = vld [vmem:[#allocation10 + $0x9f0] sm:$0xff]  ;;  %v3415_v27 = vld [vmem:[#allocation10 + $0x9e8] sm:$0xff] }
 0x2a5   : > { %4089 = vmatprep.mubr.f32.mxu1 %v3416_v60 }
 0x2a7   : > { %4090 = vmatmul.mubr.f32.gmra.mrb[70].mxu1 %v3415_v27 }
 0x2ee   : > { %v3916_v31 = vpop.f32.mrb[0].mxu1 }
 0x2ef   : > { %v9598_v63 = vadd.f32 %v12355_v35, %v3916_v31  ;;  %v3918_v4 = vpop.f32.mrb[1].mxu1 }
 0x2f1   : > { %v4162_v25 = vadd.f32 %v9598_v63, %v12151_v19 }
 0x2f2   : > { %v3921_v61 = vpop.f32.mrb[2].mxu1 }
 0x2f3   : > { %v4340_v20 = vmax.f32 %v4162_v25, 0.0  ;;  %v9599_v39 = vadd.f32 %v12355_v35, %v3921_v61  ;;  %v3923_v26 = vpop.f32.mrb[3].mxu1 }
 0x2f5   : > { %v4376_v23 = vmul.f32 %v10345_v53, %v4340_v20  ;;  %v4167_v5 = vadd.f32 %v9599_v39, %v12146_v37 }
 0x2f6   : > { %v3926_v60 = vpop.f32.mrb[4].mxu1 }
 0x2f7   : > { %4412 = vst.msk [vmem:[#allocation3 + $0x13] sm:$0xff] %vm495_vm0, %v4376_v23  ;;  %v4341_v27 = vmax.f32 %v4167_v5, 0.0  ;;  %v9600_v28 = vadd.f32 %v12355_v35, %v3926_v60  ;;  %v3928_v10 = vpop.f32.mrb[5].mxu1 }
 0x2f9   : > { %v4377_v31 = vmul.f32 %v10325_v48, %v4341_v27  ;;  %v4172_v19 = vadd.f32 %v9600_v28, %v12160_v13 }
 0x2fa   : > { %v3931_v63 = vpop.f32.mrb[6].mxu1  ;;  %v12376_v27 = vpop.f32.mrb[70].mxu0 }
 0x2fb   : > { %4413 = vst.msk [vmem:[#allocation3 + $0x1b] sm:$0xff] %vm495_vm0, %v4377_v31  ;;  %v4342_v4 = vmax.f32 %v4172_v19, 0.0  ;;  %v9601_v25 = vadd.f32 %v12355_v35, %v3931_v63  ;;  %v3933_v53 = vpop.f32.mrb[7].mxu1 }
 0x2fd   : > { %v4378_v37 = vmul.f32 %v10355_v55, %v4342_v4  ;;  %v4177_v61 = vadd.f32 %v9601_v25, %v12156_v33  ;;  %v12378_v33 = vpop.f32.mrb[71].mxu0 }
 0x2fe   : > { %v3936_v20 = vpop.f32.mrb[8].mxu1 }
 0x2ff   : > { %4414 = vst.msk [vmem:[#allocation3 + $0x23] sm:$0xff] %vm495_vm0, %v4378_v37  ;;  %v4343_v39 = vmax.f32 %v4177_v61, 0.0  ;;  %v9602_v10 = vadd.f32 %v12355_v35, %v3936_v20  ;;  %v3938_v48 = vpop.f32.mrb[9].mxu1 }
 0x301   : > { %v4379_v13 = vmul.f32 %v10350_v54, %v4343_v39  ;;  %v4182_v26 = vadd.f32 %v9602_v10, %v12169_v58 }
 0x302   : > { %v3941_v23 = vpop.f32.mrb[10].mxu1  ;;  %v4449_v53 = vld [vmem:[#allocation3 + $0x13] ss:$2 sm:$0xff]  ;;  %v4451_v37 = vld [vmem:[#allocation3 + $0x14] ss:$2 sm:$0xff] }
 0x303   : > { %4415 = vst.msk [vmem:[#allocation3 + $0x2b] sm:$0xff] %vm495_vm0, %v4379_v13  ;;  %v4344_v5 = vmax.f32 %v4182_v26, 0.0  ;;  %v9603_v60 = vadd.f32 %v12355_v35, %v3941_v23  ;;  %v3943_v55 = vpop.f32.mrb[11].mxu1  ;;  %v4452_v39 = vmax.f32 %v4449_v53, %v4451_v37  ;;  %v4936_v53 = vld [vmem:[%s14831_s5 + $0x10] sm:$0xff]  ;;  %v4937_v37 = vld [vmem:[%s14831_s5 + $0x18] sm:$0xff] }
 0x304   : > { %v4950_v55 = vld [vmem:[%s14831_s5 + $0x80] sm:$0xff] }
 0x305   : > { %v4380_v28 = vmul.f32 %v10360_v56, %v4344_v5  ;;  %v4187_v31 = vadd.f32 %v9603_v60, %v12165_v50 }
 0x306   : > { %v3946_v19 = vpop.f32.mrb[12].mxu1 }
 0x307   : > { %4416 = vst.msk [vmem:[#allocation3 + $0x33] sm:$0xff] %vm495_vm0, %v4380_v28  ;;  %v4345_v54 = vmax.f32 %v4187_v31, 0.0  ;;  %v9604_v58 = vadd.f32 %v12355_v35, %v3946_v19  ;;  %v3948_v63 = vpop.f32.mrb[13].mxu1  ;;  %v4935_v31 = vld [vmem:[%s14831_s5 + $0x8] sm:$0xff]  ;;  %v4952_v19 = vld [vmem:[%s14831_s5 + $0x90] sm:$0xff] }
 0x309   : > { %v4381_v4 = vmul.f32 %v10453_v43, %v4345_v54  ;;  %v4192_v25 = vadd.f32 %v9604_v58, %v12178_v1  ;;  %v4953_v54 = vld [vmem:[%s14831_s5 + $0x98] sm:$0xff] }
 0x30a   : > { %v3951_v61 = vpop.f32.mrb[14].mxu1 }
 0x30b   : > { %4417 = vst.msk [vmem:[#allocation3 + $0x3b] sm:$0xff] %vm495_vm0, %v4381_v4  ;;  %v4346_v20 = vmax.f32 %v4192_v25, 0.0  ;;  %v9605_v56 = vadd.f32 %v12355_v35, %v3951_v61  ;;  %v3953_v50 = vpop.f32.mrb[15].mxu1  ;;  %v4544_v61 = vld [vmem:[#allocation4] sm:$0xff] }
 0x30c   : > { %4554 = vst.msk [vmem:[#allocation10] sm:$0xff] %vm495_vm0, %v4544_v61 }
 0x30d   : > { %v4382_v10 = vmul.f32 %v10492_v11, %v4346_v20  ;;  %v4197_v48 = vadd.f32 %v9605_v56, %v12174_v46  ;;  %v4951_v11 = vld [vmem:[%s14831_s5 + $0x88] sm:$0xff]  ;;  %v4934_v46 = vld [vmem:[%s14831_s5] sm:$0xff]  ;;  %v9122_v56 = vpack.c.bf16 %v4953_v54, %v4952_v19  ;;  %v4941_v19 = vld [vmem:[%s14831_s5 + $0x38] sm:$0xff] }
 0x30e   : > { %v4454_v13 = vld [vmem:[#allocation3 + $0x25] ss:$2 sm:$0xff]  ;;  %v4457_v26 = vld [vmem:[#allocation3 + $0x26] ss:$2 sm:$0xff]  ;;  %v3956_v23 = vpop.f32.mrb[16].mxu1  ;;  %v9118_v28 = vpack.c.bf16 %v4951_v11, %v4950_v55  ;;  %v9120_v25 = vpack.c.bf16 %v4935_v31, %v4934_v46  ;;  %v4958_v54 = vld [vmem:[%s14831_s5 + $0xc0] sm:$0xff] }
 0x30f   : > { %v4455_v43 = vmax.f32 %v4452_v39, %v4454_v13  ;;  %4418 = vst.msk [vmem:[#allocation3 + $0x43] sm:$0xff] %vm495_vm0, %v4382_v10  ;;  %v4347_v1 = vmax.f32 %v4197_v48, 0.0  ;;  %v9606_v5 = vadd.f32 %v12355_v35, %v3956_v23  ;;  %v3958_v60 = vpop.f32.mrb[17].mxu1  ;;  %v9124_v48 = vpack.c.bf16 %v4937_v37, %v4936_v53  ;;  %v4624_v13 = vld [vmem:[#allocation4 + $0x2] sm:$0xff]  ;;  %v4959_v37 = vld [vmem:[%s14831_s5 + $0xc8] sm:$0xff] }
 0x310   : > { %9119 = vmatprep.subr.bf16.mxu0 %v9118_v28  ;;  %4634 = vst.msk [vmem:[#allocation10 + $0x8] sm:$0xff] %vm495_vm0, %v4624_v13  ;;  %v4956_v55 = vld [vmem:[%s14831_s5 + $0xb0] sm:$0xff]  ;;  %v4957_v11 = vld [vmem:[%s14831_s5 + $0xb8] sm:$0xff] }
 0x311   : > { %v4458_v58 = vmax.f32 %v4455_v43, %v4457_v26  ;;  %v4383_v63 = vmul.f32 %v10487_v62, %v4347_v1  ;;  %v4202_v4 = vadd.f32 %v9606_v5, %v12187_v47  ;;  %v4954_v62 = vld [vmem:[%s14831_s5 + $0xa0] sm:$0xff]  ;;  %v4955_v47 = vld [vmem:[%s14831_s5 + $0xa8] sm:$0xff]  ;;  %9121 = vmatpush3.bf16.msra.mxu0 %v9120_v25  ;;  %v4940_v31 = vld [vmem:[%s14831_s5 + $0x30] sm:$0xff]  ;;  %v9130_v53 = vpack.c.bf16 %v4957_v11, %v4956_v55 }
 0x312   : > { %v3961_v20 = vpop.f32.mrb[18].mxu1  ;;  %9123 = vmatprep.subr.bf16.mxu0 %v9122_v56  ;;  %v9126_v26 = vpack.c.bf16 %v4955_v47, %v4954_v62  ;;  %v4938_v1 = vld [vmem:[%s14831_s5 + $0x20] sm:$0xff]  ;;  %v4939_v5 = vld [vmem:[%s14831_s5 + $0x28] sm:$0xff]  ;;  %v4585_v62 = vpop.permute.xlu1 %4584 }
 0x313   : > { %4459 = vst.msk [vmem:[#allocation4 + $0xb] sm:$0xff] %vm495_vm0, %v4458_v58  ;;  %4419 = vst.msk [vmem:[#allocation3 + $0x4b] sm:$0xff] %vm495_vm0, %v4383_v63  ;;  %v4348_v50 = vmax.f32 %v4202_v4, 0.0  ;;  %v9607_v39 = vadd.f32 %v12355_v35, %v3961_v20  ;;  %v3963_v10 = vpop.f32.mrb[19].mxu1  ;;  %v9128_v28 = vpack.c.bf16 %v4939_v5, %v4938_v1  ;;  %v4943_v1 = vld [vmem:[%s14831_s5 + $0x48] sm:$0xff] }
 0x314   : > { %4614 = vst.msk [vmem:[#allocation10] sm:$0xff] %vm2265_vm1, %v4585_v62 }
 0x315   : > { %v4384_v23 = vmul.f32 %v10590_v52, %v4348_v50  ;;  %v4207_v43 = vadd.f32 %v9607_v39, %v12183_v7  ;;  %9125 = vmatpush3.bf16.msra.mxu0 %v9124_v48 }
 0x316   : > { %v3966_v60 = vpop.f32.mrb[20].mxu1  ;;  %9127 = vmatprep.subr.bf16.mxu0 %v9126_v26  ;;  %v4461_v58 = vld [vmem:[#allocation3 + $0x37] ss:$2 sm:$0xff]  ;;  %v4463_v63 = vld [vmem:[#allocation3 + $0x38] ss:$2 sm:$0xff] }
 0x317   : > { %4420 = vst.msk [vmem:[#allocation3 + $0x53] sm:$0xff] %vm495_vm0, %v4384_v23  ;;  %v4349_v52 = vmax.f32 %v4207_v43, 0.0  ;;  %v9608_v7 = vadd.f32 %v12355_v35, %v3966_v60  ;;  %v3968_v46 = vpop.f32.mrb[21].mxu1  ;;  %v4464_v48 = vmax.f32 %v4461_v58, %v4463_v63  ;;  %v9134_v23 = vpack.c.bf16 %v4959_v37, %v4958_v54  ;;  %v4942_v43 = vld [vmem:[%s14831_s5 + $0x40] sm:$0xff]  ;;  %v4944_v63 = vld [vmem:[%s14831_s5 + $0x50] sm:$0xff] }
 0x319   : > { %v4385_v4 = vmul.f32 %v10599_v2, %v4349_v52  ;;  %v4212_v25 = vadd.f32 %v9608_v7, %v12196_v9  ;;  %9129 = vmatpush3.bf16.msra.mxu0 %v9128_v28  ;;  %v9132_v2 = vpack.c.bf16 %v4941_v19, %v4940_v31  ;;  %v9136_v28 = vpack.c.bf16 %v4943_v1, %v4942_v43  ;;  %v4948_v1 = vld [vmem:[%s14831_s5 + $0x70] sm:$0xff] }
 0x31a   : > { %v3971_v61 = vpop.f32.mrb[22].mxu1  ;;  %v4644_v20 = vld [vmem:[#allocation4 + $0xa] sm:$0xff]  ;;  %9131 = vmatprep.subr.bf16.mxu0 %v9130_v53 }
 0x31b   : > { %v4565_v56 = vld [vmem:[#allocation4 + $0x9] sm:$0xff]  ;;  %4421 = vst.msk [vmem:[#allocation3 + $0x5b] sm:$0xff] %vm495_vm0, %v4385_v4  ;;  %v4350_v50 = vmax.f32 %v4212_v25, 0.0  ;;  %v9609_v39 = vadd.f32 %v12355_v35, %v3971_v61  ;;  %v3973_v10 = vpop.f32.mrb[23].mxu1  ;;  %4664 = vrot.lane.b32.xlu0 %v4644_v20, %s9834_s25  ;;  %4635 = vst.msk [vmem:[#allocation10 + $0x50] sm:$0xff] %vm495_vm0, %v4644_v20 }
 0x31c   : > { %v4545_v47 = vld [vmem:[#allocation4 + $0x8] sm:$0xff]  ;;  %4586 = vrot.lane.b32.xlu1 %v4565_v56, %s9834_s25  ;;  %v4962_v53 = vld [vmem:[%s14831_s5 + $0xe0] sm:$0xff] }
 0x31d   : > { %4555 = vst.msk [vmem:[#allocation10 + $0x48] sm:$0xff] %vm495_vm0, %v4545_v47  ;;  %v4704_v9 = vld [vmem:[#allocation4 + $0xb] sm:$0xff]  ;;  %v4386_v13 = vmul.f32 %v10608_v15, %v4350_v50  ;;  %v4217_v26 = vadd.f32 %v9609_v39, %v12192_v57  ;;  %v4960_v15 = vld [vmem:[%s14831_s5 + $0xd0] sm:$0xff]  ;;  %9133 = vmatpush3.bf16.msra.mxu0 %v9132_v2  ;;  %v4947_v39 = vld [vmem:[%s14831_s5 + $0x68] sm:$0xff] }
 0x31e   : > { %4714 = vst.msk [vmem:[#allocation10 + $0x10] sm:$0xff] %vm495_vm0, %v4704_v9  ;;  %v4466_v5 = vld [vmem:[#allocation3 + $0x49] ss:$2 sm:$0xff]  ;;  %v3976_v60 = vpop.f32.mrb[24].mxu1  ;;  %v4469_v46 = vld [vmem:[#allocation3 + $0x4a] ss:$2 sm:$0xff]  ;;  %9135 = vmatprep.subr.bf16.mxu0 %v9134_v23 }
 0x31f   : > { %v4961_v57 = vld [vmem:[%s14831_s5 + $0xd8] sm:$0xff]  ;;  %v4467_v55 = vmax.f32 %v4464_v48, %v4466_v5  ;;  %4422 = vst.msk [vmem:[#allocation3 + $0x63] sm:$0xff] %vm495_vm0, %v4386_v13  ;;  %v4351_v11 = vmax.f32 %v4217_v26, 0.0  ;;  %v9610_v52 = vadd.f32 %v12355_v35, %v3976_v60  ;;  %v3978_v7 = vpop.f32.mrb[25].mxu1  ;;  %v4946_v50 = vld [vmem:[%s14831_s5 + $0x60] sm:$0xff]  ;;  %v4964_v2 = vld [vmem:[%s14831_s5 + $0xf0] sm:$0xff] }
 0x320   : > { %v9138_v58 = vpack.c.bf16 %v4961_v57, %v4960_v15  ;;  %v4945_v4 = vld [vmem:[%s14831_s5 + $0x58] sm:$0xff]  ;;  %v9144_v13 = vpack.c.bf16 %v4947_v39, %v4946_v50 }
 0x321   : > { %v4470_v31 = vmax.f32 %v4467_v55, %v4469_v46  ;;  %v4387_v19 = vmul.f32 %v10746_v24, %v4351_v11  ;;  %v4222_v54 = vadd.f32 %v9610_v52, %v12205_v59  ;;  %v4963_v24 = vld [vmem:[%s14831_s5 + $0xe8] sm:$0xff]  ;;  %9137 = vmatpush3.bf16.msra.mxu0 %v9136_v28  ;;  %v9140_v20 = vpack.c.bf16 %v4945_v4, %v4944_v63  ;;  %v4949_v5 = vld [vmem:[%s14831_s5 + $0x78] sm:$0xff] }
 0x322   : > { %v3981_v25 = vpop.f32.mrb[26].mxu1  ;;  %9139 = vmatprep.subr.bf16.mxu0 %v9138_v58  ;;  %v9142_v47 = vpack.c.bf16 %v4963_v24, %v4962_v53  ;;  %v9148_v46 = vpack.c.bf16 %v4949_v5, %v4948_v1 }
 0x323   : > { %4471 = vst.msk [vmem:[#allocation4 + $0x15] sm:$0xff] %vm495_vm0, %v4470_v31  ;;  %4423 = vst.msk [vmem:[#allocation3 + $0x6b] sm:$0xff] %vm495_vm0, %v4387_v19  ;;  %v4352_v59 = vmax.f32 %v4222_v54, 0.0  ;;  %v9611_v37 = vadd.f32 %v12355_v35, %v3981_v25  ;;  %v3983_v61 = vpop.f32.mrb[27].mxu1 }
 0x325   : > { %v4388_v56 = vmul.f32 %v10784_v34, %v4352_v59  ;;  %v4227_v62 = vadd.f32 %v9611_v37, %v12201_v0  ;;  %v4965_v34 = vld [vmem:[%s14831_s5 + $0xf8] sm:$0xff]  ;;  %9141 = vmatpush3.bf16.msra.mxu0 %v9140_v20  ;;  %v15058_v59 = vld [vmem:[#allocation21_spill] sm:$0xff] }
 0x326   : > { %v3986_v10 = vpop.f32.mrb[28].mxu1  ;;  %9143 = vmatprep.subr.bf16.mxu0 %v9142_v47  ;;  %v9146_v43 = vpack.c.bf16 %v4965_v34, %v4964_v2  ;;  %v4473_v54 = vld [vmem:[#allocation3 + $0x5b] ss:$2 sm:$0xff]  ;;  %v4475_v58 = vld [vmem:[#allocation3 + $0x5c] ss:$2 sm:$0xff] }
 0x327   : > { %4424 = vst.msk [vmem:[#allocation3 + $0x73] sm:$0xff] %vm495_vm0, %v4388_v56  ;;  %v4353_v0 = vmax.f32 %v4227_v62, 0.0  ;;  %v9612_v9 = vadd.f32 %v12355_v35, %v3986_v10  ;;  %v3988_v48 = vpop.f32.mrb[29].mxu1  ;;  %v4476_v24 = vmax.f32 %v4473_v54, %v4475_v58  ;;  %v15059_v10 = vld [vmem:[#allocation23_spill] sm:$0xff] }
 0x329   : > { %v4389_v26 = vmul.f32 %v10779_v32, %v4353_v0  ;;  %v4232_v23 = vadd.f32 %v9612_v9, %v12214_v49  ;;  %9145 = vmatpush3.bf16.msra.mxu0 %v9144_v13  ;;  %v15060_v13 = vld [vmem:[#allocation22_spill] sm:$0xff] }
 0x32a   : > { %v3991_v60 = vpop.f32.mrb[30].mxu1  ;;  %v4645_v15 = vld [vmem:[#allocation4 + $0x12] sm:$0xff]  ;;  %9147 = vmatprep.subr.bf16.mxu0 %v9146_v43 }
 0x32b   : > { %v4566_v57 = vld [vmem:[#allocation4 + $0x11] sm:$0xff]  ;;  %4425 = vst.msk [vmem:[#allocation3 + $0x7b] sm:$0xff] %vm495_vm0, %v4389_v26  ;;  %v4354_v32 = vmax.f32 %v4232_v23, 0.0  ;;  %v9613_v49 = vadd.f32 %v12355_v35, %v3991_v60  ;;  %v3993_v11 = vpop.f32.mrb[31].mxu1  ;;  %4666 = vrot.lane.b32.xlu0 %v4645_v15, %s9834_s25  ;;  %4636 = vst.msk [vmem:[#allocation10 + $0x98] sm:$0xff] %vm495_vm0, %v4645_v15 }
 0x32c   : > { %v12524_v55 = vld [vmem:[#allocation4 + $0x14] sm:$0xff]  ;;  %4588 = vrot.lane.b32.xlu1 %v4566_v57, %s9834_s25 }
 0x32d   : > { %v4546_v52 = vld [vmem:[#allocation4 + $0x10] sm:$0xff]  ;;  %4794 = vst.msk [vmem:[#allocation10 + $0x18] sm:$0xff] %vm495_vm0, %v12524_v55  ;;  %v4390_v31 = vmul.f32 %v10831_v45, %v4354_v32  ;;  %v4237_v19 = vadd.f32 %v9613_v49, %v12210_v3  ;;  %9149 = vmatpush3.bf16.msra.mxu0 %v9148_v46  ;;  %v15061_v15 = vld [vmem:[#allocation24_spill] sm:$0xff] }
 0x32e   : > { %v4705_v7 = vld [vmem:[#allocation4 + $0x13] sm:$0xff]  ;;  %4556 = vst.msk [vmem:[#allocation10 + $0x90] sm:$0xff] %vm495_vm0, %v4546_v52  ;;  %v3996_v63 = vpop.f32.mrb[32].mxu1 }
 0x32f   : > { %4715 = vst.msk [vmem:[#allocation10 + $0x58] sm:$0xff] %vm495_vm0, %v4705_v7  ;;  %v4864_v28 = vld [vmem:[#allocation4 + $0x16] sm:$0xff]  ;;  %4426 = vst.msk [vmem:[#allocation3 + $0x83] sm:$0xff] %vm495_vm0, %v4390_v31  ;;  %v4355_v4 = vmax.f32 %v4237_v19, 0.0  ;;  %v9614_v25 = vadd.f32 %v12355_v35, %v3996_v63  ;;  %v3998_v53 = vpop.f32.mrb[33].mxu1 }
 0x330   : > { %4874 = vst.msk [vmem:[#allocation10 + $0x20] sm:$0xff] %vm495_vm0, %v4864_v28 }
 0x331   : > { %v4391_v37 = vmul.f32 %v15058_v59, %v4355_v4  ;;  %v4242_v45 = vadd.f32 %v9614_v25, %v12223_v41  ;;  %v15062_v4 = vld [vmem:[#allocation25_spill] sm:$0xff] }
 0x332   : > { %v4478_v61 = vld [vmem:[#allocation3 + $0x6d] ss:$2 sm:$0xff]  ;;  %v4001_v3 = vpop.f32.mrb[34].mxu1  ;;  %v4481_v50 = vld [vmem:[#allocation3 + $0x6e] ss:$2 sm:$0xff] }
 0x333   : > { %v4479_v20 = vmax.f32 %v4476_v24, %v4478_v61  ;;  %4427 = vst.msk [vmem:[#allocation3 + $0x8b] sm:$0xff] %vm495_vm0, %v4391_v37  ;;  %v4356_v56 = vmax.f32 %v4242_v45, 0.0  ;;  %v9615_v62 = vadd.f32 %v12355_v35, %v4001_v3  ;;  %v4003_v47 = vpop.f32.mrb[35].mxu1 }
 0x335   : > { %v4482_v39 = vmax.f32 %v4479_v20, %v4481_v50  ;;  %v4392_v2 = vmul.f32 %v15059_v10, %v4356_v56  ;;  %v4247_v34 = vadd.f32 %v9615_v62, %v12219_v6  ;;  %v15063_v62 = vld [vmem:[#allocation26_spill] sm:$0xff] }
 0x336   : > { %v4006_v0 = vpop.f32.mrb[36].mxu1 }
 0x337   : > { %4483 = vst.msk [vmem:[#allocation4 + $0x1f] sm:$0xff] %vm495_vm0, %v4482_v39  ;;  %4428 = vst.msk [vmem:[#allocation3 + $0x93] sm:$0xff] %vm495_vm0, %v4392_v2  ;;  %v4357_v41 = vmax.f32 %v4247_v34, 0.0  ;;  %v9616_v9 = vadd.f32 %v12355_v35, %v4006_v0  ;;  %v4008_v48 = vpop.f32.mrb[37].mxu1  ;;  %v15064_v0 = vld [vmem:[#allocation27_spill] sm:$0xff] }
 0x339   : > { %v4393_v26 = vmul.f32 %v15060_v13, %v4357_v41  ;;  %v4252_v23 = vadd.f32 %v9616_v9, %v12232_v40 }
 0x33a   : > { %v4011_v43 = vpop.f32.mrb[38].mxu1  ;;  %v4485_v60 = vld [vmem:[#allocation3 + $0x7f] ss:$2 sm:$0xff]  ;;  %v4487_v49 = vld [vmem:[#allocation3 + $0x80] ss:$2 sm:$0xff] }
 0x33b   : > { %4429 = vst.msk [vmem:[#allocation3 + $0x9b] sm:$0xff] %vm495_vm0, %v4393_v26  ;;  %v4358_v1 = vmax.f32 %v4252_v23, 0.0  ;;  %v9617_v5 = vadd.f32 %v12355_v35, %v4011_v43  ;;  %v4013_v6 = vpop.f32.mrb[39].mxu1  ;;  %v4488_v63 = vmax.f32 %v4485_v60, %v4487_v49  ;;  %v15065_v23 = vld [vmem:[#allocation28_spill] sm:$0xff] }
 0x33d   : > { %v4394_v57 = vmul.f32 %v15061_v15, %v4358_v1  ;;  %v4257_v32 = vadd.f32 %v9617_v5, %v12228_v21 }
 0x33e   : > { %v4016_v11 = vpop.f32.mrb[40].mxu1  ;;  %v4646_v52 = vld [vmem:[#allocation4 + $0x1a] sm:$0xff] }
 0x33f   : > { %v4567_v7 = vld [vmem:[#allocation4 + $0x19] sm:$0xff]  ;;  %4430 = vst.msk [vmem:[#allocation3 + $0xa3] sm:$0xff] %vm495_vm0, %v4394_v57  ;;  %v4359_v46 = vmax.f32 %v4257_v32, 0.0  ;;  %v9618_v40 = vadd.f32 %v12355_v35, %v4016_v11  ;;  %v4018_v28 = vpop.f32.mrb[41].mxu1  ;;  %4668 = vrot.lane.b32.xlu0 %v4646_v52, %s9834_s25  ;;  %4637 = vst.msk [vmem:[#allocation10 + $0xe0] sm:$0xff] %vm495_vm0, %v4646_v52  ;;  %v4568_v37 = vld [vmem:[#allocation4 + $0x21] sm:$0xff] }
 0x340   : > { %4590 = vrot.lane.b32.xlu1 %v4567_v7, %s9834_s25  ;;  %v12559_v31 = vld [vmem:[#allocation4 + $0x1c] sm:$0xff] }
 0x341   : > { %v4547_v19 = vld [vmem:[#allocation4 + $0x18] sm:$0xff]  ;;  %v4548_v21 = vld [vmem:[#allocation4 + $0x20] sm:$0xff]  ;;  %4795 = vst.msk [vmem:[#allocation10 + $0x60] sm:$0xff] %vm495_vm0, %v12559_v31  ;;  %v4395_v25 = vmul.f32 %v15062_v4, %v4359_v46  ;;  %v4262_v53 = vadd.f32 %v9618_v40, %v12241_v38 }
 0x342   : > { %4557 = vst.msk [vmem:[#allocation10 + $0xd8] sm:$0xff] %vm495_vm0, %v4547_v19  ;;  %v4706_v54 = vld [vmem:[#allocation4 + $0x1b] sm:$0xff]  ;;  %4558 = vst.msk [vmem:[#allocation10 + $0x120] sm:$0xff] %vm495_vm0, %v4548_v21  ;;  %v4490_v24 = vld [vmem:[#allocation3 + $0x91] ss:$2 sm:$0xff]  ;;  %v4021_v59 = vpop.f32.mrb[42].mxu1 }
 0x343   : > { %v4865_v58 = vld [vmem:[#allocation4 + $0x1e] sm:$0xff]  ;;  %4716 = vst.msk [vmem:[#allocation10 + $0xa0] sm:$0xff] %vm495_vm0, %v4706_v54  ;;  %v4491_v45 = vmax.f32 %v4488_v63, %v4490_v24  ;;  %4431 = vst.msk [vmem:[#allocation3 + $0xab] sm:$0xff] %vm495_vm0, %v4395_v25  ;;  %v4360_v61 = vmax.f32 %v4262_v53, 0.0  ;;  %v9619_v3 = vadd.f32 %v12355_v35, %v4021_v59  ;;  %v4023_v20 = vpop.f32.mrb[43].mxu1  ;;  %v15067_v53 = vld [vmem:[#allocation30_spill] sm:$0xff] }
 0x344   : > { %4875 = vst.msk [vmem:[#allocation10 + $0x68] sm:$0xff] %vm495_vm0, %v4865_v58  ;;  %4592 = vrot.lane.b32.xlu1 %v4568_v37, %s9834_s25  ;;  %v4493_v56 = vld [vmem:[#allocation3 + $0x92] ss:$2 sm:$0xff]  ;;  %v15066_v46 = vld [vmem:[#allocation29_spill] sm:$0xff] }
 0x345   : > { %v4494_v38 = vmax.f32 %v4491_v45, %v4493_v56  ;;  %v4396_v47 = vmul.f32 %v15063_v62, %v4360_v61  ;;  %v4267_v50 = vadd.f32 %v9619_v3, %v12237_v22  ;;  %v15068_v62 = vld [vmem:[#allocation31_spill] sm:$0xff] }
 0x346   : > { %v4026_v39 = vpop.f32.mrb[44].mxu1 }
 0x347   : > { %4495 = vst.msk [vmem:[#allocation4 + $0x29] sm:$0xff] %vm495_vm0, %v4494_v38  ;;  %4432 = vst.msk [vmem:[#allocation3 + $0xb3] sm:$0xff] %vm495_vm0, %v4396_v47  ;;  %v4361_v10 = vmax.f32 %v4267_v50, 0.0  ;;  %v9620_v2 = vadd.f32 %v12355_v35, %v4026_v39  ;;  %v4028_v34 = vpop.f32.mrb[45].mxu1 }
 0x348   : > { %v15069_v34 = vld [vmem:[#allocation33_spill] sm:$0xff] }
 0x349   : > { %v4397_v41 = vmul.f32 %v15064_v0, %v4361_v10  ;;  %v4272_v9 = vadd.f32 %v9620_v2, %v12251_v8 }
 0x34a   : > { %v4031_v48 = vpop.f32.mrb[46].mxu1  ;;  %v4497_v19 = vld [vmem:[#allocation3 + $0xa3] ss:$2 sm:$0xff]  ;;  %v4499_v21 = vld [vmem:[#allocation3 + $0xa4] ss:$2 sm:$0xff] }
 0x34b   : > { %4433 = vst.msk [vmem:[#allocation3 + $0xbb] sm:$0xff] %vm495_vm0, %v4397_v41  ;;  %v4362_v13 = vmax.f32 %v4272_v9, 0.0  ;;  %v9621_v26 = vadd.f32 %v12355_v35, %v4031_v48  ;;  %v4033_v22 = vpop.f32.mrb[47].mxu1  ;;  %v4500_v25 = vmax.f32 %v4497_v19, %v4499_v21 }
 0x34d   : > { %v4398_v43 = vmul.f32 %v15065_v23, %v4362_v13  ;;  %v4277_v1 = vadd.f32 %v9621_v26, %v12247_v44  ;;  %v15070_v23 = vld [vmem:[#allocation32_spill] sm:$0xff] }
 0x34e   : > { %v4036_v5 = vpop.f32.mrb[48].mxu1  ;;  %v4647_v6 = vld [vmem:[#allocation4 + $0x22] sm:$0xff]  ;;  %v4648_v15 = vld [vmem:[#allocation4 + $0x2a] sm:$0xff] }
 0x34f   : > { %v4569_v60 = vld [vmem:[#allocation4 + $0x29] sm:$0xff]  ;;  %4434 = vst.msk [vmem:[#allocation3 + $0xc3] sm:$0xff] %vm495_vm0, %v4398_v43  ;;  %v4363_v57 = vmax.f32 %v4277_v1, 0.0  ;;  %v9622_v8 = vadd.f32 %v12355_v35, %v4036_v5  ;;  %v4038_v32 = vpop.f32.mrb[49].mxu1  ;;  %4670 = vrot.lane.b32.xlu0 %v4647_v6, %s9834_s25  ;;  %4638 = vst.msk [vmem:[#allocation10 + $0x128] sm:$0xff] %vm495_vm0, %v4647_v6 }
 0x350   : > { %4594 = vrot.lane.b32.xlu1 %v4569_v60, %s9834_s25  ;;  %v12588_v49 = vld [vmem:[#allocation4 + $0x24] sm:$0xff]  ;;  %4639 = vst.msk [vmem:[#allocation10 + $0x170] sm:$0xff] %vm495_vm0, %v4648_v15 }
 0x351   : > { %v4549_v11 = vld [vmem:[#allocation4 + $0x28] sm:$0xff]  ;;  %4796 = vst.msk [vmem:[#allocation10 + $0xa8] sm:$0xff] %vm495_vm0, %v12588_v49  ;;  %v4399_v40 = vmul.f32 %v15066_v46, %v4363_v57  ;;  %v4282_v28 = vadd.f32 %v9622_v8, %v12261_v30 }
 0x352   : > { %4559 = vst.msk [vmem:[#allocation10 + $0x168] sm:$0xff] %vm495_vm0, %v4549_v11  ;;  %v4707_v44 = vld [vmem:[#allocation4 + $0x23] sm:$0xff]  ;;  %v4708_v52 = vld [vmem:[#allocation4 + $0x2b] sm:$0xff]  ;;  %v4041_v54 = vpop.f32.mrb[50].mxu1 }
 0x353   : > { %v4866_v7 = vld [vmem:[#allocation4 + $0x26] sm:$0xff]  ;;  %4717 = vst.msk [vmem:[#allocation10 + $0xe8] sm:$0xff] %vm495_vm0, %v4707_v44  ;;  %4718 = vst.msk [vmem:[#allocation10 + $0x130] sm:$0xff] %vm495_vm0, %v4708_v52  ;;  %v4364_v58 = vmax.f32 %v4282_v28, 0.0  ;;  %v9623_v63 = vadd.f32 %v12355_v35, %v4041_v54  ;;  %v4043_v4 = vpop.f32.mrb[51].mxu1  ;;  %4672 = vrot.lane.b32.xlu0 %v4648_v15, %s9834_s25 }
 0x354   : > { %4876 = vst.msk [vmem:[#allocation10 + $0xb0] sm:$0xff] %vm495_vm0, %v4866_v7  ;;  %4435 = vst.msk [vmem:[#allocation3 + $0xcb] sm:$0xff] %vm495_vm0, %v4399_v40  ;;  %v15071_v7 = vld [vmem:[#allocation34_spill] sm:$0xff] }
 0x355   : > { %v4400_v30 = vmul.f32 %v15067_v53, %v4364_v58  ;;  %v4287_v24 = vadd.f32 %v9623_v63, %v12257_v42  ;;  %v15072_v53 = vld [vmem:[#allocation35_spill] sm:$0xff] }
 0x356   : > { %v4502_v59 = vld [vmem:[#allocation3 + $0xb5] ss:$2 sm:$0xff]  ;;  %v4046_v37 = vpop.f32.mrb[52].mxu1  ;;  %v4505_v56 = vld [vmem:[#allocation3 + $0xb6] ss:$2 sm:$0xff] }
 0x357   : > { %v4503_v45 = vmax.f32 %v4500_v25, %v4502_v59  ;;  %4436 = vst.msk [vmem:[#allocation3 + $0xd3] sm:$0xff] %vm495_vm0, %v4400_v30  ;;  %v4365_v61 = vmax.f32 %v4287_v24, 0.0  ;;  %v9624_v3 = vadd.f32 %v12355_v35, %v4046_v37  ;;  %v4048_v20 = vpop.f32.mrb[53].mxu1 }
 0x359   : > { %v4506_v38 = vmax.f32 %v4503_v45, %v4505_v56  ;;  %v4401_v47 = vmul.f32 %v15068_v62, %v4365_v61  ;;  %v4292_v50 = vadd.f32 %v9624_v3, %v12272_v36  ;;  %v15073_v61 = vld [vmem:[#allocation37_spill] sm:$0xff] }
 0x35a   : > { %v4051_v39 = vpop.f32.mrb[54].mxu1 }
 0x35b   : > { %4507 = vst.msk [vmem:[#allocation4 + $0x33] sm:$0xff] %vm495_vm0, %v4506_v38  ;;  %4437 = vst.msk [vmem:[#allocation3 + $0xdb] sm:$0xff] %vm495_vm0, %v4401_v47  ;;  %v4366_v42 = vmax.f32 %v4292_v50, 0.0  ;;  %v9625_v10 = vadd.f32 %v12355_v35, %v4051_v39  ;;  %v4053_v2 = vpop.f32.mrb[55].mxu1  ;;  %v4982_v47 = vld [vmem:[%s14831_s5 + $0x180] sm:$0xff]  ;;  %v4983_v50 = vld [vmem:[%s14831_s5 + $0x188] sm:$0xff] }
 0x35c   : > { %v9150_v39 = vpack.c.bf16 %v4983_v50, %v4982_v47 }
 0x35d   : > { %v4402_v0 = vmul.f32 %v15069_v34, %v4366_v42  ;;  %v4297_v41 = vadd.f32 %v9625_v10, %v12266_v51  ;;  %v15074_v42 = vld [vmem:[#allocation36_spill] sm:$0xff] }
 0x35e   : > { %v4056_v9 = vpop.f32.mrb[56].mxu1  ;;  %v4509_v26 = vld [vmem:[#allocation3 + $0xc7] ss:$2 sm:$0xff]  ;;  %v4511_v22 = vld [vmem:[#allocation3 + $0xc8] ss:$2 sm:$0xff]  ;;  %9151 = vmatprep.subr.bf16.mxu0 %v9150_v39 }
 0x35f   : > { %4438 = vst.msk [vmem:[#allocation3 + $0xe3] sm:$0xff] %vm495_vm0, %v4402_v0  ;;  %v4367_v48 = vmax.f32 %v4297_v41, 0.0  ;;  %v9626_v13 = vadd.f32 %v12355_v35, %v4056_v9  ;;  %v4058_v36 = vpop.f32.mrb[57].mxu1  ;;  %v4512_v52 = vmax.f32 %v4509_v26, %v4511_v22  ;;  %v4724_v39 = vld [vmem:[#allocation4 + $0xc] sm:$0xff] }
 0x361   : > { %v4403_v43 = vmul.f32 %v15070_v23, %v4367_v48  ;;  %v4302_v1 = vadd.f32 %v9626_v13, %v12281_v16  ;;  %v15075_v23 = vld [vmem:[#allocation39_spill] sm:$0xff] }
 0x362   : > { %v4061_v5 = vpop.f32.mrb[58].mxu1  ;;  %v4649_v6 = vld [vmem:[#allocation4 + $0x32] sm:$0xff] }
 0x363   : > { %v4570_v60 = vld [vmem:[#allocation4 + $0x31] sm:$0xff]  ;;  %4439 = vst.msk [vmem:[#allocation3 + $0xeb] sm:$0xff] %vm495_vm0, %v4403_v43  ;;  %v4368_v51 = vmax.f32 %v4302_v1, 0.0  ;;  %v9627_v57 = vadd.f32 %v12355_v35, %v4061_v5  ;;  %v4063_v8 = vpop.f32.mrb[59].mxu1  ;;  %4674 = vrot.lane.b32.xlu0 %v4649_v6, %s9834_s25  ;;  %4640 = vst.msk [vmem:[#allocation10 + $0x1b8] sm:$0xff] %vm495_vm0, %v4649_v6 }
 0x364   : > { %v12618_v15 = vld [vmem:[#allocation4 + $0x2c] sm:$0xff]  ;;  %4596 = vrot.lane.b32.xlu1 %v4570_v60, %s9834_s25  ;;  %v12624_v32 = vld [vmem:[#allocation4 + $0x34] sm:$0xff] }
 0x365   : > { %4797 = vst.msk [vmem:[#allocation10 + $0xf0] sm:$0xff] %vm495_vm0, %v12618_v15  ;;  %v4550_v16 = vld [vmem:[#allocation4 + $0x30] sm:$0xff]  ;;  %4798 = vst.msk [vmem:[#allocation10 + $0x138] sm:$0xff] %vm495_vm0, %v12624_v32  ;;  %v4404_v46 = vmul.f32 %v15071_v7, %v4368_v51  ;;  %v4307_v40 = vadd.f32 %v9627_v57, %v12277_v17 }
 0x366   : > { %v4709_v11 = vld [vmem:[#allocation4 + $0x33] sm:$0xff]  ;;  %4560 = vst.msk [vmem:[#allocation10 + $0x1b0] sm:$0xff] %vm495_vm0, %v4550_v16  ;;  %v4066_v19 = vpop.f32.mrb[60].mxu1 }
 0x367   : > { %v4867_v44 = vld [vmem:[#allocation4 + $0x2e] sm:$0xff]  ;;  %4719 = vst.msk [vmem:[#allocation10 + $0x178] sm:$0xff] %vm495_vm0, %v4709_v11  ;;  %4440 = vst.msk [vmem:[#allocation3 + $0xf3] sm:$0xff] %vm495_vm0, %v4404_v46  ;;  %v4369_v54 = vmax.f32 %v4307_v40, 0.0  ;;  %v9628_v58 = vadd.f32 %v12355_v35, %v4066_v19  ;;  %v4068_v63 = vpop.f32.mrb[61].mxu1 }
 0x368   : > { %4877 = vst.msk [vmem:[#allocation10 + $0xf8] sm:$0xff] %vm495_vm0, %v4867_v44  ;;  %v4514_v28 = vld [vmem:[#allocation3 + $0xd9] ss:$2 sm:$0xff]  ;;  %v4517_v4 = vld [vmem:[#allocation3 + $0xda] ss:$2 sm:$0xff]  ;;  %v15076_v11 = vld [vmem:[#allocation38_spill] sm:$0xff] }
 0x369   : > { %v4515_v21 = vmax.f32 %v4512_v52, %v4514_v28  ;;  %v4405_v30 = vmul.f32 %v15072_v53, %v4369_v54  ;;  %v4312_v17 = vadd.f32 %v9628_v58, %v12288_v14  ;;  %v15077_v58 = vld [vmem:[#allocation41_spill] sm:$0xff] }
 0x36a   : > { %v4071_v24 = vpop.f32.mrb[62].mxu1 }
 0x36b   : > { %v4518_v25 = vmax.f32 %v4515_v21, %v4517_v4  ;;  %4441 = vst.msk [vmem:[#allocation3 + $0xfb] sm:$0xff] %vm495_vm0, %v4405_v30  ;;  %v4370_v59 = vmax.f32 %v4312_v17, 0.0  ;;  %v9629_v37 = vadd.f32 %v12355_v35, %v4071_v24  ;;  %v4073_v45 = vpop.f32.mrb[63].mxu1 }
 0x36d   : > { %4519 = vst.msk [vmem:[#allocation4 + $0x3d] sm:$0xff] %vm495_vm0, %v4518_v25  ;;  %v4406_v3 = vmul.f32 %v15073_v61, %v4370_v59  ;;  %v4317_v20 = vadd.f32 %v9629_v37, %v12285_v12  ;;  %v15078_v25 = vld [vmem:[#allocation40_spill] sm:$0xff] }
 0x36e   : > { %v4076_v56 = vpop.f32.mrb[64].mxu1  ;;  %v4521_v5 = vld [vmem:[#allocation3 + $0xeb] ss:$2 sm:$0xff]  ;;  %v4523_v6 = vld [vmem:[#allocation3 + $0xec] ss:$2 sm:$0xff] }
 0x36f   : > { %4442 = vst.msk [vmem:[#allocation3 + $0x103] sm:$0xff] %vm495_vm0, %v4406_v3  ;;  %v4371_v38 = vmax.f32 %v4317_v20, 0.0  ;;  %v9630_v62 = vadd.f32 %v12355_v35, %v4076_v56  ;;  %v4078_v14 = vpop.f32.mrb[65].mxu1  ;;  %v4524_v16 = vmax.f32 %v4521_v5, %v4523_v6 }
 0x371   : > { %v4407_v10 = vmul.f32 %v15074_v42, %v4371_v38  ;;  %v4322_v12 = vadd.f32 %v9630_v62, %v12295_v29  ;;  %v4966_v42 = vld [vmem:[%s14831_s5 + $0x100] sm:$0xff] }
 0x372   : > { %v4081_v2 = vpop.f32.mrb[66].mxu1 }
 0x373   : > { %4443 = vst.msk [vmem:[#allocation3 + $0x10b] sm:$0xff] %vm495_vm0, %v4407_v10  ;;  %v4372_v9 = vmax.f32 %v4322_v12, 0.0  ;;  %v9631_v48 = vadd.f32 %v12355_v35, %v4081_v2  ;;  %v4083_v13 = vpop.f32.mrb[67].mxu1  ;;  %v4967_v10 = vld [vmem:[%s14831_s5 + $0x108] sm:$0xff]  ;;  %v5438_v12 = vld [vmem:[#allocation5 + $0x1] sm:$0xff]  ;;  %v4984_v2 = vld [vmem:[%s14831_s5 + $0x190] sm:$0xff] }
 0x374   : > { %v4650_v34 = vld [vmem:[#allocation4 + $0x3a] sm:$0xff] }
 0x375   : > { %v4571_v0 = vld [vmem:[#allocation4 + $0x39] sm:$0xff]  ;;  %4676 = vrot.lane.b32.xlu0 %v4650_v34, %s9834_s25  ;;  %4641 = vst.msk [vmem:[#allocation10 + $0x200] sm:$0xff] %vm495_vm0, %v4650_v34  ;;  %v4408_v43 = vmul.f32 %v15075_v23, %v4372_v9  ;;  %v4327_v1 = vadd.f32 %v9631_v48, %v12293_v18  ;;  %v4985_v34 = vld [vmem:[%s14831_s5 + $0x198] sm:$0xff]  ;;  %v9152_v48 = vpack.c.bf16 %v4967_v10, %v4966_v42  ;;  %v4986_v23 = vld [vmem:[%s14831_s5 + $0x1a0] sm:$0xff] }
 0x376   : > { %v12655_v41 = vld [vmem:[#allocation4 + $0x3c] sm:$0xff]  ;;  %4598 = vrot.lane.b32.xlu1 %v4571_v0, %s9834_s25  ;;  %v4086_v60 = vpop.f32.mrb[68].mxu1  ;;  %v4884_v0 = vld [vmem:[#allocation10] sm:$0xff] }
 0x377   : > { %v4551_v36 = vld [vmem:[#allocation4 + $0x38] sm:$0xff]  ;;  %4799 = vst.msk [vmem:[#allocation10 + $0x180] sm:$0xff] %vm495_vm0, %v12655_v41  ;;  %4444 = vst.msk [vmem:[#allocation3 + $0x113] sm:$0xff] %vm495_vm0, %v4408_v43  ;;  %v4373_v51 = vmax.f32 %v4327_v1, 0.0  ;;  %v9632_v57 = vadd.f32 %v12355_v35, %v4086_v60  ;;  %v4088_v8 = vpop.f32.mrb[69].mxu1  ;;  %v4968_v13 = vld [vmem:[%s14831_s5 + $0x110] sm:$0xff] }
 0x378   : > { %v4710_v29 = vld [vmem:[#allocation4 + $0x3b] sm:$0xff]  ;;  %4561 = vst.msk [vmem:[#allocation10 + $0x1f8] sm:$0xff] %vm495_vm0, %v4551_v36  ;;  %v4970_v8 = vld [vmem:[%s14831_s5 + $0x120] sm:$0xff] }
 0x379   : > { %4720 = vst.msk [vmem:[#allocation10 + $0x1c0] sm:$0xff] %vm495_vm0, %v4710_v29  ;;  %v4868_v26 = vld [vmem:[#allocation4 + $0x36] sm:$0xff]  ;;  %v4869_v22 = vld [vmem:[#allocation4 + $0x3e] sm:$0xff]  ;;  %v4409_v44 = vmul.f32 %v15076_v11, %v4373_v51  ;;  %v4332_v52 = vadd.f32 %v9632_v57, %v12378_v33  ;;  %v9154_v29 = vpack.c.bf16 %v4985_v34, %v4984_v2 }
 0x37a   : > { %4878 = vst.msk [vmem:[#allocation10 + $0x140] sm:$0xff] %vm495_vm0, %v4868_v26  ;;  %4879 = vst.msk [vmem:[#allocation10 + $0x188] sm:$0xff] %vm495_vm0, %v4869_v22  ;;  %v4526_v7 = vld [vmem:[#allocation3 + $0xfd] ss:$2 sm:$0xff]  ;;  %v4091_v18 = vpop.f32.mrb[70].mxu1  ;;  %v4969_v26 = vld [vmem:[%s14831_s5 + $0x118] sm:$0xff] }
 0x37b   : > { %v4527_v46 = vmax.f32 %v4524_v16, %v4526_v7  ;;  %4445 = vst.msk [vmem:[#allocation3 + $0x11b] sm:$0xff] %vm495_vm0, %v4409_v44  ;;  %v4374_v40 = vmax.f32 %v4332_v52, 0.0  ;;  %v9633_v28 = vadd.f32 %v12355_v35, %v4091_v18  ;;  %v4093_v19 = vpop.f32.mrb[71].mxu1  ;;  %v4529_v21 = vld [vmem:[#allocation3 + $0xfe] ss:$2 sm:$0xff]  ;;  %v4989_v44 = vld [vmem:[%s14831_s5 + $0x1b8] sm:$0xff] }
 0x37c   : > { %v4987_v43 = vld [vmem:[%s14831_s5 + $0x1a8] sm:$0xff]  ;;  %v4988_v11 = vld [vmem:[%s14831_s5 + $0x1b0] sm:$0xff]  ;;  %v4990_v19 = vld [vmem:[%s14831_s5 + $0x1c0] sm:$0xff] }
 0x37d   : > { %v4530_v54 = vmax.f32 %v4527_v46, %v4529_v21  ;;  %v4410_v63 = vmul.f32 %v15077_v58, %v4374_v40  ;;  %v4337_v4 = vadd.f32 %v9633_v28, %v12376_v27  ;;  %v9158_v57 = vpack.c.bf16 %v4987_v43, %v4986_v23  ;;  %v4971_v16 = vld [vmem:[%s14831_s5 + $0x128] sm:$0xff]  ;;  %v4973_v28 = vld [vmem:[%s14831_s5 + $0x138] sm:$0xff]  ;;  %v4998_v42 = vld [vmem:[%s14831_s5 + $0x200] sm:$0xff] }
 0x37e   : > { %v9160_v18 = vpack.c.bf16 %v4971_v16, %v4970_v8  ;;  %v4804_v46 = vld [vmem:[#allocation4 + $0x15] sm:$0xff]  ;;  %v9162_v40 = vpack.c.bf16 %v4989_v44, %v4988_v11  ;;  %v4805_v58 = vld [vmem:[#allocation4 + $0x1d] sm:$0xff] }
 0x37f   : > { %4531 = vst.msk [vmem:[#allocation4 + $0x47] sm:$0xff] %vm495_vm0, %v4530_v54  ;;  %4446 = vst.msk [vmem:[#allocation3 + $0x123] sm:$0xff] %vm495_vm0, %v4410_v63  ;;  %v4375_v33 = vmax.f32 %v4337_v4, 0.0  ;;  %v4991_v21 = vld [vmem:[%s14831_s5 + $0x1c8] sm:$0xff]  ;;  %v4974_v4 = vld [vmem:[%s14831_s5 + $0x140] sm:$0xff] }
 0x380   : > { %v9166_v63 = vpack.c.bf16 %v4991_v21, %v4990_v19  ;;  %v4999_v10 = vld [vmem:[%s14831_s5 + $0x208] sm:$0xff] }
 0x381   : > { %v4411_v53 = vmul.f32 %v15078_v25, %v4375_v33  ;;  %v4992_v33 = vld [vmem:[%s14831_s5 + $0x1d0] sm:$0xff]  ;;  %v4993_v25 = vld [vmem:[%s14831_s5 + $0x1d8] sm:$0xff] }
 0x382   : > { %v4533_v30 = vld [vmem:[#allocation3 + $0x10f] ss:$2 sm:$0xff]  ;;  %v4535_v17 = vld [vmem:[#allocation3 + $0x110] ss:$2 sm:$0xff]  ;;  %v4813_v23 = vld [vmem:[#allocation4 + $0x5d] sm:$0xff] }
 0x383   : > { %4447 = vst.msk [vmem:[#allocation3 + $0x12b] sm:$0xff] %vm495_vm0, %v4411_v53  ;;  %v4536_v3 = vmax.f32 %v4533_v30, %v4535_v17  ;;  %v4806_v17 = vld [vmem:[#allocation4 + $0x25] sm:$0xff] }
 0x386   : > { %v4651_v24 = vld [vmem:[#allocation4 + $0x42] sm:$0xff] }
 0x387   : > { %v4572_v35 = vld [vmem:[#allocation4 + $0x41] sm:$0xff]  ;;  %4678 = vrot.lane.b32.xlu0 %v4651_v24, %s9834_s25  ;;  %4642 = vst.msk [vmem:[#allocation10 + $0x248] sm:$0xff] %vm495_vm0, %v4651_v24  ;;  %v4573_v56 = vld [vmem:[#allocation4 + $0x49] sm:$0xff]  ;;  %v9170_v24 = vpack.c.bf16 %v4993_v25, %v4992_v33 }
 0x388   : > { %4600 = vrot.lane.b32.xlu1 %v4572_v35, %s9834_s25  ;;  %v12684_v59 = vld [vmem:[#allocation4 + $0x44] sm:$0xff] }
 0x389   : > { %v4552_v27 = vld [vmem:[#allocation4 + $0x40] sm:$0xff]  ;;  %v4553_v37 = vld [vmem:[#allocation4 + $0x48] sm:$0xff]  ;;  %4800 = vst.msk [vmem:[#allocation10 + $0x1c8] sm:$0xff] %vm495_vm0, %v12684_v59 }
 0x38a   : > { %4562 = vst.msk [vmem:[#allocation10 + $0x240] sm:$0xff] %vm495_vm0, %v4552_v27  ;;  %v4711_v45 = vld [vmem:[#allocation4 + $0x43] sm:$0xff]  ;;  %4563 = vst.msk [vmem:[#allocation10 + $0x288] sm:$0xff] %vm495_vm0, %v4553_v37  ;;  %v4994_v37 = vld [vmem:[%s14831_s5 + $0x1e0] sm:$0xff] }
 0x38b   : > { %v4870_v61 = vld [vmem:[#allocation4 + $0x46] sm:$0xff]  ;;  %4721 = vst.msk [vmem:[#allocation10 + $0x208] sm:$0xff] %vm495_vm0, %v4711_v45  ;;  %v4995_v45 = vld [vmem:[%s14831_s5 + $0x1e8] sm:$0xff] }
 0x38c   : > { %4880 = vst.msk [vmem:[#allocation10 + $0x1d0] sm:$0xff] %vm495_vm0, %v4870_v61  ;;  %v4538_v20 = vld [vmem:[#allocation3 + $0x121] ss:$2 sm:$0xff]  ;;  %4602 = vrot.lane.b32.xlu1 %v4573_v56, %s9834_s25  ;;  %v4541_v62 = vld [vmem:[#allocation3 + $0x122] ss:$2 sm:$0xff]  ;;  %v4978_v56 = vld [vmem:[%s14831_s5 + $0x160] sm:$0xff] }
 0x38d   : > { %v4539_v38 = vmax.f32 %v4536_v3, %v4538_v20  ;;  %v4665_v47 = vpop.permute.xlu0 %4664  ;;  %v4976_v35 = vld [vmem:[%s14831_s5 + $0x150] sm:$0xff]  ;;  %v4807_v3 = vld [vmem:[#allocation4 + $0x2d] sm:$0xff]  ;;  %v9174_v20 = vpack.c.bf16 %v4995_v45, %v4994_v37 }
 0x38e   : > { %v4587_v50 = vpop.permute.xlu1 %4586  ;;  %4694 = vst.msk [vmem:[#allocation10 + $0x8] sm:$0xff] %vm2265_vm1, %v4665_v47  ;;  %v4808_v47 = vld [vmem:[#allocation4 + $0x35] sm:$0xff]  ;;  %v5000_v45 = vld [vmem:[%s14831_s5 + $0x210] sm:$0xff] }
 0x38f   : > { %v4542_v14 = vmax.f32 %v4539_v38, %v4541_v62  ;;  %4615 = vst.msk [vmem:[#allocation10 + $0x48] sm:$0xff] %vm2265_vm1, %v4587_v50  ;;  %v4996_v38 = vld [vmem:[%s14831_s5 + $0x1f0] sm:$0xff]  ;;  %v4997_v62 = vld [vmem:[%s14831_s5 + $0x1f8] sm:$0xff] }
 0x390   : > { %4744 = vrot.lane.b32.xlu1 %v4724_v39, %s9834_s25  ;;  %v9178_v50 = vpack.c.bf16 %v4997_v62, %v4996_v38  ;;  %v4980_v39 = vld [vmem:[%s14831_s5 + $0x170] sm:$0xff]  ;;  %v5002_v38 = vld [vmem:[%s14831_s5 + $0x220] sm:$0xff]  ;;  %v5003_v62 = vld [vmem:[%s14831_s5 + $0x228] sm:$0xff] }
 0x391   : > { %4543 = vst.msk [vmem:[#allocation4 + $0x51] sm:$0xff] %vm495_vm0, %v4542_v14 }
 0x394   : > { %4746 = vrot.lane.b32.xlu1 %v12524_v55, %s9834_s25 }
 0x395   : > { %v4885_v9 = vld [vmem:[#allocation10 + $0x8] sm:$0xff] }
 0x396   : > { %5107 = vmatprep.mubr.f32.mxu0 %v4885_v9  ;;  %5448 = vst [vmem:[#allocation10 + $0x8] sm:$0xff] %v5438_v12  ;;  %v4889_v27 = vld [vmem:[#allocation10 + $0x48] sm:$0xff]  ;;  %v12834_v9 = vpack.c.bf16 %v4999_v10, %v4998_v42  ;;  %v5004_v42 = vld [vmem:[%s14831_s5 + $0x230] sm:$0xff]  ;;  %v5005_v10 = vld [vmem:[%s14831_s5 + $0x238] sm:$0xff] }
 0x397   : > { %5108 = vmatmul.mubr.f32.vlgmr.msra.gmra.mrb[72].mxu0 %v4884_v0  ;;  %v4809_v0 = vld [vmem:[#allocation4 + $0x3d] sm:$0xff] }
 0x398   : > { %v4652_v36 = vld [vmem:[#allocation4 + $0x4a] sm:$0xff]  ;;  %4748 = vrot.lane.b32.xlu1 %v12559_v31, %s9834_s25  ;;  %v12723_v22 = vld [vmem:[#allocation4 + $0x54] sm:$0xff]  ;;  %9153 = vmatpush3.bf16.msra.mxu0 %v9152_v48  ;;  %v9156_v31 = vpack.c.bf16 %v4969_v26, %v4968_v13  ;;  %v4793_v48 = vld [vmem:[#allocation4 + $0x5c] sm:$0xff] }
 0x399   : > { %v12715_v55 = vld [vmem:[#allocation4 + $0x4c] sm:$0xff]  ;;  %4680 = vrot.lane.b32.xlu0 %v4652_v36, %s9834_s25  ;;  %4643 = vst.msk [vmem:[#allocation10 + $0x290] sm:$0xff] %vm495_vm0, %v4652_v36  ;;  %4802 = vst.msk [vmem:[#allocation10 + $0x258] sm:$0xff] %vm495_vm0, %v12723_v22  ;;  %v4872_v60 = vld [vmem:[#allocation4 + $0x56] sm:$0xff]  ;;  %9155 = vmatprep.subr.bf16.mxu0 %v9154_v29 }
 0x39a   : > { %4801 = vst.msk [vmem:[#allocation10 + $0x210] sm:$0xff] %vm495_vm0, %v12715_v55  ;;  %v4712_v1 = vld [vmem:[#allocation4 + $0x4b] sm:$0xff]  ;;  %v4713_v5 = vld [vmem:[#allocation4 + $0x53] sm:$0xff]  ;;  %4882 = vst.msk [vmem:[#allocation10 + $0x260] sm:$0xff] %vm495_vm0, %v4872_v60 }
 0x39b   : > { %4722 = vst.msk [vmem:[#allocation10 + $0x250] sm:$0xff] %vm495_vm0, %v4712_v1  ;;  %v4871_v6 = vld [vmem:[#allocation4 + $0x4e] sm:$0xff]  ;;  %4723 = vst.msk [vmem:[#allocation10 + $0x298] sm:$0xff] %vm495_vm0, %v4713_v5  ;;  %v4810_v36 = vld [vmem:[#allocation4 + $0x45] sm:$0xff] }
 0x39c   : > { %v4653_v51 = vld [vmem:[#allocation4 + $0x52] sm:$0xff]  ;;  %4881 = vst.msk [vmem:[#allocation10 + $0x218] sm:$0xff] %vm495_vm0, %v4871_v6  ;;  %4750 = vrot.lane.b32.xlu1 %v12588_v49, %s9834_s25  ;;  %9157 = vmatpush3.bf16.msra.mxu0 %v9156_v31  ;;  %v4972_v49 = vld [vmem:[%s14831_s5 + $0x130] sm:$0xff]  ;;  %4803 = vst.msk [vmem:[#allocation10 + $0x2a0] sm:$0xff] %vm495_vm0, %v4793_v48 }
 0x39d   : > { %4682 = vrot.lane.b32.xlu0 %v4653_v51, %s9834_s25  ;;  %v4667_v52 = vpop.permute.xlu0 %4666  ;;  %9159 = vmatprep.subr.bf16.mxu0 %v9158_v57  ;;  %v9164_v54 = vpack.c.bf16 %v4973_v28, %v4972_v49  ;;  %v4811_v29 = vld [vmem:[#allocation4 + $0x4d] sm:$0xff] }
 0x39e   : > { %v4589_v7 = vpop.permute.xlu1 %4588  ;;  %4695 = vst.msk [vmem:[#allocation10 + $0x50] sm:$0xff] %vm2265_vm1, %v4667_v52 }
 0x39f   : > { %4616 = vst.msk [vmem:[#allocation10 + $0x90] sm:$0xff] %vm2265_vm1, %v4589_v7 }
 0x3a0   : > { %4752 = vrot.lane.b32.xlu1 %v12618_v15, %s9834_s25  ;;  %9161 = vmatpush3.bf16.msra.mxu0 %v9160_v18  ;;  %v4975_v15 = vld [vmem:[%s14831_s5 + $0x148] sm:$0xff] }
 0x3a1   : > { %4824 = vrot.lane.b32.xlu0 %v4804_v46, %s9834_s25  ;;  %9163 = vmatprep.subr.bf16.mxu0 %v9162_v40  ;;  %v9168_v30 = vpack.c.bf16 %v4975_v15, %v4974_v4 }
 0x3a4   : > { %4754 = vrot.lane.b32.xlu1 %v12624_v32, %s9834_s25  ;;  %9165 = vmatpush3.bf16.msra.mxu0 %v9164_v54  ;;  %v4977_v32 = vld [vmem:[%s14831_s5 + $0x158] sm:$0xff] }
 0x3a5   : > { %4826 = vrot.lane.b32.xlu0 %v4805_v58, %s9834_s25  ;;  %v4890_v53 = vld [vmem:[#allocation10 + $0x50] sm:$0xff]  ;;  %9167 = vmatprep.subr.bf16.mxu0 %v9166_v63  ;;  %v9172_v61 = vpack.c.bf16 %v4977_v32, %v4976_v35  ;;  %v5458_v58 = vld [vmem:[#allocation5 + $0x2] sm:$0xff] }
 0x3a6   : > { %5112 = vmatprep.mubr.f32.mxu0 %v4890_v53  ;;  %v4894_v26 = vld [vmem:[#allocation10 + $0x90] sm:$0xff] }
 0x3a7   : > { %5113 = vmatmul.mubr.f32.gmra.mrb[74].mxu0 %v4889_v27 }
 0x3a8   : > { %4756 = vrot.lane.b32.xlu1 %v12655_v41, %s9834_s25  ;;  %9169 = vmatpush3.bf16.msra.mxu0 %v9168_v30  ;;  %v4979_v41 = vld [vmem:[%s14831_s5 + $0x168] sm:$0xff] }
 0x3a9   : > { %4828 = vrot.lane.b32.xlu0 %v4806_v17, %s9834_s25  ;;  %9171 = vmatprep.subr.bf16.mxu0 %v9170_v24  ;;  %v9176_v14 = vpack.c.bf16 %v4979_v41, %v4978_v56 }
 0x3ac   : > { %4758 = vrot.lane.b32.xlu1 %v12684_v59, %s9834_s25  ;;  %9173 = vmatpush3.bf16.msra.mxu0 %v9172_v61  ;;  %v4981_v59 = vld [vmem:[%s14831_s5 + $0x178] sm:$0xff] }
 0x3ad   : > { %4830 = vrot.lane.b32.xlu0 %v4807_v3, %s9834_s25  ;;  %9175 = vmatprep.subr.bf16.mxu0 %v9174_v20  ;;  %v9180_v34 = vpack.c.bf16 %v4981_v59, %v4980_v39  ;;  %v5001_v61 = vld [vmem:[%s14831_s5 + $0x218] sm:$0xff]  ;;  %v9190_v39 = vpack.c.bf16 %v5003_v62, %v5002_v38 }
 0x3ae   : > { %v9186_v41 = vpack.c.bf16 %v5001_v61, %v5000_v45  ;;  %v5784_v45 = vld [vmem:[%s14833_s7 + $0x300] sm:$0xff]  ;;  %v5707_v38 = vld [vmem:[%s14833_s7 + $0x98] sm:$0xff] }
 0x3b0   : > { %4760 = vrot.lane.b32.xlu1 %v12715_v55, %s9834_s25  ;;  %9177 = vmatpush3.bf16.msra.mxu0 %v9176_v14 }
 0x3b1   : > { %4832 = vrot.lane.b32.xlu0 %v4808_v47, %s9834_s25  ;;  %v4669_v12 = vpop.permute.xlu0 %4668  ;;  %9179 = vmatprep.subr.bf16.mxu0 %v9178_v50 }
 0x3b2   : > { %v4591_v2 = vpop.permute.xlu1 %4590  ;;  %4696 = vst.msk [vmem:[#allocation10 + $0x98] sm:$0xff] %vm2265_vm1, %v4669_v12 }
 0x3b3   : > { %4617 = vst.msk [vmem:[#allocation10 + $0xd8] sm:$0xff] %vm2265_vm1, %v4591_v2 }
 0x3b4   : > { %4762 = vrot.lane.b32.xlu1 %v12723_v22, %s9834_s25  ;;  %9181 = vmatpush3.bf16.msra.mxu0 %v9180_v34  ;;  %v4812_v22 = vld [vmem:[#allocation4 + $0x55] sm:$0xff] }
 0x3b5   : > { %4834 = vrot.lane.b32.xlu0 %v4809_v0, %s9834_s25  ;;  %9183 = vmatprep.subr.bf16.mxu0 %v12834_v9  ;;  %v9194_v0 = vpack.c.bf16 %v5005_v10, %v5004_v42  ;;  %v5708_v42 = vld [vmem:[%s14833_s7 + $0xa0] sm:$0xff]  ;;  %v5709_v10 = vld [vmem:[%s14833_s7 + $0xa8] sm:$0xff] }
 0x3b6   : > { %v4593_v13 = vpop.permute.xlu1 %4592 }
 0x3b7   : > { %4618 = vst.msk [vmem:[#allocation10 + $0x120] sm:$0xff] %vm2265_vm1, %v4593_v13 }
 0x3b9   : > { %4836 = vrot.lane.b32.xlu0 %v4810_v36, %s9834_s25  ;;  %v4895_v55 = vld [vmem:[#allocation10 + $0x98] sm:$0xff] }
 0x3ba   : > { %5117 = vmatprep.mubr.f32.mxu0 %v4895_v55  ;;  %v4899_v6 = vld [vmem:[#allocation10 + $0xd8] sm:$0xff] }
 0x3bb   : > { %5118 = vmatmul.mubr.f32.gmra.mrb[76].mxu0 %v4894_v26 }
 0x3bd   : > { %4838 = vrot.lane.b32.xlu0 %v4811_v29, %s9834_s25 }
 0x3be   : > { %v4904_v51 = vld [vmem:[#allocation10 + $0x120] sm:$0xff] }
 0x3c1   : > { %4840 = vrot.lane.b32.xlu0 %v4812_v22, %s9834_s25  ;;  %v4671_v43 = vpop.permute.xlu0 %4670 }
 0x3c2   : > { %v4595_v1 = vpop.permute.xlu1 %4594  ;;  %4697 = vst.msk [vmem:[#allocation10 + $0xe0] sm:$0xff] %vm2265_vm1, %v4671_v43 }
 0x3c3   : > { %4619 = vst.msk [vmem:[#allocation10 + $0x168] sm:$0xff] %vm2265_vm1, %v4595_v1 }
 0x3c5   : > { %4842 = vrot.lane.b32.xlu0 %v4813_v23, %s9834_s25  ;;  %v4673_v31 = vpop.permute.xlu0 %4672 }
 0x3c6   : > { %4698 = vst.msk [vmem:[#allocation10 + $0x128] sm:$0xff] %vm2265_vm1, %v4673_v31 }
 0x3c9   : > { %v4900_v5 = vld [vmem:[#allocation10 + $0xe0] sm:$0xff] }
 0x3ca   : > { %5122 = vmatprep.mubr.f32.mxu0 %v4900_v5  ;;  %v4909_v11 = vld [vmem:[#allocation10 + $0x168] sm:$0xff] }
 0x3cb   : > { %5123 = vmatmul.mubr.f32.gmra.mrb[78].mxu0 %v4899_v6 }
 0x3cd   : > { %v4905_v60 = vld [vmem:[#allocation10 + $0x128] sm:$0xff] }
 0x3ce   : > { %5127 = vmatprep.mubr.f32.mxu0 %v4905_v60 }
 0x3cf   : > { %5128 = vmatmul.mubr.f32.gmra.mrb[80].mxu0 %v4904_v51 }
 0x3d5   : > { %v4675_v57 = vpop.permute.xlu0 %4674 }
 0x3d6   : > { %v4597_v8 = vpop.permute.xlu1 %4596  ;;  %4699 = vst.msk [vmem:[#allocation10 + $0x170] sm:$0xff] %vm2265_vm1, %v4675_v57 }
 0x3d7   : > { %4620 = vst.msk [vmem:[#allocation10 + $0x1b0] sm:$0xff] %vm2265_vm1, %v4597_v8 }
 0x3dd   : > { %v4910_v16 = vld [vmem:[#allocation10 + $0x170] sm:$0xff] }
 0x3de   : > { %5132 = vmatprep.mubr.f32.mxu0 %v4910_v16  ;;  %v4914_v18 = vld [vmem:[#allocation10 + $0x1b0] sm:$0xff] }
 0x3df   : > { %5133 = vmatmul.mubr.f32.gmra.mrb[82].mxu0 %v4909_v11 }
 0x3e7   : > { %v4677_v44 = vpop.permute.xlu0 %4676 }
 0x3e8   : > { %v4599_v52 = vpop.permute.xlu1 %4598  ;;  %4700 = vst.msk [vmem:[#allocation10 + $0x1b8] sm:$0xff] %vm2265_vm1, %v4677_v44 }
 0x3e9   : > { %4621 = vst.msk [vmem:[#allocation10 + $0x1f8] sm:$0xff] %vm2265_vm1, %v4599_v52  ;;  %v4888_v52 = vld [vmem:[#allocation10 + $0x20] sm:$0xff] }
 0x3ef   : > { %v4915_v7 = vld [vmem:[#allocation10 + $0x1b8] sm:$0xff] }
 0x3f0   : > { %5137 = vmatprep.mubr.f32.mxu0 %v4915_v7  ;;  %v4919_v21 = vld [vmem:[#allocation10 + $0x1f8] sm:$0xff]  ;;  %v4893_v7 = vld [vmem:[#allocation10 + $0x68] sm:$0xff] }
 0x3f1   : > { %5138 = vmatmul.mubr.f32.gmra.mrb[84].mxu0 %v4914_v18  ;;  %v4898_v18 = vld [vmem:[#allocation10 + $0xb0] sm:$0xff] }
 0x3f9   : > { %v4679_v46 = vpop.permute.xlu0 %4678 }
 0x3fa   : > { %v4601_v40 = vpop.permute.xlu1 %4600  ;;  %4701 = vst.msk [vmem:[#allocation10 + $0x200] sm:$0xff] %vm2265_vm1, %v4679_v46  ;;  %v4903_v46 = vld [vmem:[#allocation10 + $0xf8] sm:$0xff] }
 0x3fb   : > { %4622 = vst.msk [vmem:[#allocation10 + $0x240] sm:$0xff] %vm2265_vm1, %v4601_v40  ;;  %v4908_v40 = vld [vmem:[#allocation10 + $0x140] sm:$0xff] }
 0x3fe   : > { %v4603_v49 = vpop.permute.xlu1 %4602 }
 0x3ff   : > { %4623 = vst.msk [vmem:[#allocation10 + $0x288] sm:$0xff] %vm2265_vm1, %v4603_v49  ;;  %v4913_v49 = vld [vmem:[#allocation10 + $0x188] sm:$0xff] }
 0x401   : > { %v4920_v19 = vld [vmem:[#allocation10 + $0x200] sm:$0xff] }
 0x402   : > { %v4745_v28 = vpop.permute.xlu1 %4744  ;;  %5142 = vmatprep.mubr.f32.mxu0 %v4920_v19  ;;  %v4924_v24 = vld [vmem:[#allocation10 + $0x240] sm:$0xff]  ;;  %v4923_v19 = vld [vmem:[#allocation10 + $0x218] sm:$0xff] }
 0x403   : > { %4774 = vst.msk [vmem:[#allocation10 + $0x10] sm:$0xff] %vm2265_vm1, %v4745_v28  ;;  %5143 = vmatmul.mubr.f32.gmra.mrb[86].mxu0 %v4919_v21  ;;  %v4918_v28 = vld [vmem:[#allocation10 + $0x1d0] sm:$0xff]  ;;  %v4928_v21 = vld [vmem:[#allocation10 + $0x260] sm:$0xff] }
 0x406   : > { %v4747_v54 = vpop.permute.xlu1 %4746  ;;  %v4929_v37 = vld [vmem:[#allocation10 + $0x288] sm:$0xff] }
 0x407   : > { %4775 = vst.msk [vmem:[#allocation10 + $0x58] sm:$0xff] %vm2265_vm1, %v4747_v54  ;;  %v4933_v54 = vld [vmem:[#allocation10 + $0x2a8] sm:$0xff] }
 0x40a   : > { %v4886_v63 = vld [vmem:[#allocation10 + $0x10] sm:$0xff]  ;;  %v4749_v15 = vpop.permute.xlu1 %4748 }
 0x40b   : > { %v4681_v4 = vpop.permute.xlu0 %4680  ;;  %5468 = vst [vmem:[#allocation10 + $0x10] sm:$0xff] %v5458_v58  ;;  %4776 = vst.msk [vmem:[#allocation10 + $0xa0] sm:$0xff] %vm2265_vm1, %v4749_v15 }
 0x40c   : > { %4702 = vst.msk [vmem:[#allocation10 + $0x248] sm:$0xff] %vm2265_vm1, %v4681_v4 }
 0x40e   : > { %v4751_v25 = vpop.permute.xlu1 %4750  ;;  %v4891_v59 = vld [vmem:[#allocation10 + $0x58] sm:$0xff] }
 0x40f   : > { %v4683_v33 = vpop.permute.xlu0 %4682  ;;  %4777 = vst.msk [vmem:[#allocation10 + $0xe8] sm:$0xff] %vm2265_vm1, %v4751_v25 }
 0x410   : > { %4703 = vst.msk [vmem:[#allocation10 + $0x290] sm:$0xff] %vm2265_vm1, %v4683_v33 }
 0x412   : > { %v4753_v30 = vpop.permute.xlu1 %4752 }
 0x413   : > { %v4825_v53 = vpop.permute.xlu0 %4824  ;;  %v4925_v17 = vld [vmem:[#allocation10 + $0x248] sm:$0xff]  ;;  %4778 = vst.msk [vmem:[#allocation10 + $0x130] sm:$0xff] %vm2265_vm1, %v4753_v30 }
 0x414   : > { %4854 = vst.msk [vmem:[#allocation10 + $0x18] sm:$0xff] %vm2265_vm1, %v4825_v53  ;;  %5147 = vmatprep.mubr.f32.mxu0 %v4925_v17  ;;  %v5704_v53 = vld [vmem:[%s14833_s7 + $0x80] sm:$0xff]  ;;  %v5705_v30 = vld [vmem:[%s14833_s7 + $0x88] sm:$0xff] }
 0x415   : > { %5148 = vmatmul.mubr.f32.gmra.mrb[88].mxu0 %v4924_v24  ;;  %v5800_v17 = vld [vmem:[%s14833_s7 + $0x380] sm:$0xff]  ;;  %v9198_v24 = vpack.c.bf16 %v5705_v30, %v5704_v53  ;;  %v5806_v53 = vld [vmem:[%s14833_s7 + $0x3b0] sm:$0xff] }
 0x416   : > { %v4755_v32 = vpop.permute.xlu1 %4754  ;;  %v4901_v55 = vld [vmem:[#allocation10 + $0xe8] sm:$0xff] }
 0x417   : > { %v4827_v35 = vpop.permute.xlu0 %4826  ;;  %v4930_v27 = vld [vmem:[#allocation10 + $0x290] sm:$0xff]  ;;  %4779 = vst.msk [vmem:[#allocation10 + $0x178] sm:$0xff] %vm2265_vm1, %v4755_v32 }
 0x418   : > { %4855 = vst.msk [vmem:[#allocation10 + $0x60] sm:$0xff] %vm2265_vm1, %v4827_v35  ;;  %5152 = vmatprep.mubr.f32.mxu0 %v4930_v27  ;;  %v5801_v35 = vld [vmem:[%s14833_s7 + $0x388] sm:$0xff]  ;;  %v5688_v27 = vld [vmem:[%s14833_s7] sm:$0xff] }
 0x419   : > { %5153 = vmatmul.mubr.f32.gmra.mrb[90].mxu0 %v4929_v37  ;;  %v9294_v32 = vpack.c.bf16 %v5801_v35, %v5800_v17  ;;  %v5689_v37 = vld [vmem:[%s14833_s7 + $0x8] sm:$0xff]  ;;  %v5807_v17 = vld [vmem:[%s14833_s7 + $0x3b8] sm:$0xff] }
 0x41a   : > { %v4757_v20 = vpop.permute.xlu1 %4756  ;;  %v4906_v22 = vld [vmem:[#allocation10 + $0x130] sm:$0xff]  ;;  %v9200_v61 = vpack.c.bf16 %v5689_v37, %v5688_v27  ;;  %v5791_v35 = vld [vmem:[%s14833_s7 + $0x338] sm:$0xff] }
 0x41b   : > { %v4829_v3 = vpop.permute.xlu0 %4828  ;;  %v4887_v56 = vld [vmem:[#allocation10 + $0x18] sm:$0xff]  ;;  %4780 = vst.msk [vmem:[#allocation10 + $0x1c0] sm:$0xff] %vm2265_vm1, %v4757_v20  ;;  %9295 = vmatprep.subr.bf16.mxu1 %v9294_v32  ;;  %v9306_v32 = vpack.c.bf16 %v5807_v17, %v5806_v53  ;;  %v5741_v53 = vld [vmem:[%s14833_s7 + $0x1a8] sm:$0xff] }
 0x41c   : > { %4856 = vst.msk [vmem:[#allocation10 + $0xa8] sm:$0xff] %vm2265_vm1, %v4829_v3  ;;  %5222 = vmatprep.mubr.f32.mxu0 %v4887_v56  ;;  %v5785_v3 = vld [vmem:[%s14833_s7 + $0x308] sm:$0xff] }
 0x41d   : > { %5223 = vmatmul.mubr.f32.vlgmr.msra.gmra.mrb[92].mxu0 %v4886_v63  ;;  %v9296_v56 = vpack.c.bf16 %v5785_v3, %v5784_v45  ;;  %v5716_v45 = vld [vmem:[%s14833_s7 + $0xe0] sm:$0xff] }
 0x41e   : > { %9185 = vmatpush3.bf16.msra.mxu0 %v12834_v9  ;;  %v4759_v47 = vpop.permute.xlu1 %4758  ;;  %v4896_v9 = vld [vmem:[#allocation10 + $0xa0] sm:$0xff]  ;;  %v4911_v1 = vld [vmem:[#allocation10 + $0x178] sm:$0xff] }
 0x41f   : > { %v4831_v14 = vpop.permute.xlu0 %4830  ;;  %v4892_v50 = vld [vmem:[#allocation10 + $0x60] sm:$0xff]  ;;  %9187 = vmatprep.subr.bf16.mxu0 %v9186_v41  ;;  %4781 = vst.msk [vmem:[#allocation10 + $0x208] sm:$0xff] %vm2265_vm1, %v4759_v47  ;;  %9297 = vmatpush3.bf16.msra.mxu1 %v9296_v56 }
 0x420   : > { %4857 = vst.msk [vmem:[#allocation10 + $0xf0] sm:$0xff] %vm2265_vm1, %v4831_v14  ;;  %5227 = vmatprep.mubr.f32.mxu0 %v4892_v50  ;;  %v5690_v50 = vld [vmem:[%s14833_s7 + $0x10] sm:$0xff] }
 0x421   : > { %5228 = vmatmul.mubr.f32.gmra.mrb[94].mxu0 %v4891_v59 }
 0x422   : > { %9189 = vmatpush3.bf16.msra.mxu0 %v9186_v41  ;;  %v4761_v2 = vpop.permute.xlu1 %4760  ;;  %v4916_v6 = vld [vmem:[#allocation10 + $0x1c0] sm:$0xff]  ;;  %v5706_v41 = vld [vmem:[%s14833_s7 + $0x90] sm:$0xff] }
 0x423   : > { %v4833_v12 = vpop.permute.xlu0 %4832  ;;  %v4897_v34 = vld [vmem:[#allocation10 + $0xa8] sm:$0xff]  ;;  %9191 = vmatprep.subr.bf16.mxu0 %v9190_v39  ;;  %4782 = vst.msk [vmem:[#allocation10 + $0x250] sm:$0xff] %vm2265_vm1, %v4761_v2  ;;  %v9202_v14 = vpack.c.bf16 %v5707_v38, %v5706_v41  ;;  %v5692_v2 = vld [vmem:[%s14833_s7 + $0x20] sm:$0xff] }
 0x424   : > { %4858 = vst.msk [vmem:[#allocation10 + $0x138] sm:$0xff] %vm2265_vm1, %v4833_v12  ;;  %5232 = vmatprep.mubr.f32.mxu0 %v4897_v34  ;;  %v9206_v12 = vpack.c.bf16 %v5709_v10, %v5708_v42  ;;  %v5693_v34 = vld [vmem:[%s14833_s7 + $0x28] sm:$0xff]  ;;  %v5700_v41 = vld [vmem:[%s14833_s7 + $0x60] sm:$0xff]  ;;  %v5718_v42 = vld [vmem:[%s14833_s7 + $0xf0] sm:$0xff] }
 0x425   : > { %5233 = vmatmul.mubr.f32.gmra.mrb[96].mxu0 %v4896_v9  ;;  %v5710_v9 = vld [vmem:[%s14833_s7 + $0xb0] sm:$0xff]  ;;  %v5701_v38 = vld [vmem:[%s14833_s7 + $0x68] sm:$0xff] }
 0x426   : > { %9193 = vmatpush3.bf16.msra.mxu0 %v9190_v39  ;;  %v4763_v13 = vpop.permute.xlu1 %4762  ;;  %v4921_v57 = vld [vmem:[#allocation10 + $0x208] sm:$0xff]  ;;  %v5691_v39 = vld [vmem:[%s14833_s7 + $0x18] sm:$0xff] }
 0x427   : > { %v4835_v48 = vpop.permute.xlu0 %4834  ;;  %v4902_v36 = vld [vmem:[#allocation10 + $0xf0] sm:$0xff]  ;;  %9195 = vmatprep.subr.bf16.mxu0 %v9194_v0  ;;  %4783 = vst.msk [vmem:[#allocation10 + $0x298] sm:$0xff] %vm2265_vm1, %v4763_v13  ;;  %v9204_v59 = vpack.c.bf16 %v5691_v39, %v5690_v50  ;;  %v5792_v50 = vld [vmem:[%s14833_s7 + $0x340] sm:$0xff]  ;;  %v5793_v39 = vld [vmem:[%s14833_s7 + $0x348] sm:$0xff] }
 0x428   : > { %4859 = vst.msk [vmem:[#allocation10 + $0x180] sm:$0xff] %vm2265_vm1, %v4835_v48  ;;  %5237 = vmatprep.mubr.f32.mxu0 %v4902_v36  ;;  %v5711_v48 = vld [vmem:[%s14833_s7 + $0xb8] sm:$0xff] }
 0x429   : > { %5238 = vmatmul.mubr.f32.gmra.mrb[98].mxu0 %v4901_v55  ;;  %v9210_v36 = vpack.c.bf16 %v5711_v48, %v5710_v9  ;;  %v5810_v9 = vld [vmem:[%s14833_s7 + $0x3d0] sm:$0xff]  ;;  %v5811_v48 = vld [vmem:[%s14833_s7 + $0x3d8] sm:$0xff] }
 0x42a   : > { %9197 = vmatpush3.bf16.msra.mxu0 %v9194_v0  ;;  %v4926_v16 = vld [vmem:[#allocation10 + $0x250] sm:$0xff]  ;;  %v9208_v0 = vpack.c.bf16 %v5693_v34, %v5692_v2  ;;  %v5703_v34 = vld [vmem:[%s14833_s7 + $0x78] sm:$0xff] }
 0x42b   : > { %v4837_v29 = vpop.permute.xlu0 %4836  ;;  %v4907_v26 = vld [vmem:[#allocation10 + $0x138] sm:$0xff]  ;;  %9199 = vmatprep.subr.bf16.mxu0 %v9198_v24  ;;  %v5790_v24 = vld [vmem:[%s14833_s7 + $0x330] sm:$0xff] }
 0x42c   : > { %4860 = vst.msk [vmem:[#allocation10 + $0x1c8] sm:$0xff] %vm2265_vm1, %v4837_v29  ;;  %5242 = vmatprep.mubr.f32.mxu0 %v4907_v26  ;;  %v9308_v27 = vpack.c.bf16 %v5791_v35, %v5790_v24  ;;  %v5702_v2 = vld [vmem:[%s14833_s7 + $0x70] sm:$0xff]  ;;  %v13141_v24 = vld [vmem:[#allocation5] sm:$0xff] }
 0x42d   : > { %5243 = vmatmul.mubr.f32.gmra.mrb[100].mxu0 %v4906_v22 }
 0x42e   : > { %v4931_v44 = vld [vmem:[#allocation10 + $0x298] sm:$0xff] }
 0x42f   : > { %v4839_v23 = vpop.permute.xlu0 %4838  ;;  %v4912_v43 = vld [vmem:[#allocation10 + $0x180] sm:$0xff] }
 0x430   : > { %4861 = vst.msk [vmem:[#allocation10 + $0x210] sm:$0xff] %vm2265_vm1, %v4839_v23  ;;  %5247 = vmatprep.mubr.f32.mxu0 %v4912_v43  ;;  %v5694_v43 = vld [vmem:[%s14833_s7 + $0x30] sm:$0xff] }
 0x431   : > { %5248 = vmatmul.mubr.f32.gmra.mrb[102].mxu0 %v4911_v1  ;;  %v5695_v1 = vld [vmem:[%s14833_s7 + $0x38] sm:$0xff] }
 0x433   : > { %v4841_v31 = vpop.permute.xlu0 %4840  ;;  %v4917_v5 = vld [vmem:[#allocation10 + $0x1c8] sm:$0xff] }
 0x434   : > { %4862 = vst.msk [vmem:[#allocation10 + $0x258] sm:$0xff] %vm2265_vm1, %v4841_v31  ;;  %5252 = vmatprep.mubr.f32.mxu0 %v4917_v5  ;;  %v5802_v31 = vld [vmem:[%s14833_s7 + $0x390] sm:$0xff]  ;;  %v9212_v5 = vpack.c.bf16 %v5695_v1, %v5694_v43  ;;  %v5720_v43 = vld [vmem:[%s14833_s7 + $0x100] sm:$0xff]  ;;  %v5721_v1 = vld [vmem:[%s14833_s7 + $0x108] sm:$0xff] }
 0x435   : > { %5253 = vmatmul.mubr.f32.gmra.mrb[104].mxu0 %v4916_v6  ;;  %v5803_v6 = vld [vmem:[%s14833_s7 + $0x398] sm:$0xff] }
 0x437   : > { %v4843_v60 = vpop.permute.xlu0 %4842  ;;  %v4922_v51 = vld [vmem:[#allocation10 + $0x210] sm:$0xff] }
 0x438   : > { %4863 = vst.msk [vmem:[#allocation10 + $0x2a0] sm:$0xff] %vm2265_vm1, %v4843_v60  ;;  %5257 = vmatprep.mubr.f32.mxu0 %v4922_v51  ;;  %v5786_v60 = vld [vmem:[%s14833_s7 + $0x310] sm:$0xff]  ;;  %v9298_v51 = vpack.c.bf16 %v5803_v6, %v5802_v31  ;;  %v5813_v6 = vld [vmem:[%s14833_s7 + $0x3e8] sm:$0xff] }
 0x439   : > { %5258 = vmatmul.mubr.f32.gmra.mrb[106].mxu0 %v4921_v57  ;;  %v5787_v57 = vld [vmem:[%s14833_s7 + $0x318] sm:$0xff] }
 0x43a   : > { %9299 = vmatprep.subr.bf16.mxu1 %v9298_v51  ;;  %v9228_v51 = vpack.c.bf16 %v5703_v34, %v5702_v2  ;;  %v5746_v2 = vld [vmem:[%s14833_s7 + $0x1d0] sm:$0xff]  ;;  %v5747_v34 = vld [vmem:[%s14833_s7 + $0x1d8] sm:$0xff] }
 0x43b   : > { %v4927_v8 = vld [vmem:[#allocation10 + $0x258] sm:$0xff] }
 0x43c   : > { %5262 = vmatprep.mubr.f32.mxu0 %v4927_v8  ;;  %v5712_v8 = vld [vmem:[%s14833_s7 + $0xc0] sm:$0xff] }
 0x43d   : > { %5263 = vmatmul.mubr.f32.gmra.mrb[108].mxu0 %v4926_v16  ;;  %v5713_v16 = vld [vmem:[%s14833_s7 + $0xc8] sm:$0xff] }
 0x43f   : > { %v4932_v11 = vld [vmem:[#allocation10 + $0x2a0] sm:$0xff] }
 0x440   : > { %5267 = vmatprep.mubr.f32.mxu0 %v4932_v11  ;;  %v9300_v11 = vpack.c.bf16 %v5787_v57, %v5786_v60  ;;  %v5796_v60 = vld [vmem:[%s14833_s7 + $0x360] sm:$0xff]  ;;  %v9314_v57 = vpack.c.bf16 %v5811_v48, %v5810_v9  ;;  %v9250_v9 = vpack.c.bf16 %v5747_v34, %v5746_v2  ;;  %v5730_v48 = vld [vmem:[%s14833_s7 + $0x150] sm:$0xff] }
 0x441   : > { %5268 = vmatmul.mubr.f32.gmra.mrb[110].mxu0 %v4931_v44  ;;  %v9214_v44 = vpack.c.bf16 %v5713_v16, %v5712_v8  ;;  %v5797_v16 = vld [vmem:[%s14833_s7 + $0x368] sm:$0xff] }
 0x442   : > { %8845 = vmatprep.mubr.msk.f32.mxu0 %vm495_vm0, %v4888_v52  ;;  %9301 = vmatpush3.bf16.msra.mxu1 %v9300_v11  ;;  %v5696_v52 = vld [vmem:[%s14833_s7 + $0x40] sm:$0xff]  ;;  %v5738_v11 = vld [vmem:[%s14833_s7 + $0x190] sm:$0xff] }
 0x445   : > { %8846 = vmatmul.mubr.msk.f32.vlgmr.msra.gmra.mrb[112].mxu0 %vm495_vm0, %v4893_v7  ;;  %v5697_v7 = vld [vmem:[%s14833_s7 + $0x48] sm:$0xff] }
 0x446   : > { %8848 = vmatprep.mubr.msk.f32.mxu0 %vm495_vm0, %v4898_v18  ;;  %9201 = vmatpush3.bf16.msra.mxu0 %v9200_v61  ;;  %v5804_v18 = vld [vmem:[%s14833_s7 + $0x3a0] sm:$0xff]  ;;  %v5717_v61 = vld [vmem:[%s14833_s7 + $0xe8] sm:$0xff] }
 0x447   : > { %9203 = vmatprep.subr.bf16.mxu0 %v9202_v14  ;;  %v9222_v56 = vpack.c.bf16 %v5717_v61, %v5716_v45  ;;  %v5809_v14 = vld [vmem:[%s14833_s7 + $0x3c8] sm:$0xff]  ;;  %v5724_v45 = vld [vmem:[%s14833_s7 + $0x120] sm:$0xff] }
 0x448   : > { %v5725_v61 = vld [vmem:[%s14833_s7 + $0x128] sm:$0xff] }
 0x449   : > { %8849 = vmatmul.mubr.msk.f32.gmra.mrb[114].mxu0 %vm495_vm0, %v4903_v46  ;;  %v9216_v46 = vpack.c.bf16 %v5697_v7, %v5696_v52  ;;  %v5814_v7 = vld [vmem:[%s14833_s7 + $0x3f0] sm:$0xff] }
 0x44a   : > { %8851 = vmatprep.mubr.msk.f32.mxu0 %vm495_vm0, %v4908_v40  ;;  %9205 = vmatpush3.bf16.msra.mxu0 %v9204_v59  ;;  %v5805_v40 = vld [vmem:[%s14833_s7 + $0x3a8] sm:$0xff]  ;;  %v9224_v59 = vpack.c.bf16 %v5701_v38, %v5700_v41  ;;  %v9240_v41 = vpack.c.bf16 %v5725_v61, %v5724_v45 }
 0x44b   : > { %9207 = vmatprep.subr.bf16.mxu0 %v9206_v12  ;;  %v5719_v12 = vld [vmem:[%s14833_s7 + $0xf8] sm:$0xff] }
 0x44c   : > { %v9226_v31 = vpack.c.bf16 %v5719_v12, %v5718_v42  ;;  %v5729_v12 = vld [vmem:[%s14833_s7 + $0x148] sm:$0xff] }
 0x44d   : > { %8852 = vmatmul.mubr.msk.f32.gmra.mrb[116].mxu0 %vm495_vm0, %v4913_v49  ;;  %v5788_v49 = vld [vmem:[%s14833_s7 + $0x320] sm:$0xff] }
 0x44e   : > { %8854 = vmatprep.mubr.msk.f32.mxu0 %vm495_vm0, %v4918_v28  ;;  %9209 = vmatpush3.bf16.msra.mxu0 %v9208_v0  ;;  %v5789_v28 = vld [vmem:[%s14833_s7 + $0x328] sm:$0xff]  ;;  %v9312_v0 = vpack.c.bf16 %v5793_v39, %v5792_v50  ;;  %v5744_v50 = vld [vmem:[%s14833_s7 + $0x1c0] sm:$0xff] }
 0x44f   : > { %9211 = vmatprep.subr.bf16.mxu0 %v9210_v36  ;;  %v5794_v36 = vld [vmem:[%s14833_s7 + $0x350] sm:$0xff]  ;;  %v5745_v39 = vld [vmem:[%s14833_s7 + $0x1c8] sm:$0xff] }
 0x450   : > { %v9246_v42 = vpack.c.bf16 %v5745_v39, %v5744_v50 }
 0x451   : > { %8855 = vmatmul.mubr.msk.f32.gmra.mrb[118].mxu0 %vm495_vm0, %v4923_v19  ;;  %v9302_v19 = vpack.c.bf16 %v5805_v40, %v5804_v18  ;;  %v5815_v18 = vld [vmem:[%s14833_s7 + $0x3f8] sm:$0xff] }
 0x452   : > { %8857 = vmatprep.mubr.msk.f32.mxu0 %vm495_vm0, %v4928_v21  ;;  %9213 = vmatpush3.bf16.msra.mxu0 %v9212_v5  ;;  %v9304_v21 = vpack.c.bf16 %v5789_v28, %v5788_v49  ;;  %v5812_v5 = vld [vmem:[%s14833_s7 + $0x3e0] sm:$0xff]  ;;  %v5722_v49 = vld [vmem:[%s14833_s7 + $0x110] sm:$0xff]  ;;  %v9320_v28 = vpack.c.bf16 %v5797_v16, %v5796_v60 }
 0x453   : > { %9215 = vmatprep.subr.bf16.mxu0 %v9214_v44  ;;  %9303 = vmatprep.subr.bf16.mxu1 %v9302_v19  ;;  %v5739_v44 = vld [vmem:[%s14833_s7 + $0x198] sm:$0xff]  ;;  %v9318_v40 = vpack.c.bf16 %v5813_v6, %v5812_v5  ;;  %v5750_v5 = vld [vmem:[%s14833_s7 + $0x1f0] sm:$0xff] }
 0x454   : > { %9305 = vmatpush3.bf16.msra.mxu1 %v9304_v21  ;;  %v9234_v19 = vpack.c.bf16 %v5739_v44, %v5738_v11  ;;  %v5723_v21 = vld [vmem:[%s14833_s7 + $0x118] sm:$0xff]  ;;  %v5734_v16 = vld [vmem:[%s14833_s7 + $0x170] sm:$0xff]  ;;  %v5768_v44 = vld [vmem:[%s14833_s7 + $0x280] sm:$0xff] }
 0x455   : > { %8858 = vmatmul.mubr.msk.f32.gmra.mrb[120].mxu0 %vm495_vm0, %v4933_v54  ;;  %v5714_v54 = vld [vmem:[%s14833_s7 + $0xd0] sm:$0xff]  ;;  %9307 = vmatprep.subr.bf16.mxu1 %v9306_v32  ;;  %v9236_v32 = vpack.c.bf16 %v5723_v21, %v5722_v49  ;;  %v5751_v6 = vld [vmem:[%s14833_s7 + $0x1f8] sm:$0xff] }
 0x456   : > { %9217 = vmatpush3.bf16.msra.mxu0 %v9216_v46  ;;  %v9232_v46 = vpack.c.bf16 %v5721_v1, %v5720_v43  ;;  %v5732_v43 = vld [vmem:[%s14833_s7 + $0x160] sm:$0xff]  ;;  %v5733_v1 = vld [vmem:[%s14833_s7 + $0x168] sm:$0xff]  ;;  %v5735_v11 = vld [vmem:[%s14833_s7 + $0x178] sm:$0xff] }
 0x458   : > { %9309 = vmatpush3.bf16.msra.mxu1 %v9308_v27 }
 0x46a   : > { %v8024_v58 = vpop.f32.mrb[72].mxu0 }
 0x46b   : > { %v8025_v63 = vpop.f32.mrb[73].mxu0 }
 0x46c   : > { %v12907_v4 = vadd.f32 %v8025_v63, %v8024_v58  ;;  %v5715_v58 = vld [vmem:[%s14833_s7 + $0xd8] sm:$0xff] }
 0x46d   : > { %v9218_v63 = vpack.c.bf16 %v5715_v58, %v5714_v54  ;;  %v5798_v54 = vld [vmem:[%s14833_s7 + $0x370] sm:$0xff]  ;;  %v5799_v58 = vld [vmem:[%s14833_s7 + $0x378] sm:$0xff] }
 0x46e   : > { %v9324_v27 = vpack.c.bf16 %v5799_v58, %v5798_v54  ;;  %v13227_v58 = vld [vmem:[%s14832_s6] ss:$0 sm:$0xff] }
 0x46f   : > { %9219 = vmatprep.subr.bf16.mxu0 %v9218_v63 }
 0x47a   : > { %v8027_v15 = vpop.f32.mrb[74].mxu0 }
 0x47b   : > { %v8028_v33 = vpop.f32.mrb[75].mxu0 }
 0x47c   : > { %v12909_v25 = vadd.f32 %v8028_v33, %v8027_v15  ;;  %v5698_v15 = vld [vmem:[%s14833_s7 + $0x50] sm:$0xff]  ;;  %v5699_v33 = vld [vmem:[%s14833_s7 + $0x58] sm:$0xff] }
 0x47d   : > { %v9220_v30 = vpack.c.bf16 %v5699_v33, %v5698_v15  ;;  %v9322_v15 = vpack.c.bf16 %v5815_v18, %v5814_v7  ;;  %v5740_v33 = vld [vmem:[%s14833_s7 + $0x1a0] sm:$0xff]  ;;  %v9260_v7 = vpack.c.bf16 %v5735_v11, %v5734_v16 }
 0x47f   : > { %9221 = vmatpush3.bf16.msra.mxu0 %v9220_v30  ;;  %v6536_v30 = vld [vmem:[#allocation7 + $0x1d] sm:$0xff] }
 0x480   : > { %9223 = vmatprep.subr.bf16.mxu0 %v9222_v56  ;;  %6539 = vst [vmem:[#allocation10 + $0xc8] sm:$0xff] %v6536_v30  ;;  %v5743_v56 = vld [vmem:[%s14833_s7 + $0x1b8] sm:$0xff] }
 0x483   : > { %9225 = vmatpush3.bf16.msra.mxu0 %v9224_v59 }
 0x484   : > { %9227 = vmatprep.subr.bf16.mxu0 %v9226_v31 }
 0x487   : > { %9229 = vmatpush3.bf16.msra.mxu0 %v9228_v51 }
 0x48e   : > { %v8030_v20 = vpop.f32.mrb[76].mxu0 }
 0x48f   : > { %v8031_v62 = vpop.f32.mrb[77].mxu0 }
 0x490   : > { %v12941_v47 = vadd.f32 %v8031_v62, %v8030_v20  ;;  %v5808_v62 = vld [vmem:[%s14833_s7 + $0x3c0] sm:$0xff] }
 0x491   : > { %v9310_v10 = vpack.c.bf16 %v5809_v14, %v5808_v62  ;;  %v5726_v62 = vld [vmem:[%s14833_s7 + $0x130] sm:$0xff]  ;;  %v5727_v14 = vld [vmem:[%s14833_s7 + $0x138] sm:$0xff] }
 0x492   : > { %v9244_v59 = vpack.c.bf16 %v5727_v14, %v5726_v62 }
 0x493   : > { %9311 = vmatprep.subr.bf16.mxu1 %v9310_v10  ;;  %v5728_v10 = vld [vmem:[%s14833_s7 + $0x140] sm:$0xff] }
 0x494   : > { %9313 = vmatpush3.bf16.msra.mxu1 %v9312_v0  ;;  %v9248_v0 = vpack.c.bf16 %v5729_v12, %v5728_v10  ;;  %v5120_v12 = vadd.f32 %v12941_v47, %v13227_v58  ;;  %v15083_v47 = vld [vmem:[#allocation16_spill] sm:$0xff] }
 0x495   : > { %9315 = vmatprep.subr.bf16.mxu1 %v9314_v57  ;;  %v9256_v57 = vpack.c.bf16 %v5733_v1, %v5732_v43 }
 0x49e   : > { %v8033_v13 = vpop.f32.mrb[78].mxu0 }
 0x49f   : > { %v8034_v55 = vpop.f32.mrb[79].mxu0 }
 0x4a0   : > { %v12967_v29 = vadd.f32 %v8034_v55, %v8033_v13  ;;  %v5599_v13 = vld [vmem:[#allocation10 + $0x8] sm:$0xff]  ;;  %v5795_v55 = vld [vmem:[%s14833_s7 + $0x358] sm:$0xff] }
 0x4a1   : > { %5903 = vmatprep.mubr.f32.mxu0 %v5599_v13  ;;  %v9316_v8 = vpack.c.bf16 %v5795_v55, %v5794_v36  ;;  %v5731_v13 = vld [vmem:[%s14833_s7 + $0x158] sm:$0xff]  ;;  %v5748_v36 = vld [vmem:[%s14833_s7 + $0x1e0] sm:$0xff]  ;;  %v5749_v55 = vld [vmem:[%s14833_s7 + $0x1e8] sm:$0xff] }
 0x4a2   : > { %v8036_v26 = vpop.f32.mrb[80].mxu0  ;;  %5904 = vmatmul.mubr.f32.vlgmr.msra.gmra.mrb[122].mxu0 %v13141_v24 }
 0x4a3   : > { %v8037_v22 = vpop.f32.mrb[81].mxu0  ;;  %9317 = vmatpush3.bf16.msra.mxu1 %v9316_v8  ;;  %v9258_v8 = vpack.c.bf16 %v5751_v6, %v5750_v5 }
 0x4a4   : > { %v12969_v23 = vadd.f32 %v8037_v22, %v8036_v26  ;;  %v5736_v26 = vld [vmem:[%s14833_s7 + $0x180] sm:$0xff]  ;;  %v5737_v22 = vld [vmem:[%s14833_s7 + $0x188] sm:$0xff]  ;;  %9319 = vmatprep.subr.bf16.mxu1 %v9318_v40 }
 0x4a5   : > { %v9230_v52 = vpack.c.bf16 %v5737_v22, %v5736_v26  ;;  %v9252_v26 = vpack.c.bf16 %v5731_v13, %v5730_v48  ;;  %v9254_v22 = vpack.c.bf16 %v5749_v55, %v5748_v36  ;;  %v5125_v13 = vadd.f32 %v12967_v29, %v13227_v58 }
 0x4a6   : > { %v5130_v29 = vadd.f32 %v12969_v23, %v13227_v58 }
 0x4a7   : > { %9231 = vmatprep.subr.bf16.mxu0 %v9230_v52  ;;  %9321 = vmatpush3.bf16.msra.mxu1 %v9320_v28  ;;  %v5769_v52 = vld [vmem:[%s14833_s7 + $0x288] sm:$0xff] }
 0x4a8   : > { %9233 = vmatpush3.bf16.msra.mxu0 %v9232_v46  ;;  %9323 = vmatprep.subr.bf16.mxu1 %v9322_v15  ;;  %v9262_v18 = vpack.c.bf16 %v5769_v52, %v5768_v44  ;;  %v5110_v15 = vadd.f32 %v12907_v4, %v13227_v58 }
 0x4a9   : > { %9235 = vmatprep.subr.bf16.mxu0 %v9234_v19 }
 0x4ab   : > { %9325 = vmatpush3.bf16.msra.mxu1 %v9324_v27  ;;  %v15080_v27 = vld [vmem:[#allocation11_spill] sm:$0xff] }
 0x4ac   : > { %9237 = vmatpush3.bf16.msra.mxu0 %v9236_v32 }
 0x4b2   : > { %v8039_v37 = vpop.f32.mrb[82].mxu0 }
 0x4b3   : > { %v8040_v3 = vpop.f32.mrb[83].mxu0 }
 0x4b4   : > { %v13043_v20 = vadd.f32 %v8040_v3, %v8039_v37  ;;  %v9238_v37 = vpack.c.bf16 %v5741_v53, %v5740_v33  ;;  %v5742_v3 = vld [vmem:[%s14833_s7 + $0x1b0] sm:$0xff]  ;;  %v15079_v53 = vld [vmem:[#allocation12_spill] sm:$0xff] }
 0x4b5   : > { %v9242_v38 = vpack.c.bf16 %v5743_v56, %v5742_v3  ;;  %v5115_v56 = vadd.f32 %v12909_v25, %v13227_v58 }
 0x4b6   : > { %9239 = vmatprep.subr.bf16.mxu0 %v9238_v37  ;;  %v13236_v37 = vmul.u32.u64.low 3435973837, %v15080_v27  ;;  %v13237_v45 = vmul.u32.u64.high 3435973837, %v15080_v27, %v13236_v37 }
 0x4b7   : > { %9241 = vmatpush3.bf16.msra.mxu0 %v9240_v41 }
 0x4b8   : > { %9243 = vmatprep.subr.bf16.mxu0 %v9242_v38  ;;  %v15081_v38 = vld [vmem:[#allocation14_spill] sm:$0xff] }
 0x4b9   : > { %v13244_v62 = vmul.u32.u64.low 3435973837, %v15081_v38  ;;  %v13245_v4 = vmul.u32.u64.high 3435973837, %v15081_v38, %v13244_v62 }
 0x4bb   : > { %9245 = vmatpush3.bf16.msra.mxu0 %v9244_v59  ;;  %v15082_v59 = vld [vmem:[#allocation13_spill] sm:$0xff] }
 0x4bc   : > { %9247 = vmatprep.subr.bf16.mxu0 %v9246_v42  ;;  %v13250_v42 = vmul.u32.u64.low 3435973837, %v15082_v59  ;;  %v13251_v10 = vmul.u32.u64.high 3435973837, %v15082_v59, %v13250_v42 }
 0x4bd   : > { %v15088_v42 = vld [vmem:[#allocation19_spill] sm:$0xff] }
 0x4bf   : > { %9249 = vmatpush3.bf16.msra.mxu0 %v9248_v0  ;;  %v1258_v0 = vshrl.u32 %v13237_v45, 3 }
 0x4c0   : > { %9251 = vmatprep.subr.bf16.mxu0 %v9250_v9 }
 0x4c1   : > { %v1259_v43 = vmul.u32 10, %v1258_v0 }
 0x4c3   : > { %9253 = vmatpush3.bf16.msra.mxu0 %v9252_v26  ;;  %v1291_v26 = vshrl.u32 %v13245_v4, 3  ;;  %v15087_v4 = vld [vmem:[#allocation20_spill] sm:$0xff] }
 0x4c4   : > { %v8042_v63 = vpop.f32.mrb[84].mxu0  ;;  %9255 = vmatprep.subr.bf16.mxu0 %v9254_v22 }
 0x4c5   : > { %v8043_v17 = vpop.f32.mrb[85].mxu0  ;;  %v1292_v44 = vmul.u32 10, %v1291_v26 }
 0x4c6   : > { %v13144_v35 = vadd.f32 %v8043_v17, %v8042_v63  ;;  %v13232_v30 = vmul.u32.u64.low 3435973837, %v15079_v53  ;;  %v13233_v17 = vmul.u32.u64.high 3435973837, %v15079_v53, %v13232_v30 }
 0x4c7   : > { %9257 = vmatpush3.bf16.msra.mxu0 %v9256_v57  ;;  %v15084_v57 = vld [vmem:[#allocation15_spill] sm:$0xff]  ;;  %v15086_v30 = vld [vmem:[#allocation17_spill] sm:$0xff] }
 0x4c8   : > { %9259 = vmatprep.subr.bf16.mxu0 %v9258_v8  ;;  %v1269_v34 = vshrl.u32 %v13233_v17, 3  ;;  %v13270_v8 = vmul.u32.u64.low 3435973837, %v15084_v57  ;;  %v13271_v16 = vmul.u32.u64.high 3435973837, %v15084_v57, %v13270_v8 }
 0x4ca   : > { %v1270_v55 = vmul.u32 10, %v1269_v34 }
 0x4cb   : > { %9261 = vmatpush3.bf16.msra.mxu0 %v9260_v7 }
 0x4cc   : > { %9263 = vmatprep.subr.bf16.mxu0 %v9262_v18  ;;  %v13276_v7 = vsub.s32 %v15079_v53, %v1270_v55  ;;  %v13279_v18 = vsub.s32 %v15080_v27, %v1259_v43 }
 0x4ce   : > { %vm1363_vm2 = vcmp.ne.s32.totalorder %v13276_v7, 0  ;;  %vm1373_vm12 = vcmp.lt.s32.totalorder %v13276_v7, 0  ;;  %vm1362_vm3 = vcmp.ne.s32.totalorder %v13279_v18, 0  ;;  %vm1372_vm5 = vcmp.lt.s32.totalorder %v13279_v18, 0 }
 0x4cf   : > { %vm13319_vm7 = vmand %vm1373_vm12, %vm1363_vm2 }
 0x4d0   : > { %vm13330_vm14 = vmand %vm1372_vm5, %vm1362_vm3 }
 0x4d6   : > { %v8045_v31 = vpop.f32.mrb[86].mxu0 }
 0x4d7   : > { %v8046_v60 = vpop.f32.mrb[87].mxu0 }
 0x4d8   : > { %v13206_v51 = vadd.f32 %v8046_v60, %v8045_v31  ;;  %v13265_v31 = vmul.u32.u64.low 3435973837, %v15083_v47  ;;  %v13266_v5 = vmul.u32.u64.high 3435973837, %v15083_v47, %v13265_v31  ;;  %v1280_v60 = vshrl.u32 %v13251_v10, 3 }
 0x4da   : > { %v5145_v26 = vadd.f32 %v13206_v51, %v13227_v58 }
 0x4e8   : > { %v8048_v46 = vpop.f32.mrb[88].mxu0 }
 0x4e9   : > { %v8049_v40 = vpop.f32.mrb[89].mxu0 }
 0x4ea   : > { %v13220_v49 = vadd.f32 %v8049_v40, %v8048_v46 }
 0x4ec   : > { %v8051_v28 = vpop.f32.mrb[90].mxu0 }
 0x4ed   : > { %v8052_v19 = vpop.f32.mrb[91].mxu0 }
 0x4ee   : > { %v13222_v21 = vadd.f32 %v8052_v19, %v8051_v28  ;;  %v1281_v28 = vmul.u32 10, %v1280_v60  ;;  %v5135_v19 = vadd.f32 %v13043_v20, %v13227_v58 }
 0x4f0   : > { %v8086_v54 = vpop.f32.mrb[92].mxu0 }
 0x4f1   : > { %v8087_v63 = vpop.f32.mrb[93].mxu0 }
 0x4f2   : > { %v8088_v33 = vadd.f32 %v8087_v63, %v8086_v54  ;;  %v15085_v63 = vld [vmem:[#allocation18_spill] sm:$0xff] }
 0x4f4   : > { %v8089_v32 = vpop.f32.mrb[94].mxu0  ;;  %v13239_v61 = vadd.f32 %v8088_v33, %v5110_v15  ;;  %v13286_v15 = vmul.u32.u64.low 3435973837, %v15085_v63  ;;  %v13287_v23 = vmul.u32.u64.high 3435973837, %v15085_v63, %v13286_v15  ;;  %v1293_v33 = vsub.s32 %v15081_v38, %v1292_v44 }
 0x4f5   : > { %v8090_v3 = vpop.f32.mrb[95].mxu0  ;;  %v5140_v38 = vadd.f32 %v13144_v35, %v13227_v58  ;;  %v1393_v35 = vadd.s32 10, %v13276_v7 }
 0x4f6   : > { %v8091_v41 = vadd.f32 %v8090_v3, %v8089_v32  ;;  %v13291_v17 = vmul.u32.u64.low 3435973837, %v15086_v30  ;;  %v13292_v32 = vmul.u32.u64.high 3435973837, %v15086_v30, %v13291_v17  ;;  %v13301_v3 = vsub.s32 %v15082_v59, %v1281_v28 }
 0x4f7   : > { %vm1365_vm13 = vcmp.ne.s32.totalorder %v1293_v33, 0  ;;  %vm1375_vm6 = vcmp.lt.s32.totalorder %v1293_v33, 0  ;;  %v1335_v31 = vshrl.u32 %v13287_v23, 3  ;;  %v1403_v51 = vsel %vm13319_vm7, %v1393_v35, %v13276_v7  ;;  %v13434_v35 = vld [vmem:[#allocation5 + $0x5d] sm:$0xff] }
 0x4f8   : > { %v8092_v14 = vpop.f32.mrb[96].mxu0  ;;  %v13247_v50 = vadd.f32 %v8091_v41, %v5115_v56  ;;  %v1313_v56 = vshrl.u32 %v13266_v5, 3  ;;  %v1302_v41 = vshrl.u32 %v13271_v16, 3  ;;  %vm13338_vm8 = vmand %vm1375_vm6, %vm1365_vm13  ;;  %vm1364_vm9 = vcmp.ne.s32.totalorder %v13301_v3, 0 }
 0x4f9   : > { %v8093_v39 = vpop.f32.mrb[97].mxu0  ;;  %vm1374_vm10 = vcmp.lt.s32.totalorder %v13301_v3, 0  ;;  %v1394_v44 = vadd.s32 10, %v13301_v3  ;;  %vm13373_vm15 = vcmp.lt.s32.totalorder %v1403_v51, 8  ;;  %v13584_v51 = vld [vmem:[#allocation5 + $0x5e] sm:$0xff] }
 0x4fa   : > { %v8094_v2 = vadd.f32 %v8093_v39, %v8092_v14  ;;  %v13308_v14 = vmul.u32.u64.low 3435973837, %v15087_v4  ;;  %v13309_v39 = vmul.u32.u64.high 3435973837, %v15087_v4, %v13308_v14  ;;  %v1314_v55 = vmul.u32 10, %v1313_v56  ;;  %vm13364_vm11 = vmand %vm1374_vm10, %vm1364_vm9 }
 0x4fb   : > { %v1303_v5 = vmul.u32 10, %v1302_v41  ;;  %v13405_v14 = vsel %vm13373_vm15, 1.0, %v13141_v24 }
 0x4fc   : > { %v8095_v25 = vpop.f32.mrb[98].mxu0  ;;  %v13257_v9 = vadd.f32 %v8094_v2, %v5120_v12  ;;  %v13312_v10 = vmul.u32.u64.low 3435973837, %v15088_v42  ;;  %v13313_v12 = vmul.u32.u64.high 3435973837, %v15088_v42, %v13312_v10 }
 0x4fd   : > { %v8096_v48 = vpop.f32.mrb[99].mxu0 }
 0x4fe   : > { %v8097_v36 = vadd.f32 %v8096_v48, %v8095_v25 }
 0x500   : > { %v8098_v22 = vpop.f32.mrb[100].mxu0  ;;  %v13262_v1 = vadd.f32 %v8097_v36, %v5125_v13  ;;  %v1392_v13 = vadd.s32 10, %v13279_v18  ;;  %v1395_v36 = vadd.s32 10, %v1293_v33 }
 0x501   : > { %v8099_v6 = vpop.f32.mrb[101].mxu0 }
 0x502   : > { %v8100_v11 = vadd.f32 %v8099_v6, %v8098_v22  ;;  %v1324_v6 = vshrl.u32 %v13292_v32, 3 }
 0x504   : > { %v8101_v52 = vpop.f32.mrb[102].mxu0  ;;  %v13281_v46 = vadd.f32 %v8100_v11, %v5130_v29  ;;  %v1402_v29 = vsel %vm13330_vm14, %v1392_v13, %v13279_v18  ;;  %v1405_v11 = vsel %vm13338_vm8, %v1395_v36, %v1293_v33  ;;  %v1357_v18 = vshrl.u32 %v13309_v39, 3  ;;  %v13450_v36 = vld [vmem:[#allocation5 + $0x5c] sm:$0xff] }
 0x505   : > { %v8102_v40 = vpop.f32.mrb[103].mxu0  ;;  %v1325_v15 = vmul.u32 10, %v1324_v6  ;;  %vm13377_vm4 = vcmp.lt.s32.totalorder %v1402_v29, 8  ;;  %vm13383_vm2 = vcmp.lt.s32.totalorder %v1405_v11, 8 }
 0x506   : > { %v8103_v54 = vadd.f32 %v8102_v40, %v8101_v52  ;;  %v13358_v52 = vsub.s32 %v15083_v47, %v1314_v55  ;;  %v5150_v40 = vadd.f32 %v13220_v49, %v13227_v58  ;;  %v1346_v47 = vshrl.u32 %v13313_v12, 3 }
 0x507   : > { %v13419_v12 = vsel %vm13383_vm2, 1.0, %v13141_v24 }
 0x508   : > { %v8104_v37 = vpop.f32.mrb[104].mxu0  ;;  %v13297_v45 = vadd.f32 %v8103_v54, %v5135_v19  ;;  %v1336_v19 = vmul.u32 10, %v1335_v31  ;;  %v13370_v54 = vsub.s32 %v15084_v57, %v1303_v5  ;;  %v1404_v57 = vsel %vm13364_vm11, %v1394_v44, %v13301_v3  ;;  %v6542_v44 = vld [vmem:[#allocation7 + $0x1e] sm:$0xff] }
 0x509   : > { %v8105_v20 = vpop.f32.mrb[105].mxu0  ;;  %vm1367_vm12 = vcmp.ne.s32.totalorder %v13358_v52, 0  ;;  %vm1377_vm3 = vcmp.lt.s32.totalorder %v13358_v52, 0  ;;  %v1347_v3 = vmul.u32 10, %v1346_v47  ;;  %vm13421_vm6 = vcmp.lt.s32.totalorder %v1404_v57, 8  ;;  %6545 = vst [vmem:[#allocation10 + $0xd0] sm:$0xff] %v6542_v44 }
 0x50a   : > { %v8106_v62 = vadd.f32 %v8105_v20, %v8104_v37  ;;  %v5155_v20 = vadd.f32 %v13222_v21, %v13227_v58  ;;  %v13395_v41 = vsub.s32 %v15085_v63, %v1336_v19  ;;  %vm1366_vm5 = vcmp.ne.s32.totalorder %v13370_v54, 0  ;;  %vm13429_vm7 = vmand %vm1377_vm3, %vm1367_vm12 }
 0x50b   : > { %vm1376_vm13 = vcmp.lt.s32.totalorder %v13370_v54, 0  ;;  %v13410_v21 = vsel %vm13377_vm4, 1.0, %v13141_v24  ;;  %v1397_v58 = vadd.s32 10, %v13358_v52  ;;  %v13460_v43 = vsel %vm13421_vm6, 1.0, %v13141_v24 }
 0x50c   : > { %v8107_v2 = vpop.f32.mrb[106].mxu0  ;;  %v13324_v25 = vadd.f32 %v8106_v62, %v5140_v38  ;;  %v1358_v38 = vmul.u32 10, %v1357_v18  ;;  %v13400_v62 = vsub.s32 %v15086_v30, %v1325_v15  ;;  %vm13441_vm14 = vmand %vm1376_vm13, %vm1366_vm5  ;;  %vm1369_vm8 = vcmp.ne.s32.totalorder %v13395_v41, 0 }
 0x50d   : > { %v8108_v0 = vpop.f32.mrb[107].mxu0  ;;  %vm1379_vm9 = vcmp.lt.s32.totalorder %v13395_v41, 0  ;;  %v1399_v31 = vadd.s32 10, %v13395_v41 }
 0x50e   : > { %v8109_v22 = vadd.f32 %v8108_v0, %v8107_v2  ;;  %v13448_v13 = vsub.s32 %v15087_v4, %v1358_v38  ;;  %vm1368_vm10 = vcmp.ne.s32.totalorder %v13400_v62, 0  ;;  %vm1378_vm11 = vcmp.lt.s32.totalorder %v13400_v62, 0  ;;  %vm13475_vm15 = vmand %vm1379_vm9, %vm1369_vm8 }
 0x50f   : > { %v1407_v4 = vsel %vm13429_vm7, %v1397_v58, %v13358_v52  ;;  %vm13486_vm4 = vmand %vm1378_vm11, %vm1368_vm10  ;;  %v1409_v19 = vsel %vm13475_vm15, %v1399_v31, %v13395_v41  ;;  %vm9835_vm15 = vmmov 0  }
 0x510   : > { %v8110_v60 = vpop.f32.mrb[108].mxu0  ;;  %v13349_v8 = vadd.f32 %v8109_v22, %v5145_v26  ;;  %vm1371_vm2 = vcmp.ne.s32.totalorder %v13448_v13, 0  ;;  %vm1381_vm12 = vcmp.lt.s32.totalorder %v13448_v13, 0  ;;  %vm13492_vm3 = vcmp.lt.s32.totalorder %v1407_v4, 8 }
 0x511   : > { %v8111_v16 = vpop.f32.mrb[109].mxu0  ;;  %v1401_v18 = vadd.s32 10, %v13448_v13  ;;  %vm13515_vm7 = vmand %vm1381_vm12, %vm1371_vm2  ;;  %vm1419_vm8 = vcmp.lt.s32.totalorder %v1409_v19, 8 }
 0x512   : > { %v8112_v28 = vadd.f32 %v8111_v16, %v8110_v60  ;;  %v1398_v16 = vadd.s32 10, %v13400_v62 }
 0x513   : > { %v1411_v38 = vsel %vm13515_vm7, %v1401_v18, %v13448_v13 }
 0x514   : > { %v8113_v23 = vpop.f32.mrb[110].mxu0  ;;  %v13381_v17 = vadd.f32 %v8112_v28, %v5150_v40  ;;  %vm13558_vm10 = vcmp.lt.s32.totalorder %v1411_v38, 8 }
 0x515   : > { %v8114_v32 = vpop.f32.mrb[111].mxu0 }
 0x516   : > { %v8115_v56 = vadd.f32 %v8114_v32, %v8113_v23  ;;  %v1408_v23 = vsel %vm13486_vm4, %v1398_v16, %v13400_v62  ;;  %vm508_vm4 = vcmask 522240  }
 0x517   : > { %vm1418_vm9 = vcmp.lt.s32.totalorder %v1408_v23, 8 }
 0x518   : > { %v8847_v39 = vpop.f32.mrb[112].mxu0  ;;  %v13413_v63 = vadd.f32 %v8115_v56, %v5155_v20 }
 0x519   : > { %v5345_v10 = vadd.f32 %v8847_v39, %v13247_v50  ;;  %v5339_v30 = vpop.f32.mrb[113].mxu0  ;;  %v1396_v50 = vadd.s32 10, %v13370_v54 }
 0x51a   : > { %v5340_v0 = vadd.f32 %v5339_v30, %v13239_v61  ;;  %v13455_v61 = vsub.s32 %v15088_v42, %v1347_v3  ;;  %v13552_v30 = vsel %vm1419_vm8, 1.0, %v13141_v24 }
 0x51b   : > { %v5389_v55 = vmax.f32 %v5345_v10, 0.0  ;;  %v1406_v42 = vsel %vm13441_vm14, %v1396_v50, %v13370_v54 }
 0x51c   : > { %v5388_v26 = vmax.f32 %v5340_v0, 0.0  ;;  %v8850_v22 = vpop.f32.mrb[114].mxu0  ;;  %vm1370_vm5 = vcmp.ne.s32.totalorder %v13455_v61, 0  ;;  %vm1380_vm13 = vcmp.lt.s32.totalorder %v13455_v61, 0  ;;  %vm13498_vm6 = vcmp.lt.s32.totalorder %v1406_v42, 8 }
 0x51d   : > { %v5399_v5 = vmul.f32 %v13405_v14, %v5389_v55  ;;  %v5355_v6 = vadd.f32 %v8850_v22, %v13262_v1  ;;  %v5349_v60 = vpop.f32.mrb[115].mxu0  ;;  %v1400_v49 = vadd.s32 10, %v13455_v61  ;;  %vm13531_vm14 = vmand %vm1380_vm13, %vm1370_vm5  ;;  %v13538_v56 = vsel %vm13498_vm6, 1.0, %v13141_v24 }
 0x51e   : > { %v5398_v29 = vmul.f32 %v13410_v21, %v5388_v26  ;;  %v5350_v11 = vadd.f32 %v5349_v60, %v13257_v9  ;;  %v13581_v60 = vsel %vm13558_vm10, 1.0, %v13141_v24 }
 0x51f   : > { %5409 = vst [vmem:[#allocation5 + $0x13] sm:$0xff] %v5399_v5  ;;  %5509 = vst [vmem:[#allocation10 + $0x68] sm:$0xff] %v5399_v5  ;;  %v5391_v52 = vmax.f32 %v5355_v6, 0.0  ;;  %v1410_v58 = vsel %vm13531_vm14, %v1400_v49, %v13455_v61 }
 0x520   : > { %5408 = vst [vmem:[#allocation5 + $0xb] sm:$0xff] %v5398_v29  ;;  %5508 = vst [vmem:[#allocation10 + $0x20] sm:$0xff] %v5398_v29  ;;  %v5390_v9 = vmax.f32 %v5350_v11, 0.0  ;;  %v8853_v28 = vpop.f32.mrb[116].mxu0  ;;  %vm13566_vm11 = vcmp.lt.s32.totalorder %v1410_v58, 8 }
 0x521   : > { %v5401_v54 = vmul.f32 %v13419_v12, %v5391_v52  ;;  %v5365_v15 = vadd.f32 %v8853_v28, %v13297_v45  ;;  %v5359_v47 = vpop.f32.mrb[117].mxu0  ;;  %v13524_v45 = vsel %vm13492_vm3, 1.0, %v13141_v24  ;;  %v13593_v1 = vsel %vm13566_vm11, 1.0, %v13141_v24 }
 0x522   : > { %v5400_v32 = vmul.f32 %v13460_v43, %v5390_v9  ;;  %v5360_v37 = vadd.f32 %v5359_v47, %v13281_v46 }
 0x523   : > { %5411 = vst [vmem:[#allocation5 + $0x23] sm:$0xff] %v5401_v54  ;;  %5511 = vst [vmem:[#allocation10 + $0xf8] sm:$0xff] %v5401_v54  ;;  %v5393_v20 = vmax.f32 %v5365_v15, 0.0 }
 0x524   : > { %5410 = vst [vmem:[#allocation5 + $0x1b] sm:$0xff] %v5400_v32  ;;  %5510 = vst [vmem:[#allocation10 + $0xb0] sm:$0xff] %v5400_v32  ;;  %v5392_v46 = vmax.f32 %v5360_v37, 0.0  ;;  %v8856_v41 = vpop.f32.mrb[118].mxu0 }
 0x525   : > { %v5403_v62 = vmul.f32 %v13524_v45, %v5393_v20  ;;  %v5375_v3 = vadd.f32 %v8856_v41, %v13349_v8  ;;  %v5369_v39 = vpop.f32.mrb[119].mxu0  ;;  %v13556_v8 = vsel %vm1418_vm9, 1.0, %v13141_v24 }
 0x526   : > { %v13549_v10 = vmul.f32 %v13538_v56, %v5392_v46  ;;  %v5370_v2 = vadd.f32 %v5369_v39, %v13324_v25 }
 0x527   : > { %v5419_v34 = vld [vmem:[#allocation5 + $0x8] sm:$0xff]  ;;  %5413 = vst [vmem:[#allocation5 + $0x33] sm:$0xff] %v5403_v62  ;;  %5513 = vst [vmem:[#allocation10 + $0x188] sm:$0xff] %v5403_v62  ;;  %v5395_v0 = vmax.f32 %v5375_v3, 0.0  ;;  %v13562_v13 = vld [vmem:[#allocation5 + $0x12] sm:$0xff] }
 0x528   : > { %v5439_v50 = vld [vmem:[#allocation5 + $0x9] sm:$0xff]  ;;  %5412 = vst [vmem:[#allocation5 + $0x2b] sm:$0xff] %v13549_v10  ;;  %5512 = vst [vmem:[#allocation10 + $0x140] sm:$0xff] %v13549_v10  ;;  %v5394_v55 = vmax.f32 %v5370_v2, 0.0  ;;  %v8859_v25 = vpop.f32.mrb[120].mxu0  ;;  %v5440_v26 = vld [vmem:[#allocation5 + $0x11] sm:$0xff] }
 0x529   : > { %5908 = vmatprep.mubr.f32.mxu0 %v5439_v50  ;;  %5470 = vst [vmem:[#allocation10 + $0xa0] sm:$0xff] %v13562_v13  ;;  %v13572_v22 = vmul.f32 %v13552_v30, %v5395_v0  ;;  %v5385_v4 = vadd.f32 %v8859_v25, %v13413_v63  ;;  %v5379_v31 = vpop.f32.mrb[121].mxu0  ;;  %v5420_v5 = vld [vmem:[#allocation5 + $0x10] sm:$0xff] }
 0x52a   : > { %5909 = vmatmul.mubr.f32.gmra.mrb[124].mxu0 %v5419_v34  ;;  %v13576_v6 = vmul.f32 %v13556_v8, %v5394_v55  ;;  %v5380_v42 = vadd.f32 %v5379_v31, %v13381_v17 }
 0x52b   : > { %5913 = vmatprep.mubr.f32.mxu0 %v5440_v26  ;;  %v5421_v16 = vld [vmem:[#allocation5 + $0x18] sm:$0xff]  ;;  %v13586_v29 = vld [vmem:[#allocation5 + $0x20] sm:$0xff]  ;;  %5415 = vst [vmem:[#allocation5 + $0x43] sm:$0xff] %v13572_v22  ;;  %5515 = vst [vmem:[#allocation10 + $0x218] sm:$0xff] %v13572_v22  ;;  %v5397_v11 = vmax.f32 %v5385_v4, 0.0 }
 0x52c   : > { %v5441_v63 = vld [vmem:[#allocation5 + $0x19] sm:$0xff]  ;;  %v5442_v44 = vld [vmem:[#allocation5 + $0x21] sm:$0xff]  ;;  %5431 = vst [vmem:[#allocation10 + $0xd8] sm:$0xff] %v5421_v16  ;;  %5432 = vst [vmem:[#allocation10 + $0x120] sm:$0xff] %v13586_v29  ;;  %v5396_v40 = vmax.f32 %v5380_v42, 0.0 }
 0x52d   : > { %v13595_v52 = vld [vmem:[#allocation5 + $0x1a] sm:$0xff]  ;;  %v13597_v17 = vld [vmem:[#allocation5 + $0x22] sm:$0xff]  ;;  %5451 = vst [vmem:[#allocation10 + $0xe0] sm:$0xff] %v5441_v63  ;;  %5414 = vst [vmem:[#allocation5 + $0x3b] sm:$0xff] %v13576_v6  ;;  %v13606_v24 = vmul.f32 %v13581_v60, %v5397_v11 }
 0x52e   : > { %5514 = vst [vmem:[#allocation10 + $0x1d0] sm:$0xff] %v13576_v6  ;;  %v5538_v9 = vld [vmem:[#allocation5 + $0x14] sm:$0xff]  ;;  %v5579_v28 = vld [vmem:[#allocation5 + $0x1e] sm:$0xff]  ;;  %5452 = vst [vmem:[#allocation10 + $0x128] sm:$0xff] %v5442_v44  ;;  %5914 = vmatmul.mubr.f32.gmra.mrb[126].mxu0 %v5420_v5  ;;  %v13609_v19 = vmul.f32 %v13593_v1, %v5396_v40 }
 0x52f   : > { %5471 = vst [vmem:[#allocation10 + $0xe8] sm:$0xff] %v13595_v52  ;;  %5472 = vst [vmem:[#allocation10 + $0x130] sm:$0xff] %v13597_v17  ;;  %v5558_v7 = vld [vmem:[#allocation5 + $0x15] sm:$0xff]  ;;  %5918 = vmatprep.mubr.f32.mxu0 %v5441_v63  ;;  %v5559_v18 = vld [vmem:[#allocation5 + $0x1d] sm:$0xff] }
 0x530   : > { %5491 = vst [vmem:[#allocation10 + $0xf0] sm:$0xff] %v13597_v17  ;;  %5589 = vst [vmem:[#allocation10 + $0x88] sm:$0xff] %v5579_v28  ;;  %6248 = vmatprep.mubr.f32.mxu1 %v5558_v7  ;;  %v13611_v54 = vld [vmem:[#allocation5 + $0x28] sm:$0xff]  ;;  %v13613_v15 = vld [vmem:[#allocation5 + $0x30] sm:$0xff] }
 0x531   : > { %v5443_v47 = vld [vmem:[#allocation5 + $0x29] sm:$0xff]  ;;  %5417 = vst [vmem:[#allocation5 + $0x53] sm:$0xff] %v13606_v24  ;;  %5517 = vst [vmem:[#allocation10 + $0x2a8] sm:$0xff] %v13606_v24  ;;  %6249 = vmatmul.mubr.f32.vlgmr.msra.gmra.mrb[72].mxu1 %v5538_v9  ;;  %v5444_v23 = vld [vmem:[#allocation5 + $0x31] sm:$0xff] }
 0x532   : > { %v13617_v33 = vld [vmem:[#allocation5 + $0x2a] sm:$0xff]  ;;  %v13619_v49 = vld [vmem:[#allocation5 + $0x32] sm:$0xff]  ;;  %5433 = vst [vmem:[#allocation10 + $0x168] sm:$0xff] %v13611_v54  ;;  %5434 = vst [vmem:[#allocation10 + $0x1b0] sm:$0xff] %v13613_v15  ;;  %6253 = vmatprep.mubr.f32.mxu1 %v5559_v18  ;;  %5919 = vmatmul.mubr.f32.gmra.mrb[128].mxu0 %v5421_v16 }
 0x533   : > { %5453 = vst [vmem:[#allocation10 + $0x170] sm:$0xff] %v5443_v47  ;;  %5416 = vst [vmem:[#allocation5 + $0x4b] sm:$0xff] %v13609_v19  ;;  %v13629_v32 = vld [vmem:[#allocation5 + $0x24] sm:$0xff]  ;;  %v5561_v37 = vld [vmem:[#allocation5 + $0x2d] sm:$0xff]  ;;  %5923 = vmatprep.mubr.f32.mxu0 %v5442_v44 }
 0x534   : > { %5516 = vst [vmem:[#allocation10 + $0x260] sm:$0xff] %v13609_v19  ;;  %5454 = vst [vmem:[#allocation10 + $0x1b8] sm:$0xff] %v5444_v23  ;;  %v13631_v57 = vld [vmem:[#allocation5 + $0x1c] sm:$0xff]  ;;  %v5560_v20 = vld [vmem:[#allocation5 + $0x25] sm:$0xff] }
 0x535   : > { %5473 = vst [vmem:[#allocation10 + $0x178] sm:$0xff] %v13617_v33  ;;  %5474 = vst [vmem:[#allocation10 + $0x1c0] sm:$0xff] %v13619_v49  ;;  %v13633_v46 = vld [vmem:[#allocation5 + $0x2c] sm:$0xff]  ;;  %v5425_v41 = vld [vmem:[#allocation5 + $0x38] sm:$0xff]  ;;  %6254 = vmatmul.mubr.f32.gmra.mrb[74].mxu1 %v13631_v57 }
 0x536   : > { %5492 = vst [vmem:[#allocation10 + $0x138] sm:$0xff] %v13617_v33  ;;  %5493 = vst [vmem:[#allocation10 + $0x180] sm:$0xff] %v13619_v49  ;;  %v5426_v38 = vld [vmem:[#allocation5 + $0x40] sm:$0xff]  ;;  %6258 = vmatprep.mubr.f32.mxu1 %v5560_v20  ;;  %5924 = vmatmul.mubr.f32.gmra.mrb[130].mxu0 %v13586_v29  ;;  %v5562_v2 = vld [vmem:[#allocation5 + $0x35] sm:$0xff] }
 0x537   : > { %v5445_v62 = vld [vmem:[#allocation5 + $0x39] sm:$0xff]  ;;  %v5446_v3 = vld [vmem:[#allocation5 + $0x41] sm:$0xff]  ;;  %5435 = vst [vmem:[#allocation10 + $0x1f8] sm:$0xff] %v5425_v41  ;;  %5436 = vst [vmem:[#allocation10 + $0x240] sm:$0xff] %v5426_v38  ;;  %5928 = vmatprep.mubr.f32.mxu0 %v5443_v47 }
 0x538   : > { %v13636_v39 = vld [vmem:[#allocation5 + $0x3a] sm:$0xff]  ;;  %v13638_v58 = vld [vmem:[#allocation5 + $0x42] sm:$0xff]  ;;  %5455 = vst [vmem:[#allocation10 + $0x200] sm:$0xff] %v5445_v62  ;;  %5456 = vst [vmem:[#allocation10 + $0x248] sm:$0xff] %v5446_v3 }
 0x539   : > { %5475 = vst [vmem:[#allocation10 + $0x208] sm:$0xff] %v13636_v39  ;;  %5476 = vst [vmem:[#allocation10 + $0x250] sm:$0xff] %v13638_v58  ;;  %v13645_v34 = vld [vmem:[#allocation5 + $0x34] sm:$0xff]  ;;  %v5563_v50 = vld [vmem:[#allocation5 + $0x3d] sm:$0xff]  ;;  %6259 = vmatmul.mubr.f32.gmra.mrb[76].mxu1 %v13629_v32 }
 0x53a   : > { %5494 = vst [vmem:[#allocation10 + $0x1c8] sm:$0xff] %v13636_v39  ;;  %5495 = vst [vmem:[#allocation10 + $0x210] sm:$0xff] %v13638_v58  ;;  %v13647_v0 = vld [vmem:[#allocation5 + $0x3c] sm:$0xff]  ;;  %v13649_v55 = vld [vmem:[#allocation5 + $0x54] sm:$0xff]  ;;  %6263 = vmatprep.mubr.f32.mxu1 %v5561_v37  ;;  %5929 = vmatmul.mubr.f32.gmra.mrb[132].mxu0 %v13611_v54 }
 0x53b   : > { %v5566_v48 = vld [vmem:[#allocation5 + $0x55] sm:$0xff]  ;;  %v5427_v25 = vld [vmem:[#allocation5 + $0x48] sm:$0xff]  ;;  %5933 = vmatprep.mubr.f32.mxu0 %v5444_v23  ;;  %v13669_v11 = vld [vmem:[#allocation5 + $0x3e] sm:$0xff] }
 0x53c   : > { %v5447_v61 = vld [vmem:[#allocation5 + $0x49] sm:$0xff]  ;;  %v13654_v4 = vld [vmem:[#allocation5 + $0x52] sm:$0xff]  ;;  %5437 = vst [vmem:[#allocation10 + $0x288] sm:$0xff] %v5427_v25  ;;  %v5771_v54 = vld [vmem:[%s14833_s7 + $0x298] sm:$0xff] }
 0x53d   : > { %v13651_v26 = vld [vmem:[#allocation5 + $0x4a] sm:$0xff]  ;;  %5457 = vst [vmem:[#allocation10 + $0x290] sm:$0xff] %v5447_v61  ;;  %5497 = vst [vmem:[#allocation10 + $0x2a0] sm:$0xff] %v13654_v4  ;;  %6264 = vmatmul.mubr.f32.gmra.mrb[78].mxu1 %v13633_v46  ;;  %v13667_v63 = vld [vmem:[#allocation5 + $0x36] sm:$0xff] }
 0x53e   : > { %5477 = vst [vmem:[#allocation10 + $0x298] sm:$0xff] %v13651_v26  ;;  %5496 = vst [vmem:[#allocation10 + $0x258] sm:$0xff] %v13651_v26  ;;  %v5564_v31 = vld [vmem:[#allocation5 + $0x45] sm:$0xff]  ;;  %v5565_v42 = vld [vmem:[#allocation5 + $0x4d] sm:$0xff]  ;;  %6268 = vmatprep.mubr.f32.mxu1 %v5562_v2  ;;  %5934 = vmatmul.mubr.f32.gmra.mrb[134].mxu0 %v13613_v15 }
 0x53f   : > { %v13658_v5 = vld [vmem:[#allocation5 + $0x44] sm:$0xff]  ;;  %v13662_v16 = vld [vmem:[#allocation5 + $0x4c] sm:$0xff]  ;;  %v13675_v9 = vld [vmem:[#allocation5 + $0x56] sm:$0xff]  ;;  %5938 = vmatprep.mubr.f32.mxu0 %v5445_v62 }
 0x540   : > { %v13665_v29 = vld [vmem:[#allocation5 + $0x2e] sm:$0xff]  ;;  %v13671_v44 = vld [vmem:[#allocation5 + $0x46] sm:$0xff]  ;;  %v5770_v18 = vld [vmem:[%s14833_s7 + $0x290] sm:$0xff] }
 0x541   : > { %v13673_v40 = vld [vmem:[#allocation5 + $0x4e] sm:$0xff]  ;;  %6269 = vmatmul.mubr.f32.gmra.mrb[80].mxu1 %v13645_v34  ;;  %v5600_v47 = vld [vmem:[#allocation10 + $0x10] sm:$0xff]  ;;  %v9266_v37 = vpack.c.bf16 %v5771_v54, %v5770_v18 }
 0x542   : > { %6273 = vmatprep.mubr.f32.mxu1 %v5563_v50  ;;  %5939 = vmatmul.mubr.f32.gmra.mrb[136].mxu0 %v5425_v41  ;;  %v5752_v28 = vld [vmem:[%s14833_s7 + $0x200] sm:$0xff]  ;;  %v5753_v7 = vld [vmem:[%s14833_s7 + $0x208] sm:$0xff]  ;;  %v5754_v20 = vld [vmem:[%s14833_s7 + $0x210] sm:$0xff] }
 0x543   : > { %5943 = vmatprep.mubr.f32.mxu0 %v5446_v3  ;;  %v5459_v15 = vld [vmem:[#allocation5 + $0xa] sm:$0xff]  ;;  %v9264_v23 = vpack.c.bf16 %v5753_v7, %v5752_v28  ;;  %v5755_v41 = vld [vmem:[%s14833_s7 + $0x218] sm:$0xff] }
 0x544   : > { %v5773_v62 = vld [vmem:[%s14833_s7 + $0x2a8] sm:$0xff]  ;;  %v9268_v3 = vpack.c.bf16 %v5755_v41, %v5754_v20  ;;  %v5756_v50 = vld [vmem:[%s14833_s7 + $0x220] sm:$0xff]  ;;  %v5759_v28 = vld [vmem:[%s14833_s7 + $0x238] sm:$0xff] }
 0x545   : > { %6274 = vmatmul.mubr.f32.gmra.mrb[82].mxu1 %v13647_v0  ;;  %v5618_v7 = vld [vmem:[#allocation10 + $0xa0] sm:$0xff]  ;;  %v5777_v18 = vld [vmem:[%s14833_s7 + $0x2c8] sm:$0xff] }
 0x546   : > { %6278 = vmatprep.mubr.f32.mxu1 %v5564_v31  ;;  %5944 = vmatmul.mubr.f32.gmra.mrb[138].mxu0 %v5426_v38  ;;  %v5772_v38 = vld [vmem:[%s14833_s7 + $0x2a0] sm:$0xff] }
 0x547   : > { %5948 = vmatprep.mubr.f32.mxu0 %v5447_v61  ;;  %v9270_v2 = vpack.c.bf16 %v5773_v62, %v5772_v38  ;;  %v5762_v38 = vld [vmem:[%s14833_s7 + $0x250] sm:$0xff]  ;;  %v5763_v62 = vld [vmem:[%s14833_s7 + $0x258] sm:$0xff] }
 0x549   : > { %6279 = vmatmul.mubr.f32.gmra.mrb[84].mxu1 %v13658_v5 }
 0x54a   : > { %6283 = vmatprep.mubr.f32.mxu1 %v5565_v42  ;;  %5949 = vmatmul.mubr.f32.gmra.mrb[140].mxu0 %v5427_v25  ;;  %v5774_v25 = vld [vmem:[%s14833_s7 + $0x2b0] sm:$0xff] }
 0x54b   : > { %6018 = vmatprep.mubr.f32.mxu0 %v5459_v15  ;;  %v5758_v42 = vld [vmem:[%s14833_s7 + $0x230] sm:$0xff] }
 0x54c   : > { %v9276_v54 = vpack.c.bf16 %v5759_v28, %v5758_v42  ;;  %v5766_v42 = vld [vmem:[%s14833_s7 + $0x270] sm:$0xff]  ;;  %v5767_v28 = vld [vmem:[%s14833_s7 + $0x278] sm:$0xff] }
 0x54d   : > { %6284 = vmatmul.mubr.f32.gmra.mrb[86].mxu1 %v13662_v16 }
 0x54e   : > { %6288 = vmatprep.mubr.f32.mxu1 %v5566_v48  ;;  %6019 = vmatmul.mubr.f32.vlgmr.msra.gmra.mrb[142].mxu0 %v5600_v47  ;;  %v5757_v48 = vld [vmem:[%s14833_s7 + $0x228] sm:$0xff] }
 0x54f   : > { %9265 = vmatpush3.bf16.msra.mxu0 %v9264_v23  ;;  %6023 = vmatprep.mubr.f32.mxu0 %v13562_v13  ;;  %v5775_v13 = vld [vmem:[%s14833_s7 + $0x2b8] sm:$0xff]  ;;  %v9272_v61 = vpack.c.bf16 %v5757_v48, %v5756_v50  ;;  %v5761_v47 = vld [vmem:[%s14833_s7 + $0x248] sm:$0xff]  ;;  %v5778_v23 = vld [vmem:[%s14833_s7 + $0x2d0] sm:$0xff] }
 0x550   : > { %9267 = vmatprep.subr.bf16.mxu0 %v9266_v37  ;;  %v9274_v31 = vpack.c.bf16 %v5775_v13, %v5774_v25  ;;  %v5779_v37 = vld [vmem:[%s14833_s7 + $0x2d8] sm:$0xff]  ;;  %v5764_v48 = vld [vmem:[%s14833_s7 + $0x260] sm:$0xff]  ;;  %v5765_v25 = vld [vmem:[%s14833_s7 + $0x268] sm:$0xff] }
 0x551   : > { %6289 = vmatmul.mubr.f32.gmra.mrb[88].mxu1 %v13649_v55  ;;  %v9282_v41 = vpack.c.bf16 %v5779_v37, %v5778_v23  ;;  %v5782_v13 = vld [vmem:[%s14833_s7 + $0x2f0] sm:$0xff]  ;;  %v5611_v37 = vld [vmem:[#allocation10 + $0x68] sm:$0xff] }
 0x552   : > { %6293 = vmatprep.mubr.f32.mxu1 %v13434_v35  ;;  %6024 = vmatmul.mubr.f32.gmra.mrb[144].mxu0 %v5459_v15  ;;  %v5776_v35 = vld [vmem:[%s14833_s7 + $0x2c0] sm:$0xff] }
 0x553   : > { %6028 = vmatprep.mubr.f32.mxu0 %v13595_v52  ;;  %9269 = vmatpush3.bf16.msra.mxu0 %v9268_v3  ;;  %v9278_v15 = vpack.c.bf16 %v5777_v18, %v5776_v35  ;;  %v5780_v3 = vld [vmem:[%s14833_s7 + $0x2e0] sm:$0xff]  ;;  %v9292_v35 = vpack.c.bf16 %v5767_v28, %v5766_v42 }
 0x554   : > { %9271 = vmatprep.subr.bf16.mxu0 %v9270_v2  ;;  %v9284_v2 = vpack.c.bf16 %v5763_v62, %v5762_v38  ;;  %v5620_v38 = vld [vmem:[#allocation10 + $0xb0] sm:$0xff]  ;;  %v5824_v62 = vld [vmem:[%s14833_s7 + $0x440] sm:$0xff] }
 0x555   : > { %6294 = vmatmul.mubr.f32.gmra.mrb[90].mxu1 %v13450_v36  ;;  %v5760_v36 = vld [vmem:[%s14833_s7 + $0x240] sm:$0xff] }
 0x556   : > { %6029 = vmatmul.mubr.f32.gmra.mrb[146].mxu0 %v5618_v7  ;;  %v9280_v20 = vpack.c.bf16 %v5761_v47, %v5760_v36  ;;  %v5816_v7 = vld [vmem:[%s14833_s7 + $0x400] sm:$0xff]  ;;  %v5519_v47 = vld [vmem:[#allocation5 + $0x14] sm:$0xff] }
 0x557   : > { %6033 = vmatprep.mubr.f32.mxu0 %v13597_v17  ;;  %9273 = vmatpush3.bf16.msra.mxu0 %v9272_v61  ;;  %v9288_v61 = vpack.c.bf16 %v5765_v25, %v5764_v48  ;;  %v5602_v36 = vld [vmem:[#allocation10 + $0x20] sm:$0xff]  ;;  %v5829_v25 = vld [vmem:[%s14833_s7 + $0x468] sm:$0xff] }
 0x558   : > { %9275 = vmatprep.subr.bf16.mxu0 %v9274_v31  ;;  %v5580_v42 = vld [vmem:[#allocation5 + $0x26] sm:$0xff] }
 0x55a   : > { %6034 = vmatmul.mubr.f32.gmra.mrb[148].mxu0 %v13595_v52  ;;  %v5781_v52 = vld [vmem:[%s14833_s7 + $0x2e8] sm:$0xff] }
 0x55b   : > { %6038 = vmatprep.mubr.f32.mxu0 %v13617_v33  ;;  %9277 = vmatpush3.bf16.msra.mxu0 %v9276_v54  ;;  %v9286_v50 = vpack.c.bf16 %v5781_v52, %v5780_v3  ;;  %v5819_v54 = vld [vmem:[%s14833_s7 + $0x418] sm:$0xff]  ;;  %v5825_v3 = vld [vmem:[%s14833_s7 + $0x448] sm:$0xff] }
 0x55c   : > { %9279 = vmatprep.subr.bf16.mxu0 %v9278_v15  ;;  %v5518_v15 = vld [vmem:[#allocation5 + $0xc] sm:$0xff]  ;;  %v9342_v52 = vpack.c.bf16 %v5825_v3, %v5824_v62 }
 0x55e   : > { %6039 = vmatmul.mubr.f32.gmra.mrb[150].mxu0 %v13597_v17  ;;  %v5783_v17 = vld [vmem:[%s14833_s7 + $0x2f8] sm:$0xff] }
 0x55f   : > { %6043 = vmatprep.mubr.f32.mxu0 %v13619_v49  ;;  %9281 = vmatpush3.bf16.msra.mxu0 %v9280_v20  ;;  %v9290_v31 = vpack.c.bf16 %v5783_v17, %v5782_v13  ;;  %v5823_v20 = vld [vmem:[%s14833_s7 + $0x438] sm:$0xff]  ;;  %v5647_v17 = vld [vmem:[#allocation10 + $0x188] sm:$0xff] }
 0x560   : > { %9283 = vmatprep.subr.bf16.mxu0 %v9282_v41 }
 0x562   : > { %6044 = vmatmul.mubr.f32.gmra.mrb[152].mxu0 %v13617_v33  ;;  %v5817_v33 = vld [vmem:[%s14833_s7 + $0x408] sm:$0xff] }
 0x563   : > { %6048 = vmatprep.mubr.f32.mxu0 %v13636_v39  ;;  %9285 = vmatpush3.bf16.msra.mxu0 %v9284_v2  ;;  %v9326_v18 = vpack.c.bf16 %v5817_v33, %v5816_v7  ;;  %v5629_v2 = vld [vmem:[#allocation10 + $0xf8] sm:$0xff] }
 0x564   : > { %9287 = vmatprep.subr.bf16.mxu0 %v9286_v50  ;;  %v5827_v50 = vld [vmem:[%s14833_s7 + $0x458] sm:$0xff] }
 0x566   : > { %6049 = vmatmul.mubr.f32.gmra.mrb[154].mxu0 %v13619_v49  ;;  %v5818_v49 = vld [vmem:[%s14833_s7 + $0x410] sm:$0xff] }
 0x567   : > { %6053 = vmatprep.mubr.f32.mxu0 %v13638_v58  ;;  %9289 = vmatpush3.bf16.msra.mxu0 %v9288_v61  ;;  %v5831_v61 = vld [vmem:[%s14833_s7 + $0x478] sm:$0xff] }
 0x568   : > { %9291 = vmatprep.subr.bf16.mxu0 %v9290_v31 }
 0x56a   : > { %6054 = vmatmul.mubr.f32.gmra.mrb[156].mxu0 %v13636_v39  ;;  %v9330_v39 = vpack.c.bf16 %v5819_v54, %v5818_v49 }
 0x56b   : > { %6058 = vmatprep.mubr.f32.mxu0 %v13651_v26  ;;  %9293 = vmatpush3.bf16.msra.mxu0 %v9292_v35 }
 0x56c   : > { %9327 = vmatprep.subr.bf16.mxu0 %v9326_v18 }
 0x56e   : > { %6059 = vmatmul.mubr.f32.gmra.mrb[158].mxu0 %v13638_v58  ;;  %v5820_v58 = vld [vmem:[%s14833_s7 + $0x420] sm:$0xff] }
 0x56f   : > { %6063 = vmatprep.mubr.f32.mxu0 %v13654_v4  ;;  %v5821_v4 = vld [vmem:[%s14833_s7 + $0x428] sm:$0xff] }
 0x570   : > { %v9334_v23 = vpack.c.bf16 %v5821_v4, %v5820_v58  ;;  %v6591_v58 = vld [vmem:[%s14835_s9 + $0x90] sm:$0xff]  ;;  %v6592_v4 = vld [vmem:[%s14835_s9 + $0x98] sm:$0xff] }
 0x572   : > { %6064 = vmatmul.mubr.f32.gmra.mrb[160].mxu0 %v13651_v26  ;;  %v5822_v26 = vld [vmem:[%s14833_s7 + $0x430] sm:$0xff] }
 0x573   : > { %6133 = vmatprep.mubr.f32.mxu0 %v5518_v15  ;;  %v9338_v41 = vpack.c.bf16 %v5823_v20, %v5822_v26  ;;  %v6576_v26 = vld [vmem:[%s14835_s9 + $0x18] sm:$0xff] }
 0x576   : > { %6134 = vmatmul.mubr.f32.vlgmr.msra.gmra.mrb[162].mxu0 %v5602_v36 }
 0x577   : > { %9329 = vmatpush3.bf16.msra.mxu0 %v9326_v18  ;;  %6138 = vmatprep.mubr.f32.mxu0 %v5519_v47  ;;  %v6575_v47 = vld [vmem:[%s14835_s9 + $0x10] sm:$0xff] }
 0x578   : > { %9331 = vmatprep.subr.bf16.mxu0 %v9330_v39 }
 0x57a   : > { %6139 = vmatmul.mubr.f32.gmra.mrb[164].mxu0 %v5611_v37  ;;  %v9362_v37 = vpack.c.bf16 %v6592_v4, %v6591_v58 }
 0x57b   : > { %6143 = vmatprep.mubr.f32.mxu0 %v13631_v57  ;;  %9333 = vmatpush3.bf16.msra.mxu0 %v9330_v39  ;;  %v5826_v57 = vld [vmem:[%s14833_s7 + $0x450] sm:$0xff] }
 0x57c   : > { %9335 = vmatprep.subr.bf16.mxu0 %v9334_v23  ;;  %v9346_v48 = vpack.c.bf16 %v5827_v50, %v5826_v57  ;;  %v6594_v57 = vld [vmem:[%s14835_s9 + $0xa8] sm:$0xff]  ;;  %v6577_v50 = vld [vmem:[%s14835_s9 + $0x20] sm:$0xff] }
 0x57e   : > { %6144 = vmatmul.mubr.f32.gmra.mrb[166].mxu0 %v5620_v38  ;;  %v9364_v38 = vpack.c.bf16 %v6576_v26, %v6575_v47  ;;  %v6608_v26 = vld [vmem:[%s14835_s9 + $0x118] sm:$0xff] }
 0x57f   : > { %6148 = vmatprep.mubr.f32.mxu0 %v13629_v32  ;;  %9337 = vmatpush3.bf16.msra.mxu0 %v9334_v23  ;;  %v5828_v32 = vld [vmem:[%s14833_s7 + $0x460] sm:$0xff] }
 0x580   : > { %9339 = vmatprep.subr.bf16.mxu0 %v9338_v41  ;;  %v9350_v13 = vpack.c.bf16 %v5829_v25, %v5828_v32  ;;  %v6578_v25 = vld [vmem:[%s14835_s9 + $0x28] sm:$0xff] }
 0x582   : > { %6149 = vmatmul.mubr.f32.gmra.mrb[168].mxu0 %v5629_v2  ;;  %v6593_v2 = vld [vmem:[%s14835_s9 + $0xa0] sm:$0xff] }
 0x583   : > { %6153 = vmatprep.mubr.f32.mxu0 %v13633_v46  ;;  %9341 = vmatpush3.bf16.msra.mxu0 %v9338_v41  ;;  %v5830_v46 = vld [vmem:[%s14833_s7 + $0x470] sm:$0xff]  ;;  %v9366_v32 = vpack.c.bf16 %v6594_v57, %v6593_v2  ;;  %v6598_v2 = vld [vmem:[%s14835_s9 + $0xc8] sm:$0xff]  ;;  %v6625_v57 = vld [vmem:[%s14835_s9 + $0x1a0] sm:$0xff] }
 0x584   : > { %9343 = vmatprep.subr.bf16.mxu0 %v9342_v52 }
 0x586   : > { %6154 = vmatmul.mubr.f32.gmra.mrb[170].mxu0 %v13549_v10  ;;  %v9354_v10 = vpack.c.bf16 %v5831_v61, %v5830_v46 }
 0x587   : > { %6158 = vmatprep.mubr.f32.mxu0 %v13645_v34  ;;  %9345 = vmatpush3.bf16.msra.mxu0 %v9342_v52  ;;  %v8166_v34 = vpop.f32.mrb[122].mxu0 }
 0x588   : > { %9347 = vmatprep.subr.bf16.mxu0 %v9346_v48  ;;  %v8167_v31 = vpop.f32.mrb[123].mxu0 }
 0x58a   : > { %6159 = vmatmul.mubr.f32.gmra.mrb[172].mxu0 %v5647_v17  ;;  %v6622_v17 = vld [vmem:[%s14835_s9 + $0x188] sm:$0xff] }
 0x58b   : > { %6163 = vmatprep.mubr.f32.mxu0 %v13647_v0  ;;  %9349 = vmatpush3.bf16.msra.mxu0 %v9346_v48  ;;  %v5578_v0 = vld [vmem:[#allocation5 + $0x16] sm:$0xff] }
 0x58c   : > { %9351 = vmatprep.subr.bf16.mxu0 %v9350_v13 }
 0x58e   : > { %6164 = vmatmul.mubr.f32.gmra.mrb[174].mxu0 %v13576_v6  ;;  %v13852_v6 = vadd.f32 %v8167_v31, %v8166_v34 }
 0x58f   : > { %6168 = vmatprep.mubr.f32.mxu0 %v13658_v5  ;;  %9353 = vmatpush3.bf16.msra.mxu0 %v9350_v13  ;;  %v5615_v5 = vld [vmem:[#allocation10 + $0x88] sm:$0xff]  ;;  %v6621_v13 = vld [vmem:[%s14835_s9 + $0x180] sm:$0xff] }
 0x590   : > { %9355 = vmatprep.subr.bf16.mxu0 %v9354_v10  ;;  %v9390_v34 = vpack.c.bf16 %v6622_v17, %v6621_v13  ;;  %v6581_v13 = vld [vmem:[%s14835_s9 + $0x40] sm:$0xff]  ;;  %v6582_v17 = vld [vmem:[%s14835_s9 + $0x48] sm:$0xff] }
 0x592   : > { %6169 = vmatmul.mubr.f32.gmra.mrb[176].mxu0 %v13572_v22  ;;  %v6589_v22 = vld [vmem:[%s14835_s9 + $0x80] sm:$0xff] }
 0x593   : > { %6173 = vmatprep.mubr.f32.mxu0 %v13662_v16  ;;  %9357 = vmatpush3.bf16.msra.mxu0 %v9354_v10  ;;  %v9368_v10 = vpack.c.bf16 %v6578_v25, %v6577_v50  ;;  %v6626_v50 = vld [vmem:[%s14835_s9 + $0x1a8] sm:$0xff] }
 0x594   : > { %9391 = vmatprep.subr.bf16.mxu0 %v9390_v34  ;;  %v9398_v25 = vpack.c.bf16 %v6626_v50, %v6625_v57 }
 0x596   : > { %6174 = vmatmul.mubr.f32.gmra.mrb[178].mxu0 %v13609_v19 }
 0x597   : > { %6178 = vmatprep.mubr.f32.mxu0 %v13649_v55 }
 0x59a   : > { %6179 = vmatmul.mubr.f32.gmra.mrb[180].mxu0 %v13606_v24  ;;  %v6590_v24 = vld [vmem:[%s14835_s9 + $0x88] sm:$0xff] }
 0x59b   : > { %8892 = vmatprep.mubr.f32.mxu0 %v5578_v0  ;;  %v9358_v19 = vpack.c.bf16 %v6590_v24, %v6589_v22  ;;  %v6606_v22 = vld [vmem:[%s14835_s9 + $0x108] sm:$0xff]  ;;  %v6595_v24 = vld [vmem:[%s14835_s9 + $0xb0] sm:$0xff] }
 0x59d   : > { %9359 = vmatprep.subr.bf16.mxu1 %v9358_v19 }
 0x59e   : > { %8893 = vmatmul.mubr.f32.vlgmr.msra.gmra.mrb[182].mxu0 %v5615_v5 }
 0x59f   : > { %8895 = vmatprep.mubr.f32.mxu0 %v5580_v42  ;;  %v6605_v42 = vld [vmem:[%s14835_s9 + $0x100] sm:$0xff] }
 0x5a2   : > { %8896 = vmatmul.mubr.f32.gmra.mrb[184].mxu0 %v13665_v29 }
 0x5a3   : > { %8898 = vmatprep.mubr.f32.mxu0 %v13667_v63 }
 0x5a6   : > { %8899 = vmatmul.mubr.f32.gmra.mrb[186].mxu0 %v13669_v11  ;;  %v6573_v11 = vld [vmem:[%s14835_s9] sm:$0xff] }
 0x5a7   : > { %8901 = vmatprep.mubr.f32.mxu0 %v13671_v44 }
 0x5aa   : > { %8902 = vmatmul.mubr.f32.gmra.mrb[188].mxu0 %v13673_v40 }
 0x5ab   : > { %8904 = vmatprep.mubr.f32.mxu0 %v13675_v9 }
 0x5ae   : > { %8905 = vmatmul.mubr.f32.gmra.mrb[190].mxu0 %v13584_v51  ;;  %v6574_v51 = vld [vmem:[%s14835_s9 + $0x8] sm:$0xff] }
 0x5af   : > { %v9360_v40 = vpack.c.bf16 %v6574_v51, %v6573_v11  ;;  %v6580_v11 = vld [vmem:[%s14835_s9 + $0x38] sm:$0xff] }
 0x5b1   : > { %9361 = vmatpush3.bf16.msra.mxu1 %v9360_v40 }
 0x5b2   : > { %9363 = vmatprep.subr.bf16.mxu1 %v9362_v37  ;;  %v6607_v37 = vld [vmem:[%s14835_s9 + $0x110] sm:$0xff] }
 0x5b5   : > { %9365 = vmatpush3.bf16.msra.mxu1 %v9364_v38 }
 0x5b6   : > { %9367 = vmatprep.subr.bf16.mxu1 %v9366_v32 }
 0x5b9   : > { %9369 = vmatpush3.bf16.msra.mxu1 %v9368_v10 }
 0x5fd   : > { %v8169_v55 = vpop.f32.mrb[124].mxu0 }
 0x5fe   : > { %v8170_v16 = vpop.f32.mrb[125].mxu0 }
 0x5ff   : > { %v13867_v29 = vadd.f32 %v8170_v16, %v8169_v55  ;;  %v9392_v55 = vpack.c.bf16 %v6606_v22, %v6605_v42  ;;  %v6596_v16 = vld [vmem:[%s14835_s9 + $0xb8] sm:$0xff]  ;;  %v6627_v42 = vld [vmem:[%s14835_s9 + $0x1b0] sm:$0xff] }
 0x600   : > { %v9370_v40 = vpack.c.bf16 %v6596_v16, %v6595_v24  ;;  %v6628_v22 = vld [vmem:[%s14835_s9 + $0x1b8] sm:$0xff]  ;;  %v6599_v16 = vld [vmem:[%s14835_s9 + $0xd0] sm:$0xff] }
 0x601   : > { %v8172_v63 = vpop.f32.mrb[126].mxu0  ;;  %9393 = vmatpush3.bf16.msra.mxu0 %v9392_v55  ;;  %v9402_v55 = vpack.c.bf16 %v6628_v22, %v6627_v42  ;;  %v6603_v22 = vld [vmem:[%s14835_s9 + $0xf0] sm:$0xff] }
 0x602   : > { %v8173_v44 = vpop.f32.mrb[127].mxu0  ;;  %9371 = vmatprep.subr.bf16.mxu1 %v9370_v40 }
 0x603   : > { %v13875_v28 = vadd.f32 %v8173_v44, %v8172_v63  ;;  %v6579_v63 = vld [vmem:[%s14835_s9 + $0x30] sm:$0xff] }
 0x604   : > { %v8352_v9 = vpop.f32.mrb[72].mxu1 }
 0x605   : > { %v8353_v7 = vpop.f32.mrb[73].mxu1  ;;  %v8175_v35 = vpop.f32.mrb[128].mxu0 }
 0x606   : > { %v13877_v33 = vadd.f32 %v8353_v7, %v8352_v9  ;;  %v8176_v18 = vpop.f32.mrb[129].mxu0  ;;  %v9372_v9 = vpack.c.bf16 %v6580_v11, %v6579_v63  ;;  %v6623_v7 = vld [vmem:[%s14835_s9 + $0x190] sm:$0xff]  ;;  %v6600_v63 = vld [vmem:[%s14835_s9 + $0xd8] sm:$0xff] }
 0x607   : > { %v13879_v54 = vadd.f32 %v8176_v18, %v8175_v35  ;;  %v6624_v35 = vld [vmem:[%s14835_s9 + $0x198] sm:$0xff]  ;;  %v6611_v11 = vld [vmem:[%s14835_s9 + $0x130] sm:$0xff] }
 0x608   : > { %v8355_v49 = vpop.f32.mrb[74].mxu1  ;;  %9373 = vmatpush3.bf16.msra.mxu1 %v9372_v9  ;;  %v9378_v9 = vpack.c.bf16 %v6600_v63, %v6599_v16 }
 0x609   : > { %v8356_v15 = vpop.f32.mrb[75].mxu1  ;;  %v8178_v36 = vpop.f32.mrb[130].mxu0 }
 0x60a   : > { %v13881_v39 = vadd.f32 %v8356_v15, %v8355_v49  ;;  %v8179_v23 = vpop.f32.mrb[131].mxu0  ;;  %v9394_v49 = vpack.c.bf16 %v6624_v35, %v6623_v7  ;;  %v6612_v7 = vld [vmem:[%s14835_s9 + $0x138] sm:$0xff]  ;;  %v6583_v35 = vld [vmem:[%s14835_s9 + $0x50] sm:$0xff] }
 0x60b   : > { %v13895_v41 = vadd.f32 %v8179_v23, %v8178_v36 }
 0x60c   : > { %v8358_v20 = vpop.f32.mrb[76].mxu1  ;;  %9395 = vmatprep.subr.bf16.mxu0 %v9394_v49  ;;  %v14014_v49 = vld [vmem:[%s14834_s8] ss:$0 sm:$0xff] }
 0x60d   : > { %v8359_v62 = vpop.f32.mrb[77].mxu1  ;;  %v8181_v52 = vpop.f32.mrb[132].mxu0 }
 0x60e   : > { %v13897_v3 = vadd.f32 %v8359_v62, %v8358_v20  ;;  %v8182_v48 = vpop.f32.mrb[133].mxu0  ;;  %v6597_v20 = vld [vmem:[%s14835_s9 + $0xc0] sm:$0xff] }
 0x60f   : > { %v13917_v61 = vadd.f32 %v8182_v48, %v8181_v52  ;;  %v9396_v52 = vpack.c.bf16 %v6608_v26, %v6607_v37  ;;  %v9374_v32 = vpack.c.bf16 %v6598_v2, %v6597_v20  ;;  %v9404_v20 = vpack.c.bf16 %v6612_v7, %v6611_v11  ;;  %v6602_v2 = vld [vmem:[%s14835_s9 + $0xe8] sm:$0xff] }
 0x610   : > { %v8361_v46 = vpop.f32.mrb[78].mxu1 }
 0x611   : > { %v8362_v0 = vpop.f32.mrb[79].mxu1  ;;  %v8184_v5 = vpop.f32.mrb[134].mxu0  ;;  %9397 = vmatpush3.bf16.msra.mxu0 %v9396_v52  ;;  %9375 = vmatprep.subr.bf16.mxu1 %v9374_v32  ;;  %v6601_v52 = vld [vmem:[%s14835_s9 + $0xe0] sm:$0xff] }
 0x612   : > { %v13919_v31 = vadd.f32 %v8362_v0, %v8361_v46  ;;  %v8185_v19 = vpop.f32.mrb[135].mxu0  ;;  %v6609_v46 = vld [vmem:[%s14835_s9 + $0x120] sm:$0xff]  ;;  %v9376_v0 = vpack.c.bf16 %v6582_v17, %v6581_v13  ;;  %9399 = vmatprep.subr.bf16.mxu0 %v9398_v25  ;;  %v9382_v32 = vpack.c.bf16 %v6602_v2, %v6601_v52  ;;  %v6586_v13 = vld [vmem:[%s14835_s9 + $0x68] sm:$0xff] }
 0x613   : > { %v13939_v44 = vadd.f32 %v8185_v19, %v8184_v5  ;;  %v6610_v5 = vld [vmem:[%s14835_s9 + $0x128] sm:$0xff]  ;;  %v6585_v25 = vld [vmem:[%s14835_s9 + $0x60] sm:$0xff] }
 0x614   : > { %v8364_v51 = vpop.f32.mrb[80].mxu1  ;;  %v9400_v19 = vpack.c.bf16 %v6610_v5, %v6609_v46  ;;  %9377 = vmatpush3.bf16.msra.mxu1 %v9376_v0  ;;  %v6631_v0 = vld [vmem:[%s14835_s9 + $0x1d0] sm:$0xff]  ;;  %v6632_v5 = vld [vmem:[%s14835_s9 + $0x1d8] sm:$0xff]  ;;  %v6654_v52 = vld [vmem:[%s14835_s9 + $0x288] sm:$0xff] }
 0x615   : > { %v8365_v18 = vpop.f32.mrb[81].mxu1  ;;  %v8187_v36 = vpop.f32.mrb[136].mxu0  ;;  %9379 = vmatprep.subr.bf16.mxu1 %v9378_v9  ;;  %v6588_v9 = vld [vmem:[%s14835_s9 + $0x78] sm:$0xff] }
 0x616   : > { %v13947_v15 = vadd.f32 %v8365_v18, %v8364_v51  ;;  %v8188_v58 = vpop.f32.mrb[137].mxu0  ;;  %v6584_v18 = vld [vmem:[%s14835_s9 + $0x58] sm:$0xff]  ;;  %9401 = vmatpush3.bf16.msra.mxu0 %v9400_v19  ;;  %v6587_v19 = vld [vmem:[%s14835_s9 + $0x70] sm:$0xff] }
 0x617   : > { %v13949_v47 = vadd.f32 %v8188_v58, %v8187_v36  ;;  %v9380_v58 = vpack.c.bf16 %v6584_v18, %v6583_v35  ;;  %9403 = vmatprep.subr.bf16.mxu0 %v9402_v55  ;;  %v5906_v55 = vadd.f32 %v13852_v6, %v14014_v49  ;;  %v9410_v35 = vpack.c.bf16 %v6632_v5, %v6631_v0  ;;  %v6615_v18 = vld [vmem:[%s14835_s9 + $0x150] sm:$0xff]  ;;  %v6616_v6 = vld [vmem:[%s14835_s9 + $0x158] sm:$0xff]  ;;  %v6618_v0 = vld [vmem:[%s14835_s9 + $0x168] sm:$0xff] }
 0x618   : > { %v8367_v4 = vpop.f32.mrb[82].mxu1 }
 0x619   : > { %v8368_v23 = vpop.f32.mrb[83].mxu1  ;;  %v8190_v62 = vpop.f32.mrb[138].mxu0  ;;  %9381 = vmatpush3.bf16.msra.mxu1 %v9380_v58 }
 0x61a   : > { %v13960_v38 = vadd.f32 %v8368_v23, %v8367_v4  ;;  %v8191_v48 = vpop.f32.mrb[139].mxu0  ;;  %v6629_v4 = vld [vmem:[%s14835_s9 + $0x1c0] sm:$0xff]  ;;  %v6630_v23 = vld [vmem:[%s14835_s9 + $0x1c8] sm:$0xff]  ;;  %9383 = vmatprep.subr.bf16.mxu1 %v9382_v32  ;;  %9405 = vmatpush3.bf16.msra.mxu0 %v9404_v20 }
 0x61b   : > { %v13980_v34 = vadd.f32 %v8191_v48, %v8190_v62  ;;  %v6613_v62 = vld [vmem:[%s14835_s9 + $0x140] sm:$0xff]  ;;  %v9406_v50 = vpack.c.bf16 %v6630_v23, %v6629_v4  ;;  %v6614_v48 = vld [vmem:[%s14835_s9 + $0x148] sm:$0xff] }
 0x61c   : > { %v8370_v10 = vpop.f32.mrb[84].mxu1  ;;  %v9408_v11 = vpack.c.bf16 %v6614_v48, %v6613_v62  ;;  %v6634_v20 = vld [vmem:[%s14835_s9 + $0x1e8] sm:$0xff]  ;;  %v6653_v62 = vld [vmem:[%s14835_s9 + $0x280] sm:$0xff] }
 0x61d   : > { %v8371_v24 = vpop.f32.mrb[85].mxu1  ;;  %v8193_v40 = vpop.f32.mrb[140].mxu0  ;;  %9407 = vmatprep.subr.bf16.mxu0 %v9406_v50  ;;  %v5911_v50 = vadd.f32 %v13867_v29, %v14014_v49  ;;  %v6635_v29 = vld [vmem:[%s14835_s9 + $0x1f0] sm:$0xff] }
 0x61e   : > { %v14000_v51 = vadd.f32 %v8371_v24, %v8370_v10  ;;  %v8194_v36 = vpop.f32.mrb[141].mxu0  ;;  %v9384_v10 = vpack.c.bf16 %v6586_v13, %v6585_v25  ;;  %v6604_v24 = vld [vmem:[%s14835_s9 + $0xf8] sm:$0xff]  ;;  %9409 = vmatpush3.bf16.msra.mxu0 %v9408_v11  ;;  %v9412_v25 = vpack.c.bf16 %v6616_v6, %v6615_v18  ;;  %v6685_v18 = vld [vmem:[%s14835_s9 + $0x380] sm:$0xff] }
 0x61f   : > { %v14022_v26 = vadd.f32 %v8194_v36, %v8193_v40  ;;  %v9386_v40 = vpack.c.bf16 %v6604_v24, %v6603_v22  ;;  %v6633_v36 = vld [vmem:[%s14835_s9 + $0x1e0] sm:$0xff]  ;;  %9411 = vmatprep.subr.bf16.mxu0 %v9410_v35  ;;  %v6636_v24 = vld [vmem:[%s14835_s9 + $0x1f8] sm:$0xff] }
 0x620   : > { %v8373_v37 = vpop.f32.mrb[86].mxu1  ;;  %9385 = vmatpush3.bf16.msra.mxu1 %v9384_v10  ;;  %v6617_v10 = vld [vmem:[%s14835_s9 + $0x160] sm:$0xff]  ;;  %v9418_v11 = vpack.c.bf16 %v6636_v24, %v6635_v29 }
 0x621   : > { %v8374_v57 = vpop.f32.mrb[87].mxu1  ;;  %v8228_v46 = vpop.f32.mrb[142].mxu0  ;;  %9387 = vmatprep.subr.bf16.mxu1 %v9386_v40  ;;  %v6619_v40 = vld [vmem:[%s14835_s9 + $0x170] sm:$0xff] }
 0x622   : > { %v14042_v17 = vadd.f32 %v8374_v57, %v8373_v37  ;;  %v8229_v42 = vpop.f32.mrb[143].mxu0  ;;  %v9388_v37 = vpack.c.bf16 %v6588_v9, %v6587_v19  ;;  %v9422_v57 = vpack.c.bf16 %v6654_v52, %v6653_v62  ;;  %9413 = vmatpush3.bf16.msra.mxu0 %v9412_v25  ;;  %v6620_v9 = vld [vmem:[%s14835_s9 + $0x178] sm:$0xff] }
 0x623   : > { %v8230_v63 = vadd.f32 %v8229_v42, %v8228_v46  ;;  %v9414_v46 = vpack.c.bf16 %v6634_v20, %v6633_v36  ;;  %v5921_v36 = vadd.f32 %v13879_v54, %v14014_v49  ;;  %v5931_v54 = vadd.f32 %v13917_v61, %v14014_v49 }
 0x624   : > { %v8376_v16 = vpop.f32.mrb[88].mxu1  ;;  %9389 = vmatpush3.bf16.msra.mxu1 %v9388_v37  ;;  %v9420_v37 = vpack.c.bf16 %v6620_v9, %v6619_v40  ;;  %v5946_v61 = vadd.f32 %v13980_v34, %v14014_v49 }
 0x625   : > { %v8377_v7 = vpop.f32.mrb[89].mxu1  ;;  %v14073_v58 = vadd.f32 %v8230_v63, %v5906_v55  ;;  %v8231_v23 = vpop.f32.mrb[144].mxu0  ;;  %9423 = vmatprep.subr.bf16.mxu1 %v9422_v57  ;;  %v5916_v55 = vadd.f32 %v13875_v28, %v14014_v49  ;;  %v9416_v63 = vpack.c.bf16 %v6618_v0, %v6617_v10  ;;  %9415 = vmatprep.subr.bf16.mxu0 %v9414_v46  ;;  %v6686_v28 = vld [vmem:[%s14835_s9 + $0x388] sm:$0xff] }
 0x626   : > { %v14075_v4 = vadd.f32 %v8377_v7, %v8376_v16  ;;  %v8232_v2 = vpop.f32.mrb[145].mxu0  ;;  %v9454_v20 = vpack.c.bf16 %v6686_v28, %v6685_v18  ;;  %v5926_v57 = vadd.f32 %v13895_v41, %v14014_v49 }
 0x627   : > { %v8233_v48 = vadd.f32 %v8232_v2, %v8231_v23  ;;  %9417 = vmatpush3.bf16.msra.mxu0 %v9416_v63 }
 0x628   : > { %v8379_v32 = vpop.f32.mrb[90].mxu1  ;;  %9419 = vmatprep.subr.bf16.mxu0 %v9418_v11 }
 0x629   : > { %v8380_v13 = vpop.f32.mrb[91].mxu1  ;;  %v14094_v5 = vadd.f32 %v8233_v48, %v5911_v50  ;;  %v8234_v42 = vpop.f32.mrb[146].mxu0 }
 0x62a   : > { %v14096_v22 = vadd.f32 %v8380_v13, %v8379_v32  ;;  %v8235_v19 = vpop.f32.mrb[147].mxu0 }
 0x62b   : > { %v8236_v16 = vadd.f32 %v8235_v19, %v8234_v42  ;;  %9421 = vmatpush3.bf16.msra.mxu0 %v9420_v37  ;;  %v5936_v42 = vadd.f32 %v13939_v44, %v14014_v49  ;;  %v5951_v44 = vadd.f32 %v14022_v26, %v14014_v49 }
 0x62c   : > { %9455 = vmatprep.subr.bf16.mxu0 %v9454_v20 }
 0x62d   : > { %v6031_v7 = vadd.f32 %v8236_v16, %v5916_v55  ;;  %v8237_v35 = vpop.f32.mrb[148].mxu0  ;;  %v5941_v55 = vadd.f32 %v13949_v47, %v14014_v49 }
 0x62e   : > { %v8238_v6 = vpop.f32.mrb[149].mxu0 }
 0x62f   : > { %v8239_v23 = vadd.f32 %v8238_v6, %v8237_v35 }
 0x631   : > { %v6036_v62 = vadd.f32 %v8239_v23, %v5921_v36  ;;  %v8240_v52 = vpop.f32.mrb[150].mxu0 }
 0x632   : > { %v8241_v2 = vpop.f32.mrb[151].mxu0 }
 0x633   : > { %v8242_v50 = vadd.f32 %v8241_v2, %v8240_v52 }
 0x635   : > { %v6041_v48 = vadd.f32 %v8242_v50, %v5926_v57  ;;  %v8243_v32 = vpop.f32.mrb[152].mxu0 }
 0x636   : > { %v8244_v25 = vpop.f32.mrb[153].mxu0 }
 0x637   : > { %v8245_v13 = vadd.f32 %v8244_v25, %v8243_v32 }
 0x639   : > { %v6046_v46 = vadd.f32 %v8245_v13, %v5931_v54  ;;  %v8246_v10 = vpop.f32.mrb[154].mxu0 }
 0x63a   : > { %v8247_v0 = vpop.f32.mrb[155].mxu0 }
 0x63b   : > { %v8248_v29 = vadd.f32 %v8247_v0, %v8246_v10 }
 0x63d   : > { %v6051_v24 = vadd.f32 %v8248_v29, %v5936_v42  ;;  %v8249_v19 = vpop.f32.mrb[156].mxu0 }
 0x63e   : > { %v8250_v41 = vpop.f32.mrb[157].mxu0 }
 0x63f   : > { %v8251_v16 = vadd.f32 %v8250_v41, %v8249_v19 }
 0x641   : > { %v6056_v63 = vadd.f32 %v8251_v16, %v5941_v55  ;;  %v8252_v11 = vpop.f32.mrb[158].mxu0 }
 0x642   : > { %v8253_v40 = vpop.f32.mrb[159].mxu0 }
 0x643   : > { %v8254_v9 = vadd.f32 %v8253_v40, %v8252_v11 }
 0x645   : > { %v6061_v35 = vadd.f32 %v8254_v9, %v5946_v61  ;;  %v8255_v18 = vpop.f32.mrb[160].mxu0 }
 0x646   : > { %v8256_v28 = vpop.f32.mrb[161].mxu0 }
 0x647   : > { %v8257_v6 = vadd.f32 %v8256_v28, %v8255_v18 }
 0x649   : > { %v6066_v36 = vadd.f32 %v8257_v6, %v5951_v44  ;;  %v8290_v23 = vpop.f32.mrb[162].mxu0 }
 0x64a   : > { %v8291_v37 = vpop.f32.mrb[163].mxu0 }
 0x64b   : > { %v8292_v20 = vadd.f32 %v8291_v37, %v8290_v23 }
 0x64d   : > { %v6136_v47 = vadd.f32 %v8292_v20, %v14073_v58  ;;  %v8293_v52 = vpop.f32.mrb[164].mxu0 }
 0x64e   : > { %v8294_v2 = vpop.f32.mrb[165].mxu0 }
 0x64f   : > { %v8295_v57 = vadd.f32 %v8294_v2, %v8293_v52  ;;  %v6251_v50 = vadd.f32 %v13877_v33, %v6136_v47 }
 0x651   : > { %v6141_v34 = vadd.f32 %v8295_v57, %v14094_v5  ;;  %v8296_v32 = vpop.f32.mrb[166].mxu0 }
 0x652   : > { %v8297_v25 = vpop.f32.mrb[167].mxu0 }
 0x653   : > { %v8298_v54 = vadd.f32 %v8297_v25, %v8296_v32  ;;  %v6256_v13 = vadd.f32 %v13881_v39, %v6141_v34 }
 0x655   : > { %v6146_v49 = vadd.f32 %v8298_v54, %v6031_v7  ;;  %v8299_v26 = vpop.f32.mrb[168].mxu0 }
 0x656   : > { %v8300_v10 = vpop.f32.mrb[169].mxu0 }
 0x657   : > { %v8301_v0 = vadd.f32 %v8300_v10, %v8299_v26  ;;  %v6261_v42 = vadd.f32 %v13897_v3, %v6146_v49 }
 0x659   : > { %v6151_v29 = vadd.f32 %v8301_v0, %v6036_v62  ;;  %v8302_v58 = vpop.f32.mrb[170].mxu0 }
 0x65a   : > { %v8303_v19 = vpop.f32.mrb[171].mxu0 }
 0x65b   : > { %v8304_v41 = vadd.f32 %v8303_v19, %v8302_v58  ;;  %v6266_v55 = vadd.f32 %v13919_v31, %v6151_v29 }
 0x65d   : > { %v6156_v33 = vadd.f32 %v8304_v41, %v6041_v48  ;;  %v8305_v16 = vpop.f32.mrb[172].mxu0 }
 0x65e   : > { %v8306_v5 = vpop.f32.mrb[173].mxu0 }
 0x65f   : > { %v8307_v11 = vadd.f32 %v8306_v5, %v8305_v16  ;;  %v6271_v40 = vadd.f32 %v13947_v15, %v6156_v33 }
 0x661   : > { %v6161_v61 = vadd.f32 %v8307_v11, %v6046_v46  ;;  %v8308_v39 = vpop.f32.mrb[174].mxu0 }
 0x662   : > { %v8309_v7 = vpop.f32.mrb[175].mxu0 }
 0x663   : > { %v8310_v9 = vadd.f32 %v8309_v7, %v8308_v39  ;;  %v6276_v18 = vadd.f32 %v13960_v38, %v6161_v61 }
 0x665   : > { %v6166_v28 = vadd.f32 %v8310_v9, %v6051_v24  ;;  %v8311_v3 = vpop.f32.mrb[176].mxu0 }
 0x666   : > { %v8312_v62 = vpop.f32.mrb[177].mxu0 }
 0x667   : > { %v8313_v44 = vadd.f32 %v8312_v62, %v8311_v3  ;;  %v6281_v6 = vadd.f32 %v14000_v51, %v6166_v28 }
 0x669   : > { %v6171_v23 = vadd.f32 %v8313_v44, %v6056_v63  ;;  %v8314_v31 = vpop.f32.mrb[178].mxu0 }
 0x66a   : > { %v8315_v48 = vpop.f32.mrb[179].mxu0 }
 0x66b   : > { %v8316_v37 = vadd.f32 %v8315_v48, %v8314_v31  ;;  %v6286_v20 = vadd.f32 %v14042_v17, %v6171_v23 }
 0x66d   : > { %v6176_v47 = vadd.f32 %v8316_v37, %v6061_v35  ;;  %v8317_v15 = vpop.f32.mrb[180].mxu0 }
 0x66e   : > { %v8318_v46 = vpop.f32.mrb[181].mxu0 }
 0x66f   : > { %v8319_v52 = vadd.f32 %v8318_v46, %v8317_v15  ;;  %v6291_v2 = vadd.f32 %v14075_v4, %v6176_v47 }
 0x671   : > { %v6181_v57 = vadd.f32 %v8319_v52, %v6066_v36  ;;  %v8894_v38 = vpop.f32.mrb[182].mxu0 }
 0x672   : > { %v6371_v24 = vadd.f32 %v8894_v38, %v6256_v13  ;;  %v6365_v34 = vpop.f32.mrb[183].mxu0  ;;  %v6637_v38 = vld [vmem:[%s14835_s9 + $0x200] sm:$0xff] }
 0x673   : > { %v6366_v32 = vadd.f32 %v6365_v34, %v6251_v50  ;;  %v6296_v25 = vadd.f32 %v14096_v22, %v6181_v57  ;;  %v6656_v34 = vld [vmem:[%s14835_s9 + $0x298] sm:$0xff] }
 0x674   : > { %v6415_v51 = vmax.f32 %v6371_v24, 0.0  ;;  %v6638_v24 = vld [vmem:[%s14835_s9 + $0x208] sm:$0xff] }
 0x675   : > { %v6414_v63 = vmax.f32 %v6366_v32, 0.0  ;;  %v8897_v54 = vpop.f32.mrb[184].mxu0 }
 0x676   : > { %v6425_v49 = vmul.f32 %v13405_v14, %v6415_v51  ;;  %v6381_v26 = vadd.f32 %v8897_v54, %v6266_v55  ;;  %v6375_v17 = vpop.f32.mrb[185].mxu0  ;;  %v6640_v51 = vld [vmem:[%s14835_s9 + $0x218] sm:$0xff]  ;;  %v6670_v54 = vld [vmem:[%s14835_s9 + $0x308] sm:$0xff] }
 0x677   : > { %v6424_v35 = vmul.f32 %v13410_v21, %v6414_v63  ;;  %v6376_v10 = vadd.f32 %v6375_v17, %v6261_v42  ;;  %v6669_v63 = vld [vmem:[%s14835_s9 + $0x300] sm:$0xff] }
 0x678   : > { %6435 = vst [vmem:[#allocation6 + $0x13] sm:$0xff] %v6425_v49  ;;  %v6417_v0 = vmax.f32 %v6381_v26, 0.0  ;;  %v9424_v26 = vpack.c.bf16 %v6638_v24, %v6637_v38  ;;  %v6657_v17 = vld [vmem:[%s14835_s9 + $0x2a0] sm:$0xff]  ;;  %v6692_v38 = vld [vmem:[%s14835_s9 + $0x3b8] sm:$0xff] }
 0x679   : > { %6434 = vst [vmem:[#allocation6 + $0xb] sm:$0xff] %v6424_v35  ;;  %v6416_v4 = vmax.f32 %v6376_v10, 0.0  ;;  %v8900_v36 = vpop.f32.mrb[186].mxu0  ;;  %v6658_v35 = vld [vmem:[%s14835_s9 + $0x2a8] sm:$0xff]  ;;  %v6687_v10 = vld [vmem:[%s14835_s9 + $0x390] sm:$0xff] }
 0x67a   : > { %v6427_v13 = vmul.f32 %v13419_v12, %v6417_v0  ;;  %v6391_v50 = vadd.f32 %v8900_v36, %v6276_v18  ;;  %v6385_v29 = vpop.f32.mrb[187].mxu0  ;;  %v6688_v0 = vld [vmem:[%s14835_s9 + $0x398] sm:$0xff] }
 0x67b   : > { %v6426_v22 = vmul.f32 %v13460_v43, %v6416_v4  ;;  %v6386_v58 = vadd.f32 %v6385_v29, %v6271_v40 }
 0x67c   : > { %6437 = vst [vmem:[#allocation6 + $0x23] sm:$0xff] %v6427_v13  ;;  %v6419_v19 = vmax.f32 %v6391_v50, 0.0 }
 0x67d   : > { %6436 = vst [vmem:[#allocation6 + $0x1b] sm:$0xff] %v6426_v22  ;;  %v6418_v14 = vmax.f32 %v6386_v58, 0.0  ;;  %v8903_v41 = vpop.f32.mrb[188].mxu0 }
 0x67e   : > { %v6429_v21 = vmul.f32 %v13524_v45, %v6419_v19  ;;  %v6401_v42 = vadd.f32 %v8903_v41, %v6286_v20  ;;  %v6395_v55 = vpop.f32.mrb[189].mxu0  ;;  %v14193_v19 = vld [vmem:[%s14835_s9 + $0x220] sm:$0xff]  ;;  %v6671_v41 = vld [vmem:[%s14835_s9 + $0x310] sm:$0xff] }
 0x67f   : > { %v6428_v33 = vmul.f32 %v13538_v56, %v6418_v14  ;;  %v6396_v16 = vadd.f32 %v6395_v55, %v6281_v6  ;;  %v6642_v14 = vld [vmem:[%s14835_s9 + $0x228] sm:$0xff] }
 0x680   : > { %v6445_v5 = vld [vmem:[#allocation6 + $0xb] ss:$2 sm:$0xf]  ;;  %v6447_v11 = vld [vmem:[#allocation6 + $0xc] ss:$2 sm:$0xf] }
 0x681   : > { %6439 = vst [vmem:[#allocation6 + $0x33] sm:$0xff] %v6429_v21  ;;  %6438 = vst [vmem:[#allocation6 + $0x2b] sm:$0xff] %v6428_v33  ;;  %v6421_v12 = vmax.f32 %v6401_v42, 0.0  ;;  %v6420_v61 = vmax.f32 %v6396_v16, 0.0  ;;  %v8906_v43 = vpop.f32.mrb[190].mxu0  ;;  %v6448_v7 = vmax.f32 %v6445_v5, %v6447_v11  ;;  %v6672_v21 = vld [vmem:[%s14835_s9 + $0x318] sm:$0xff]  ;;  %v9456_v33 = vpack.c.bf16 %v6670_v54, %v6669_v63 }
 0x682   : > { %v6411_v40 = vadd.f32 %v8906_v43, %v6296_v25  ;;  %v6405_v39 = vpop.f32.mrb[191].mxu0  ;;  %v6639_v25 = vld [vmem:[%s14835_s9 + $0x210] sm:$0xff]  ;;  %v6660_v5 = vld [vmem:[%s14835_s9 + $0x2b8] sm:$0xff] }
 0x683   : > { %v6431_v9 = vmul.f32 %v13552_v30, %v6421_v12  ;;  %v6430_v18 = vmul.f32 %v13556_v8, %v6420_v61  ;;  %v6406_v45 = vadd.f32 %v6405_v39, %v6291_v2  ;;  %v9428_v55 = vpack.c.bf16 %v6640_v51, %v6639_v25  ;;  %v6659_v16 = vld [vmem:[%s14835_s9 + $0x2b0] sm:$0xff]  ;;  %v6676_v51 = vld [vmem:[%s14835_s9 + $0x338] sm:$0xff] }
 0x684   : > { %v6450_v28 = vld [vmem:[#allocation6 + $0x15] ss:$2 sm:$0xf]  ;;  %v6457_v62 = vld [vmem:[#allocation6 + $0x1f] ss:$2 sm:$0xf]  ;;  %v9458_v39 = vpack.c.bf16 %v6688_v0, %v6687_v10 }
 0x685   : > { %v6451_v3 = vmax.f32 %v6448_v7, %v6450_v28  ;;  %v6459_v56 = vld [vmem:[#allocation6 + $0x20] ss:$2 sm:$0xf]  ;;  %6441 = vst [vmem:[#allocation6 + $0x43] sm:$0xff] %v6431_v9  ;;  %6440 = vst [vmem:[#allocation6 + $0x3b] sm:$0xff] %v6430_v18  ;;  %v6423_v6 = vmax.f32 %v6411_v40, 0.0  ;;  %v9430_v40 = vpack.c.bf16 %v6658_v35, %v6657_v17 }
 0x686   : > { %v6453_v44 = vld [vmem:[#allocation6 + $0x16] ss:$2 sm:$0xf]  ;;  %v6422_v23 = vmax.f32 %v6406_v45, 0.0  ;;  %v6460_v48 = vmax.f32 %v6457_v62, %v6459_v56  ;;  %v6689_v7 = vld [vmem:[%s14835_s9 + $0x3a0] sm:$0xff]  ;;  %v6690_v9 = vld [vmem:[%s14835_s9 + $0x3a8] sm:$0xff] }
 0x687   : > { %v6454_v31 = vmax.f32 %v6451_v3, %v6453_v44  ;;  %v6433_v15 = vmul.f32 %v13581_v60, %v6423_v6  ;;  %v6643_v62 = vld [vmem:[%s14835_s9 + $0x230] sm:$0xff]  ;;  %v6644_v56 = vld [vmem:[%s14835_s9 + $0x238] sm:$0xff]  ;;  %v6673_v44 = vld [vmem:[%s14835_s9 + $0x320] sm:$0xff]  ;;  %v9432_v6 = vpack.c.bf16 %v6642_v14, %v14193_v19 }
 0x688   : > { %v6469_v37 = vld [vmem:[#allocation6 + $0x33] ss:$2 sm:$0xf]  ;;  %v6471_v20 = vld [vmem:[#allocation6 + $0x34] ss:$2 sm:$0xf]  ;;  %v6432_v30 = vmul.f32 %v13593_v1, %v6422_v23  ;;  %v9460_v23 = vpack.c.bf16 %v6672_v21, %v6671_v41  ;;  %v9436_v24 = vpack.c.bf16 %v6644_v56, %v6643_v62 }
 0x689   : > { %v6462_v47 = vld [vmem:[#allocation6 + $0x29] ss:$2 sm:$0xf]  ;;  %6455 = vst [vmem:[#allocation7 + $0x7] sm:$0xf] %v6454_v31  ;;  %6443 = vst [vmem:[#allocation6 + $0x53] sm:$0xff] %v6433_v15  ;;  %v6472_v52 = vmax.f32 %v6469_v37, %v6471_v20 }
 0x68a   : > { %v6463_v8 = vmax.f32 %v6460_v48, %v6462_v47  ;;  %v6465_v46 = vld [vmem:[#allocation6 + $0x2a] ss:$2 sm:$0xf]  ;;  %6442 = vst [vmem:[#allocation6 + $0x4b] sm:$0xff] %v6432_v30  ;;  %v6661_v48 = vld [vmem:[%s14835_s9 + $0x2c0] sm:$0xff]  ;;  %v9434_v30 = vpack.c.bf16 %v6660_v5, %v6659_v16  ;;  %v6648_v10 = vld [vmem:[%s14835_s9 + $0x258] sm:$0xff] }
 0x68b   : > { %v6655_v1 = vld [vmem:[%s14835_s9 + $0x290] sm:$0xff]  ;;  %v6674_v31 = vld [vmem:[%s14835_s9 + $0x328] sm:$0xff]  ;;  %v6677_v0 = vld [vmem:[%s14835_s9 + $0x340] sm:$0xff] }
 0x68c   : > { %v6466_v2 = vmax.f32 %v6463_v8, %v6465_v46  ;;  %v6474_v57 = vld [vmem:[#allocation6 + $0x3d] ss:$2 sm:$0xf]  ;;  %v6477_v32 = vld [vmem:[#allocation6 + $0x3e] ss:$2 sm:$0xf]  ;;  %v9426_v13 = vpack.c.bf16 %v6656_v34, %v6655_v1  ;;  %v9462_v8 = vpack.c.bf16 %v6690_v9, %v6689_v7 }
 0x68d   : > { %v6475_v60 = vmax.f32 %v6472_v52, %v6474_v57  ;;  %v6662_v37 = vld [vmem:[%s14835_s9 + $0x2c8] sm:$0xff]  ;;  %v6691_v57 = vld [vmem:[%s14835_s9 + $0x3b0] sm:$0xff]  ;;  %v6645_v1 = vld [vmem:[%s14835_s9 + $0x240] sm:$0xff] }
 0x68e   : > { %6467 = vst [vmem:[#allocation7 + $0xd] sm:$0xf] %v6466_v2  ;;  %v6646_v34 = vld [vmem:[%s14835_s9 + $0x248] sm:$0xff]  ;;  %v6675_v25 = vld [vmem:[%s14835_s9 + $0x330] sm:$0xff]  ;;  %v9466_v54 = vpack.c.bf16 %v6692_v38, %v6691_v57  ;;  %v6696_v16 = vld [vmem:[%s14835_s9 + $0x3d8] sm:$0xff] }
 0x68f   : > { %v6478_v49 = vmax.f32 %v6475_v60, %v6477_v32  ;;  %v9464_v60 = vpack.c.bf16 %v6674_v31, %v6673_v44  ;;  %v9438_v32 = vpack.c.bf16 %v6662_v37, %v6661_v48  ;;  %v6663_v63 = vld [vmem:[%s14835_s9 + $0x2d0] sm:$0xff]  ;;  %v6694_v17 = vld [vmem:[%s14835_s9 + $0x3c8] sm:$0xff]  ;;  %v6680_v9 = vld [vmem:[%s14835_s9 + $0x358] sm:$0xff] }
 0x690   : > { %v6498_v4 = vld [vmem:[#allocation7 + $0x1] sm:$0xff]  ;;  %v6652_v48 = vld [vmem:[%s14835_s9 + $0x278] sm:$0xff]  ;;  %v6681_v37 = vld [vmem:[%s14835_s9 + $0x360] sm:$0xff] }
 0x691   : > { %v6492_v36 = vld [vmem:[#allocation7] sm:$0xff]  ;;  %6479 = vst [vmem:[#allocation7 + $0x13] sm:$0xf] %v6478_v49  ;;  %6501 = vst [vmem:[#allocation10 + $0x8] sm:$0xff] %v6498_v4  ;;  %6788 = vmatprep.mubr.f32.mxu1 %v6498_v4  ;;  %v6664_v49 = vld [vmem:[%s14835_s9 + $0x2d8] sm:$0xff] }
 0x692   : > { %v6504_v50 = vld [vmem:[#allocation7 + $0x2] sm:$0xff]  ;;  %6495 = vst [vmem:[#allocation10] sm:$0xff] %v6492_v36  ;;  %6789 = vmatmul.mubr.f32.vlgmr.msra.gmra.mrb[92].mxu1 %v6492_v36  ;;  %v6489_v18 = vld [vmem:[#allocation6 + $0x52] ss:$2 sm:$0xf]  ;;  %v9442_v14 = vpack.c.bf16 %v6664_v49, %v6663_v63 }
 0x693   : > { %v6481_v29 = vld [vmem:[#allocation6 + $0x47] ss:$2 sm:$0xf]  ;;  %v6483_v22 = vld [vmem:[#allocation6 + $0x48] ss:$2 sm:$0xf]  ;;  %9425 = vmatpush3.bf16.msra.mxu1 %v9424_v26 }
 0x694   : > { %6507 = vst [vmem:[#allocation10 + $0x10] sm:$0xff] %v6504_v50  ;;  %v6484_v58 = vmax.f32 %v6481_v29, %v6483_v22  ;;  %v6486_v42 = vld [vmem:[#allocation6 + $0x51] ss:$2 sm:$0xf]  ;;  %9427 = vmatprep.subr.bf16.mxu1 %v9426_v13  ;;  %v6693_v26 = vld [vmem:[%s14835_s9 + $0x3c0] sm:$0xff]  ;;  %v6678_v4 = vld [vmem:[%s14835_s9 + $0x348] sm:$0xff]  ;;  %v9468_v29 = vpack.c.bf16 %v6676_v51, %v6675_v25 }
 0x695   : > { %v6499_v12 = vld [vmem:[#allocation7 + $0x9] sm:$0xff]  ;;  %v6665_v22 = vld [vmem:[%s14835_s9 + $0x2e0] sm:$0xff]  ;;  %v9470_v41 = vpack.c.bf16 %v6694_v17, %v6693_v26  ;;  %v6698_v62 = vld [vmem:[%s14835_s9 + $0x3e8] sm:$0xff]  ;;  %v15125_v25 = vmov 0.0|0.0  }
 0x696   : > { %v6487_v11 = vmax.f32 %v6484_v58, %v6486_v42  ;;  %v6510_v61 = vld [vmem:[#allocation7 + $0x6] sm:$0xff]  ;;  %6502 = vst [vmem:[#allocation10 + $0x50] sm:$0xff] %v6499_v12  ;;  %6793 = vmatprep.mubr.f32.mxu1 %v6499_v12  ;;  %v9472_v12 = vpack.c.bf16 %v6678_v4, %v6677_v0  ;;  %v6705_v26 = vld [vmem:[%s14835_s9 + $0x420] sm:$0xff] }
 0x697   : > { %v6493_v43 = vld [vmem:[#allocation7 + $0x8] sm:$0xff]  ;;  %6513 = vst [vmem:[#allocation10 + $0x18] sm:$0xff] %v6510_v61  ;;  %6868 = vmatprep.mubr.f32.mxu0 %v6510_v61  ;;  %9429 = vmatpush3.bf16.msra.mxu1 %v9428_v55  ;;  %v6666_v58 = vld [vmem:[%s14835_s9 + $0x2e8] sm:$0xff]  ;;  %v6649_v61 = vld [vmem:[%s14835_s9 + $0x260] sm:$0xff] }
 0x698   : > { %6496 = vst [vmem:[#allocation10 + $0x48] sm:$0xff] %v6493_v43  ;;  %v6505_v45 = vld [vmem:[#allocation7 + $0xa] sm:$0xff]  ;;  %v6490_v3 = vmax.f32 %v6487_v11, %v6489_v18  ;;  %6794 = vmatmul.mubr.f32.gmra.mrb[94].mxu1 %v6493_v43  ;;  %6869 = vmatmul.mubr.f32.vlgmr.msra.gmra.mrb[192].mxu0 %v6504_v50  ;;  %v9440_v50 = vpack.c.bf16 %v6646_v34, %v6645_v1  ;;  %v6701_v1 = vld [vmem:[%s14835_s9 + $0x400] sm:$0xff]  ;;  %v6702_v34 = vld [vmem:[%s14835_s9 + $0x408] sm:$0xff] }
 0x699   : > { %v14216_v28 = vld [vmem:[#allocation7 + $0x7] sm:$0xff]  ;;  %6508 = vst [vmem:[#allocation10 + $0x58] sm:$0xff] %v6505_v45  ;;  %9457 = vmatpush3.bf16.msra.mxu0 %v9456_v33  ;;  %v6500_v20 = vld [vmem:[#allocation7 + $0x11] sm:$0xff]  ;;  %9431 = vmatprep.subr.bf16.mxu1 %v9430_v40  ;;  %v9446_v40 = vpack.c.bf16 %v6666_v58, %v6665_v22  ;;  %v9487_v51 = vpack.c.bf16 %v6702_v34, %v6701_v1 }
 0x69a   : > { %6519 = vst [vmem:[#allocation10 + $0x20] sm:$0xff] %v14216_v28  ;;  %6491 = vst [vmem:[#allocation7 + $0x19] sm:$0xf] %v6490_v3  ;;  %v14238_v47 = vld [vmem:[#allocation7 + $0xe] sm:$0xff]  ;;  %9459 = vmatprep.subr.bf16.mxu0 %v9458_v39  ;;  %6798 = vmatprep.mubr.f32.mxu1 %v6500_v20  ;;  %v6697_v3 = vld [vmem:[%s14835_s9 + $0x3e0] sm:$0xff] }
 0x69b   : > { %v14240_v15 = vld [vmem:[#allocation7 + $0x10] sm:$0xff]  ;;  %6503 = vst [vmem:[#allocation10 + $0x98] sm:$0xff] %v6500_v20  ;;  %6514 = vst [vmem:[#allocation10 + $0x60] sm:$0xff] %v14238_v47  ;;  %6873 = vmatprep.mubr.f32.mxu0 %v14238_v47  ;;  %9433 = vmatpush3.bf16.msra.mxu1 %v9432_v6  ;;  %v6647_v35 = vld [vmem:[%s14835_s9 + $0x250] sm:$0xff]  ;;  %v9478_v31 = vpack.c.bf16 %v6698_v62, %v6697_v3 }
 0x69c   : > { %6497 = vst [vmem:[#allocation10 + $0x90] sm:$0xff] %v14240_v15  ;;  %v6534_v46 = vld [vmem:[#allocation7 + $0xd] sm:$0xff]  ;;  %6799 = vmatmul.mubr.f32.gmra.mrb[96].mxu1 %v14240_v15  ;;  %6874 = vmatmul.mubr.f32.gmra.mrb[194].mxu0 %v6505_v45  ;;  %v9444_v11 = vpack.c.bf16 %v6648_v10, %v6647_v35  ;;  %v6682_v20 = vld [vmem:[%s14835_s9 + $0x368] sm:$0xff]  ;;  %v6709_v0 = vld [vmem:[%s14835_s9 + $0x440] sm:$0xff] }
 0x69d   : > { %v14245_v52 = vld [vmem:[#allocation7 + $0xf] sm:$0xff]  ;;  %9461 = vmatpush3.bf16.msra.mxu0 %v9460_v23  ;;  %6948 = vmatprep.mubr.f32.mxu1 %v6493_v43  ;;  %v6650_v43 = vld [vmem:[%s14835_s9 + $0x268] sm:$0xff]  ;;  %v9480_v57 = vpack.c.bf16 %v6682_v20, %v6681_v37  ;;  %v6713_v58 = vld [vmem:[%s14835_s9 + $0x460] sm:$0xff] }
 0x69e   : > { %v14247_v2 = vld [vmem:[#allocation7 + $0xc] sm:$0xff]  ;;  %6520 = vst [vmem:[#allocation10 + $0x68] sm:$0xff] %v14245_v52  ;;  %9435 = vmatprep.subr.bf16.mxu1 %v9434_v30  ;;  %9463 = vmatprep.subr.bf16.mxu0 %v9462_v8  ;;  %v9448_v56 = vpack.c.bf16 %v6650_v43, %v6649_v61  ;;  %v6706_v17 = vld [vmem:[%s14835_s9 + $0x428] sm:$0xff]  ;;  %v7298_v3 = vld [vmem:[%s14837_s11 + $0x180] sm:$0xff] }
 0x69f   : > { %9437 = vmatpush3.bf16.msra.mxu1 %v9436_v24  ;;  %v6695_v33 = vld [vmem:[%s14835_s9 + $0x3d0] sm:$0xff]  ;;  %v6668_v45 = vld [vmem:[%s14835_s9 + $0x2f8] sm:$0xff]  ;;  %v6710_v4 = vld [vmem:[%s14835_s9 + $0x448] sm:$0xff] }
 0x6a0   : > { %9439 = vmatprep.subr.bf16.mxu1 %v9438_v32  ;;  %v9474_v39 = vpack.c.bf16 %v6696_v16, %v6695_v33  ;;  %v6679_v7 = vld [vmem:[%s14835_s9 + $0x350] sm:$0xff]  ;;  %v6700_v8 = vld [vmem:[%s14835_s9 + $0x3f8] sm:$0xff]  ;;  %v7266_v33 = vld [vmem:[%s14837_s11 + $0x80] sm:$0xff] }
 0x6a1   : > { %9465 = vmatpush3.bf16.msra.mxu0 %v9464_v60  ;;  %v14293_v36 = vld [vmem:[#allocation7 + $0x16] sm:$0xff]  ;;  %v6667_v18 = vld [vmem:[%s14835_s9 + $0x2f0] sm:$0xff]  ;;  %v9476_v44 = vpack.c.bf16 %v6680_v9, %v6679_v7  ;;  %v7271_v9 = vld [vmem:[%s14837_s11 + $0xa8] sm:$0xff] }
 0x6a2   : > { %v6506_v13 = vld [vmem:[#allocation7 + $0x12] sm:$0xff]  ;;  %6515 = vst [vmem:[#allocation10 + $0xa8] sm:$0xff] %v14293_v36  ;;  %6878 = vmatprep.mubr.f32.mxu0 %v14293_v36  ;;  %6544 = vst [vmem:[#allocation10 + $0x88] sm:$0xff] %v14293_v36  ;;  %9467 = vmatprep.subr.bf16.mxu0 %v9466_v54  ;;  %v14319_v5 = vld [vmem:[#allocation7 + $0x1c] sm:$0xff]  ;;  %v9450_v23 = vpack.c.bf16 %v6668_v45, %v6667_v18 }
 0x6a3   : > { %v14301_v19 = vld [vmem:[#allocation7 + $0x18] sm:$0xff]  ;;  %6509 = vst [vmem:[#allocation10 + $0xa0] sm:$0xff] %v6506_v13  ;;  %6879 = vmatmul.mubr.f32.gmra.mrb[196].mxu0 %v6506_v13  ;;  %9441 = vmatpush3.bf16.msra.mxu1 %v9440_v50  ;;  %v6651_v6 = vld [vmem:[%s14835_s9 + $0x270] sm:$0xff]  ;;  %v6684_v60 = vld [vmem:[%s14835_s9 + $0x378] sm:$0xff]  ;;  %v9499_v13 = vpack.c.bf16 %v6710_v4, %v6709_v0 }
 0x6a4   : > { %v14305_v21 = vld [vmem:[#allocation7 + $0x15] sm:$0xff]  ;;  %7028 = vmatprep.mubr.f32.mxu0 %v6534_v46  ;;  %9443 = vmatprep.subr.bf16.mxu1 %v9442_v14  ;;  %v6699_v30 = vld [vmem:[%s14835_s9 + $0x3f0] sm:$0xff]  ;;  %v9452_v46 = vpack.c.bf16 %v6652_v48, %v6651_v6  ;;  %v7299_v6 = vld [vmem:[%s14837_s11 + $0x188] sm:$0xff] }
 0x6a5   : > { %v14307_v42 = vld [vmem:[#allocation7 + $0x17] sm:$0xff]  ;;  %9469 = vmatpush3.bf16.msra.mxu0 %v9468_v29  ;;  %v9482_v38 = vpack.c.bf16 %v6700_v8, %v6699_v30  ;;  %v6683_v24 = vld [vmem:[%s14835_s9 + $0x370] sm:$0xff]  ;;  %v7283_v37 = vld [vmem:[%s14837_s11 + $0x108] sm:$0xff] }
 0x6a6   : > { %v14309_v55 = vld [vmem:[#allocation7 + $0x14] sm:$0xff]  ;;  %6521 = vst [vmem:[#allocation10 + $0xb0] sm:$0xff] %v14307_v42  ;;  %9471 = vmatprep.subr.bf16.mxu0 %v9470_v41  ;;  %v9484_v32 = vpack.c.bf16 %v6684_v60, %v6683_v24  ;;  %v6703_v63 = vld [vmem:[%s14835_s9 + $0x410] sm:$0xff] }
 0x6a7   : > { %9445 = vmatpush3.bf16.msra.mxu1 %v9444_v11  ;;  %v6704_v54 = vld [vmem:[%s14835_s9 + $0x418] sm:$0xff]  ;;  %v6707_v35 = vld [vmem:[%s14835_s9 + $0x430] sm:$0xff]  ;;  %v7270_v7 = vld [vmem:[%s14837_s11 + $0xa0] sm:$0xff] }
 0x6a8   : > { %9447 = vmatprep.subr.bf16.mxu1 %v9446_v40  ;;  %v9490_v49 = vpack.c.bf16 %v6704_v54, %v6703_v63  ;;  %v6708_v10 = vld [vmem:[%s14835_s9 + $0x438] sm:$0xff]  ;;  %v6711_v50 = vld [vmem:[%s14835_s9 + $0x450] sm:$0xff]  ;;  %v7254_v45 = vld [vmem:[%s14837_s11 + $0x20] sm:$0xff]  ;;  %v9518_v62 = vpack.c.bf16 %v7271_v9, %v7270_v7 }
 0x6a9   : > { %9473 = vmatpush3.bf16.msra.mxu0 %v9472_v12  ;;  %v6712_v29 = vld [vmem:[%s14835_s9 + $0x458] sm:$0xff]  ;;  %v6715_v41 = vld [vmem:[%s14835_s9 + $0x470] sm:$0xff]  ;;  %v7282_v48 = vld [vmem:[%s14837_s11 + $0x100] sm:$0xff] }
 0x6aa   : > { %9475 = vmatprep.subr.bf16.mxu0 %v9474_v39  ;;  %v9502_v22 = vpack.c.bf16 %v6712_v29, %v6711_v50  ;;  %v7268_v11 = vld [vmem:[%s14837_s11 + $0x90] sm:$0xff]  ;;  %v7269_v12 = vld [vmem:[%s14837_s11 + $0x98] sm:$0xff]  ;;  %v9544_v20 = vpack.c.bf16 %v7283_v37, %v7282_v48  ;;  %v7274_v34 = vld [vmem:[%s14837_s11 + $0xc0] sm:$0xff] }
 0x6ab   : > { %9449 = vmatpush3.bf16.msra.mxu1 %v9448_v56  ;;  %v9514_v43 = vpack.c.bf16 %v7269_v12, %v7268_v11  ;;  %v7252_v40 = vld [vmem:[%s14837_s11 + $0x10] sm:$0xff]  ;;  %v7253_v39 = vld [vmem:[%s14837_s11 + $0x18] sm:$0xff]  ;;  %v7255_v56 = vld [vmem:[%s14837_s11 + $0x28] sm:$0xff] }
 0x6ac   : > { %9451 = vmatprep.subr.bf16.mxu1 %v9450_v23  ;;  %v9516_v18 = vpack.c.bf16 %v7253_v39, %v7252_v40  ;;  %v7273_v23 = vld [vmem:[%s14837_s11 + $0xb8] sm:$0xff]  ;;  %v7300_v30 = vld [vmem:[%s14837_s11 + $0x190] sm:$0xff]  ;;  %v7302_v54 = vld [vmem:[%s14837_s11 + $0x1a0] sm:$0xff] }
 0x6ad   : > { %9477 = vmatpush3.bf16.msra.mxu0 %v9476_v44  ;;  %v7272_v44 = vld [vmem:[%s14837_s11 + $0xb0] sm:$0xff]  ;;  %v7301_v8 = vld [vmem:[%s14837_s11 + $0x198] sm:$0xff] }
 0x6ae   : > { %9479 = vmatprep.subr.bf16.mxu0 %v9478_v31  ;;  %v9542_v31 = vpack.c.bf16 %v7299_v6, %v7298_v3  ;;  %v7284_v24 = vld [vmem:[%s14837_s11 + $0x110] sm:$0xff]  ;;  %v9522_v60 = vpack.c.bf16 %v7273_v23, %v7272_v44  ;;  %v7257_v1 = vld [vmem:[%s14837_s11 + $0x38] sm:$0xff] }
 0x6af   : > { %9453 = vmatpush3.bf16.msra.mxu1 %v9452_v46  ;;  %v9520_v46 = vpack.c.bf16 %v7255_v56, %v7254_v45  ;;  %v7276_v4 = vld [vmem:[%s14837_s11 + $0xd0] sm:$0xff] }
 0x6b0   : > { %9486 = vmatprep.subr.bf16.mxu1 %v15125_v25 }
 0x6b1   : > { %9481 = vmatpush3.bf16.msra.mxu0 %v9480_v57  ;;  %v7256_v57 = vld [vmem:[%s14837_s11 + $0x30] sm:$0xff] }
 0x6b2   : > { %9483 = vmatprep.subr.bf16.mxu0 %v9482_v38  ;;  %6949 = vmatmul.mubr.f32.vlgmr.msra.gmra.mrb[98].mxu1 %v14216_v28  ;;  %v9493_v28 = vpack.c.bf16 %v6706_v17, %v6705_v26  ;;  %v9546_v38 = vpack.c.bf16 %v7301_v8, %v7300_v30  ;;  %v7286_v17 = vld [vmem:[%s14837_s11 + $0x120] sm:$0xff] }
 0x6b3   : > { %6953 = vmatprep.mubr.f32.mxu1 %v14240_v15  ;;  %9488 = vmatpush3.bf16.msra.mxu1 %v9487_v51  ;;  %v6571_v15 = vld [vmem:[#allocation10 + $0xc8] sm:$0xff] }
 0x6b4   : > { %9489 = vmatprep.subr.bf16.mxu1 %v15125_v25  ;;  %v7275_v51 = vld [vmem:[%s14837_s11 + $0xc8] sm:$0xff] }
 0x6b5   : > { %9485 = vmatpush3.bf16.msra.mxu0 %v9484_v32  ;;  %v7285_v32 = vld [vmem:[%s14837_s11 + $0x118] sm:$0xff] }
 0x6b6   : > { %6954 = vmatmul.mubr.f32.gmra.mrb[100].mxu1 %v14245_v52  ;;  %v14404_v52 = vld [vmem:[#allocation5] sm:$0xff]  ;;  %v9548_v63 = vpack.c.bf16 %v7285_v32, %v7284_v24 }
 0x6b7   : > { %6958 = vmatprep.mubr.f32.mxu1 %v14301_v19  ;;  %9491 = vmatpush3.bf16.msra.mxu1 %v9490_v49  ;;  %v6714_v19 = vld [vmem:[%s14835_s9 + $0x468] sm:$0xff]  ;;  %509 = vst.msk [vmem:[#allocation8] sm:$0x7f] %vm508_vm4, %v14404_v52 }
 0x6b8   : > { %7029 = vmatmul.mubr.f32.vlgmr.msra.gmra.mrb[198].mxu0 %v14247_v2  ;;  %9492 = vmatprep.subr.bf16.mxu1 %v15125_v25  ;;  %v9496_v2 = vpack.c.bf16 %v6708_v10, %v6707_v35  ;;  %v9505_v14 = vpack.c.bf16 %v6714_v19, %v6713_v58  ;;  %v7303_v49 = vld [vmem:[%s14837_s11 + $0x1a8] sm:$0xff]  ;;  %v9526_v35 = vpack.c.bf16 %v7275_v51, %v7274_v34  ;;  %v7258_v10 = vld [vmem:[%s14837_s11 + $0x40] sm:$0xff]  ;;  %v7261_v58 = vld [vmem:[%s14837_s11 + $0x58] sm:$0xff] }
 0x6b9   : > { %7033 = vmatprep.mubr.f32.mxu0 %v14305_v21  ;;  %v6716_v21 = vld [vmem:[%s14835_s9 + $0x478] sm:$0xff]  ;;  %v9550_v26 = vpack.c.bf16 %v7303_v49, %v7302_v54 }
 0x6ba   : > { %6959 = vmatmul.mubr.f32.gmra.mrb[102].mxu1 %v14307_v42  ;;  %v9508_v42 = vpack.c.bf16 %v6716_v21, %v6715_v41 }
 0x6bb   : > { %8939 = vmatprep.mubr.msk.f32.mxu1 %vm9835_vm15, %v14404_v52  ;;  %9494 = vmatpush3.bf16.msra.mxu1 %v9493_v28  ;;  %v7287_v28 = vld [vmem:[%s14837_s11 + $0x128] sm:$0xff] }
 0x6bc   : > { %7034 = vmatmul.mubr.f32.gmra.mrb[200].mxu0 %v14309_v55  ;;  %9495 = vmatprep.subr.bf16.mxu1 %v15125_v25  ;;  %v6572_v55 = vld [vmem:[#allocation10 + $0xd0] sm:$0xff]  ;;  %v9552_v0 = vpack.c.bf16 %v7287_v28, %v7286_v17 }
 0x6bd   : > { %7038 = vmatprep.mubr.f32.mxu0 %v6571_v15  ;;  %v9524_v15 = vpack.c.bf16 %v7257_v1, %v7256_v57  ;;  %v14561_v1 = vmul.u32.u64.low 2863311531, %v15079_v53  ;;  %v14562_v34 = vmul.u32.u64.high 2863311531, %v15079_v53, %v14561_v1 }
 0x6bf   : > { %9497 = vmatpush3.bf16.msra.mxu1 %v9496_v2  ;;  %v7259_v2 = vld [vmem:[%s14837_s11 + $0x48] sm:$0xff] }
 0x6c0   : > { %7039 = vmatmul.mubr.f32.gmra.mrb[202].mxu0 %v14319_v5  ;;  %9498 = vmatprep.subr.bf16.mxu1 %v15125_v25  ;;  %v7251_v5 = vld [vmem:[%s14837_s11 + $0x8] sm:$0xff]  ;;  %v9528_v50 = vpack.c.bf16 %v7259_v2, %v7258_v10 }
 0x6c3   : > { %9500 = vmatpush3.bf16.msra.mxu1 %v9499_v13  ;;  %v7277_v13 = vld [vmem:[%s14837_s11 + $0xd8] sm:$0xff] }
 0x6c4   : > { %9501 = vmatprep.subr.bf16.mxu1 %v15125_v25  ;;  %v9530_v29 = vpack.c.bf16 %v7277_v13, %v7276_v4 }
 0x6c7   : > { %9503 = vmatpush3.bf16.msra.mxu1 %v9502_v22  ;;  %v7260_v22 = vld [vmem:[%s14837_s11 + $0x50] sm:$0xff] }
 0x6c8   : > { %9504 = vmatprep.subr.bf16.mxu1 %v15125_v25  ;;  %v9532_v19 = vpack.c.bf16 %v7261_v58, %v7260_v22  ;;  %v1459_v22 = vshrl.u32 %v14562_v34, 2  ;;  %v7307_v34 = vld [vmem:[%s14837_s11 + $0x1c8] sm:$0xff] }
 0x6cb   : > { %9506 = vmatpush3.bf16.msra.mxu1 %v9505_v14 }
 0x6cc   : > { %9507 = vmatprep.subr.bf16.mxu1 %v15125_v25 }
 0x6cf   : > { %9509 = vmatpush3.bf16.msra.mxu1 %v9508_v42  ;;  %v7896_v42 = vld [vmem:[%s14836_s10] ss:$0 sm:$0xff] }
 0x6d0   : > { %9543 = vmatprep.subr.bf16.mxu1 %v9542_v31 }
 0x6d2   : > { %8940 = vmatmul.mubr.f32.vlgmr.msra.gmra.mrb[104].mxu1 %v14238_v47  ;;  %v7267_v47 = vld [vmem:[%s14837_s11 + $0x88] sm:$0xff] }
 0x6d3   : > { %8942 = vmatprep.mubr.msk.f32.mxu1 %vm9835_vm15, %v14404_v52  ;;  %v9510_v16 = vpack.c.bf16 %v7267_v47, %v7266_v33  ;;  %9545 = vmatpush3.bf16.msra.mxu1 %v9544_v20  ;;  %v14557_v37 = vmul.u32.u64.low 2863311531, %v15080_v27  ;;  %v14558_v20 = vmul.u32.u64.high 2863311531, %v15080_v27, %v14557_v37 }
 0x6d4   : > { %9547 = vmatprep.subr.bf16.mxu1 %v9546_v38 }
 0x6d5   : > { %9511 = vmatprep.subr.bf16.mxu0 %v9510_v16 }
 0x6d6   : > { %8943 = vmatmul.mubr.f32.gmra.mrb[106].mxu1 %v14293_v36  ;;  %v7250_v36 = vld [vmem:[%s14837_s11] sm:$0xff] }
 0x6d7   : > { %8945 = vmatprep.mubr.msk.f32.mxu1 %vm9835_vm15, %v14404_v52  ;;  %v9512_v61 = vpack.c.bf16 %v7251_v5, %v7250_v36  ;;  %9549 = vmatpush3.bf16.msra.mxu1 %v9548_v63 }
 0x6d8   : > { %9551 = vmatprep.subr.bf16.mxu1 %v9550_v26 }
 0x6d9   : > { %9513 = vmatpush3.bf16.msra.mxu0 %v9512_v61 }
 0x6da   : > { %8946 = vmatmul.mubr.f32.gmra.mrb[108].mxu1 %v6572_v55  ;;  %9515 = vmatprep.subr.bf16.mxu0 %v9514_v43 }
 0x6db   : > { %9553 = vmatpush3.bf16.msra.mxu1 %v9552_v0 }
 0x6dd   : > { %9517 = vmatpush3.bf16.msra.mxu0 %v9516_v18 }
 0x6de   : > { %9519 = vmatprep.subr.bf16.mxu0 %v9518_v62 }
 0x6e1   : > { %9521 = vmatpush3.bf16.msra.mxu0 %v9520_v46 }
 0x6e2   : > { %9523 = vmatprep.subr.bf16.mxu0 %v9522_v60 }
 0x6e5   : > { %9525 = vmatpush3.bf16.msra.mxu0 %v9524_v15  ;;  %v1448_v15 = vshrl.u32 %v14558_v20, 2 }
 0x6e6   : > { %9527 = vmatprep.subr.bf16.mxu0 %v9526_v35  ;;  %v14566_v35 = vmul.u32.u64.low 2863311531, %v15082_v59  ;;  %v14567_v10 = vmul.u32.u64.high 2863311531, %v15082_v59, %v14566_v35 }
 0x6e9   : > { %9529 = vmatpush3.bf16.msra.mxu0 %v9528_v50 }
 0x6ea   : > { %9531 = vmatprep.subr.bf16.mxu0 %v9530_v29  ;;  %v1449_v29 = vmul.u32 6, %v1448_v15 }
 0x6ed   : > { %9533 = vmatpush3.bf16.msra.mxu0 %v9532_v19  ;;  %v1450_v19 = vsub.s32 %v15080_v27, %v1449_v29  ;;  %v7292_v29 = vld [vmem:[%s14837_s11 + $0x150] sm:$0xff] }
 0x6ef   : > { %vm1475_vm2 = vcmp.ne.s32.totalorder %v1450_v19, 0  ;;  %vm1478_vm12 = vcmp.lt.s32.totalorder %v1450_v19, 0 }
 0x6f0   : > { %vm1481_vm3 = vmand %vm1478_vm12, %vm1475_vm2 }
 0x765   : > { %v8440_v14 = vpop.f32.mrb[92].mxu1 }
 0x766   : > { %v8441_v41 = vpop.f32.mrb[93].mxu1 }
 0x767   : > { %v8442_v21 = vadd.f32 %v8441_v41, %v8440_v14  ;;  %v1460_v14 = vmul.u32 6, %v1459_v22  ;;  %v1470_v41 = vshrl.u32 %v14567_v10, 2  ;;  %v7293_v22 = vld [vmem:[%s14837_s11 + $0x158] sm:$0xff] }
 0x769   : > { %v6791_v16 = vadd.f32 %v8442_v21, %v7896_v42  ;;  %v1461_v21 = vsub.s32 %v15079_v53, %v1460_v14 }
 0x76b   : > { %v8443_v55 = vpop.f32.mrb[94].mxu1  ;;  %v8481_v33 = vpop.f32.mrb[192].mxu0  ;;  %vm1476_vm5 = vcmp.ne.s32.totalorder %v1461_v21, 0  ;;  %vm1479_vm13 = vcmp.lt.s32.totalorder %v1461_v21, 0 }
 0x76c   : > { %v8444_v47 = vpop.f32.mrb[95].mxu1  ;;  %v8482_v36 = vpop.f32.mrb[193].mxu0  ;;  %vm1482_vm6 = vmand %vm1479_vm13, %vm1476_vm5 }
 0x76d   : > { %v8445_v5 = vadd.f32 %v8444_v47, %v8443_v55  ;;  %v8483_v11 = vadd.f32 %v8482_v36, %v8481_v33  ;;  %v1484_v55 = vadd.s32 6, %v1450_v19  ;;  %v1485_v36 = vadd.s32 6, %v1461_v21 }
 0x76f   : > { %v6871_v12 = vadd.f32 %v8483_v11, %v6791_v16  ;;  %v8446_v61 = vpop.f32.mrb[96].mxu1  ;;  %v8484_v43 = vpop.f32.mrb[194].mxu0  ;;  %v6796_v7 = vadd.f32 %v8445_v5, %v7896_v42  ;;  %v1487_v47 = vsel %vm1481_vm3, %v1484_v55, %v1450_v19  ;;  %v1488_v16 = vsel %vm1482_vm6, %v1485_v36, %v1461_v21  ;;  %v7294_v36 = vld [vmem:[%s14837_s11 + $0x160] sm:$0xff] }
 0x770   : > { %v8447_v40 = vpop.f32.mrb[97].mxu1  ;;  %v8485_v39 = vpop.f32.mrb[195].mxu0  ;;  %vm1490_vm8 = vcmp.lt.s32.totalorder %v1487_v47, 4  ;;  %vm14592_vm10 = vcmp.lt.s32.totalorder %v1488_v16, 4  ;;  %v7311_v47 = vld [vmem:[%s14837_s11 + $0x1e8] sm:$0xff] }
 0x771   : > { %v8448_v9 = vadd.f32 %v8447_v40, %v8446_v61  ;;  %v8486_v18 = vadd.f32 %v8485_v39, %v8484_v43  ;;  %v14581_v61 = vsel %vm1490_vm8, 1.0, %v14404_v52  ;;  %v7279_v43 = vld [vmem:[%s14837_s11 + $0xe8] sm:$0xff]  ;;  %v7304_v40 = vld [vmem:[%s14837_s11 + $0x1b0] sm:$0xff] }
 0x773   : > { %v6876_v45 = vadd.f32 %v8486_v18, %v6796_v7  ;;  %v6801_v56 = vadd.f32 %v8448_v9, %v7896_v42  ;;  %v1471_v42 = vmul.u32 6, %v1470_v41  ;;  %v7305_v18 = vld [vmem:[%s14837_s11 + $0x1b8] sm:$0xff] }
 0x774   : > { %v7313_v7 = vld [vmem:[%s14837_s11 + $0x1f8] sm:$0xff] }
 0x775   : > { %v1472_v33 = vsub.s32 %v15082_v59, %v1471_v42  ;;  %v7278_v59 = vld [vmem:[%s14837_s11 + $0xe0] sm:$0xff] }
 0x776   : > { %v8487_v3 = vpop.f32.mrb[196].mxu0  ;;  %v9534_v9 = vpack.c.bf16 %v7279_v43, %v7278_v59 }
 0x777   : > { %v8488_v62 = vpop.f32.mrb[197].mxu0  ;;  %vm1477_vm7 = vcmp.ne.s32.totalorder %v1472_v33, 0  ;;  %vm1480_vm14 = vcmp.lt.s32.totalorder %v1472_v33, 0  ;;  %v1486_v5 = vadd.s32 6, %v1472_v33 }
 0x778   : > { %v8489_v44 = vadd.f32 %v8488_v62, %v8487_v3  ;;  %vm14576_vm9 = vmand %vm1480_vm14, %vm1477_vm7  ;;  %v7263_v3 = vld [vmem:[%s14837_s11 + $0x68] sm:$0xff]  ;;  %9535 = vmatprep.subr.bf16.mxu0 %v9534_v9 }
 0x77a   : > { %v6881_v6 = vadd.f32 %v8489_v44, %v6801_v56  ;;  %v1489_v56 = vsel %vm14576_vm9, %v1486_v5, %v1472_v33  ;;  %v9554_v44 = vpack.c.bf16 %v7305_v18, %v7304_v40  ;;  %v7310_v33 = vld [vmem:[%s14837_s11 + $0x1e0] sm:$0xff]  ;;  %v7296_v18 = vld [vmem:[%s14837_s11 + $0x170] sm:$0xff] }
 0x77b   : > { %vm14629_vm11 = vcmp.lt.s32.totalorder %v1489_v56, 4  ;;  %v9566_v16 = vpack.c.bf16 %v7311_v47, %v7310_v33 }
 0x77c   : > { %9555 = vmatprep.subr.bf16.mxu1 %v9554_v44 }
 0x785   : > { %v8522_v23 = vpop.f32.mrb[98].mxu1 }
 0x786   : > { %v8523_v31 = vpop.f32.mrb[99].mxu1 }
 0x787   : > { %v8524_v48 = vadd.f32 %v8523_v31, %v8522_v23  ;;  %v7288_v23 = vld [vmem:[%s14837_s11 + $0x130] sm:$0xff]  ;;  %v7289_v31 = vld [vmem:[%s14837_s11 + $0x138] sm:$0xff] }
 0x789   : > { %v6951_v30 = vadd.f32 %v8524_v48, %v6871_v12  ;;  %v8525_v8 = vpop.f32.mrb[100].mxu1 }
 0x78a   : > { %v8526_v57 = vpop.f32.mrb[101].mxu1 }
 0x78b   : > { %v8563_v46 = vpop.f32.mrb[198].mxu0  ;;  %v8527_v24 = vadd.f32 %v8526_v57, %v8525_v8  ;;  %v14617_v8 = vsel %vm14592_vm10, 1.0, %v14404_v52  ;;  %v7281_v57 = vld [vmem:[%s14837_s11 + $0xf8] sm:$0xff] }
 0x78c   : > { %v8564_v38 = vpop.f32.mrb[199].mxu0 }
 0x78d   : > { %v8565_v60 = vadd.f32 %v8564_v38, %v8563_v46  ;;  %v6956_v32 = vadd.f32 %v8527_v24, %v6876_v45  ;;  %v8528_v51 = vpop.f32.mrb[102].mxu1  ;;  %v7262_v45 = vld [vmem:[%s14837_s11 + $0x60] sm:$0xff]  ;;  %v7280_v46 = vld [vmem:[%s14837_s11 + $0xf0] sm:$0xff] }
 0x78e   : > { %v8529_v49 = vpop.f32.mrb[103].mxu1  ;;  %v7306_v38 = vld [vmem:[%s14837_s11 + $0x1c0] sm:$0xff]  ;;  %v9538_v1 = vpack.c.bf16 %v7281_v57, %v7280_v46 }
 0x78f   : > { %v8566_v63 = vpop.f32.mrb[200].mxu0  ;;  %v7031_v54 = vadd.f32 %v8565_v60, %v6951_v30  ;;  %v8530_v17 = vadd.f32 %v8529_v49, %v8528_v51  ;;  %v9556_v30 = vpack.c.bf16 %v7289_v31, %v7288_v23  ;;  %v7265_v51 = vld [vmem:[%s14837_s11 + $0x78] sm:$0xff] }
 0x790   : > { %v8567_v26 = vpop.f32.mrb[201].mxu0 }
 0x791   : > { %v8568_v28 = vadd.f32 %v8567_v26, %v8566_v63  ;;  %v6961_v2 = vadd.f32 %v8530_v17, %v6881_v6  ;;  %v9536_v6 = vpack.c.bf16 %v7263_v3, %v7262_v45  ;;  %9557 = vmatpush3.bf16.msra.mxu1 %v9556_v30  ;;  %v7290_v26 = vld [vmem:[%s14837_s11 + $0x140] sm:$0xff]  ;;  %v7291_v17 = vld [vmem:[%s14837_s11 + $0x148] sm:$0xff]  ;;  %v7297_v45 = vld [vmem:[%s14837_s11 + $0x178] sm:$0xff] }
 0x792   : > { %v9560_v10 = vpack.c.bf16 %v7291_v17, %v7290_v26  ;;  %v9572_v56 = vpack.c.bf16 %v7297_v45, %v7296_v18  ;;  %v7594_v45 = vld [vmem:[%s14839_s13 + $0x20] sm:$0xff] }
 0x793   : > { %v8569_v0 = vpop.f32.mrb[202].mxu0  ;;  %v7036_v4 = vadd.f32 %v8568_v28, %v6956_v32  ;;  %9537 = vmatpush3.bf16.msra.mxu0 %v9536_v6  ;;  %v7264_v32 = vld [vmem:[%s14837_s11 + $0x70] sm:$0xff] }
 0x794   : > { %v8570_v13 = vpop.f32.mrb[203].mxu0  ;;  %v9540_v49 = vpack.c.bf16 %v7265_v51, %v7264_v32  ;;  %9539 = vmatprep.subr.bf16.mxu0 %v9538_v1  ;;  %v7315_v32 = vld [vmem:[%s14837_s11 + $0x208] sm:$0xff] }
 0x795   : > { %v8571_v50 = vadd.f32 %v8570_v13, %v8569_v0  ;;  %v7308_v0 = vld [vmem:[%s14837_s11 + $0x1d0] sm:$0xff] }
 0x797   : > { %v14570_v58 = vadd.f32 %v8571_v50, %v6961_v2  ;;  %v14653_v2 = vsel %vm14629_vm11, 1.0, %v14404_v52  ;;  %9541 = vmatpush3.bf16.msra.mxu0 %v9540_v49 }
 0x798   : > { %9574 = vmatprep.subr.bf16.mxu0 %v15125_v25 }
 0x7a5   : > { %v7110_v27 = vpop.f32.mrb[104].mxu1 }
 0x7a6   : > { %v7111_v11 = vadd.f32 %v7110_v27, %v7031_v54  ;;  %v8941_v12 = vpop.f32.mrb[105].mxu1  ;;  %v9558_v54 = vpack.c.bf16 %v7307_v34, %v7306_v38  ;;  %v7295_v27 = vld [vmem:[%s14837_s11 + $0x168] sm:$0xff]  ;;  %v7314_v34 = vld [vmem:[%s14837_s11 + $0x200] sm:$0xff] }
 0x7a7   : > { %v9568_v5 = vpack.c.bf16 %v7295_v27, %v7294_v36  ;;  %v9575_v51 = vpack.c.bf16 %v7315_v32, %v7314_v34 }
 0x7a8   : > { %v7124_v39 = vmax.f32 %v7111_v11, 0.0  ;;  %9559 = vmatprep.subr.bf16.mxu1 %v9558_v54 }
 0x7a9   : > { %v7115_v62 = vpop.f32.mrb[106].mxu1  ;;  %9561 = vmatpush3.bf16.msra.mxu1 %v9560_v10 }
 0x7aa   : > { %v7127_v48 = vmul.f32 %v14581_v61, %v7124_v39  ;;  %v7116_v37 = vadd.f32 %v7115_v62, %v7036_v4  ;;  %v8944_v20 = vpop.f32.mrb[107].mxu1  ;;  %v7309_v4 = vld [vmem:[%s14837_s11 + $0x1d8] sm:$0xff]  ;;  %v7312_v39 = vld [vmem:[%s14837_s11 + $0x1f0] sm:$0xff] }
 0x7ab   : > { %v9562_v50 = vpack.c.bf16 %v7309_v4, %v7308_v0  ;;  %v9570_v9 = vpack.c.bf16 %v7313_v7, %v7312_v39  ;;  %v7592_v7 = vld [vmem:[%s14839_s13 + $0x10] sm:$0xff] }
 0x7ac   : > { %7130 = vst.msk [vmem:[#allocation8 + $0x7] sm:$0xff] %vm495_vm0, %v7127_v48  ;;  %v7125_v24 = vmax.f32 %v7116_v37, 0.0 }
 0x7ad   : > { %v7120_v63 = vpop.f32.mrb[108].mxu1  ;;  %9563 = vmatprep.subr.bf16.mxu1 %v9562_v50  ;;  %v7319_v50 = vld [vmem:[%s14837_s11 + $0x228] sm:$0xff] }
 0x7ae   : > { %v7128_v28 = vmul.f32 %v14617_v8, %v7125_v24  ;;  %v7121_v15 = vadd.f32 %v7120_v63, %v14570_v58  ;;  %v8947_v35 = vpop.f32.mrb[109].mxu1  ;;  %v9564_v58 = vpack.c.bf16 %v7293_v22, %v7292_v29  ;;  %v7316_v63 = vld [vmem:[%s14837_s11 + $0x210] sm:$0xff] }
 0x7af   : > { %v7318_v35 = vld [vmem:[%s14837_s11 + $0x220] sm:$0xff]  ;;  %v7320_v22 = vld [vmem:[%s14837_s11 + $0x230] sm:$0xff] }
 0x7b0   : > { %7131 = vst.msk [vmem:[#allocation8 + $0xf] sm:$0xff] %vm495_vm0, %v7128_v28  ;;  %v7126_v13 = vmax.f32 %v7121_v15, 0.0  ;;  %9565 = vmatpush3.bf16.msra.mxu1 %v9564_v58  ;;  %v7317_v28 = vld [vmem:[%s14837_s11 + $0x218] sm:$0xff]  ;;  %v9581_v29 = vpack.c.bf16 %v7319_v50, %v7318_v35 }
 0x7b1   : > { %9567 = vmatprep.subr.bf16.mxu1 %v9566_v16  ;;  %v9578_v15 = vpack.c.bf16 %v7317_v28, %v7316_v63 }
 0x7b2   : > { %v7129_v19 = vmul.f32 %v14653_v2, %v7126_v13 }
 0x7b3   : > { %v7163_v14 = vld [vmem:[#allocation8 + $0x6] sm:$0xff] }
 0x7b4   : > { %v7139_v41 = vld [vmem:[#allocation8 + $0x1] sm:$0xff]  ;;  %7132 = vst.msk [vmem:[#allocation8 + $0x17] sm:$0xff] %vm495_vm0, %v7129_v19  ;;  %7169 = vrot.lane.b32.xlu0 %v7163_v14, %s9834_s25  ;;  %9569 = vmatpush3.bf16.msra.mxu1 %v9568_v5 }
 0x7b5   : > { %v7157_v21 = vld [vmem:[#allocation8 + $0x2] sm:$0xff]  ;;  %7145 = vrot.lane.b32.xlu1 %v7139_v41, %s9834_s25  ;;  %9571 = vmatprep.subr.bf16.mxu1 %v9570_v9 }
 0x7b6   : > { %7160 = vst.msk [vmem:[#allocation10 + $0x8] sm:$0xff] %vm495_vm0, %v7157_v21  ;;  %v7133_v42 = vld [vmem:[#allocation8] sm:$0xff]  ;;  %v7321_v21 = vld [vmem:[%s14837_s11 + $0x238] sm:$0xff] }
 0x7b7   : > { %v7181_v55 = vld [vmem:[#allocation8 + $0x7] sm:$0xff]  ;;  %7136 = vst.msk [vmem:[#allocation10] sm:$0xff] %vm495_vm0, %v7133_v42  ;;  %v7182_v40 = vld [vmem:[#allocation8 + $0xf] sm:$0xff]  ;;  %v9584_v42 = vpack.c.bf16 %v7321_v21, %v7320_v22 }
 0x7b8   : > { %7184 = vst.msk [vmem:[#allocation10 + $0x10] sm:$0xff] %vm495_vm0, %v7181_v55  ;;  %v7229_v11 = vld [vmem:[#allocation8 + $0xe] sm:$0xff]  ;;  %7185 = vst.msk [vmem:[#allocation10 + $0x58] sm:$0xff] %vm495_vm0, %v7182_v40  ;;  %9573 = vmatpush3.bf16.msra.mxu1 %v9572_v56  ;;  %v7591_v40 = vld [vmem:[%s14839_s13 + $0x8] sm:$0xff] }
 0x7b9   : > { %v7140_v12 = vld [vmem:[#allocation8 + $0x9] sm:$0xff]  ;;  %7232 = vst.msk [vmem:[#allocation10 + $0x20] sm:$0xff] %vm495_vm0, %v7229_v11  ;;  %7171 = vrot.lane.b32.xlu0 %v7229_v11, %s9834_s25  ;;  %9586 = vmatprep.subr.bf16.mxu1 %v15125_v25 }
 0x7ba   : > { %7147 = vrot.lane.b32.xlu1 %v7140_v12, %s9834_s25  ;;  %v7187_v53 = vld [vmem:[#allocation8 + $0x8] sm:$0xff] }
 0x7bb   : > { %v7158_v59 = vld [vmem:[#allocation8 + $0xa] sm:$0xff]  ;;  %7137 = vst.msk [vmem:[#allocation10 + $0x48] sm:$0xff] %vm495_vm0, %v7187_v53  ;;  %v7230_v3 = vld [vmem:[#allocation8 + $0x16] sm:$0xff]  ;;  %v7231_v20 = vld [vmem:[#allocation8 + $0x1e] sm:$0xff] }
 0x7bc   : > { %v7205_v43 = vld [vmem:[#allocation8 + $0xc] sm:$0xff]  ;;  %7161 = vst.msk [vmem:[#allocation10 + $0x50] sm:$0xff] %vm495_vm0, %v7158_v59  ;;  %7233 = vst.msk [vmem:[#allocation10 + $0x68] sm:$0xff] %vm495_vm0, %v7230_v3  ;;  %v7206_v23 = vld [vmem:[#allocation8 + $0x14] sm:$0xff] }
 0x7bd   : > { %7208 = vst.msk [vmem:[#allocation10 + $0x18] sm:$0xff] %vm495_vm0, %v7205_v43  ;;  %v7211_v62 = vld [vmem:[#allocation8 + $0xd] sm:$0xff]  ;;  %7209 = vst.msk [vmem:[#allocation10 + $0x60] sm:$0xff] %vm495_vm0, %v7206_v23  ;;  %v7207_v31 = vld [vmem:[#allocation8 + $0x1c] sm:$0xff] }
 0x7be   : > { %7217 = vrot.lane.b32.xlu0 %v7211_v62, %s9834_s25  ;;  %7173 = vrot.lane.b32.xlu1 %v7230_v3, %s9834_s25  ;;  %v7188_v44 = vld [vmem:[#allocation8 + $0x10] sm:$0xff]  ;;  %7210 = vst.msk [vmem:[#allocation10 + $0xa8] sm:$0xff] %vm495_vm0, %v7207_v31  ;;  %7234 = vst.msk [vmem:[#allocation10 + $0xb0] sm:$0xff] %vm495_vm0, %v7231_v20  ;;  %v7213_v46 = vld [vmem:[#allocation8 + $0x1d] sm:$0xff] }
 0x7bf   : > { %v7159_v6 = vld [vmem:[#allocation8 + $0x12] sm:$0xff]  ;;  %7138 = vst.msk [vmem:[#allocation10 + $0x90] sm:$0xff] %vm495_vm0, %v7188_v44  ;;  %v7593_v9 = vld [vmem:[%s14839_s13 + $0x18] sm:$0xff]  ;;  %v7596_v62 = vld [vmem:[%s14839_s13 + $0x30] sm:$0xff] }
 0x7c0   : > { %7162 = vst.msk [vmem:[#allocation10 + $0x98] sm:$0xff] %vm495_vm0, %v7159_v6  ;;  %v7183_v48 = vld [vmem:[#allocation8 + $0x17] sm:$0xff]  ;;  %v9590_v18 = vpack.c.bf16 %v7593_v9, %v7592_v7 }
 0x7c1   : > { %v7141_v37 = vld [vmem:[#allocation8 + $0x11] sm:$0xff]  ;;  %7186 = vst.msk [vmem:[#allocation10 + $0xa0] sm:$0xff] %vm495_vm0, %v7183_v48 }
 0x7c2   : > { %7193 = vrot.lane.b32.xlu0 %v7187_v53, %s9834_s25  ;;  %7149 = vrot.lane.b32.xlu1 %v7141_v37, %s9834_s25  ;;  %v7212_v30 = vld [vmem:[#allocation8 + $0x15] sm:$0xff] }
 0x7c3   : > { %v7189_v57 = vld [vmem:[#allocation8 + $0x18] sm:$0xff]  ;;  %v7239_v5 = vld [vmem:[#allocation10 + $0x20] sm:$0xff] }
 0x7c4   : > { %v7244_v53 = vld [vmem:[#allocation10 + $0x68] sm:$0xff]  ;;  %v7590_v43 = vld [vmem:[%s14839_s13] sm:$0xff] }
 0x7c5   : > { %v7249_v59 = vld [vmem:[#allocation10 + $0xb0] sm:$0xff]  ;;  %v9587_v39 = vpack.c.bf16 %v7591_v40, %v7590_v43  ;;  %v7595_v3 = vld [vmem:[%s14839_s13 + $0x28] sm:$0xff] }
 0x7c6   : > { %7219 = vrot.lane.b32.xlu0 %v7212_v30, %s9834_s25  ;;  %7195 = vrot.lane.b32.xlu1 %v7188_v44, %s9834_s25  ;;  %v9593_v56 = vpack.c.bf16 %v7595_v3, %v7594_v45  ;;  %v7597_v44 = vld [vmem:[%s14839_s13 + $0x38] sm:$0xff] }
 0x7c7   : > { %v9596_v6 = vpack.c.bf16 %v7597_v44, %v7596_v62 }
 0x7ca   : > { %7221 = vrot.lane.b32.xlu0 %v7213_v46, %s9834_s25  ;;  %7197 = vrot.lane.b32.xlu1 %v7189_v57, %s9834_s25  ;;  %v7897_v46 = vld [vmem:[%s14838_s12] ss:$0 sm:$0xff] }
 0x826   : > { %v7170_v38 = vpop.permute.xlu0 %7169 }
 0x827   : > { %v7146_v24 = vpop.permute.xlu1 %7145  ;;  %7178 = vst.msk [vmem:[#allocation10 + $0x8] sm:$0xff] %vm2265_vm1, %v7170_v38 }
 0x828   : > { %7154 = vst.msk [vmem:[#allocation10] sm:$0xff] %vm2265_vm1, %v7146_v24 }
 0x82b   : > { %v7172_v60 = vpop.permute.xlu0 %7171 }
 0x82c   : > { %v7148_v1 = vpop.permute.xlu1 %7147  ;;  %7179 = vst.msk [vmem:[#allocation10 + $0x50] sm:$0xff] %vm2265_vm1, %v7172_v60 }
 0x82d   : > { %7155 = vst.msk [vmem:[#allocation10 + $0x48] sm:$0xff] %vm2265_vm1, %v7148_v1 }
 0x82e   : > { %v7236_v26 = vld [vmem:[#allocation10 + $0x8] sm:$0xff] }
 0x82f   : > { %v7235_v17 = vld [vmem:[#allocation10] sm:$0xff]  ;;  %7402 = vmatprep.mubr.f32.mxu0 %v7236_v26 }
 0x830   : > { %v7218_v54 = vpop.permute.xlu0 %7217  ;;  %v7174_v49 = vpop.permute.xlu1 %7173  ;;  %7403 = vmatmul.mubr.f32.vlgmr.msra.gmra.mrb[204].mxu0 %v7235_v17 }
 0x831   : > { %7226 = vst.msk [vmem:[#allocation10 + $0x18] sm:$0xff] %vm2265_vm1, %v7218_v54  ;;  %7180 = vst.msk [vmem:[#allocation10 + $0x98] sm:$0xff] %vm2265_vm1, %v7174_v49  ;;  %9576 = vmatpush3.bf16.msra.mxu0 %v9575_v51 }
 0x832   : > { %9577 = vmatprep.subr.bf16.mxu0 %v15125_v25 }
 0x833   : > { %v7241_v4 = vld [vmem:[#allocation10 + $0x50] sm:$0xff] }
 0x834   : > { %v7194_v10 = vpop.permute.xlu0 %7193  ;;  %v7150_v0 = vpop.permute.xlu1 %7149  ;;  %v7240_v13 = vld [vmem:[#allocation10 + $0x48] sm:$0xff]  ;;  %7407 = vmatprep.mubr.f32.mxu0 %v7241_v4 }
 0x835   : > { %7202 = vst.msk [vmem:[#allocation10 + $0x10] sm:$0xff] %vm2265_vm1, %v7194_v10  ;;  %7156 = vst.msk [vmem:[#allocation10 + $0x90] sm:$0xff] %vm2265_vm1, %v7150_v0  ;;  %7408 = vmatmul.mubr.f32.gmra.mrb[206].mxu0 %v7240_v13 }
 0x836   : > { %9579 = vmatpush3.bf16.msra.mxu0 %v9578_v15 }
 0x837   : > { %9580 = vmatprep.subr.bf16.mxu0 %v15125_v25 }
 0x838   : > { %v7220_v58 = vpop.permute.xlu0 %7219  ;;  %v7196_v19 = vpop.permute.xlu1 %7195  ;;  %v7246_v14 = vld [vmem:[#allocation10 + $0x98] sm:$0xff] }
 0x839   : > { %v7238_v41 = vld [vmem:[#allocation10 + $0x18] sm:$0xff]  ;;  %7227 = vst.msk [vmem:[#allocation10 + $0x60] sm:$0xff] %vm2265_vm1, %v7220_v58  ;;  %7203 = vst.msk [vmem:[#allocation10 + $0x58] sm:$0xff] %vm2265_vm1, %v7196_v19  ;;  %7412 = vmatprep.mubr.f32.mxu0 %v7246_v14 }
 0x83a   : > { %7482 = vmatprep.mubr.f32.mxu1 %v7238_v41  ;;  %9582 = vmatpush3.bf16.msra.mxu0 %v9581_v29 }
 0x83b   : > { %9583 = vmatprep.subr.bf16.mxu0 %v15125_v25 }
 0x83c   : > { %v7222_v55 = vpop.permute.xlu0 %7221  ;;  %v7198_v33 = vpop.permute.xlu1 %7197  ;;  %v7245_v47 = vld [vmem:[#allocation10 + $0x90] sm:$0xff] }
 0x83d   : > { %v7237_v36 = vld [vmem:[#allocation10 + $0x10] sm:$0xff]  ;;  %7228 = vst.msk [vmem:[#allocation10 + $0xa8] sm:$0xff] %vm2265_vm1, %v7222_v55  ;;  %7204 = vst.msk [vmem:[#allocation10 + $0xa0] sm:$0xff] %vm2265_vm1, %v7198_v33  ;;  %7413 = vmatmul.mubr.f32.gmra.mrb[208].mxu0 %v7245_v47  ;;  %vm7694_vm1 = vcmask 97280  }
 0x83e   : > { %7483 = vmatmul.mubr.f32.vlgmr.msra.gmra.mrb[110].mxu1 %v7237_v36  ;;  %8964 = vmatprep.mubr.msk.f32.mxu0 %vm9835_vm15, %v14404_v52 }
 0x83f   : > { %9585 = vmatpush3.bf16.msra.mxu0 %v9584_v42  ;;  %9588 = vmatpush3.bf16.msra.mxu1 %v9587_v39 }
 0x840   : > { %v7243_v27 = vld [vmem:[#allocation10 + $0x60] sm:$0xff]  ;;  %v7242_v16 = vld [vmem:[#allocation10 + $0x58] sm:$0xff]  ;;  %9589 = vmatprep.subr.bf16.mxu1 %v15125_v25 }
 0x841   : > { %7487 = vmatprep.mubr.f32.mxu1 %v7243_v27 }
 0x842   : > { %8965 = vmatmul.mubr.msk.f32.vlgmr.msra.gmra.mrb[210].mxu0 %vm495_vm0, %v7239_v5  ;;  %7488 = vmatmul.mubr.f32.gmra.mrb[112].mxu1 %v7242_v16 }
 0x843   : > { %8967 = vmatprep.mubr.msk.f32.mxu0 %vm9835_vm15, %v14404_v52  ;;  %9591 = vmatpush3.bf16.msra.mxu1 %v9590_v18 }
 0x844   : > { %v7248_v11 = vld [vmem:[#allocation10 + $0xa8] sm:$0xff]  ;;  %v7247_v12 = vld [vmem:[#allocation10 + $0xa0] sm:$0xff]  ;;  %9592 = vmatprep.subr.bf16.mxu1 %v15125_v25 }
 0x845   : > { %7492 = vmatprep.mubr.f32.mxu1 %v7248_v11 }
 0x846   : > { %8968 = vmatmul.mubr.msk.f32.gmra.mrb[212].mxu0 %vm495_vm0, %v7244_v53  ;;  %7493 = vmatmul.mubr.f32.gmra.mrb[114].mxu1 %v7247_v12 }
 0x847   : > { %8970 = vmatprep.mubr.msk.f32.mxu0 %vm9835_vm15, %v14404_v52  ;;  %8989 = vmatprep.mubr.msk.f32.mxu1 %vm9835_vm15, %v14404_v52 }
 0x848   : > { %9594 = vmatpush3.bf16.msra.mxu1 %v9593_v56 }
 0x849   : > { %9595 = vmatprep.subr.bf16.mxu1 %v15125_v25 }
 0x84a   : > { %8971 = vmatmul.mubr.msk.f32.gmra.mrb[214].mxu0 %vm495_vm0, %v7249_v59 }
 0x84c   : > { %9597 = vmatpush3.bf16.msra.mxu1 %v9596_v6 }
 0x903   : > { %v8623_v23 = vpop.f32.mrb[204].mxu0 }
 0x904   : > { %v8624_v31 = vpop.f32.mrb[205].mxu0 }
 0x905   : > { %v8625_v48 = vadd.f32 %v8624_v31, %v8623_v23 }
 0x907   : > { %v7405_v1 = vadd.f32 %v8625_v48, %v7897_v46 }
 0x908   : > { %v8626_v37 = vpop.f32.mrb[206].mxu0 }
 0x909   : > { %v8627_v20 = vpop.f32.mrb[207].mxu0 }
 0x90a   : > { %v8628_v30 = vadd.f32 %v8627_v20, %v8626_v37 }
 0x90c   : > { %v7410_v17 = vadd.f32 %v8628_v30, %v7897_v46 }
 0x910   : > { %v8629_v57 = vpop.f32.mrb[208].mxu0 }
 0x911   : > { %v8664_v38 = vpop.f32.mrb[110].mxu1  ;;  %v8630_v24 = vpop.f32.mrb[209].mxu0 }
 0x912   : > { %v8665_v60 = vpop.f32.mrb[111].mxu1  ;;  %v8631_v34 = vadd.f32 %v8630_v24, %v8629_v57 }
 0x913   : > { %v8666_v32 = vadd.f32 %v8665_v60, %v8664_v38 }
 0x914   : > { %v7415_v29 = vadd.f32 %v8631_v34, %v7897_v46 }
 0x915   : > { %v7485_v51 = vadd.f32 %v8666_v32, %v7405_v1  ;;  %v7564_v25 = vpop.f32.mrb[210].mxu0  ;;  %v8667_v63 = vpop.f32.mrb[112].mxu1 }
 0x916   : > { %v8966_v49 = vpop.f32.mrb[211].mxu0  ;;  %v8668_v26 = vpop.f32.mrb[113].mxu1 }
 0x917   : > { %v7565_v54 = vadd.f32 %v7564_v25, %v7485_v51  ;;  %v8669_v28 = vadd.f32 %v8668_v26, %v8667_v63 }
 0x919   : > { %v7578_v15 = vmax.f32 %v7565_v54, 0.0  ;;  %v7490_v35 = vadd.f32 %v8669_v28, %v7410_v17  ;;  %v7569_v10 = vpop.f32.mrb[212].mxu0  ;;  %v8670_v0 = vpop.f32.mrb[114].mxu1 }
 0x91a   : > { %v8969_v13 = vpop.f32.mrb[213].mxu0  ;;  %v8671_v50 = vpop.f32.mrb[115].mxu1 }
 0x91b   : > { %v7581_v4 = vmul.f32 %v14581_v61, %v7578_v15  ;;  %v7570_v22 = vadd.f32 %v7569_v10, %v7490_v35  ;;  %v8672_v58 = vadd.f32 %v8671_v50, %v8670_v0 }
 0x91d   : > { %7584 = vst.msk [vmem:[#allocation9 + $0x7] sm:$0xff] %vm495_vm0, %v7581_v4  ;;  %v7579_v19 = vmax.f32 %v7570_v22, 0.0  ;;  %v7495_v14 = vadd.f32 %v8672_v58, %v7415_v29  ;;  %v7574_v41 = vpop.f32.mrb[214].mxu0 }
 0x91e   : > { %v8972_v21 = vpop.f32.mrb[215].mxu0 }
 0x91f   : > { %v7582_v42 = vmul.f32 %v14617_v8, %v7579_v19  ;;  %v7575_v55 = vadd.f32 %v7574_v41, %v7495_v14 }
 0x921   : > { %7585 = vst.msk [vmem:[#allocation9 + $0xf] sm:$0xff] %vm495_vm0, %v7582_v42  ;;  %v7580_v33 = vmax.f32 %v7575_v55, 0.0 }
 0x923   : > { %v7583_v61 = vmul.f32 %v14653_v2, %v7580_v33  ;;  %v7901_v2 = vld [vmem:[%s14840_s14] ss:$0 sm:$0xff] }
 0x924   : > { %v7587_v47 = vld [vmem:[#allocation9 + $0x7] sm:$0xff] }
 0x925   : > { %8990 = vmatmul.mubr.msk.f32.vlgmr.msra.gmra.mrb[116].mxu1 %vm495_vm0, %v7587_v47  ;;  %7586 = vst.msk [vmem:[#allocation9 + $0x17] sm:$0xff] %vm495_vm0, %v7583_v61 }
 0x926   : > { %8992 = vmatprep.mubr.msk.f32.mxu1 %vm9835_vm15, %v14404_v52 }
 0x928   : > { %v7588_v36 = vld [vmem:[#allocation9 + $0xf] sm:$0xff] }
 0x929   : > { %8993 = vmatmul.mubr.msk.f32.gmra.mrb[118].mxu1 %vm495_vm0, %v7588_v36 }
 0x92a   : > { %8995 = vmatprep.mubr.msk.f32.mxu1 %vm9835_vm15, %v14404_v52 }
 0x92c   : > { %v7589_v8 = vld [vmem:[#allocation9 + $0x17] sm:$0xff] }
 0x92d   : > { %8996 = vmatmul.mubr.msk.f32.gmra.mrb[120].mxu1 %vm495_vm0, %v7589_v8 }
 0x9f8   : > { %v7680_v27 = vpop.f32.mrb[116].mxu1 }
 0x9f9   : > { %v7681_v16 = vadd.f32 %v7901_v2, %v7680_v27  ;;  %v8991_v5 = vpop.f32.mrb[117].mxu1 }
 0x9fb   : > { %7695 = vst.msk [vmem:[%s494_s23] sm:$0xff] %vm7694_vm1, %v7681_v16 }
 0x9fc   : > { %v7685_v11 = vpop.f32.mrb[118].mxu1 }
 0x9fd   : > { %v7686_v12 = vadd.f32 %v7901_v2, %v7685_v11  ;;  %v8994_v52 = vpop.f32.mrb[119].mxu1 }
 0x9ff   : > { %7696 = vst.msk [vmem:[%s494_s23 + $0x8] sm:$0xff] %vm7694_vm1, %v7686_v12 }
 0xa00   : > { %v7690_v53 = vpop.f32.mrb[120].mxu1 }
 0xa01   : > { %v7691_v59 = vadd.f32 %v7901_v2, %v7690_v53  ;;  %v8997_v43 = vpop.f32.mrb[121].mxu1 }
 0xa03   : > { %7697 = vst.msk [vmem:[%s494_s23 + $0x10] sm:$0xff] %vm7694_vm1, %v7691_v59 }
 0xa04 PF: > { %s25_s18 = sadd.s32 1, %s9830_s18  }
 0xa05   : > { %p22_p4 = scmp.ge.s32.totalorder %s25_s18, 4  }
 0xa07   :  { %24 = sbr.rel (!%p22_p4) target bundleno = 1 (0x1), region = 158 }

</bundles_post_ra>
